<compile_context>
chip_gen: v7x
topology: tpu7x:2x2x1
jax: 0.10.0
libtpu: 0.0.40
codegen_flags: <defaults>
</compile_context>

<pallas_src>
import functools

import numpy as np
import jax
import jax.numpy as jnp
from jax import lax
from jax.experimental import pallas as pl
from jax.experimental.pallas import tpu as pltpu

STRIDES = (2, 1, 2)        # per-stage conv strides (static, matches the module)
K1, K1P = 27, 32           # stage-1 GEMM K (3*3*3) and its 8-aligned pad


# ----------------------------------------------------------------------------
# Static geometry: interior mask, stride-2 selection matrix, pooling matrix.
# ----------------------------------------------------------------------------
@functools.lru_cache(maxsize=None)
def _geometry(n, h1, w1, h3, w3):
    """Constants for batch-n nets whose stage-1/2 maps are h1 x w1 and whose
    stage-3 map is h3 x w3.  Activations are stored row-major over the
    zero-padded (h1+2) x (w1+2) grid with g guard rows at each end, so every
    3x3 tap is a plain (contiguous) row shift of the slab."""
    hp, wp = h1 + 2, w1 + 2
    p = n * hp * wp                         # rows of one activation slab
    g = ((wp + 1 + 7) // 8) * 8             # guard rows >= max |row shift| = wp+1
    offs = tuple((dy - 1) * wp + (dx - 1) for dy in range(3) for dx in range(3))

    hh, ww = np.meshgrid(np.arange(hp), np.arange(wp), indexing="ij")
    interior = (hh >= 1) & (hh <= h1) & (ww >= 1) & (ww <= w1)
    intmask = np.tile(interior.reshape(-1).astype(np.float32), n).reshape(p, 1)

    m3 = n * h3 * w3
    sel3 = np.zeros((m3, p), np.float32)    # picks the stride-2 output centres
    pool = np.zeros((n, m3), np.float32)    # global average pool as a matmul
    for nn in range(n):
        for ho in range(h3):
            for wo in range(w3):
                row = nn * h3 * w3 + ho * w3 + wo
                sel3[row, nn * hp * wp + (2 * ho + 1) * wp + (2 * wo + 1)] = 1.0
        pool[nn, nn * h3 * w3:(nn + 1) * h3 * w3] = 1.0 / (h3 * w3)

    return dict(hp=hp, wp=wp, p=p, g=g, offs=offs,
                intmask=jnp.asarray(intmask),
                sel3=jnp.asarray(sel3),
                pool=jnp.asarray(pool))


# ----------------------------------------------------------------------------
# The single fused Pallas kernel.
# ----------------------------------------------------------------------------
def _make_kernel(p, g, offs):
    def kernel(lhs1_ref, w1_ref, s1_ref, b1_ref,
               w2_ref, s2_ref, b2_ref,
               w3_ref, s3_ref, b3_ref,
               mask_ref, sel3_ref, pool_ref,
               fcw_ref, fcb_ref,
               out_ref, act1_ref, act2_ref):
        f32 = jnp.float32
        mask = mask_ref[...]                                       # (p, 1)

        # ---- stage 1: 3x3 s2 conv (single im2col GEMM) + BN + ReLU --------
        y1 = jnp.dot(lhs1_ref[...], w1_ref[...], preferred_element_type=f32)
        y1 = jnp.maximum(y1 * s1_ref[...] + b1_ref[...], 0.0) * mask
        act1_ref[...] = jnp.zeros_like(act1_ref)                   # guards = 0
        act1_ref[pl.ds(g, p), :] = y1                              # padded grid

        # ---- stage 2: 3x3 s1 conv as 9 shifted-window GEMMs + BN + ReLU ----
        acc2 = None
        for k, off in enumerate(offs):
            t = jnp.dot(act1_ref[pl.ds(g + off, p), :], w2_ref[k],
                        preferred_element_type=f32)
            acc2 = t if acc2 is None else acc2 + t
        y2 = jnp.maximum(acc2 * s2_ref[...] + b2_ref[...], 0.0) * mask
        act2_ref[...] = jnp.zeros_like(act2_ref)
        act2_ref[pl.ds(g, p), :] = y2

        # ---- stage 3: 3x3 s2 conv; sel3 gathers the stride-2 rows on MXU ---
        sel = sel3_ref[...]                                        # (m3, p)
        acc3 = None
        for k, off in enumerate(offs):
            lhs = jnp.dot(sel, act2_ref[pl.ds(g + off, p), :],
                          preferred_element_type=f32)              # (m3, 64)
            t = jnp.dot(lhs, w3_ref[k], preferred_element_type=f32)
            acc3 = t if acc3 is None else acc3 + t
        y3 = jnp.maximum(acc3 * s3_ref[...] + b3_ref[...], 0.0)    # (m3, 1024)

        # ---- global average pool (as matmul) + fc ---------------------------
        pooled = jnp.dot(pool_ref[...], y3, preferred_element_type=f32)
        out_ref[...] = (jnp.dot(pooled, fcw_ref[...], preferred_element_type=f32)
                        + fcb_ref[...])

    return kernel


# ----------------------------------------------------------------------------
# Wrapper-side input prep for the very first conv.
# ----------------------------------------------------------------------------
def _stage1_im2col(x_nchw, h1, w1, hp, wp):
    """NCHW input -> padded-grid im2col LHS (n*hp*wp, 32) for the stage-1 GEMM."""
    # TODO(synk): this input-layout prep (NCHW->NHWC transpose + stride-2 patch
    # gather for the first conv) stays as XLA wrapper glue; everything
    # downstream runs inside the single Pallas kernel.
    x = jnp.transpose(x_nchw, (0, 2, 3, 1)).astype(jnp.float32)
    n = x.shape[0]
    xp = jnp.pad(x, ((0, 0), (1, 1), (1, 1), (0, 0)))
    cols = []
    for dy in range(3):
        for dx in range(3):
            cols.append(xp[:, dy:dy + 2 * (h1 - 1) + 1:2,
                           dx:dx + 2 * (w1 - 1) + 1:2, :])
    patches = jnp.concatenate(cols, axis=-1)                    # (n, h1, w1, 27)
    grid = jnp.zeros((n, hp, wp, K1), jnp.float32)
    grid = grid.at[:, 1:1 + h1, 1:1 + w1, :].set(patches)
    lhs = grid.reshape(n * hp * wp, K1)
    return jnp.pad(lhs, ((0, 0), (0, K1P - K1)))                # K 27 -> 32


# ----------------------------------------------------------------------------
# Parameter construction (deterministic, synthetic); BN folded at init.
# ----------------------------------------------------------------------------
def make_params(key):
    cfg = [(3, 32), (32, 64), (64, 1024)]
    eps = 1e-5
    params = {"stages": []}
    for cin, cout in cfg:
        key, k1, k2, k3, k4, k5, k6 = jax.random.split(key, 7)
        w = jax.random.normal(k1, (cout, cin, 3, 3), jnp.float32) * 0.05
        conv_b = jax.random.normal(k2, (cout,), jnp.float32) * 0.05
        gamma = 1.0 + 0.1 * jax.random.normal(k3, (cout,), jnp.float32)
        beta = 0.1 * jax.random.normal(k4, (cout,), jnp.float32)
        rmean = 0.1 * jax.random.normal(k5, (cout,), jnp.float32)
        rvar = jnp.abs(jax.random.normal(k6, (cout,), jnp.float32)) * 0.1 + 0.9
        scale = gamma / jnp.sqrt(rvar + eps)
        # fold conv bias and BN shift: BN(conv(x)+b) = conv(x)*scale + bias
        bias = beta - rmean * scale + conv_b * scale
        w_hwio = jnp.transpose(w, (2, 3, 1, 0))                 # (3,3,cin,cout)
        params["stages"].append(dict(
            w_k=w_hwio.reshape(9, cin, cout),                   # per-tap weights
            w_hwio=w_hwio,
            scale=scale.reshape(1, cout), bias=bias.reshape(1, cout)))
    # stage-1 weight as one (K-padded) GEMM matrix: (27,32) -> (32,32)
    params["w1_mat_pad"] = jnp.pad(
        params["stages"][0]["w_hwio"].reshape(K1, 32), ((0, K1P - K1), (0, 0)))
    key, k1, k2 = jax.random.split(key, 3)
    fc_w = jax.random.normal(k1, (1000, 1024), jnp.float32) * 0.02
    fc_b = jax.random.normal(k2, (1000,), jnp.float32) * 0.02
    fc_w_t = jnp.transpose(fc_w)                                # (1024, 1000)
    params["fc_w"] = fc_w_t
    params["fc_b"] = fc_b
    params["fc_w_pad"] = jnp.pad(fc_w_t, ((0, 0), (0, 24)))     # 1000 -> 1024
    params["fc_b_pad"] = jnp.pad(fc_b, (0, 24)).reshape(1, -1)
    return params


# ----------------------------------------------------------------------------
# Forward pass (one Pallas kernel) and a pure-JAX reference.
# ----------------------------------------------------------------------------
def mobilenetv1_forward(x_nchw, params):
    n, _, h, w = x_nchw.shape
    h1, w1 = (h - 1) // 2 + 1, (w - 1) // 2 + 1      # stage-1/2 spatial dims
    h3, w3 = (h1 - 1) // 2 + 1, (w1 - 1) // 2 + 1    # stage-3 spatial dims
    geo = _geometry(n, h1, w1, h3, w3)
    p, g, offs = geo["p"], geo["g"], geo["offs"]

    lhs1 = _stage1_im2col(x_nchw, h1, w1, geo["hp"], geo["wp"])
    st1, st2, st3 = params["stages"]
    c1 = st1["scale"].shape[1]
    c2 = st2["scale"].shape[1]

    out = pl.pallas_call(
        _make_kernel(p, g, offs),
        out_shape=jax.ShapeDtypeStruct(
            (n, params["fc_w_pad"].shape[1]), jnp.float32),
        scratch_shapes=[pltpu.VMEM((p + 2 * g, c1), jnp.float32),
                        pltpu.VMEM((p + 2 * g, c2), jnp.float32)],
        compiler_params=pltpu.CompilerParams(
            vmem_limit_bytes=32 * 1024 * 1024),
    )(lhs1,
      params["w1_mat_pad"], st1["scale"], st1["bias"],
      st2["w_k"], st2["scale"], st2["bias"],
      st3["w_k"], st3["scale"], st3["bias"],
      geo["intmask"], geo["sel3"], geo["pool"],
      params["fc_w_pad"], params["fc_b_pad"])
    return out[:, :1000]


def mobilenetv1_reference(x_nchw, params):
    x = jnp.transpose(x_nchw, (0, 2, 3, 1)).astype(jnp.float32)
    for st, stride in zip(params["stages"], STRIDES):
        x = lax.conv_general_dilated(
            x, st["w_hwio"], window_strides=(stride, stride),
            padding=((1, 1), (1, 1)),
            dimension_numbers=("NHWC", "HWIO", "NHWC"))
        x = x * st["scale"].reshape(-1) + st["bias"].reshape(-1)
        x = jnp.maximum(x, 0.0)
    pooled = jnp.mean(x, axis=(1, 2))
    return pooled @ params["fc_w"] + params["fc_b"]


if __name__ == "__main__":
    key = jax.random.PRNGKey(0)
    key, kx = jax.random.split(key)
    # PyTorch-convention input: NCHW, 3 input channels, small spatial size.
    x = jax.random.normal(kx, (2, 3, 16, 16), jnp.float32)
    params = make_params(key)

    fwd = jax.jit(mobilenetv1_forward)
    out = jax.block_until_ready(fwd(x, params))
    assert out.shape == (2, 1000), out.shape

    ref = jax.block_until_ready(jax.jit(mobilenetv1_reference)(x, params))
    assert jnp.allclose(out, ref, rtol=1e-3, atol=1e-3), \
        float(jnp.max(jnp.abs(out - ref)))

    print("KERNEL_OK")
</pallas_src>

<mosaic_0001>
module attributes {stable_mosaic.version = 11 : i64} {
  func.func @kernel(%arg0: memref<200x32xf32, #tpu.memory_space<vmem>>, %arg1: memref<32x32xf32, #tpu.memory_space<vmem>>, %arg2: memref<1x32xf32, #tpu.memory_space<vmem>>, %arg3: memref<1x32xf32, #tpu.memory_space<vmem>>, %arg4: memref<9x32x64xf32, #tpu.memory_space<vmem>>, %arg5: memref<1x64xf32, #tpu.memory_space<vmem>>, %arg6: memref<1x64xf32, #tpu.memory_space<vmem>>, %arg7: memref<9x64x1024xf32, #tpu.memory_space<vmem>>, %arg8: memref<1x1024xf32, #tpu.memory_space<vmem>>, %arg9: memref<1x1024xf32, #tpu.memory_space<vmem>>, %arg10: memref<200x1xf32, #tpu.memory_space<vmem>>, %arg11: memref<32x200xf32, #tpu.memory_space<vmem>>, %arg12: memref<2x32xf32, #tpu.memory_space<vmem>>, %arg13: memref<1024x1024xf32, #tpu.memory_space<vmem>>, %arg14: memref<1x1024xf32, #tpu.memory_space<vmem>>, %arg15: memref<2x1024xf32, #tpu.memory_space<vmem>>, %arg16: memref<232x32xf32, #tpu.memory_space<vmem>>, %arg17: memref<232x64xf32, #tpu.memory_space<vmem>>) attributes {dimension_semantics = [], scalar_prefetch = 0 : i64, scratch_operands = 2 : i64, tpu.core_type = #tpu.core_type<tc>} {
    %c0 = arith.constant 0 : index
    %c0_0 = arith.constant 0 : index
    %0 = vector.load %arg10[%c0, %c0_0] : memref<200x1xf32, #tpu.memory_space<vmem>>, vector<200x1xf32>
    %c0_1 = arith.constant 0 : index
    %c0_2 = arith.constant 0 : index
    %1 = vector.load %arg0[%c0_1, %c0_2] : memref<200x32xf32, #tpu.memory_space<vmem>>, vector<200x32xf32>
    %c0_3 = arith.constant 0 : index
    %c0_4 = arith.constant 0 : index
    %2 = vector.load %arg1[%c0_3, %c0_4] : memref<32x32xf32, #tpu.memory_space<vmem>>, vector<32x32xf32>
    %cst = arith.constant dense<0.000000e+00> : vector<200x32xf32>
    %3 = tpu.matmul %1, %2, %cst {dimension_numbers = #tpu.dot_dimension_numbers<[1], [0], [0], [1], [0, 0, 1, 1], [], []>} : vector<200x32xf32>, vector<32x32xf32>, vector<200x32xf32> -> vector<200x32xf32>
    %c0_5 = arith.constant 0 : index
    %c0_6 = arith.constant 0 : index
    %4 = vector.load %arg2[%c0_5, %c0_6] : memref<1x32xf32, #tpu.memory_space<vmem>>, vector<1x32xf32>
    %5 = vector.broadcast %4 : vector<1x32xf32> to vector<200x32xf32>
    %6 = arith.mulf %3, %5 : vector<200x32xf32>
    %c0_7 = arith.constant 0 : index
    %c0_8 = arith.constant 0 : index
    %7 = vector.load %arg3[%c0_7, %c0_8] : memref<1x32xf32, #tpu.memory_space<vmem>>, vector<1x32xf32>
    %8 = vector.broadcast %7 : vector<1x32xf32> to vector<200x32xf32>
    %9 = arith.addf %6, %8 : vector<200x32xf32>
    %cst_9 = arith.constant 0.000000e+00 : f32
    %10 = vector.broadcast %cst_9 : f32 to vector<200x32xf32>
    %11 = arith.maximumf %9, %10 : vector<200x32xf32>
    %12 = vector.broadcast %0 : vector<200x1xf32> to vector<200x32xf32>
    %13 = arith.mulf %11, %12 : vector<200x32xf32>
    %cst_10 = arith.constant 0.000000e+00 : f32
    %14 = vector.broadcast %cst_10 : f32 to vector<232x32xf32>
    %c0_11 = arith.constant 0 : index
    %c0_12 = arith.constant 0 : index
    %15 = vector.load %arg16[%c0_11, %c0_12] : memref<232x32xf32, #tpu.memory_space<vmem>>, vector<232x32xf32>
    tpu.vector_store %arg16[%c0_11, %c0_12], %14 {strides = array<i32>} : memref<232x32xf32, #tpu.memory_space<vmem>>, vector<232x32xf32>,
    %c16 = arith.constant 16 : index
    %c0_13 = arith.constant 0 : index
    %16 = vector.load %arg16[%c16, %c0_13] : memref<232x32xf32, #tpu.memory_space<vmem>>, vector<200x32xf32>
    tpu.vector_store %arg16[%c16, %c0_13], %13 {strides = array<i32>} : memref<232x32xf32, #tpu.memory_space<vmem>>, vector<200x32xf32>,
    %c5 = arith.constant 5 : index
    %c0_14 = arith.constant 0 : index
    %17 = vector.load %arg16[%c5, %c0_14] : memref<232x32xf32, #tpu.memory_space<vmem>>, vector<200x32xf32>
    %c0_15 = arith.constant 0 : index
    %c0_16 = arith.constant 0 : index
    %c0_17 = arith.constant 0 : index
    %18 = vector.load %arg4[%c0_15, %c0_16, %c0_17] : memref<9x32x64xf32, #tpu.memory_space<vmem>>, vector<1x32x64xf32>
    %19 = vector.shape_cast %18 : vector<1x32x64xf32> to vector<32x64xf32>
    %cst_18 = arith.constant dense<0.000000e+00> : vector<200x64xf32>
    %20 = tpu.matmul %17, %19, %cst_18 {dimension_numbers = #tpu.dot_dimension_numbers<[1], [0], [0], [1], [0, 0, 1, 1], [], []>} : vector<200x32xf32>, vector<32x64xf32>, vector<200x64xf32> -> vector<200x64xf32>
    %c6 = arith.constant 6 : index
    %c0_19 = arith.constant 0 : index
    %21 = vector.load %arg16[%c6, %c0_19] : memref<232x32xf32, #tpu.memory_space<vmem>>, vector<200x32xf32>
    %c1 = arith.constant 1 : index
    %c0_20 = arith.constant 0 : index
    %c0_21 = arith.constant 0 : index
    %22 = vector.load %arg4[%c1, %c0_20, %c0_21] : memref<9x32x64xf32, #tpu.memory_space<vmem>>, vector<1x32x64xf32>
    %23 = vector.shape_cast %22 : vector<1x32x64xf32> to vector<32x64xf32>
    %cst_22 = arith.constant dense<0.000000e+00> : vector<200x64xf32>
    %24 = tpu.matmul %21, %23, %cst_22 {dimension_numbers = #tpu.dot_dimension_numbers<[1], [0], [0], [1], [0, 0, 1, 1], [], []>} : vector<200x32xf32>, vector<32x64xf32>, vector<200x64xf32> -> vector<200x64xf32>
    %25 = arith.addf %20, %24 : vector<200x64xf32>
    %c7 = arith.constant 7 : index
    %c0_23 = arith.constant 0 : index
    %26 = vector.load %arg16[%c7, %c0_23] : memref<232x32xf32, #tpu.memory_space<vmem>>, vector<200x32xf32>
    %c2 = arith.constant 2 : index
    %c0_24 = arith.constant 0 : index
    %c0_25 = arith.constant 0 : index
    %27 = vector.load %arg4[%c2, %c0_24, %c0_25] : memref<9x32x64xf32, #tpu.memory_space<vmem>>, vector<1x32x64xf32>
    %28 = vector.shape_cast %27 : vector<1x32x64xf32> to vector<32x64xf32>
    %cst_26 = arith.constant dense<0.000000e+00> : vector<200x64xf32>
    %29 = tpu.matmul %26, %28, %cst_26 {dimension_numbers = #tpu.dot_dimension_numbers<[1], [0], [0], [1], [0, 0, 1, 1], [], []>} : vector<200x32xf32>, vector<32x64xf32>, vector<200x64xf32> -> vector<200x64xf32>
    %30 = arith.addf %25, %29 : vector<200x64xf32>
    %c15 = arith.constant 15 : index
    %c0_27 = arith.constant 0 : index
    %31 = vector.load %arg16[%c15, %c0_27] : memref<232x32xf32, #tpu.memory_space<vmem>>, vector<200x32xf32>
    %c3 = arith.constant 3 : index
    %c0_28 = arith.constant 0 : index
    %c0_29 = arith.constant 0 : index
    %32 = vector.load %arg4[%c3, %c0_28, %c0_29] : memref<9x32x64xf32, #tpu.memory_space<vmem>>, vector<1x32x64xf32>
    %33 = vector.shape_cast %32 : vector<1x32x64xf32> to vector<32x64xf32>
    %cst_30 = arith.constant dense<0.000000e+00> : vector<200x64xf32>
    %34 = tpu.matmul %31, %33, %cst_30 {dimension_numbers = #tpu.dot_dimension_numbers<[1], [0], [0], [1], [0, 0, 1, 1], [], []>} : vector<200x32xf32>, vector<32x64xf32>, vector<200x64xf32> -> vector<200x64xf32>
    %35 = arith.addf %30, %34 : vector<200x64xf32>
    %c16_31 = arith.constant 16 : index
    %c0_32 = arith.constant 0 : index
    %36 = vector.load %arg16[%c16_31, %c0_32] : memref<232x32xf32, #tpu.memory_space<vmem>>, vector<200x32xf32>
    %c4 = arith.constant 4 : index
    %c0_33 = arith.constant 0 : index
    %c0_34 = arith.constant 0 : index
    %37 = vector.load %arg4[%c4, %c0_33, %c0_34] : memref<9x32x64xf32, #tpu.memory_space<vmem>>, vector<1x32x64xf32>
    %38 = vector.shape_cast %37 : vector<1x32x64xf32> to vector<32x64xf32>
    %cst_35 = arith.constant dense<0.000000e+00> : vector<200x64xf32>
    %39 = tpu.matmul %36, %38, %cst_35 {dimension_numbers = #tpu.dot_dimension_numbers<[1], [0], [0], [1], [0, 0, 1, 1], [], []>} : vector<200x32xf32>, vector<32x64xf32>, vector<200x64xf32> -> vector<200x64xf32>
    %40 = arith.addf %35, %39 : vector<200x64xf32>
    %c17 = arith.constant 17 : index
    %c0_36 = arith.constant 0 : index
    %41 = vector.load %arg16[%c17, %c0_36] : memref<232x32xf32, #tpu.memory_space<vmem>>, vector<200x32xf32>
    %c5_37 = arith.constant 5 : index
    %c0_38 = arith.constant 0 : index
    %c0_39 = arith.constant 0 : index
    %42 = vector.load %arg4[%c5_37, %c0_38, %c0_39] : memref<9x32x64xf32, #tpu.memory_space<vmem>>, vector<1x32x64xf32>
    %43 = vector.shape_cast %42 : vector<1x32x64xf32> to vector<32x64xf32>
    %cst_40 = arith.constant dense<0.000000e+00> : vector<200x64xf32>
    %44 = tpu.matmul %41, %43, %cst_40 {dimension_numbers = #tpu.dot_dimension_numbers<[1], [0], [0], [1], [0, 0, 1, 1], [], []>} : vector<200x32xf32>, vector<32x64xf32>, vector<200x64xf32> -> vector<200x64xf32>
    %45 = arith.addf %40, %44 : vector<200x64xf32>
    %c25 = arith.constant 25 : index
    %c0_41 = arith.constant 0 : index
    %46 = vector.load %arg16[%c25, %c0_41] : memref<232x32xf32, #tpu.memory_space<vmem>>, vector<200x32xf32>
    %c6_42 = arith.constant 6 : index
    %c0_43 = arith.constant 0 : index
    %c0_44 = arith.constant 0 : index
    %47 = vector.load %arg4[%c6_42, %c0_43, %c0_44] : memref<9x32x64xf32, #tpu.memory_space<vmem>>, vector<1x32x64xf32>
    %48 = vector.shape_cast %47 : vector<1x32x64xf32> to vector<32x64xf32>
    %cst_45 = arith.constant dense<0.000000e+00> : vector<200x64xf32>
    %49 = tpu.matmul %46, %48, %cst_45 {dimension_numbers = #tpu.dot_dimension_numbers<[1], [0], [0], [1], [0, 0, 1, 1], [], []>} : vector<200x32xf32>, vector<32x64xf32>, vector<200x64xf32> -> vector<200x64xf32>
    %50 = arith.addf %45, %49 : vector<200x64xf32>
    %c26 = arith.constant 26 : index
    %c0_46 = arith.constant 0 : index
    %51 = vector.load %arg16[%c26, %c0_46] : memref<232x32xf32, #tpu.memory_space<vmem>>, vector<200x32xf32>
    %c7_47 = arith.constant 7 : index
    %c0_48 = arith.constant 0 : index
    %c0_49 = arith.constant 0 : index
    %52 = vector.load %arg4[%c7_47, %c0_48, %c0_49] : memref<9x32x64xf32, #tpu.memory_space<vmem>>, vector<1x32x64xf32>
    %53 = vector.shape_cast %52 : vector<1x32x64xf32> to vector<32x64xf32>
    %cst_50 = arith.constant dense<0.000000e+00> : vector<200x64xf32>
    %54 = tpu.matmul %51, %53, %cst_50 {dimension_numbers = #tpu.dot_dimension_numbers<[1], [0], [0], [1], [0, 0, 1, 1], [], []>} : vector<200x32xf32>, vector<32x64xf32>, vector<200x64xf32> -> vector<200x64xf32>
    %55 = arith.addf %50, %54 : vector<200x64xf32>
    %c27 = arith.constant 27 : index
    %c0_51 = arith.constant 0 : index
    %56 = vector.load %arg16[%c27, %c0_51] : memref<232x32xf32, #tpu.memory_space<vmem>>, vector<200x32xf32>
    %c8 = arith.constant 8 : index
    %c0_52 = arith.constant 0 : index
    %c0_53 = arith.constant 0 : index
    %57 = vector.load %arg4[%c8, %c0_52, %c0_53] : memref<9x32x64xf32, #tpu.memory_space<vmem>>, vector<1x32x64xf32>
    %58 = vector.shape_cast %57 : vector<1x32x64xf32> to vector<32x64xf32>
    %cst_54 = arith.constant dense<0.000000e+00> : vector<200x64xf32>
    %59 = tpu.matmul %56, %58, %cst_54 {dimension_numbers = #tpu.dot_dimension_numbers<[1], [0], [0], [1], [0, 0, 1, 1], [], []>} : vector<200x32xf32>, vector<32x64xf32>, vector<200x64xf32> -> vector<200x64xf32>
    %60 = arith.addf %55, %59 : vector<200x64xf32>
    %c0_55 = arith.constant 0 : index
    %c0_56 = arith.constant 0 : index
    %61 = vector.load %arg5[%c0_55, %c0_56] : memref<1x64xf32, #tpu.memory_space<vmem>>, vector<1x64xf32>
    %62 = vector.broadcast %61 : vector<1x64xf32> to vector<200x64xf32>
    %63 = arith.mulf %60, %62 : vector<200x64xf32>
    %c0_57 = arith.constant 0 : index
    %c0_58 = arith.constant 0 : index
    %64 = vector.load %arg6[%c0_57, %c0_58] : memref<1x64xf32, #tpu.memory_space<vmem>>, vector<1x64xf32>
    %65 = vector.broadcast %64 : vector<1x64xf32> to vector<200x64xf32>
    %66 = arith.addf %63, %65 : vector<200x64xf32>
    %cst_59 = arith.constant 0.000000e+00 : f32
    %67 = vector.broadcast %cst_59 : f32 to vector<200x64xf32>
    %68 = arith.maximumf %66, %67 : vector<200x64xf32>
    %69 = vector.broadcast %0 : vector<200x1xf32> to vector<200x64xf32>
    %70 = arith.mulf %68, %69 : vector<200x64xf32>
    %cst_60 = arith.constant 0.000000e+00 : f32
    %71 = vector.broadcast %cst_60 : f32 to vector<232x64xf32>
    %c0_61 = arith.constant 0 : index
    %c0_62 = arith.constant 0 : index
    %72 = vector.load %arg17[%c0_61, %c0_62] : memref<232x64xf32, #tpu.memory_space<vmem>>, vector<232x64xf32>
    tpu.vector_store %arg17[%c0_61, %c0_62], %71 {strides = array<i32>} : memref<232x64xf32, #tpu.memory_space<vmem>>, vector<232x64xf32>,
    %c16_63 = arith.constant 16 : index
    %c0_64 = arith.constant 0 : index
    %73 = vector.load %arg17[%c16_63, %c0_64] : memref<232x64xf32, #tpu.memory_space<vmem>>, vector<200x64xf32>
    tpu.vector_store %arg17[%c16_63, %c0_64], %70 {strides = array<i32>} : memref<232x64xf32, #tpu.memory_space<vmem>>, vector<200x64xf32>,
    %c0_65 = arith.constant 0 : index
    %c0_66 = arith.constant 0 : index
    %74 = vector.load %arg11[%c0_65, %c0_66] : memref<32x200xf32, #tpu.memory_space<vmem>>, vector<32x200xf32>
    %c5_67 = arith.constant 5 : index
    %c0_68 = arith.constant 0 : index
    %75 = vector.load %arg17[%c5_67, %c0_68] : memref<232x64xf32, #tpu.memory_space<vmem>>, vector<200x64xf32>
    %cst_69 = arith.constant dense<0.000000e+00> : vector<32x64xf32>
    %76 = tpu.matmul %74, %75, %cst_69 {dimension_numbers = #tpu.dot_dimension_numbers<[1], [0], [0], [1], [0, 0, 1, 1], [], []>} : vector<32x200xf32>, vector<200x64xf32>, vector<32x64xf32> -> vector<32x64xf32>
    %c0_70 = arith.constant 0 : index
    %c0_71 = arith.constant 0 : index
    %c0_72 = arith.constant 0 : index
    %77 = vector.load %arg7[%c0_70, %c0_71, %c0_72] : memref<9x64x1024xf32, #tpu.memory_space<vmem>>, vector<1x64x1024xf32>
    %78 = vector.shape_cast %77 : vector<1x64x1024xf32> to vector<64x1024xf32>
    %cst_73 = arith.constant dense<0.000000e+00> : vector<32x1024xf32>
    %79 = tpu.matmul %76, %78, %cst_73 {dimension_numbers = #tpu.dot_dimension_numbers<[1], [0], [0], [1], [0, 0, 1, 1], [], []>} : vector<32x64xf32>, vector<64x1024xf32>, vector<32x1024xf32> -> vector<32x1024xf32>
    %c6_74 = arith.constant 6 : index
    %c0_75 = arith.constant 0 : index
    %80 = vector.load %arg17[%c6_74, %c0_75] : memref<232x64xf32, #tpu.memory_space<vmem>>, vector<200x64xf32>
    %cst_76 = arith.constant dense<0.000000e+00> : vector<32x64xf32>
    %81 = tpu.matmul %74, %80, %cst_76 {dimension_numbers = #tpu.dot_dimension_numbers<[1], [0], [0], [1], [0, 0, 1, 1], [], []>} : vector<32x200xf32>, vector<200x64xf32>, vector<32x64xf32> -> vector<32x64xf32>
    %c1_77 = arith.constant 1 : index
    %c0_78 = arith.constant 0 : index
    %c0_79 = arith.constant 0 : index
    %82 = vector.load %arg7[%c1_77, %c0_78, %c0_79] : memref<9x64x1024xf32, #tpu.memory_space<vmem>>, vector<1x64x1024xf32>
    %83 = vector.shape_cast %82 : vector<1x64x1024xf32> to vector<64x1024xf32>
    %cst_80 = arith.constant dense<0.000000e+00> : vector<32x1024xf32>
    %84 = tpu.matmul %81, %83, %cst_80 {dimension_numbers = #tpu.dot_dimension_numbers<[1], [0], [0], [1], [0, 0, 1, 1], [], []>} : vector<32x64xf32>, vector<64x1024xf32>, vector<32x1024xf32> -> vector<32x1024xf32>
    %85 = arith.addf %79, %84 : vector<32x1024xf32>
    %c7_81 = arith.constant 7 : index
    %c0_82 = arith.constant 0 : index
    %86 = vector.load %arg17[%c7_81, %c0_82] : memref<232x64xf32, #tpu.memory_space<vmem>>, vector<200x64xf32>
    %cst_83 = arith.constant dense<0.000000e+00> : vector<32x64xf32>
    %87 = tpu.matmul %74, %86, %cst_83 {dimension_numbers = #tpu.dot_dimension_numbers<[1], [0], [0], [1], [0, 0, 1, 1], [], []>} : vector<32x200xf32>, vector<200x64xf32>, vector<32x64xf32> -> vector<32x64xf32>
    %c2_84 = arith.constant 2 : index
    %c0_85 = arith.constant 0 : index
    %c0_86 = arith.constant 0 : index
    %88 = vector.load %arg7[%c2_84, %c0_85, %c0_86] : memref<9x64x1024xf32, #tpu.memory_space<vmem>>, vector<1x64x1024xf32>
    %89 = vector.shape_cast %88 : vector<1x64x1024xf32> to vector<64x1024xf32>
    %cst_87 = arith.constant dense<0.000000e+00> : vector<32x1024xf32>
    %90 = tpu.matmul %87, %89, %cst_87 {dimension_numbers = #tpu.dot_dimension_numbers<[1], [0], [0], [1], [0, 0, 1, 1], [], []>} : vector<32x64xf32>, vector<64x1024xf32>, vector<32x1024xf32> -> vector<32x1024xf32>
    %91 = arith.addf %85, %90 : vector<32x1024xf32>
    %c15_88 = arith.constant 15 : index
    %c0_89 = arith.constant 0 : index
    %92 = vector.load %arg17[%c15_88, %c0_89] : memref<232x64xf32, #tpu.memory_space<vmem>>, vector<200x64xf32>
    %cst_90 = arith.constant dense<0.000000e+00> : vector<32x64xf32>
    %93 = tpu.matmul %74, %92, %cst_90 {dimension_numbers = #tpu.dot_dimension_numbers<[1], [0], [0], [1], [0, 0, 1, 1], [], []>} : vector<32x200xf32>, vector<200x64xf32>, vector<32x64xf32> -> vector<32x64xf32>
    %c3_91 = arith.constant 3 : index
    %c0_92 = arith.constant 0 : index
    %c0_93 = arith.constant 0 : index
    %94 = vector.load %arg7[%c3_91, %c0_92, %c0_93] : memref<9x64x1024xf32, #tpu.memory_space<vmem>>, vector<1x64x1024xf32>
    %95 = vector.shape_cast %94 : vector<1x64x1024xf32> to vector<64x1024xf32>
    %cst_94 = arith.constant dense<0.000000e+00> : vector<32x1024xf32>
    %96 = tpu.matmul %93, %95, %cst_94 {dimension_numbers = #tpu.dot_dimension_numbers<[1], [0], [0], [1], [0, 0, 1, 1], [], []>} : vector<32x64xf32>, vector<64x1024xf32>, vector<32x1024xf32> -> vector<32x1024xf32>
    %97 = arith.addf %91, %96 : vector<32x1024xf32>
    %c16_95 = arith.constant 16 : index
    %c0_96 = arith.constant 0 : index
    %98 = vector.load %arg17[%c16_95, %c0_96] : memref<232x64xf32, #tpu.memory_space<vmem>>, vector<200x64xf32>
    %cst_97 = arith.constant dense<0.000000e+00> : vector<32x64xf32>
    %99 = tpu.matmul %74, %98, %cst_97 {dimension_numbers = #tpu.dot_dimension_numbers<[1], [0], [0], [1], [0, 0, 1, 1], [], []>} : vector<32x200xf32>, vector<200x64xf32>, vector<32x64xf32> -> vector<32x64xf32>
    %c4_98 = arith.constant 4 : index
    %c0_99 = arith.constant 0 : index
    %c0_100 = arith.constant 0 : index
    %100 = vector.load %arg7[%c4_98, %c0_99, %c0_100] : memref<9x64x1024xf32, #tpu.memory_space<vmem>>, vector<1x64x1024xf32>
    %101 = vector.shape_cast %100 : vector<1x64x1024xf32> to vector<64x1024xf32>
    %cst_101 = arith.constant dense<0.000000e+00> : vector<32x1024xf32>
    %102 = tpu.matmul %99, %101, %cst_101 {dimension_numbers = #tpu.dot_dimension_numbers<[1], [0], [0], [1], [0, 0, 1, 1], [], []>} : vector<32x64xf32>, vector<64x1024xf32>, vector<32x1024xf32> -> vector<32x1024xf32>
    %103 = arith.addf %97, %102 : vector<32x1024xf32>
    %c17_102 = arith.constant 17 : index
    %c0_103 = arith.constant 0 : index
    %104 = vector.load %arg17[%c17_102, %c0_103] : memref<232x64xf32, #tpu.memory_space<vmem>>, vector<200x64xf32>
    %cst_104 = arith.constant dense<0.000000e+00> : vector<32x64xf32>
    %105 = tpu.matmul %74, %104, %cst_104 {dimension_numbers = #tpu.dot_dimension_numbers<[1], [0], [0], [1], [0, 0, 1, 1], [], []>} : vector<32x200xf32>, vector<200x64xf32>, vector<32x64xf32> -> vector<32x64xf32>
    %c5_105 = arith.constant 5 : index
    %c0_106 = arith.constant 0 : index
    %c0_107 = arith.constant 0 : index
    %106 = vector.load %arg7[%c5_105, %c0_106, %c0_107] : memref<9x64x1024xf32, #tpu.memory_space<vmem>>, vector<1x64x1024xf32>
    %107 = vector.shape_cast %106 : vector<1x64x1024xf32> to vector<64x1024xf32>
    %cst_108 = arith.constant dense<0.000000e+00> : vector<32x1024xf32>
    %108 = tpu.matmul %105, %107, %cst_108 {dimension_numbers = #tpu.dot_dimension_numbers<[1], [0], [0], [1], [0, 0, 1, 1], [], []>} : vector<32x64xf32>, vector<64x1024xf32>, vector<32x1024xf32> -> vector<32x1024xf32>
    %109 = arith.addf %103, %108 : vector<32x1024xf32>
    %c25_109 = arith.constant 25 : index
    %c0_110 = arith.constant 0 : index
    %110 = vector.load %arg17[%c25_109, %c0_110] : memref<232x64xf32, #tpu.memory_space<vmem>>, vector<200x64xf32>
    %cst_111 = arith.constant dense<0.000000e+00> : vector<32x64xf32>
    %111 = tpu.matmul %74, %110, %cst_111 {dimension_numbers = #tpu.dot_dimension_numbers<[1], [0], [0], [1], [0, 0, 1, 1], [], []>} : vector<32x200xf32>, vector<200x64xf32>, vector<32x64xf32> -> vector<32x64xf32>
    %c6_112 = arith.constant 6 : index
    %c0_113 = arith.constant 0 : index
    %c0_114 = arith.constant 0 : index
    %112 = vector.load %arg7[%c6_112, %c0_113, %c0_114] : memref<9x64x1024xf32, #tpu.memory_space<vmem>>, vector<1x64x1024xf32>
    %113 = vector.shape_cast %112 : vector<1x64x1024xf32> to vector<64x1024xf32>
    %cst_115 = arith.constant dense<0.000000e+00> : vector<32x1024xf32>
    %114 = tpu.matmul %111, %113, %cst_115 {dimension_numbers = #tpu.dot_dimension_numbers<[1], [0], [0], [1], [0, 0, 1, 1], [], []>} : vector<32x64xf32>, vector<64x1024xf32>, vector<32x1024xf32> -> vector<32x1024xf32>
    %115 = arith.addf %109, %114 : vector<32x1024xf32>
    %c26_116 = arith.constant 26 : index
    %c0_117 = arith.constant 0 : index
    %116 = vector.load %arg17[%c26_116, %c0_117] : memref<232x64xf32, #tpu.memory_space<vmem>>, vector<200x64xf32>
    %cst_118 = arith.constant dense<0.000000e+00> : vector<32x64xf32>
    %117 = tpu.matmul %74, %116, %cst_118 {dimension_numbers = #tpu.dot_dimension_numbers<[1], [0], [0], [1], [0, 0, 1, 1], [], []>} : vector<32x200xf32>, vector<200x64xf32>, vector<32x64xf32> -> vector<32x64xf32>
    %c7_119 = arith.constant 7 : index
    %c0_120 = arith.constant 0 : index
    %c0_121 = arith.constant 0 : index
    %118 = vector.load %arg7[%c7_119, %c0_120, %c0_121] : memref<9x64x1024xf32, #tpu.memory_space<vmem>>, vector<1x64x1024xf32>
    %119 = vector.shape_cast %118 : vector<1x64x1024xf32> to vector<64x1024xf32>
    %cst_122 = arith.constant dense<0.000000e+00> : vector<32x1024xf32>
    %120 = tpu.matmul %117, %119, %cst_122 {dimension_numbers = #tpu.dot_dimension_numbers<[1], [0], [0], [1], [0, 0, 1, 1], [], []>} : vector<32x64xf32>, vector<64x1024xf32>, vector<32x1024xf32> -> vector<32x1024xf32>
    %121 = arith.addf %115, %120 : vector<32x1024xf32>
    %c27_123 = arith.constant 27 : index
    %c0_124 = arith.constant 0 : index
    %122 = vector.load %arg17[%c27_123, %c0_124] : memref<232x64xf32, #tpu.memory_space<vmem>>, vector<200x64xf32>
    %cst_125 = arith.constant dense<0.000000e+00> : vector<32x64xf32>
    %123 = tpu.matmul %74, %122, %cst_125 {dimension_numbers = #tpu.dot_dimension_numbers<[1], [0], [0], [1], [0, 0, 1, 1], [], []>} : vector<32x200xf32>, vector<200x64xf32>, vector<32x64xf32> -> vector<32x64xf32>
    %c8_126 = arith.constant 8 : index
    %c0_127 = arith.constant 0 : index
    %c0_128 = arith.constant 0 : index
    %124 = vector.load %arg7[%c8_126, %c0_127, %c0_128] : memref<9x64x1024xf32, #tpu.memory_space<vmem>>, vector<1x64x1024xf32>
    %125 = vector.shape_cast %124 : vector<1x64x1024xf32> to vector<64x1024xf32>
    %cst_129 = arith.constant dense<0.000000e+00> : vector<32x1024xf32>
    %126 = tpu.matmul %123, %125, %cst_129 {dimension_numbers = #tpu.dot_dimension_numbers<[1], [0], [0], [1], [0, 0, 1, 1], [], []>} : vector<32x64xf32>, vector<64x1024xf32>, vector<32x1024xf32> -> vector<32x1024xf32>
    %127 = arith.addf %121, %126 : vector<32x1024xf32>
    %c0_130 = arith.constant 0 : index
    %c0_131 = arith.constant 0 : index
    %128 = vector.load %arg8[%c0_130, %c0_131] : memref<1x1024xf32, #tpu.memory_space<vmem>>, vector<1x1024xf32>
    %129 = vector.broadcast %128 : vector<1x1024xf32> to vector<32x1024xf32>
    %130 = arith.mulf %127, %129 : vector<32x1024xf32>
    %c0_132 = arith.constant 0 : index
    %c0_133 = arith.constant 0 : index
    %131 = vector.load %arg9[%c0_132, %c0_133] : memref<1x1024xf32, #tpu.memory_space<vmem>>, vector<1x1024xf32>
    %132 = vector.broadcast %131 : vector<1x1024xf32> to vector<32x1024xf32>
    %133 = arith.addf %130, %132 : vector<32x1024xf32>
    %cst_134 = arith.constant 0.000000e+00 : f32
    %134 = vector.broadcast %cst_134 : f32 to vector<32x1024xf32>
    %135 = arith.maximumf %133, %134 : vector<32x1024xf32>
    %c0_135 = arith.constant 0 : index
    %c0_136 = arith.constant 0 : index
    %136 = vector.load %arg12[%c0_135, %c0_136] : memref<2x32xf32, #tpu.memory_space<vmem>>, vector<2x32xf32>
    %cst_137 = arith.constant dense<0.000000e+00> : vector<2x1024xf32>
    %137 = tpu.matmul %136, %135, %cst_137 {dimension_numbers = #tpu.dot_dimension_numbers<[1], [0], [0], [1], [0, 0, 1, 1], [], []>} : vector<2x32xf32>, vector<32x1024xf32>, vector<2x1024xf32> -> vector<2x1024xf32>
    %c0_138 = arith.constant 0 : index
    %c0_139 = arith.constant 0 : index
    %138 = vector.load %arg13[%c0_138, %c0_139] : memref<1024x1024xf32, #tpu.memory_space<vmem>>, vector<1024x1024xf32>
    %cst_140 = arith.constant dense<0.000000e+00> : vector<2x1024xf32>
    %139 = tpu.matmul %137, %138, %cst_140 {dimension_numbers = #tpu.dot_dimension_numbers<[1], [0], [0], [1], [0, 0, 1, 1], [], []>} : vector<2x1024xf32>, vector<1024x1024xf32>, vector<2x1024xf32> -> vector<2x1024xf32>
    %c0_141 = arith.constant 0 : index
    %c0_142 = arith.constant 0 : index
    %140 = vector.load %arg14[%c0_141, %c0_142] : memref<1x1024xf32, #tpu.memory_space<vmem>>, vector<1x1024xf32>
    %141 = vector.broadcast %140 : vector<1x1024xf32> to vector<2x1024xf32>
    %142 = arith.addf %139, %141 : vector<2x1024xf32>
    %c0_143 = arith.constant 0 : index
    %c0_144 = arith.constant 0 : index
    %143 = vector.load %arg15[%c0_143, %c0_144] : memref<2x1024xf32, #tpu.memory_space<vmem>>, vector<2x1024xf32>
    tpu.vector_store %arg15[%c0_143, %c0_144], %142 {strides = array<i32>} : memref<2x1024xf32, #tpu.memory_space<vmem>>, vector<2x1024xf32>,
    return
  }
}

</mosaic_0001>

<bundles_post_ra>
// kernel: mobilenetv1_forward.1
= control target key start
LH: loop header
LB: loop body
LE: loop exit
PB: predicated region body
PF: predicated region fallthrough
CT: control target
= control target key end

     0   :  { %20 = vsyncpa [#allocation5], 0  ;;  %s21410_s0 = inlined_call_operand.vmem [shape: f32[200,32], index: 0, kind: input, shape index: {}]   ;;  %s21411_s1 = inlined_call_operand.hbm [shape: f32[32,32], index: 1, kind: input, shape index: {}]   ;;  %s21412_s2 = inlined_call_operand.hbm [shape: f32[1,32], index: 2, kind: input, shape index: {}]   ;;  %s21413_s3 = inlined_call_operand.hbm [shape: f32[1,32], index: 3, kind: input, shape index: {}]   ;;  %s21414_s4 = inlined_call_operand.hbm [shape: f32[9,32,64], index: 4, kind: input, shape index: {}]   ;;  %s21415_s5 = inlined_call_operand.hbm [shape: f32[1,64], index: 5, kind: input, shape index: {}]   ;;  %s21416_s6 = inlined_call_operand.hbm [shape: f32[1,64], index: 6, kind: input, shape index: {}]   ;;  %s21417_s7 = inlined_call_operand.vmem [shape: f32[9,64,1024], index: 7, kind: input, shape index: {}]   ;;  %s21418_s8 = inlined_call_operand.hbm [shape: f32[1,1024], index: 8, kind: input, shape index: {}]   ;;  %s21419_s9 = inlined_call_operand.hbm [shape: f32[1,1024], index: 9, kind: input, shape index: {}]   ;;  %s21420_s10 = inlined_call_operand.hbm [shape: f32[200,1], index: 10, kind: input, shape index: {}]   ;;  %s21421_s11 = inlined_call_operand.hbm [shape: f32[32,200], index: 11, kind: input, shape index: {}]   ;;  %s21422_s12 = inlined_call_operand.hbm [shape: f32[2,32], index: 12, kind: input, shape index: {}]   ;;  %s21423_s13 = inlined_call_operand.hbm [shape: f32[1024,1024], index: 13, kind: input, shape index: {}]   ;;  %s21424_s14 = inlined_call_operand.hbm [shape: f32[1,1024], index: 14, kind: input, shape index: {}]   ;;  %s21425_s15 = inlined_call_operand.hbm [shape: f32[2,1024], index: 15, kind: output, shape index: {}]  }
   0x1   :  { %21 = vsyncpa [#allocation8], 0 }
   0x2   :  { %22 = vsyncpa [#allocation11], 0 }
   0x3   :  { %23 = vsyncpa [#allocation14], 0 }
   0x4   :  { %24 = vsyncpa [#allocation17], 0 }
   0x5   :  { %25 = vsyncpa [#allocation20], 0 }
   0x6   :  { %26 = vsyncpa [#allocation23], 0 }
   0x7   :  { %27 = vsyncpa [#allocation6], 0  ;;  %s16876_s18 = smov [#allocation7]   ;;  %s16552_s22 = scalar_lea.hbm %s21412_s2, 16 }
   0x8   :  { %s48_s19 = sshll.u32 %s16876_s18, 4  ;;  %p16553_p0 = scmp.ne.s32.totalorder %s21412_s2, %s16552_s22  ;;  %s49_s19 = int_to_ptr.vmem [resolvable:$true] %s48_s19 }
   0x9   :  { %p16556_p1 = scmp.lt.u32.totalorder %s16552_s22, %s21412_s2 }
   0xb   :  { %p16558_p2 = pnand %p16556_p1, %p16553_p0 }
   0xd   :  { %16561 = shalt.err (!%p16558_p2)
}
   0xe   :  { %s16562_s27 = scalar_lea.vmem %s49_s19, 16  ;;  %s16566_s28 = scalar_lea.vmem %s49_s19, 32 }
   0xf   :  { %p16563_p3 = scmp.ne.s32.totalorder %s49_s19, %s16562_s27  ;;  %p16567_p4 = scmp.lt.s32.totalorder %s49_s19, %s49_s19 }
  0x10   :  { %p16568_p5 = scmp.lt.s32.totalorder %s16566_s28, %s16562_s27 }
  0x12   :  { %p16569_p6 = por %p16568_p5, %p16567_p4 }
  0x14   :  { %p16570_p7 = pnand %p16569_p6, %p16563_p3 }
  0x16   :  { %16573 = shalt.err (!%p16570_p7)
}
  0x17   :  { %51 = dma.hbm_to_vmem [thread:$0]  %s21412_s2, 16, %s49_s19, [#allocation8]  }
  0x18   :  { %s16877_s16 = smov [#allocation10]   ;;  %s16878_s18 = smov [#allocation13]  }
  0x19   :  { %s67_s17 = sshll.u32 %s16877_s16, 4  ;;  %s90_s20 = sshll.u32 %s16878_s18, 4  ;;  %s68_s17 = int_to_ptr.vmem [resolvable:$true] %s67_s17  ;;  %s91_s20 = int_to_ptr.vmem [resolvable:$true] %s90_s20 }
  0x1a   :  { %s16574_s23 = scalar_lea.hbm %s21414_s4, 4608 }
  0x1b   :  { %p16575_p8 = scmp.ne.s32.totalorder %s21414_s4, %s16574_s23  ;;  %p16578_p9 = scmp.lt.u32.totalorder %s16574_s23, %s21414_s4 }
  0x1d   :  { %p16580_p10 = pnand %p16578_p9, %p16575_p8 }
  0x1f   :  { %16583 = shalt.err (!%p16580_p10)
}
  0x20   :  { %s16584_s2 = scalar_lea.vmem %s68_s17, 4608  ;;  %p16589_p12 = scmp.lt.s32.totalorder %s68_s17, %s68_s17 }
  0x21   :  { %p16585_p11 = scmp.ne.s32.totalorder %s68_s17, %s16584_s2  ;;  %p16590_p13 = scmp.lt.s32.totalorder %s16584_s2, %s16584_s2 }
  0x23   :  { %p16591_p0 = por %p16590_p13, %p16589_p12 }
  0x25   :  { %p16592_p1 = pnand %p16591_p0, %p16585_p11 }
  0x27   :  { %16595 = shalt.err (!%p16592_p1)
}
  0x28   :  { %s16879_s19 = smov 128   ;;  %s16880_s28 = smov 8  }
  0x29   :  { %73 = dma.hbm_to_vmem [thread:$0]  %s21414_s4, 4608, %s68_s17, [#allocation11], %s16879_s19, %s16879_s19, %s16880_s28  }
  0x2a   :  { %s16596_s21 = scalar_lea.hbm %s21416_s6, 16 }
  0x2b   :  { %p16597_p2 = scmp.ne.s32.totalorder %s21416_s6, %s16596_s21  ;;  %p16600_p3 = scmp.lt.u32.totalorder %s16596_s21, %s21416_s6 }
  0x2d   :  { %p16602_p4 = pnand %p16600_p3, %p16597_p2 }
  0x2f   :  { %16605 = shalt.err (!%p16602_p4)
}
  0x30   :  { %s16606_s26 = scalar_lea.vmem %s91_s20, 16  ;;  %s16610_s27 = scalar_lea.vmem %s91_s20, 32 }
  0x31   :  { %p16607_p5 = scmp.ne.s32.totalorder %s91_s20, %s16606_s26  ;;  %p16611_p6 = scmp.lt.s32.totalorder %s91_s20, %s91_s20 }
  0x32   :  { %p16612_p7 = scmp.lt.s32.totalorder %s16610_s27, %s16606_s26 }
  0x34   :  { %p16613_p8 = por %p16612_p7, %p16611_p6 }
  0x36   :  { %p16614_p9 = pnand %p16613_p8, %p16607_p5 }
  0x38   :  { %16617 = shalt.err (!%p16614_p9)
}
  0x39   :  { %93 = dma.hbm_to_vmem [thread:$0]  %s21416_s6, 16, %s91_s20, [#allocation14]  }
  0x3a   :  { %s16881_s2 = smov [#allocation16]   ;;  %s16882_s30 = smov [#allocation19]  }
  0x3b   :  { %s112_s29 = sshll.u32 %s16881_s2, 4  ;;  %s133_s16 = sshll.u32 %s16882_s30, 4  ;;  %s113_s29 = int_to_ptr.vmem [resolvable:$true] %s112_s29  ;;  %s134_s16 = int_to_ptr.vmem [resolvable:$true] %s133_s16 }
  0x3c   :  { %s16618_s22 = scalar_lea.hbm %s21419_s9, 128 }
  0x3d   :  { %p16619_p10 = scmp.ne.s32.totalorder %s21419_s9, %s16618_s22  ;;  %p16622_p11 = scmp.lt.u32.totalorder %s16618_s22, %s21419_s9 }
  0x3f   :  { %p16624_p12 = pnand %p16622_p11, %p16619_p10 }
  0x41   :  { %16627 = shalt.err (!%p16624_p12)
}
  0x42   :  { %s16628_s6 = scalar_lea.vmem %s113_s29, 128  ;;  %p16633_p0 = scmp.lt.s32.totalorder %s113_s29, %s113_s29 }
  0x43   :  { %p16629_p13 = scmp.ne.s32.totalorder %s113_s29, %s16628_s6  ;;  %p16634_p1 = scmp.lt.s32.totalorder %s16628_s6, %s16628_s6 }
  0x45   :  { %p16635_p2 = por %p16634_p1, %p16633_p0 }
  0x47   :  { %p16636_p3 = pnand %p16635_p2, %p16629_p13 }
  0x49   :  { %16639 = shalt.err (!%p16636_p3)
}
  0x4a   :  { %115 = dma.hbm_to_vmem [thread:$0]  %s21419_s9, 128, %s113_s29, [#allocation17]  }
  0x4b   :  { %s16640_s2 = scalar_lea.hbm %s21421_s11, 1024 }
  0x4c   :  { %p16641_p4 = scmp.ne.s32.totalorder %s21421_s11, %s16640_s2  ;;  %p16644_p5 = scmp.lt.u32.totalorder %s16640_s2, %s21421_s11 }
  0x4e   :  { %p16646_p6 = pnand %p16644_p5, %p16641_p4 }
  0x50   :  { %16649 = shalt.err (!%p16646_p6)
}
  0x51   :  { %s16650_s23 = scalar_lea.vmem %s134_s16, 1024  ;;  %p16655_p8 = scmp.lt.s32.totalorder %s134_s16, %s134_s16 }
  0x52   :  { %p16651_p7 = scmp.ne.s32.totalorder %s134_s16, %s16650_s23  ;;  %p16656_p9 = scmp.lt.s32.totalorder %s16650_s23, %s16650_s23 }
  0x54   :  { %p16657_p10 = por %p16656_p9, %p16655_p8 }
  0x56   :  { %p16658_p11 = pnand %p16657_p10, %p16651_p7 }
  0x58   :  { %16661 = shalt.err (!%p16658_p11)
}
  0x59   :  { %s16883_s9 = smov 256   ;;  %s16884_s29 = smov 16  }
  0x5a   :  { %139 = dma.hbm_to_vmem [thread:$0]  %s21421_s11, 1024, %s134_s16, [#allocation20], %s16883_s9, %s16883_s9, %s16884_s29  }
  0x5b   :  { %s16885_s26 = smov [#allocation22]   ;;  %s16662_s4 = scalar_lea.hbm %s21423_s13, 131072 }
  0x5c   :  { %s155_s6 = sshll.u32 %s16885_s26, 4  ;;  %p16663_p12 = scmp.ne.s32.totalorder %s21423_s13, %s16662_s4  ;;  %s156_s6 = int_to_ptr.vmem [resolvable:$true] %s155_s6 }
  0x5d   :  { %p16666_p13 = scmp.lt.u32.totalorder %s16662_s4, %s21423_s13 }
  0x5f   :  { %p16668_p0 = pnand %p16666_p13, %p16663_p12 }
  0x61   :  { %16671 = shalt.err (!%p16668_p0)
}
  0x62   :  { %s16672_s21 = scalar_lea.vmem %s156_s6, 131072  ;;  %p16677_p2 = scmp.lt.s32.totalorder %s156_s6, %s156_s6 }
  0x63   :  { %p16673_p1 = scmp.ne.s32.totalorder %s156_s6, %s16672_s21  ;;  %p16678_p3 = scmp.lt.s32.totalorder %s16672_s21, %s16672_s21 }
  0x65   :  { %p16679_p4 = por %p16678_p3, %p16677_p2 }
  0x67   :  { %p16680_p5 = pnand %p16679_p4, %p16673_p1 }
  0x69   :  { %16683 = shalt.err (!%p16680_p5)
}
  0x6a   :  { %s16886_s11 = smov 1024   ;;  %s16887_s16 = smov 64  }
  0x6b   :  { %161 = dma.hbm_to_vmem [thread:$0]  %s21423_s13, 131072, %s156_s6, [#allocation23], %s16886_s11, %s16886_s11, %s16887_s16  }
  0x6c   :  { %s16888_s9 = smov [#allocation4]   ;;  %s16889_s24 = smov [#allocation9]  }
  0x6d   :  { %s35_s29 = sshll.u32 %s16888_s9, 4  ;;  %s58_s25 = sshll.u32 %s16889_s24, 4  ;;  %s36_s29 = int_to_ptr.vmem [resolvable:$true] %s35_s29  ;;  %s59_s25 = int_to_ptr.vmem [resolvable:$true] %s58_s25 }
  0x6e   :  { %s16684_s27 = scalar_lea.hbm %s21411_s1, 512 }
  0x6f   :  { %p16685_p6 = scmp.ne.s32.totalorder %s21411_s1, %s16684_s27  ;;  %p16688_p7 = scmp.lt.u32.totalorder %s16684_s27, %s21411_s1 }
  0x71   :  { %p16690_p8 = pnand %p16688_p7, %p16685_p6 }
  0x73   :  { %16693 = shalt.err (!%p16690_p8)
}
  0x74   :  { %s16694_s13 = scalar_lea.vmem %s36_s29, 512  ;;  %p16699_p10 = scmp.lt.s32.totalorder %s36_s29, %s36_s29 }
  0x75   :  { %p16695_p9 = scmp.ne.s32.totalorder %s36_s29, %s16694_s13  ;;  %p16700_p11 = scmp.lt.s32.totalorder %s16694_s13, %s16694_s13 }
  0x77   :  { %p16701_p12 = por %p16700_p11, %p16699_p10 }
  0x79   :  { %p16702_p13 = pnand %p16701_p12, %p16695_p9 }
  0x7b   :  { %16705 = shalt.err (!%p16702_p13)
}
  0x7c   :  { %41 = dma.hbm_to_vmem [thread:$0]  %s21411_s1, 512, %s36_s29, [#allocation5], %s16879_s19, %s16879_s19, %s16880_s28  }
  0x7d   :  { %s16706_s16 = scalar_lea.hbm %s21413_s3, 16 }
  0x7e   :  { %p16707_p0 = scmp.ne.s32.totalorder %s21413_s3, %s16706_s16  ;;  %p16710_p1 = scmp.lt.u32.totalorder %s16706_s16, %s21413_s3 }
  0x80   :  { %p16712_p2 = pnand %p16710_p1, %p16707_p0 }
  0x82   :  { %16715 = shalt.err (!%p16712_p2)
}
  0x83   :  { %s16716_s26 = scalar_lea.vmem %s59_s25, 16  ;;  %s16720_s20 = scalar_lea.vmem %s59_s25, 32 }
  0x84   :  { %p16717_p3 = scmp.ne.s32.totalorder %s59_s25, %s16716_s26  ;;  %p16721_p4 = scmp.lt.s32.totalorder %s59_s25, %s59_s25 }
  0x85   :  { %p16722_p5 = scmp.lt.s32.totalorder %s16720_s20, %s16716_s26 }
  0x87   :  { %p16723_p6 = por %p16722_p5, %p16721_p4 }
  0x89   :  { %p16724_p7 = pnand %p16723_p6, %p16717_p3 }
  0x8b   :  { %16727 = shalt.err (!%p16724_p7)
}
  0x8c   :  { %61 = dma.hbm_to_vmem [thread:$0]  %s21413_s3, 16, %s59_s25, [#allocation8]  }
  0x8d   :  { %s16890_s27 = smov [#allocation12]   ;;  %s16891_s17 = smov [#allocation15]  }
  0x8e   :  { %s80_s4 = sshll.u32 %s16890_s27, 4  ;;  %s102_s2 = sshll.u32 %s16891_s17, 4  ;;  %s81_s4 = int_to_ptr.vmem [resolvable:$true] %s80_s4  ;;  %s103_s2 = int_to_ptr.vmem [resolvable:$true] %s102_s2 }
  0x8f   :  { %s16728_s6 = scalar_lea.hbm %s21415_s5, 16 }
  0x90   :  { %p16729_p8 = scmp.ne.s32.totalorder %s21415_s5, %s16728_s6  ;;  %p16732_p9 = scmp.lt.u32.totalorder %s16728_s6, %s21415_s5 }
  0x92   :  { %p16734_p10 = pnand %p16732_p9, %p16729_p8 }
  0x94   :  { %16737 = shalt.err (!%p16734_p10)
}
  0x95   :  { %s16738_s3 = scalar_lea.vmem %s81_s4, 16  ;;  %s16742_s25 = scalar_lea.vmem %s81_s4, 32 }
  0x96   :  { %p16739_p11 = scmp.ne.s32.totalorder %s81_s4, %s16738_s3  ;;  %p16743_p12 = scmp.lt.s32.totalorder %s81_s4, %s81_s4 }
  0x97   :  { %p16744_p13 = scmp.lt.s32.totalorder %s16742_s25, %s16738_s3 }
  0x99   :  { %p16745_p0 = por %p16744_p13, %p16743_p12 }
  0x9b   :  { %p16746_p1 = pnand %p16745_p0, %p16739_p11 }
  0x9d   :  { %16749 = shalt.err (!%p16746_p1)
}
  0x9e   :  { %83 = dma.hbm_to_vmem [thread:$0]  %s21415_s5, 16, %s81_s4, [#allocation11]  }
  0x9f   :  { %s16750_s26 = scalar_lea.hbm %s21418_s8, 128 }
  0xa0   :  { %p16751_p2 = scmp.ne.s32.totalorder %s21418_s8, %s16750_s26  ;;  %p16754_p3 = scmp.lt.u32.totalorder %s16750_s26, %s21418_s8 }
  0xa2   :  { %p16756_p4 = pnand %p16754_p3, %p16751_p2 }
  0xa4   :  { %16759 = shalt.err (!%p16756_p4)
}
  0xa5   :  { %s16760_s17 = scalar_lea.vmem %s103_s2, 128  ;;  %p16765_p6 = scmp.lt.s32.totalorder %s103_s2, %s103_s2 }
  0xa6   :  { %p16761_p5 = scmp.ne.s32.totalorder %s103_s2, %s16760_s17  ;;  %p16766_p7 = scmp.lt.s32.totalorder %s16760_s17, %s16760_s17 }
  0xa8   :  { %p16767_p8 = por %p16766_p7, %p16765_p6 }
  0xaa   :  { %p16768_p9 = pnand %p16767_p8, %p16761_p5 }
  0xac   :  { %16771 = shalt.err (!%p16768_p9)
}
  0xad   :  { %105 = dma.hbm_to_vmem [thread:$0]  %s21418_s8, 128, %s103_s2, [#allocation14]  }
  0xae   :  { %s16892_s30 = smov [#allocation18]   ;;  %s16893_s6 = smov [#allocation21]  }
  0xaf   :  { %s121_s13 = sshll.u32 %s16892_s30, 4  ;;  %s146_s18 = sshll.u32 %s16893_s6, 4  ;;  %s122_s13 = int_to_ptr.vmem [resolvable:$true] %s121_s13  ;;  %s147_s18 = int_to_ptr.vmem [resolvable:$true] %s146_s18 }
  0xb0   :  { %s16772_s16 = scalar_lea.hbm %s21420_s10, 3200 }
  0xb1   :  { %p16773_p10 = scmp.ne.s32.totalorder %s21420_s10, %s16772_s16  ;;  %p16776_p11 = scmp.lt.u32.totalorder %s16772_s16, %s21420_s10 }
  0xb3   :  { %p16778_p12 = pnand %p16776_p11, %p16773_p10 }
  0xb5   :  { %16781 = shalt.err (!%p16778_p12)
}
  0xb6   :  { %s16782_s8 = scalar_lea.vmem %s122_s13, 3200  ;;  %p16787_p0 = scmp.lt.s32.totalorder %s122_s13, %s122_s13 }
  0xb7   :  { %p16783_p13 = scmp.ne.s32.totalorder %s122_s13, %s16782_s8  ;;  %p16788_p1 = scmp.lt.s32.totalorder %s16782_s8, %s16782_s8 }
  0xb9   :  { %p16789_p2 = por %p16788_p1, %p16787_p0 }
  0xbb   :  { %p16790_p3 = pnand %p16789_p2, %p16783_p13 }
  0xbd   :  { %16793 = shalt.err (!%p16790_p3)
}
  0xbe   :  { %127 = dma.hbm_to_vmem [thread:$0]  %s21420_s10, 3200, %s122_s13, [#allocation17], %s16879_s19, %s16879_s19, %s16880_s28  }
  0xbf   :  { %s16794_s20 = scalar_lea.hbm %s21422_s12, 32 }
  0xc0   :  { %p16795_p4 = scmp.ne.s32.totalorder %s21422_s12, %s16794_s20  ;;  %p16798_p5 = scmp.lt.u32.totalorder %s16794_s20, %s21422_s12 }
  0xc2   :  { %p16800_p6 = pnand %p16798_p5, %p16795_p4 }
  0xc4   :  { %16803 = shalt.err (!%p16800_p6)
}
  0xc5   :  { %s16804_s5 = scalar_lea.vmem %s147_s18, 32  ;;  %p16809_p8 = scmp.lt.s32.totalorder %s147_s18, %s147_s18 }
  0xc6   :  { %p16805_p7 = scmp.ne.s32.totalorder %s147_s18, %s16804_s5  ;;  %p16810_p9 = scmp.lt.s32.totalorder %s16804_s5, %s16804_s5 }
  0xc8   :  { %p16811_p10 = por %p16810_p9, %p16809_p8 }
  0xca   :  { %p16812_p11 = pnand %p16811_p10, %p16805_p7 }
  0xcc   :  { %16815 = shalt.err (!%p16812_p11)
}
  0xcd   :  { %149 = dma.hbm_to_vmem [thread:$0]  %s21422_s12, 32, %s147_s18, [#allocation20]  }
  0xce   :  { %s16894_s28 = smov [#allocation24]   ;;  %s16816_s6 = scalar_lea.hbm %s21424_s14, 128 }
  0xcf   :  { %s168_s4 = sshll.u32 %s16894_s28, 4  ;;  %p16817_p12 = scmp.ne.s32.totalorder %s21424_s14, %s16816_s6  ;;  %s169_s4 = int_to_ptr.vmem [resolvable:$true] %s168_s4 }
  0xd0   :  { %p16820_p13 = scmp.lt.u32.totalorder %s16816_s6, %s21424_s14 }
  0xd2   :  { %p16822_p0 = pnand %p16820_p13, %p16817_p12 }
  0xd4   :  { %16825 = shalt.err (!%p16822_p0)
}
  0xd5   :  { %s16826_s25 = scalar_lea.vmem %s169_s4, 128  ;;  %p16831_p2 = scmp.lt.s32.totalorder %s169_s4, %s169_s4 }
  0xd6   :  { %p16827_p1 = scmp.ne.s32.totalorder %s169_s4, %s16826_s25  ;;  %p16832_p3 = scmp.lt.s32.totalorder %s16826_s25, %s16826_s25 }
  0xd8   :  { %p16833_p4 = por %p16832_p3, %p16831_p2 }
  0xda   :  { %p16834_p5 = pnand %p16833_p4, %p16827_p1 }
  0xdc   :  { %16837 = shalt.err (!%p16834_p5)
}
  0xdd   :  { %171 = dma.hbm_to_vmem [thread:$0]  %s21424_s14, 128, %s169_s4, [#allocation23]  }
  0xde   :  { %16860 = dma.done.wait [#allocation5], 512  }
  0xdf   :  { %16861 = vsyncadd [#allocation5], 4294966784 }
  0xe0   :  { %16862 = dma.done.wait [#allocation8], 32  }
  0xe1   :  { %16863 = vsyncadd [#allocation8], 4294967264 }
  0xe2   :  { %16864 = dma.done.wait [#allocation11], 4624  }
  0xe3   :  { %16865 = vsyncadd [#allocation11], 4294962672 }
  0xe4   :  { %16866 = dma.done.wait [#allocation14], 144  }
  0xe5   :  { %16867 = vsyncadd [#allocation14], 4294967152 }
  0xe6   :  { %16868 = dma.done.wait [#allocation17], 3328  }
  0xe7   :  { %16869 = vsyncadd [#allocation17], 4294963968 }
  0xe8   :  { %16870 = dma.done.wait [#allocation20], 1056  }
  0xe9   :  { %16871 = vsyncadd [#allocation20], 4294966240 }
  0xea   :  { %16872 = dma.done.wait [#allocation23], 131200  }
  0xeb   :  { %16873 = vsyncadd [#allocation23], 4294836096  ;;  %vm265_vm0 = vcmask 261120   ;;  %v21429_v0 = vmov 0.0|0.0   ;;  %v21426_v1 = vmov 0.0   ;;  %vm16897_vm1 = vmmov 0  }
  0xec   :  { %13760 = vmatprep.subr.bf16.mxu0 %v21429_v0  ;;  %15776 = vmatprep.subr.bf16.mxu1 %v21429_v0  ;;  %770 = vst.msk [vmem:[#allocation2] sm:$0xff] %vm265_vm0, %v21426_v1  ;;  %771 = vst.msk [vmem:[#allocation2 + $0x8] sm:$0xff] %vm265_vm0, %v21426_v1  ;;  %v16898_v2 = vmov 0   ;;  %v261_v3 = vld [vmem:[#allocation4] sm:$0xff]  ;;  %v262_v4 = vld [vmem:[#allocation4 + $0x8] sm:$0xff]  ;;  %vm3767_vm2 = vcmask 523264  }
  0xed   :  { %772 = vst.msk [vmem:[#allocation2 + $0x10] sm:$0xff] %vm265_vm0, %v21426_v1  ;;  %773 = vst.msk [vmem:[#allocation2 + $0x18] sm:$0xff] %vm265_vm0, %v21426_v1  ;;  %12938 = vmatprep.mubr.msk.f32.mxu0 %vm16897_vm1, %v21426_v1  ;;  %12983 = vmatprep.mubr.msk.f32.mxu1 %vm16897_vm1, %v21426_v1  ;;  %v263_v5 = vld [vmem:[#allocation4 + $0x10] sm:$0xff]  ;;  %v13761_v6 = vpack.c.bf16 %v262_v4, %v261_v3  ;;  %v264_v7 = vld [vmem:[#allocation4 + $0x18] sm:$0xff]  ;;  %vm3855_vm3 = vcmask 588800  }
  0xee   :  { %774 = vst.msk [vmem:[#allocation2 + $0x20] sm:$0xff] %vm265_vm0, %v21426_v1  ;;  %775 = vst.msk [vmem:[#allocation2 + $0x28] sm:$0xff] %vm265_vm0, %v21426_v1  ;;  %16493 = vset.pattern.permute.xlu0 %v16898_v2  ;;  %16494 = vset.pattern.permute.xlu1 %v16898_v2  ;;  %v13764_v8 = vpack.c.bf16 %v264_v7, %v263_v5  ;;  %v236_v9 = vld [vmem:[%s21410_s0] sm:$0xff]  ;;  %v251_v10 = vld [vmem:[%s21410_s0 + $0x78] sm:$0xff] }
  0xef   :  { %776 = vst.msk [vmem:[#allocation2 + $0x30] sm:$0xff] %vm265_vm0, %v21426_v1  ;;  %777 = vst.msk [vmem:[#allocation2 + $0x38] sm:$0xff] %vm265_vm0, %v21426_v1  ;;  %13762 = vmatpush3.bf16.msra.mxu0 %v13761_v6  ;;  %15778 = vmatpush3.bf16.msra.mxu1 %v13761_v6  ;;  %v211_v11 = vld [vmem:[#allocation18] sm:$0xff]  ;;  %v212_v12 = vld [vmem:[#allocation18 + $0x8] sm:$0xff] }
  0xf0   :  { %778 = vst.msk [vmem:[#allocation2 + $0x40] sm:$0xff] %vm265_vm0, %v21426_v1  ;;  %779 = vst.msk [vmem:[#allocation2 + $0x48] sm:$0xff] %vm265_vm0, %v21426_v1  ;;  %13763 = vmatprep.subr.bf16.mxu0 %v21429_v0  ;;  %15777 = vmatprep.subr.bf16.mxu1 %v21429_v0  ;;  %v213_v13 = vld [vmem:[#allocation18 + $0x10] sm:$0xff]  ;;  %v237_v14 = vld [vmem:[%s21410_s0 + $0x8] sm:$0xff] }
  0xf1   :  { %780 = vst.msk [vmem:[#allocation2 + $0x50] sm:$0xff] %vm265_vm0, %v21426_v1  ;;  %781 = vst.msk [vmem:[#allocation2 + $0x58] sm:$0xff] %vm265_vm0, %v21426_v1  ;;  %622 = vperm.xlu0 %16493, %v211_v11   ;;  %v252_v15 = vld [vmem:[%s21410_s0 + $0x80] sm:$0xff]  ;;  %632 = vperm.xlu1 %16494, %v213_v13   ;;  %v215_v17 = vld [vmem:[#allocation18 + $0x20] sm:$0xff] }
  0xf2   :  { %782 = vst.msk [vmem:[#allocation2 + $0x60] sm:$0xff] %vm265_vm0, %v21426_v1  ;;  %783 = vst.msk [vmem:[#allocation2 + $0x68] sm:$0xff] %vm265_vm0, %v21426_v1  ;;  %v214_v16 = vld [vmem:[#allocation18 + $0x18] sm:$0xff]  ;;  %v238_v18 = vld [vmem:[%s21410_s0 + $0x10] sm:$0xff] }
  0xf3   :  { %784 = vst.msk [vmem:[#allocation2 + $0x70] sm:$0xff] %vm265_vm0, %v21426_v1  ;;  %785 = vst.msk [vmem:[#allocation2 + $0x78] sm:$0xff] %vm265_vm0, %v21426_v1  ;;  %13765 = vmatpush3.bf16.msra.mxu0 %v13764_v8  ;;  %15779 = vmatpush3.bf16.msra.mxu1 %v13764_v8  ;;  %v253_v19 = vld [vmem:[%s21410_s0 + $0x88] sm:$0xff]  ;;  %v216_v20 = vld [vmem:[#allocation18 + $0x28] sm:$0xff] }
  0xf4   :  { %786 = vst.msk [vmem:[#allocation2 + $0x80] sm:$0xff] %vm265_vm0, %v21426_v1  ;;  %787 = vst.msk [vmem:[#allocation2 + $0x88] sm:$0xff] %vm265_vm0, %v21426_v1  ;;  %13766 = vmatprep.subr.bf16.mxu1 %v21429_v0  ;;  %13820 = vmatprep.subr.bf16.mxu0 %v21429_v0  ;;  %v217_v21 = vld [vmem:[#allocation18 + $0x30] sm:$0xff]  ;;  %v254_v23 = vld [vmem:[%s21410_s0 + $0x90] sm:$0xff] }
  0xf5   :  { %788 = vst.msk [vmem:[#allocation2 + $0x90] sm:$0xff] %vm265_vm0, %v21426_v1  ;;  %789 = vst.msk [vmem:[#allocation2 + $0x98] sm:$0xff] %vm265_vm0, %v21426_v1  ;;  %627 = vperm.xlu0 %16493, %v212_v12   ;;  %637 = vperm.xlu1 %16494, %v214_v16   ;;  %v239_v22 = vld [vmem:[%s21410_s0 + $0x18] sm:$0xff]  ;;  %v218_v24 = vld [vmem:[#allocation18 + $0x38] sm:$0xff] }
  0xf6   :  { %790 = vst.msk [vmem:[#allocation2 + $0xa0] sm:$0xff] %vm265_vm0, %v21426_v1  ;;  %791 = vst.msk [vmem:[#allocation2 + $0xa8] sm:$0xff] %vm265_vm0, %v21426_v1  ;;  %12939 = vmatmul.mubr.msk.f32.vlgmr.msra.gmra.mrb[0].mxu0 %vm265_vm0, %v236_v9  ;;  %12984 = vmatmul.mubr.msk.f32.vlgmr.msra.gmra.mrb[0].mxu1 %vm265_vm0, %v251_v10  ;;  %v219_v25 = vld [vmem:[#allocation18 + $0x40] sm:$0xff]  ;;  %v240_v26 = vld [vmem:[%s21410_s0 + $0x20] sm:$0xff] }
  0xf7   :  { %792 = vst.msk [vmem:[#allocation2 + $0xb0] sm:$0xff] %vm265_vm0, %v21426_v1  ;;  %793 = vst.msk [vmem:[#allocation2 + $0xb8] sm:$0xff] %vm265_vm0, %v21426_v1  ;;  %12941 = vmatprep.mubr.msk.f32.mxu0 %vm16897_vm1, %v21426_v1  ;;  %12986 = vmatprep.mubr.msk.f32.mxu1 %vm16897_vm1, %v21426_v1  ;;  %v255_v27 = vld [vmem:[%s21410_s0 + $0x98] sm:$0xff]  ;;  %v220_v30 = vld [vmem:[#allocation18 + $0x48] sm:$0xff] }
  0xf8   :  { %794 = vst.msk [vmem:[#allocation2 + $0xc0] sm:$0xff] %vm265_vm0, %v21426_v1  ;;  %795 = vst.msk [vmem:[#allocation2 + $0xc8] sm:$0xff] %vm265_vm0, %v21426_v1  ;;  %v879_v28 = vld [vmem:[#allocation10 + $0x20] sm:$0xff]  ;;  %v880_v29 = vld [vmem:[#allocation10 + $0x28] sm:$0xff] }
  0xf9   :  { %796 = vst.msk [vmem:[#allocation2 + $0xd0] sm:$0xff] %vm265_vm0, %v21426_v1  ;;  %797 = vst.msk [vmem:[#allocation2 + $0xd8] sm:$0xff] %vm265_vm0, %v21426_v1  ;;  %642 = vperm.xlu0 %16493, %v215_v17   ;;  %647 = vperm.xlu1 %16494, %v216_v20   ;;  %v13767_v31 = vpack.c.bf16 %v880_v29, %v879_v28  ;;  %v221_v32 = vld [vmem:[#allocation18 + $0x50] sm:$0xff]  ;;  %v241_v33 = vld [vmem:[%s21410_s0 + $0x28] sm:$0xff] }
  0xfa   :  { %798 = vst.msk [vmem:[#allocation2 + $0xe0] sm:$0xff] %vm265_vm0, %v21426_v1  ;;  %12942 = vmatmul.mubr.msk.f32.gmra.mrb[2].mxu0 %vm265_vm0, %v237_v14  ;;  %12987 = vmatmul.mubr.msk.f32.gmra.mrb[2].mxu1 %vm265_vm0, %v252_v15  ;;  %v256_v34 = vld [vmem:[%s21410_s0 + $0xa0] sm:$0xff]  ;;  %v223_v36 = vld [vmem:[#allocation18 + $0x60] sm:$0xff]  ;;  %v242_v37 = vld [vmem:[%s21410_s0 + $0x30] sm:$0xff] }
  0xfb   :  { %12944 = vmatprep.mubr.msk.f32.mxu0 %vm16897_vm1, %v21426_v1  ;;  %12989 = vmatprep.mubr.msk.f32.mxu1 %vm16897_vm1, %v21426_v1  ;;  %v222_v35 = vld [vmem:[#allocation18 + $0x58] sm:$0xff]  ;;  %v257_v38 = vld [vmem:[%s21410_s0 + $0xa8] sm:$0xff]  ;;  %v224_v39 = vld [vmem:[#allocation18 + $0x68] sm:$0xff]  ;;  %3770 = vst.msk [vmem:[#allocation3 + $0x10] sm:$0xff] %vm3767_vm2, %v21426_v1 }
  0xfc   :  { %13768 = vmatpush3.bf16.msra.mxu1 %v13767_v31  ;;  %v225_v40 = vld [vmem:[#allocation18 + $0x70] sm:$0xff]  ;;  %v258_v42 = vld [vmem:[%s21410_s0 + $0xb0] sm:$0xff]  ;;  %v226_v43 = vld [vmem:[#allocation18 + $0x78] sm:$0xff]  ;;  %3768 = vst.msk [vmem:[#allocation3] sm:$0xff] %vm3767_vm2, %v21426_v1 }
  0xfd   :  { %652 = vperm.xlu0 %16493, %v217_v21   ;;  %657 = vperm.xlu1 %16494, %v218_v24   ;;  %v243_v41 = vld [vmem:[%s21410_s0 + $0x38] sm:$0xff]  ;;  %v227_v44 = vld [vmem:[#allocation18 + $0x80] sm:$0xff]  ;;  %v244_v45 = vld [vmem:[%s21410_s0 + $0x40] sm:$0xff]  ;;  %3769 = vst.msk [vmem:[#allocation3 + $0x8] sm:$0xff] %vm3767_vm2, %v21426_v1 }
  0xfe   :  { %12945 = vmatmul.mubr.msk.f32.gmra.mrb[4].mxu0 %vm265_vm0, %v238_v18  ;;  %12990 = vmatmul.mubr.msk.f32.gmra.mrb[4].mxu1 %vm265_vm0, %v253_v19  ;;  %v259_v46 = vld [vmem:[%s21410_s0 + $0xb8] sm:$0xff]  ;;  %v228_v47 = vld [vmem:[#allocation18 + $0x88] sm:$0xff]  ;;  %v245_v49 = vld [vmem:[%s21410_s0 + $0x48] sm:$0xff]  ;;  %3771 = vst.msk [vmem:[#allocation3 + $0x18] sm:$0xff] %vm3767_vm2, %v21426_v1 }
  0xff   :  { %12947 = vmatprep.mubr.msk.f32.mxu0 %vm16897_vm1, %v21426_v1  ;;  %12992 = vmatprep.mubr.msk.f32.mxu1 %vm16897_vm1, %v21426_v1  ;;  %v229_v48 = vld [vmem:[#allocation18 + $0x90] sm:$0xff]  ;;  %v260_v50 = vld [vmem:[%s21410_s0 + $0xc0] sm:$0xff]  ;;  %v882_v52 = vld [vmem:[#allocation10 + $0x38] sm:$0xff]  ;;  %3772 = vst.msk [vmem:[#allocation3 + $0x20] sm:$0xff] %vm3767_vm2, %v21426_v1 }
 0x100   :  { %13769 = vmatprep.subr.bf16.mxu1 %v21429_v0  ;;  %v881_v51 = vld [vmem:[#allocation10 + $0x30] sm:$0xff]  ;;  %v246_v56 = vld [vmem:[%s21410_s0 + $0x50] sm:$0xff]  ;;  %v233_v58 = vld [vmem:[#allocation18 + $0xb0] sm:$0xff]  ;;  %3773 = vst.msk [vmem:[#allocation3 + $0x28] sm:$0xff] %vm3767_vm2, %v21426_v1 }
 0x101   :  { %662 = vperm.xlu0 %16493, %v219_v25   ;;  %667 = vperm.xlu1 %16494, %v220_v30   ;;  %v230_v53 = vld [vmem:[#allocation18 + $0x98] sm:$0xff]  ;;  %v13770_v54 = vpack.c.bf16 %v882_v52, %v881_v51  ;;  %v231_v55 = vld [vmem:[#allocation18 + $0xa0] sm:$0xff]  ;;  %v232_v57 = vld [vmem:[#allocation18 + $0xa8] sm:$0xff]  ;;  %3774 = vst.msk [vmem:[#allocation3 + $0x30] sm:$0xff] %vm3767_vm2, %v21426_v1 }
 0x102   :  { %12948 = vmatmul.mubr.msk.f32.gmra.mrb[6].mxu0 %vm265_vm0, %v239_v22  ;;  %12993 = vmatmul.mubr.msk.f32.gmra.mrb[6].mxu1 %vm265_vm0, %v254_v23  ;;  %v247_v59 = vld [vmem:[%s21410_s0 + $0x58] sm:$0xff]  ;;  %v234_v60 = vld [vmem:[#allocation18 + $0xb8] sm:$0xff]  ;;  %v235_v61 = vld [vmem:[#allocation18 + $0xc0] sm:$0xff]  ;;  %3775 = vst.msk [vmem:[#allocation3 + $0x38] sm:$0xff] %vm3767_vm2, %v21426_v1 }
 0x103   :  { %12950 = vmatprep.mubr.msk.f32.mxu0 %vm16897_vm1, %v21426_v1  ;;  %12995 = vmatprep.mubr.msk.f32.mxu1 %vm16897_vm1, %v21426_v1  ;;  %v248_v62 = vld [vmem:[%s21410_s0 + $0x60] sm:$0xff]  ;;  %v249_v63 = vld [vmem:[%s21410_s0 + $0x68] sm:$0xff]  ;;  %v250_v2 = vld [vmem:[%s21410_s0 + $0x70] sm:$0xff]  ;;  %3776 = vst.msk [vmem:[#allocation3 + $0x40] sm:$0xff] %vm3767_vm2, %v21426_v1 }
 0x104   :  { %13771 = vmatpush3.bf16.msra.mxu1 %v13770_v54  ;;  %v853_v3 = vld [vmem:[#allocation2 + $0x6] sm:$0xff]  ;;  %v849_v4 = vld [vmem:[#allocation10] sm:$0xff]  ;;  %v850_v5 = vld [vmem:[#allocation10 + $0x8] sm:$0xff]  ;;  %3777 = vst.msk [vmem:[#allocation3 + $0x48] sm:$0xff] %vm3767_vm2, %v21426_v1 }
 0x105   :  { %672 = vperm.xlu0 %16493, %v221_v32   ;;  %677 = vperm.xlu1 %16494, %v222_v35   ;;  %v13773_v6 = vpack.c.bf16 %v850_v5, %v849_v4  ;;  %v851_v7 = vld [vmem:[#allocation10 + $0x10] sm:$0xff]  ;;  %v852_v8 = vld [vmem:[#allocation10 + $0x18] sm:$0xff]  ;;  %3778 = vst.msk [vmem:[#allocation3 + $0x50] sm:$0xff] %vm3767_vm2, %v21426_v1  ;;  %3779 = vst.msk [vmem:[#allocation3 + $0x58] sm:$0xff] %vm3767_vm2, %v21426_v1 }
 0x106   :  { %12951 = vmatmul.mubr.msk.f32.gmra.mrb[8].mxu0 %vm265_vm0, %v240_v26  ;;  %12996 = vmatmul.mubr.msk.f32.gmra.mrb[8].mxu1 %vm265_vm0, %v255_v27  ;;  %v13776_v9 = vpack.c.bf16 %v852_v8, %v851_v7  ;;  %v17395_v23 = vld [vmem:[#allocation7] ss:$0 sm:$0xff]  ;;  %v17399_v26 = vld [vmem:[#allocation9] ss:$0 sm:$0xff]  ;;  %3780 = vst.msk [vmem:[#allocation3 + $0x60] sm:$0xff] %vm3767_vm2, %v21426_v1  ;;  %3781 = vst.msk [vmem:[#allocation3 + $0x68] sm:$0xff] %vm3767_vm2, %v21426_v1 }
 0x107   :  { %12953 = vmatprep.mubr.msk.f32.mxu0 %vm16897_vm1, %v21426_v1  ;;  %12998 = vmatprep.mubr.msk.f32.mxu1 %vm16897_vm1, %v21426_v1  ;;  %3782 = vst.msk [vmem:[#allocation3 + $0x70] sm:$0xff] %vm3767_vm2, %v21426_v1  ;;  %3783 = vst.msk [vmem:[#allocation3 + $0x78] sm:$0xff] %vm3767_vm2, %v21426_v1 }
 0x108   :  { %13772 = vmatprep.subr.bf16.mxu1 %v21429_v0  ;;  %3784 = vst.msk [vmem:[#allocation3 + $0x80] sm:$0xff] %vm3767_vm2, %v21426_v1  ;;  %3785 = vst.msk [vmem:[#allocation3 + $0x88] sm:$0xff] %vm3767_vm2, %v21426_v1 }
 0x109   :  { %682 = vperm.xlu0 %16493, %v223_v36   ;;  %687 = vperm.xlu1 %16494, %v224_v39   ;;  %3786 = vst.msk [vmem:[#allocation3 + $0x90] sm:$0xff] %vm3767_vm2, %v21426_v1  ;;  %3787 = vst.msk [vmem:[#allocation3 + $0x98] sm:$0xff] %vm3767_vm2, %v21426_v1 }
 0x10a   :  { %12954 = vmatmul.mubr.msk.f32.gmra.mrb[10].mxu0 %vm265_vm0, %v241_v33  ;;  %12999 = vmatmul.mubr.msk.f32.gmra.mrb[10].mxu1 %vm265_vm0, %v256_v34  ;;  %3788 = vst.msk [vmem:[#allocation3 + $0xa0] sm:$0xff] %vm3767_vm2, %v21426_v1  ;;  %3789 = vst.msk [vmem:[#allocation3 + $0xa8] sm:$0xff] %vm3767_vm2, %v21426_v1 }
 0x10b   :  { %12956 = vmatprep.mubr.msk.f32.mxu0 %vm16897_vm1, %v21426_v1  ;;  %13001 = vmatprep.mubr.msk.f32.mxu1 %vm16897_vm1, %v21426_v1  ;;  %3790 = vst.msk [vmem:[#allocation3 + $0xb0] sm:$0xff] %vm3767_vm2, %v21426_v1  ;;  %3791 = vst.msk [vmem:[#allocation3 + $0xb8] sm:$0xff] %vm3767_vm2, %v21426_v1 }
 0x10c   :  { %3792 = vst.msk [vmem:[#allocation3 + $0xc0] sm:$0xff] %vm3767_vm2, %v21426_v1  ;;  %3793 = vst.msk [vmem:[#allocation3 + $0xc8] sm:$0xff] %vm3767_vm2, %v21426_v1 }
 0x10d   :  { %692 = vperm.xlu0 %16493, %v225_v40   ;;  %697 = vperm.xlu1 %16494, %v226_v43   ;;  %3794 = vst.msk [vmem:[#allocation3 + $0xd0] sm:$0xff] %vm3767_vm2, %v21426_v1  ;;  %3795 = vst.msk [vmem:[#allocation3 + $0xd8] sm:$0xff] %vm3767_vm2, %v21426_v1 }
 0x10e   :  { %12957 = vmatmul.mubr.msk.f32.gmra.mrb[12].mxu0 %vm265_vm0, %v242_v37  ;;  %13002 = vmatmul.mubr.msk.f32.gmra.mrb[12].mxu1 %vm265_vm0, %v257_v38  ;;  %3796 = vst.msk [vmem:[#allocation3 + $0xe0] sm:$0xff] %vm3767_vm2, %v21426_v1 }
 0x10f   :  { %12959 = vmatprep.mubr.msk.f32.mxu0 %vm16897_vm1, %v21426_v1  ;;  %13004 = vmatprep.mubr.msk.f32.mxu1 %vm16897_vm1, %v21426_v1 }
 0x111   :  { %702 = vperm.xlu0 %16493, %v227_v44   ;;  %707 = vperm.xlu1 %16494, %v228_v47  }
 0x112   :  { %12960 = vmatmul.mubr.msk.f32.gmra.mrb[14].mxu0 %vm265_vm0, %v243_v41  ;;  %13005 = vmatmul.mubr.msk.f32.gmra.mrb[14].mxu1 %vm265_vm0, %v258_v42 }
 0x113   :  { %12962 = vmatprep.mubr.msk.f32.mxu0 %vm16897_vm1, %v21426_v1  ;;  %13007 = vmatprep.mubr.msk.f32.mxu1 %vm16897_vm1, %v21426_v1 }
 0x115   :  { %712 = vperm.xlu0 %16493, %v229_v48   ;;  %717 = vperm.xlu1 %16494, %v230_v53  }
 0x116   :  { %12963 = vmatmul.mubr.msk.f32.gmra.mrb[16].mxu0 %vm265_vm0, %v244_v45  ;;  %13008 = vmatmul.mubr.msk.f32.gmra.mrb[16].mxu1 %vm265_vm0, %v259_v46 }
 0x117   :  { %12965 = vmatprep.mubr.msk.f32.mxu0 %vm16897_vm1, %v21426_v1  ;;  %13010 = vmatprep.mubr.msk.f32.mxu1 %vm16897_vm1, %v21426_v1 }
 0x119   :  { %722 = vperm.xlu0 %16493, %v231_v55   ;;  %727 = vperm.xlu1 %16494, %v232_v57  }
 0x11a   :  { %12966 = vmatmul.mubr.msk.f32.gmra.mrb[18].mxu0 %vm265_vm0, %v245_v49  ;;  %13011 = vmatmul.mubr.msk.f32.gmra.mrb[18].mxu1 %vm265_vm0, %v260_v50 }
 0x11b   :  { %12968 = vmatprep.mubr.msk.f32.mxu0 %vm16897_vm1, %v21426_v1  ;;  %13021 = vmatprep.mubr.msk.f32.mxu1 %vm16897_vm1, %v21426_v1 }
 0x11d   :  { %732 = vperm.xlu0 %16493, %v233_v58   ;;  %737 = vperm.xlu1 %16494, %v234_v60  }
 0x11e   :  { %12969 = vmatmul.mubr.msk.f32.gmra.mrb[20].mxu0 %vm265_vm0, %v246_v56  ;;  %13022 = vmatmul.mubr.msk.f32.vlgmr.msra.gmra.mrb[20].mxu1 %vm265_vm0, %v853_v3 }
 0x11f   :  { %12971 = vmatprep.mubr.msk.f32.mxu0 %vm16897_vm1, %v21426_v1  ;;  %13024 = vmatprep.mubr.msk.f32.mxu1 %vm16897_vm1, %v21426_v1 }
 0x120   :  { %13774 = vmatpush3.bf16.msra.mxu1 %v13773_v6 }
 0x121   :  { %742 = vperm.xlu0 %16493, %v235_v61   ;;  %13775 = vmatprep.subr.bf16.mxu1 %v21429_v0 }
 0x122   :  { %12972 = vmatmul.mubr.msk.f32.gmra.mrb[22].mxu0 %vm265_vm0, %v247_v59 }
 0x123   :  { %12974 = vmatprep.mubr.msk.f32.mxu0 %vm16897_vm1, %v21426_v1 }
 0x124   :  { %13777 = vmatpush3.bf16.msra.mxu1 %v13776_v9 }
 0x125   :  { %13778 = vmatprep.subr.bf16.mxu1 %v21429_v0 }
 0x126   :  { %12975 = vmatmul.mubr.msk.f32.gmra.mrb[24].mxu0 %vm265_vm0, %v248_v62 }
 0x127   :  { %12977 = vmatprep.mubr.msk.f32.mxu0 %vm16897_vm1, %v21426_v1 }
 0x12a   :  { %12978 = vmatmul.mubr.msk.f32.gmra.mrb[26].mxu0 %vm265_vm0, %v249_v63 }
 0x12b   :  { %12980 = vmatprep.mubr.msk.f32.mxu0 %vm16897_vm1, %v21426_v1 }
 0x12e   :  { %12981 = vmatmul.mubr.msk.f32.gmra.mrb[28].mxu0 %vm265_vm0, %v250_v2 }
 0x170   :  { %v17369_v10 = vpop.permute.xlu0 %622  ;;  %v17371_v11 = vpop.permute.xlu1 %632 }
 0x174   :  { %v17373_v12 = vpop.permute.xlu0 %627  ;;  %v17375_v13 = vpop.permute.xlu1 %637 }
 0x178   :  { %v17377_v14 = vpop.permute.xlu0 %642  ;;  %v17379_v15 = vpop.permute.xlu1 %647 }
 0x17c   :  { %v17381_v16 = vpop.permute.xlu0 %652  ;;  %v17383_v17 = vpop.permute.xlu1 %657 }
 0x180   :  { %v17385_v18 = vpop.permute.xlu0 %662  ;;  %v17387_v19 = vpop.permute.xlu1 %667 }
 0x184   :  { %v17389_v20 = vpop.permute.xlu0 %672  ;;  %v17391_v21 = vpop.permute.xlu1 %677 }
 0x188   :  { %v17393_v22 = vpop.permute.xlu0 %682  ;;  %v17397_v24 = vpop.permute.xlu1 %687 }
 0x18c   :  { %v17403_v32 = vpop.permute.xlu0 %692  ;;  %v17409_v43 = vpop.permute.xlu1 %697 }
 0x190   :  { %v17419_v56 = vpop.permute.xlu0 %702  ;;  %v17429_v7 = vpop.permute.xlu1 %707 }
 0x1c9   :  { %v407_v25 = vpop.f32.mrb[0].mxu0  ;;  %v482_v27 = vpop.f32.mrb[0].mxu1 }
 0x1ca   :  { %v538_v28 = vmul.f32 %v17395_v23, %v407_v25  ;;  %v12940_v29 = vpop.f32.mrb[1].mxu0  ;;  %v553_v30 = vmul.f32 %v17395_v23, %v482_v27  ;;  %v12985_v31 = vpop.f32.mrb[1].mxu1 }
 0x1cc   :  { %v570_v33 = vadd.f32 %v17399_v26, %v538_v28  ;;  %v585_v34 = vadd.f32 %v17399_v26, %v553_v30 }
 0x1cd   :  { %v412_v35 = vpop.f32.mrb[2].mxu0  ;;  %v487_v36 = vpop.f32.mrb[2].mxu1 }
 0x1ce   :  { %v595_v37 = vmax.f32 %v570_v33, 0.0  ;;  %v610_v38 = vmax.f32 %v585_v34, 0.0  ;;  %v539_v39 = vmul.f32 %v17395_v23, %v412_v35  ;;  %v554_v40 = vmul.f32 %v17395_v23, %v487_v36  ;;  %v12943_v41 = vpop.f32.mrb[3].mxu0  ;;  %v12988_v42 = vpop.f32.mrb[3].mxu1 }
 0x1d0   :  { %v745_v44 = vmul.f32 %v17369_v10, %v595_v37  ;;  %v760_v45 = vmul.f32 %v17409_v43, %v610_v38  ;;  %v571_v46 = vadd.f32 %v17399_v26, %v539_v39  ;;  %v586_v47 = vadd.f32 %v17399_v26, %v554_v40  ;;  %v17440_v38 = vpop.permute.xlu0 %712 }
 0x1d1   :  { %v417_v48 = vpop.f32.mrb[4].mxu0  ;;  %v492_v49 = vpop.f32.mrb[4].mxu1 }
 0x1d2   :  { %799 = vst.msk [vmem:[#allocation2 + $0x10] sm:$0xff] %vm265_vm0, %v745_v44  ;;  %814 = vst.msk [vmem:[#allocation2 + $0x88] sm:$0xff] %vm265_vm0, %v760_v45  ;;  %v596_v50 = vmax.f32 %v571_v46, 0.0  ;;  %v611_v51 = vmax.f32 %v586_v47, 0.0  ;;  %v540_v52 = vmul.f32 %v17395_v23, %v417_v48  ;;  %v555_v53 = vmul.f32 %v17395_v23, %v492_v49  ;;  %v12946_v54 = vpop.f32.mrb[5].mxu0  ;;  %v12991_v55 = vpop.f32.mrb[5].mxu1 }
 0x1d4   :  { %v746_v57 = vmul.f32 %v17373_v12, %v596_v50  ;;  %v761_v58 = vmul.f32 %v17419_v56, %v611_v51  ;;  %v572_v59 = vadd.f32 %v17399_v26, %v540_v52  ;;  %v587_v60 = vadd.f32 %v17399_v26, %v555_v53  ;;  %v17453_v53 = vpop.permute.xlu1 %717 }
 0x1d5   :  { %v422_v61 = vpop.f32.mrb[6].mxu0  ;;  %v497_v62 = vpop.f32.mrb[6].mxu1 }
 0x1d6   :  { %800 = vst.msk [vmem:[#allocation2 + $0x18] sm:$0xff] %vm265_vm0, %v746_v57  ;;  %815 = vst.msk [vmem:[#allocation2 + $0x90] sm:$0xff] %vm265_vm0, %v761_v58  ;;  %v597_v63 = vmax.f32 %v572_v59, 0.0  ;;  %v612_v2 = vmax.f32 %v587_v60, 0.0  ;;  %v541_v3 = vmul.f32 %v17395_v23, %v422_v61  ;;  %v556_v4 = vmul.f32 %v17395_v23, %v497_v62  ;;  %v12949_v5 = vpop.f32.mrb[7].mxu0  ;;  %v12994_v6 = vpop.f32.mrb[7].mxu1 }
 0x1d7   :  { %v17466_v6 = vpop.permute.xlu0 %722 }
 0x1d8   :  { %v747_v8 = vmul.f32 %v17371_v11, %v597_v63  ;;  %v762_v9 = vmul.f32 %v17429_v7, %v612_v2  ;;  %v573_v25 = vadd.f32 %v17399_v26, %v541_v3  ;;  %v588_v27 = vadd.f32 %v17399_v26, %v556_v4 }
 0x1d9   :  { %v427_v28 = vpop.f32.mrb[8].mxu0  ;;  %v502_v29 = vpop.f32.mrb[8].mxu1  ;;  %v854_v30 = vld [vmem:[#allocation2 + $0xe] sm:$0xff] }
 0x1da   :  { %801 = vst.msk [vmem:[#allocation2 + $0x20] sm:$0xff] %vm265_vm0, %v747_v8  ;;  %816 = vst.msk [vmem:[#allocation2 + $0x98] sm:$0xff] %vm265_vm0, %v762_v9  ;;  %v598_v31 = vmax.f32 %v573_v25, 0.0  ;;  %v613_v33 = vmax.f32 %v588_v27, 0.0  ;;  %v542_v34 = vmul.f32 %v17395_v23, %v427_v28  ;;  %v557_v35 = vmul.f32 %v17395_v23, %v502_v29  ;;  %v12952_v36 = vpop.f32.mrb[9].mxu0  ;;  %13025 = vmatmul.mubr.msk.f32.gmra.mrb[22].mxu1 %vm265_vm0, %v854_v30  ;;  %v12997_v37 = vpop.f32.mrb[9].mxu1 }
 0x1db   :  { %13027 = vmatprep.mubr.msk.f32.mxu1 %vm16897_vm1, %v21426_v1 }
 0x1dc   :  { %v748_v39 = vmul.f32 %v17375_v13, %v598_v31  ;;  %v763_v40 = vmul.f32 %v17440_v38, %v613_v33  ;;  %v574_v41 = vadd.f32 %v17399_v26, %v542_v34  ;;  %v589_v42 = vadd.f32 %v17399_v26, %v557_v35 }
 0x1dd   :  { %v432_v44 = vpop.f32.mrb[10].mxu0  ;;  %v507_v45 = vpop.f32.mrb[10].mxu1  ;;  %v855_v46 = vld [vmem:[#allocation2 + $0x16] sm:$0xff] }
 0x1de   :  { %802 = vst.msk [vmem:[#allocation2 + $0x28] sm:$0xff] %vm265_vm0, %v748_v39  ;;  %817 = vst.msk [vmem:[#allocation2 + $0xa0] sm:$0xff] %vm265_vm0, %v763_v40  ;;  %v599_v47 = vmax.f32 %v574_v41, 0.0  ;;  %v614_v48 = vmax.f32 %v589_v42, 0.0  ;;  %v543_v49 = vmul.f32 %v17395_v23, %v432_v44  ;;  %v558_v50 = vmul.f32 %v17395_v23, %v507_v45  ;;  %v12955_v51 = vpop.f32.mrb[11].mxu0  ;;  %13028 = vmatmul.mubr.msk.f32.gmra.mrb[24].mxu1 %vm265_vm0, %v855_v46  ;;  %v13000_v52 = vpop.f32.mrb[11].mxu1 }
 0x1df   :  { %13030 = vmatprep.mubr.msk.f32.mxu1 %vm16897_vm1, %v21426_v1  ;;  %v17479_v39 = vpop.permute.xlu1 %727 }
 0x1e0   :  { %v749_v54 = vmul.f32 %v17377_v14, %v599_v47  ;;  %v764_v55 = vmul.f32 %v17453_v53, %v614_v48  ;;  %v575_v57 = vadd.f32 %v17399_v26, %v543_v49  ;;  %v590_v58 = vadd.f32 %v17399_v26, %v558_v50 }
 0x1e1   :  { %v437_v59 = vpop.f32.mrb[12].mxu0  ;;  %v512_v60 = vpop.f32.mrb[12].mxu1  ;;  %v856_v61 = vld [vmem:[#allocation2 + $0x1e] sm:$0xff] }
 0x1e2   :  { %803 = vst.msk [vmem:[#allocation2 + $0x30] sm:$0xff] %vm265_vm0, %v749_v54  ;;  %818 = vst.msk [vmem:[#allocation2 + $0xa8] sm:$0xff] %vm265_vm0, %v764_v55  ;;  %v600_v62 = vmax.f32 %v575_v57, 0.0  ;;  %v615_v63 = vmax.f32 %v590_v58, 0.0  ;;  %v544_v2 = vmul.f32 %v17395_v23, %v437_v59  ;;  %v559_v3 = vmul.f32 %v17395_v23, %v512_v60  ;;  %v12958_v4 = vpop.f32.mrb[13].mxu0  ;;  %13031 = vmatmul.mubr.msk.f32.gmra.mrb[26].mxu1 %vm265_vm0, %v856_v61  ;;  %v13003_v5 = vpop.f32.mrb[13].mxu1 }
 0x1e3   :  { %13033 = vmatprep.mubr.msk.f32.mxu1 %vm16897_vm1, %v21426_v1  ;;  %v17492_v55 = vpop.permute.xlu0 %732 }
 0x1e4   :  { %v750_v8 = vmul.f32 %v17379_v15, %v600_v62  ;;  %v765_v9 = vmul.f32 %v17466_v6, %v615_v63  ;;  %v576_v25 = vadd.f32 %v17399_v26, %v544_v2  ;;  %v591_v27 = vadd.f32 %v17399_v26, %v559_v3 }
 0x1e5   :  { %v442_v28 = vpop.f32.mrb[14].mxu0  ;;  %v517_v29 = vpop.f32.mrb[14].mxu1  ;;  %v857_v30 = vld [vmem:[#allocation2 + $0x26] sm:$0xff] }
 0x1e6   :  { %804 = vst.msk [vmem:[#allocation2 + $0x38] sm:$0xff] %vm265_vm0, %v750_v8  ;;  %819 = vst.msk [vmem:[#allocation2 + $0xb0] sm:$0xff] %vm265_vm0, %v765_v9  ;;  %v601_v31 = vmax.f32 %v576_v25, 0.0  ;;  %v616_v33 = vmax.f32 %v591_v27, 0.0  ;;  %v545_v34 = vmul.f32 %v17395_v23, %v442_v28  ;;  %v560_v35 = vmul.f32 %v17395_v23, %v517_v29  ;;  %v12961_v36 = vpop.f32.mrb[15].mxu0  ;;  %13034 = vmatmul.mubr.msk.f32.gmra.mrb[28].mxu1 %vm265_vm0, %v857_v30  ;;  %v13006_v37 = vpop.f32.mrb[15].mxu1 }
 0x1e7   :  { %13036 = vmatprep.mubr.msk.f32.mxu1 %vm16897_vm1, %v21426_v1  ;;  %v17505_v25 = vpop.permute.xlu1 %737 }
 0x1e8   :  { %v751_v40 = vmul.f32 %v17381_v16, %v601_v31  ;;  %v766_v41 = vmul.f32 %v17479_v39, %v616_v33  ;;  %v577_v42 = vadd.f32 %v17399_v26, %v545_v34  ;;  %v592_v44 = vadd.f32 %v17399_v26, %v560_v35 }
 0x1e9   :  { %v447_v45 = vpop.f32.mrb[16].mxu0  ;;  %v522_v46 = vpop.f32.mrb[16].mxu1  ;;  %v858_v47 = vld [vmem:[#allocation2 + $0x2e] sm:$0xff] }
 0x1ea   :  { %805 = vst.msk [vmem:[#allocation2 + $0x40] sm:$0xff] %vm265_vm0, %v751_v40  ;;  %820 = vst.msk [vmem:[#allocation2 + $0xb8] sm:$0xff] %vm265_vm0, %v766_v41  ;;  %v602_v48 = vmax.f32 %v577_v42, 0.0  ;;  %v617_v49 = vmax.f32 %v592_v44, 0.0  ;;  %v546_v50 = vmul.f32 %v17395_v23, %v447_v45  ;;  %v561_v51 = vmul.f32 %v17395_v23, %v522_v46  ;;  %v12964_v52 = vpop.f32.mrb[17].mxu0  ;;  %13037 = vmatmul.mubr.msk.f32.gmra.mrb[30].mxu1 %vm265_vm0, %v858_v47  ;;  %v13009_v54 = vpop.f32.mrb[17].mxu1 }
 0x1eb   :  { %13039 = vmatprep.mubr.msk.f32.mxu1 %vm16897_vm1, %v21426_v1  ;;  %v17517_v40 = vpop.permute.xlu0 %742 }
 0x1ec   :  { %v752_v57 = vmul.f32 %v17383_v17, %v602_v48  ;;  %v767_v58 = vmul.f32 %v17492_v55, %v617_v49  ;;  %v578_v59 = vadd.f32 %v17399_v26, %v546_v50  ;;  %v593_v60 = vadd.f32 %v17399_v26, %v561_v51 }
 0x1ed   :  { %v452_v61 = vpop.f32.mrb[18].mxu0  ;;  %v527_v62 = vpop.f32.mrb[18].mxu1  ;;  %v859_v63 = vld [vmem:[#allocation2 + $0x36] sm:$0xff] }
 0x1ee   :  { %806 = vst.msk [vmem:[#allocation2 + $0x48] sm:$0xff] %vm265_vm0, %v752_v57  ;;  %821 = vst.msk [vmem:[#allocation2 + $0xc0] sm:$0xff] %vm265_vm0, %v767_v58  ;;  %v603_v2 = vmax.f32 %v578_v59, 0.0  ;;  %v618_v3 = vmax.f32 %v593_v60, 0.0  ;;  %v547_v4 = vmul.f32 %v17395_v23, %v452_v61  ;;  %v562_v5 = vmul.f32 %v17395_v23, %v527_v62  ;;  %v12967_v8 = vpop.f32.mrb[19].mxu0  ;;  %13040 = vmatmul.mubr.msk.f32.gmra.mrb[32].mxu1 %vm265_vm0, %v859_v63  ;;  %v13012_v9 = vpop.f32.mrb[19].mxu1 }
 0x1ef   :  { %13042 = vmatprep.mubr.msk.f32.mxu1 %vm16897_vm1, %v21426_v1 }
 0x1f0   :  { %v753_v27 = vmul.f32 %v17385_v18, %v603_v2  ;;  %v768_v28 = vmul.f32 %v17505_v25, %v618_v3  ;;  %v579_v29 = vadd.f32 %v17399_v26, %v547_v4  ;;  %v594_v30 = vadd.f32 %v17399_v26, %v562_v5 }
 0x1f1   :  { %v457_v31 = vpop.f32.mrb[20].mxu0  ;;  %v860_v33 = vld [vmem:[#allocation2 + $0x3e] sm:$0xff] }
 0x1f2   :  { %807 = vst.msk [vmem:[#allocation2 + $0x50] sm:$0xff] %vm265_vm0, %v753_v27  ;;  %822 = vst.msk [vmem:[#allocation2 + $0xc8] sm:$0xff] %vm265_vm0, %v768_v28  ;;  %v604_v34 = vmax.f32 %v579_v29, 0.0  ;;  %v619_v35 = vmax.f32 %v594_v30, 0.0  ;;  %v548_v36 = vmul.f32 %v17395_v23, %v457_v31  ;;  %v12970_v37 = vpop.f32.mrb[21].mxu0  ;;  %13043 = vmatmul.mubr.msk.f32.gmra.mrb[34].mxu1 %vm265_vm0, %v860_v33 }
 0x1f3   :  { %13045 = vmatprep.mubr.msk.f32.mxu1 %vm16897_vm1, %v21426_v1 }
 0x1f4   :  { %v754_v41 = vmul.f32 %v17387_v19, %v604_v34  ;;  %v769_v42 = vmul.f32 %v17517_v40, %v619_v35  ;;  %v580_v44 = vadd.f32 %v17399_v26, %v548_v36 }
 0x1f5   :  { %v462_v45 = vpop.f32.mrb[22].mxu0  ;;  %v861_v46 = vld [vmem:[#allocation2 + $0x46] sm:$0xff] }
 0x1f6   :  { %808 = vst.msk [vmem:[#allocation2 + $0x58] sm:$0xff] %vm265_vm0, %v754_v41  ;;  %823 = vst.msk [vmem:[#allocation2 + $0xd0] sm:$0xff] %vm265_vm0, %v769_v42  ;;  %v605_v47 = vmax.f32 %v580_v44, 0.0  ;;  %v549_v48 = vmul.f32 %v17395_v23, %v462_v45  ;;  %v12973_v49 = vpop.f32.mrb[23].mxu0  ;;  %13046 = vmatmul.mubr.msk.f32.gmra.mrb[36].mxu1 %vm265_vm0, %v861_v46  ;;  %v870_v42 = vld [vmem:[#allocation2 + $0x8e] sm:$0xff]  ;;  %v871_v44 = vld [vmem:[#allocation2 + $0x96] sm:$0xff] }
 0x1f7   :  { %13048 = vmatprep.mubr.msk.f32.mxu1 %vm16897_vm1, %v21426_v1  ;;  %v872_v45 = vld [vmem:[#allocation2 + $0x9e] sm:$0xff]  ;;  %v873_v46 = vld [vmem:[#allocation2 + $0xa6] sm:$0xff] }
 0x1f8   :  { %v755_v50 = vmul.f32 %v17389_v20, %v605_v47  ;;  %v581_v51 = vadd.f32 %v17399_v26, %v549_v48  ;;  %v874_v47 = vld [vmem:[#allocation2 + $0xae] sm:$0xff]  ;;  %v875_v48 = vld [vmem:[#allocation2 + $0xb6] sm:$0xff]  ;;  %v876_v49 = vld [vmem:[#allocation2 + $0xbe] sm:$0xff] }
 0x1f9   :  { %v467_v52 = vpop.f32.mrb[24].mxu0  ;;  %v862_v54 = vld [vmem:[#allocation2 + $0x4e] sm:$0xff] }
 0x1fa   :  { %809 = vst.msk [vmem:[#allocation2 + $0x60] sm:$0xff] %vm265_vm0, %v755_v50  ;;  %v606_v57 = vmax.f32 %v581_v51, 0.0  ;;  %v550_v58 = vmul.f32 %v17395_v23, %v467_v52  ;;  %v12976_v59 = vpop.f32.mrb[25].mxu0  ;;  %13049 = vmatmul.mubr.msk.f32.gmra.mrb[38].mxu1 %vm265_vm0, %v862_v54  ;;  %v1439_v50 = vld [vmem:[#allocation10 + $0x40] sm:$0xff]  ;;  %v1440_v51 = vld [vmem:[#allocation10 + $0x48] sm:$0xff]  ;;  %v877_v52 = vld [vmem:[#allocation2 + $0xc6] sm:$0xff] }
 0x1fb   :  { %13051 = vmatprep.mubr.msk.f32.mxu1 %vm16897_vm1, %v21426_v1  ;;  %v824_v54 = vld [vmem:[#allocation2 + $0x5] sm:$0xff] }
 0x1fc   :  { %v756_v60 = vmul.f32 %v17391_v21, %v606_v57  ;;  %v582_v61 = vadd.f32 %v17399_v26, %v550_v58  ;;  %v13779_v57 = vpack.c.bf16 %v1440_v51, %v1439_v50  ;;  %v1441_v58 = vld [vmem:[#allocation10 + $0x50] sm:$0xff]  ;;  %v1442_v59 = vld [vmem:[#allocation10 + $0x58] sm:$0xff] }
 0x1fd   :  { %v472_v62 = vpop.f32.mrb[26].mxu0  ;;  %v863_v63 = vld [vmem:[#allocation2 + $0x56] sm:$0xff]  ;;  %v1762_v50 = vld [vmem:[#allocation10 + $0x78] sm:$0xff] }
 0x1fe   :  { %810 = vst.msk [vmem:[#allocation2 + $0x68] sm:$0xff] %vm265_vm0, %v756_v60  ;;  %v607_v2 = vmax.f32 %v582_v61, 0.0  ;;  %v551_v3 = vmul.f32 %v17395_v23, %v472_v62  ;;  %v12979_v4 = vpop.f32.mrb[27].mxu0  ;;  %13052 = vmatmul.mubr.msk.f32.gmra.mrb[40].mxu1 %vm265_vm0, %v863_v63  ;;  %v13782_v60 = vpack.c.bf16 %v1442_v59, %v1441_v58  ;;  %v825_v61 = vld [vmem:[#allocation2 + $0xd] sm:$0xff]  ;;  %v826_v62 = vld [vmem:[#allocation2 + $0x15] sm:$0xff]  ;;  %v827_v63 = vld [vmem:[#allocation2 + $0x1d] sm:$0xff] }
 0x1ff   :  { %13054 = vmatprep.mubr.msk.f32.mxu1 %vm16897_vm1, %v21426_v1  ;;  %v830_v4 = vld [vmem:[#allocation2 + $0x35] sm:$0xff]  ;;  %v17695_v58 = vld [vmem:[#allocation2 + $0x27] sm:$0xff] }
 0x200   :  { %v757_v5 = vmul.f32 %v17393_v22, %v607_v2  ;;  %v583_v8 = vadd.f32 %v17399_v26, %v551_v3  ;;  %v828_v2 = vld [vmem:[#allocation2 + $0x25] sm:$0xff]  ;;  %v829_v3 = vld [vmem:[#allocation2 + $0x2d] sm:$0xff] }
 0x201   :  { %v477_v9 = vpop.f32.mrb[28].mxu0  ;;  %v864_v27 = vld [vmem:[#allocation2 + $0x5e] sm:$0xff]  ;;  %v17701_v59 = vld [vmem:[#allocation2 + $0x2f] sm:$0xff] }
 0x202   :  { %811 = vst.msk [vmem:[#allocation2 + $0x70] sm:$0xff] %vm265_vm0, %v757_v5  ;;  %v608_v28 = vmax.f32 %v583_v8, 0.0  ;;  %v552_v29 = vmul.f32 %v17395_v23, %v477_v9  ;;  %v12982_v30 = vpop.f32.mrb[29].mxu0  ;;  %13055 = vmatmul.mubr.msk.f32.gmra.mrb[42].mxu1 %vm265_vm0, %v864_v27  ;;  %v831_v5 = vld [vmem:[#allocation2 + $0x3d] sm:$0xff]  ;;  %v832_v8 = vld [vmem:[#allocation2 + $0x45] sm:$0xff]  ;;  %v833_v9 = vld [vmem:[#allocation2 + $0x4d] sm:$0xff] }
 0x203   :  { %13057 = vmatprep.mubr.msk.f32.mxu1 %vm16897_vm1, %v21426_v1  ;;  %v834_v27 = vld [vmem:[#allocation2 + $0x55] sm:$0xff] }
 0x204   :  { %v758_v31 = vmul.f32 %v17397_v24, %v608_v28  ;;  %v584_v33 = vadd.f32 %v17399_v26, %v552_v29  ;;  %v835_v28 = vld [vmem:[#allocation2 + $0x5d] sm:$0xff] }
 0x205   :  { %v865_v34 = vld [vmem:[#allocation2 + $0x66] sm:$0xff] }
 0x206   :  { %812 = vst.msk [vmem:[#allocation2 + $0x78] sm:$0xff] %vm265_vm0, %v758_v31  ;;  %v609_v35 = vmax.f32 %v584_v33, 0.0  ;;  %13058 = vmatmul.mubr.msk.f32.gmra.mrb[44].mxu1 %vm265_vm0, %v865_v34  ;;  %v836_v29 = vld [vmem:[#allocation2 + $0x65] sm:$0xff] }
 0x207   :  { %13060 = vmatprep.mubr.msk.f32.mxu1 %vm16897_vm1, %v21426_v1 }
 0x208   :  { %v759_v23 = vmul.f32 %v17403_v32, %v609_v35  ;;  %v841_v35 = vld [vmem:[#allocation2 + $0x8d] sm:$0xff] }
 0x209   :  { %v866_v36 = vld [vmem:[#allocation2 + $0x6e] sm:$0xff] }
 0x20a   :  { %813 = vst.msk [vmem:[#allocation2 + $0x80] sm:$0xff] %vm265_vm0, %v759_v23  ;;  %13061 = vmatmul.mubr.msk.f32.gmra.mrb[46].mxu1 %vm265_vm0, %v866_v36  ;;  %v837_v30 = vld [vmem:[#allocation2 + $0x6d] sm:$0xff]  ;;  %v842_v23 = vld [vmem:[#allocation2 + $0x95] sm:$0xff]  ;;  %v843_v36 = vld [vmem:[#allocation2 + $0x9d] sm:$0xff] }
 0x20b   :  { %13063 = vmatprep.mubr.msk.f32.mxu1 %vm16897_vm1, %v21426_v1 }
 0x20d   :  { %v867_v26 = vld [vmem:[#allocation2 + $0x76] sm:$0xff] }
 0x20e   :  { %13064 = vmatmul.mubr.msk.f32.gmra.mrb[48].mxu1 %vm265_vm0, %v867_v26  ;;  %v838_v31 = vld [vmem:[#allocation2 + $0x75] sm:$0xff]  ;;  %v844_v26 = vld [vmem:[#allocation2 + $0xa5] sm:$0xff] }
 0x20f   :  { %13066 = vmatprep.mubr.msk.f32.mxu1 %vm16897_vm1, %v21426_v1 }
 0x211   :  { %v868_v37 = vld [vmem:[#allocation2 + $0x7e] sm:$0xff]  ;;  %v869_v41 = vld [vmem:[#allocation2 + $0x86] sm:$0xff] }
 0x212   :  { %13067 = vmatmul.mubr.msk.f32.gmra.mrb[50].mxu1 %vm265_vm0, %v868_v37  ;;  %v839_v33 = vld [vmem:[#allocation2 + $0x7d] sm:$0xff]  ;;  %v840_v34 = vld [vmem:[#allocation2 + $0x85] sm:$0xff]  ;;  %v845_v37 = vld [vmem:[#allocation2 + $0xad] sm:$0xff] }
 0x213   :  { %13069 = vmatprep.mubr.msk.f32.mxu1 %vm16897_vm1, %v21426_v1 }
 0x216   :  { %13070 = vmatmul.mubr.msk.f32.gmra.mrb[52].mxu1 %vm265_vm0, %v869_v41  ;;  %v846_v41 = vld [vmem:[#allocation2 + $0xb5] sm:$0xff] }
 0x217   :  { %13072 = vmatprep.mubr.msk.f32.mxu1 %vm16897_vm1, %v21426_v1 }
 0x21a   :  { %13073 = vmatmul.mubr.msk.f32.gmra.mrb[54].mxu1 %vm265_vm0, %v870_v42  ;;  %v847_v42 = vld [vmem:[#allocation2 + $0xbd] sm:$0xff] }
 0x21b   :  { %13075 = vmatprep.mubr.msk.f32.mxu1 %vm16897_vm1, %v21426_v1 }
 0x21e   :  { %13076 = vmatmul.mubr.msk.f32.gmra.mrb[56].mxu1 %vm265_vm0, %v871_v44  ;;  %v1759_v44 = vld [vmem:[#allocation10 + $0x60] sm:$0xff] }
 0x21f   :  { %13078 = vmatprep.mubr.msk.f32.mxu1 %vm16897_vm1, %v21426_v1 }
 0x222   :  { %13079 = vmatmul.mubr.msk.f32.gmra.mrb[58].mxu1 %vm265_vm0, %v872_v45  ;;  %v1760_v45 = vld [vmem:[#allocation10 + $0x68] sm:$0xff] }
 0x223   :  { %13081 = vmatprep.mubr.msk.f32.mxu1 %vm16897_vm1, %v21426_v1 }
 0x226   :  { %13082 = vmatmul.mubr.msk.f32.gmra.mrb[60].mxu1 %vm265_vm0, %v873_v46  ;;  %v848_v46 = vld [vmem:[#allocation2 + $0xc5] sm:$0xff] }
 0x227   :  { %13084 = vmatprep.mubr.msk.f32.mxu1 %vm16897_vm1, %v21426_v1 }
 0x22a   :  { %13085 = vmatmul.mubr.msk.f32.gmra.mrb[62].mxu1 %vm265_vm0, %v874_v47  ;;  %v1413_v47 = vld [vmem:[#allocation2 + $0x7] sm:$0xff] }
 0x22b   :  { %13087 = vmatprep.mubr.msk.f32.mxu1 %vm16897_vm1, %v21426_v1 }
 0x22e   :  { %13088 = vmatmul.mubr.msk.f32.gmra.mrb[64].mxu1 %vm265_vm0, %v875_v48  ;;  %v13785_v48 = vpack.c.bf16 %v1760_v45, %v1759_v44  ;;  %v2399_v45 = vld [vmem:[#allocation10 + $0xa0] sm:$0xff] }
 0x22f   :  { %13090 = vmatprep.mubr.msk.f32.mxu1 %vm16897_vm1, %v21426_v1 }
 0x232   :  { %13091 = vmatmul.mubr.msk.f32.gmra.mrb[66].mxu1 %vm265_vm0, %v876_v49  ;;  %v1761_v49 = vld [vmem:[#allocation10 + $0x70] sm:$0xff] }
 0x233   :  { %13093 = vmatprep.mubr.msk.f32.mxu1 %vm16897_vm1, %v21426_v1  ;;  %v13788_v51 = vpack.c.bf16 %v1762_v50, %v1761_v49  ;;  %v2401_v49 = vld [vmem:[#allocation10 + $0xb0] sm:$0xff]  ;;  %v2402_v50 = vld [vmem:[#allocation10 + $0xb8] sm:$0xff] }
 0x236   :  { %13094 = vmatmul.mubr.msk.f32.gmra.mrb[68].mxu1 %vm265_vm0, %v877_v52  ;;  %v17676_v52 = vld [vmem:[#allocation2 + $0xf] sm:$0xff] }
 0x237   :  { %13104 = vmatprep.mubr.msk.f32.mxu1 %vm16897_vm1, %v21426_v1 }
 0x23a   :  { %13105 = vmatmul.mubr.msk.f32.vlgmr.msra.gmra.mrb[20].mxu1 %vm265_vm0, %v824_v54  ;;  %v17683_v54 = vld [vmem:[#allocation2 + $0x17] sm:$0xff] }
 0x23b   :  { %13107 = vmatprep.mubr.msk.f32.mxu1 %vm16897_vm1, %v21426_v1  ;;  %13780 = vmatpush3.bf16.msra.mxu1 %v13779_v57  ;;  %v17689_v57 = vld [vmem:[#allocation2 + $0x1f] sm:$0xff] }
 0x23c   :  { %13781 = vmatprep.subr.bf16.mxu1 %v21429_v0 }
 0x23e   :  { %13108 = vmatmul.mubr.msk.f32.gmra.mrb[22].mxu1 %vm265_vm0, %v825_v61  ;;  %v17713_v61 = vld [vmem:[#allocation2 + $0x3f] sm:$0xff] }
 0x23f   :  { %13110 = vmatprep.mubr.msk.f32.mxu1 %vm16897_vm1, %v21426_v1  ;;  %13783 = vmatpush3.bf16.msra.mxu1 %v13782_v60  ;;  %v17707_v60 = vld [vmem:[#allocation2 + $0x37] sm:$0xff] }
 0x240   :  { %13784 = vmatprep.subr.bf16.mxu1 %v21429_v0 }
 0x242   :  { %13111 = vmatmul.mubr.msk.f32.gmra.mrb[24].mxu1 %vm265_vm0, %v826_v62  ;;  %v17719_v62 = vld [vmem:[#allocation2 + $0x47] sm:$0xff] }
 0x243   :  { %13113 = vmatprep.mubr.msk.f32.mxu1 %vm16897_vm1, %v21426_v1 }
 0x246   :  { %13114 = vmatmul.mubr.msk.f32.gmra.mrb[26].mxu1 %vm265_vm0, %v827_v63  ;;  %v17725_v63 = vld [vmem:[#allocation2 + $0x4f] sm:$0xff] }
 0x247   :  { %13116 = vmatprep.mubr.msk.f32.mxu1 %vm16897_vm1, %v21426_v1 }
 0x24a   :  { %13117 = vmatmul.mubr.msk.f32.gmra.mrb[28].mxu1 %vm265_vm0, %v828_v2  ;;  %v17731_v2 = vld [vmem:[#allocation2 + $0x57] sm:$0xff] }
 0x24b   :  { %13119 = vmatprep.mubr.msk.f32.mxu1 %vm16897_vm1, %v21426_v1 }
 0x24e   :  { %13120 = vmatmul.mubr.msk.f32.gmra.mrb[30].mxu1 %vm265_vm0, %v829_v3  ;;  %v17737_v3 = vld [vmem:[#allocation2 + $0x5f] sm:$0xff] }
 0x24f   :  { %13122 = vmatprep.mubr.msk.f32.mxu1 %vm16897_vm1, %v21426_v1 }
 0x252   :  { %13123 = vmatmul.mubr.msk.f32.gmra.mrb[32].mxu1 %vm265_vm0, %v830_v4  ;;  %v17743_v4 = vld [vmem:[#allocation2 + $0x67] sm:$0xff] }
 0x253   :  { %13125 = vmatprep.mubr.msk.f32.mxu1 %vm16897_vm1, %v21426_v1 }
 0x256   :  { %13126 = vmatmul.mubr.msk.f32.gmra.mrb[34].mxu1 %vm265_vm0, %v831_v5  ;;  %v17749_v5 = vld [vmem:[#allocation2 + $0x6f] sm:$0xff] }
 0x257   :  { %13128 = vmatprep.mubr.msk.f32.mxu1 %vm16897_vm1, %v21426_v1 }
 0x25a   :  { %13129 = vmatmul.mubr.msk.f32.gmra.mrb[36].mxu1 %vm265_vm0, %v832_v8  ;;  %v17755_v8 = vld [vmem:[#allocation2 + $0x77] sm:$0xff] }
 0x25b   :  { %13131 = vmatprep.mubr.msk.f32.mxu1 %vm16897_vm1, %v21426_v1 }
 0x25e   :  { %13132 = vmatmul.mubr.msk.f32.gmra.mrb[38].mxu1 %vm265_vm0, %v833_v9  ;;  %v17761_v9 = vld [vmem:[#allocation2 + $0x7f] sm:$0xff] }
 0x25f   :  { %13134 = vmatprep.mubr.msk.f32.mxu1 %vm16897_vm1, %v21426_v1 }
 0x262   :  { %13135 = vmatmul.mubr.msk.f32.gmra.mrb[40].mxu1 %vm265_vm0, %v834_v27  ;;  %v17767_v27 = vld [vmem:[#allocation2 + $0x87] sm:$0xff] }
 0x263   :  { %13137 = vmatprep.mubr.msk.f32.mxu1 %vm16897_vm1, %v21426_v1 }
 0x266   :  { %13138 = vmatmul.mubr.msk.f32.gmra.mrb[42].mxu1 %vm265_vm0, %v835_v28  ;;  %v17773_v28 = vld [vmem:[#allocation2 + $0x8f] sm:$0xff] }
 0x267   :  { %13140 = vmatprep.mubr.msk.f32.mxu1 %vm16897_vm1, %v21426_v1 }
 0x26a   :  { %13141 = vmatmul.mubr.msk.f32.gmra.mrb[44].mxu1 %vm265_vm0, %v836_v29  ;;  %v17779_v29 = vld [vmem:[#allocation2 + $0x97] sm:$0xff] }
 0x26b   :  { %13143 = vmatprep.mubr.msk.f32.mxu1 %vm16897_vm1, %v21426_v1 }
 0x26e   :  { %13144 = vmatmul.mubr.msk.f32.gmra.mrb[46].mxu1 %vm265_vm0, %v837_v30  ;;  %v17785_v30 = vld [vmem:[#allocation2 + $0x9f] sm:$0xff] }
 0x26f   :  { %13146 = vmatprep.mubr.msk.f32.mxu1 %vm16897_vm1, %v21426_v1 }
 0x272   :  { %13147 = vmatmul.mubr.msk.f32.gmra.mrb[48].mxu1 %vm265_vm0, %v838_v31  ;;  %v17791_v31 = vld [vmem:[#allocation2 + $0xa7] sm:$0xff] }
 0x273   :  { %13149 = vmatprep.mubr.msk.f32.mxu1 %vm16897_vm1, %v21426_v1 }
 0x276   :  { %13150 = vmatmul.mubr.msk.f32.gmra.mrb[50].mxu1 %vm265_vm0, %v839_v33  ;;  %v1434_v33 = vld [vmem:[#allocation2 + $0xaf] sm:$0xff] }
 0x277   :  { %13152 = vmatprep.mubr.msk.f32.mxu1 %vm16897_vm1, %v21426_v1 }
 0x27a   :  { %13153 = vmatmul.mubr.msk.f32.gmra.mrb[52].mxu1 %vm265_vm0, %v840_v34  ;;  %v1435_v34 = vld [vmem:[#allocation2 + $0xb7] sm:$0xff] }
 0x27b   :  { %13155 = vmatprep.mubr.msk.f32.mxu1 %vm16897_vm1, %v21426_v1 }
 0x27e   :  { %13156 = vmatmul.mubr.msk.f32.gmra.mrb[54].mxu1 %vm265_vm0, %v841_v35  ;;  %v1436_v35 = vld [vmem:[#allocation2 + $0xbf] sm:$0xff] }
 0x27f   :  { %13158 = vmatprep.mubr.msk.f32.mxu1 %vm16897_vm1, %v21426_v1 }
 0x282   :  { %13159 = vmatmul.mubr.msk.f32.gmra.mrb[56].mxu1 %vm265_vm0, %v842_v23  ;;  %v2079_v23 = vld [vmem:[#allocation10 + $0x80] sm:$0xff] }
 0x283   :  { %13161 = vmatprep.mubr.msk.f32.mxu1 %vm16897_vm1, %v21426_v1 }
 0x286   :  { %13162 = vmatmul.mubr.msk.f32.gmra.mrb[58].mxu1 %vm265_vm0, %v843_v36  ;;  %v2080_v36 = vld [vmem:[#allocation10 + $0x88] sm:$0xff] }
 0x287   :  { %13164 = vmatprep.mubr.msk.f32.mxu1 %vm16897_vm1, %v21426_v1 }
 0x28a   :  { %13165 = vmatmul.mubr.msk.f32.gmra.mrb[60].mxu1 %vm265_vm0, %v844_v26  ;;  %v1437_v26 = vld [vmem:[#allocation2 + $0xc7] sm:$0xff] }
 0x28b   :  { %13167 = vmatprep.mubr.msk.f32.mxu1 %vm16897_vm1, %v21426_v1 }
 0x28e   :  { %13168 = vmatmul.mubr.msk.f32.gmra.mrb[62].mxu1 %vm265_vm0, %v845_v37  ;;  %v13791_v37 = vpack.c.bf16 %v2080_v36, %v2079_v23  ;;  %v2076_v23 = vld [vmem:[#allocation2 + $0xc8] sm:$0xff]  ;;  %v2719_v36 = vld [vmem:[#allocation10 + $0xc0] sm:$0xff] }
 0x28f   :  { %13170 = vmatprep.mubr.msk.f32.mxu1 %vm16897_vm1, %v21426_v1 }
 0x292   :  { %13171 = vmatmul.mubr.msk.f32.gmra.mrb[64].mxu1 %vm265_vm0, %v846_v41  ;;  %v2081_v41 = vld [vmem:[#allocation10 + $0x90] sm:$0xff] }
 0x293   :  { %13173 = vmatprep.mubr.msk.f32.mxu1 %vm16897_vm1, %v21426_v1 }
 0x296   :  { %13174 = vmatmul.mubr.msk.f32.gmra.mrb[66].mxu1 %vm265_vm0, %v847_v42  ;;  %v2082_v42 = vld [vmem:[#allocation10 + $0x98] sm:$0xff] }
 0x297   :  { %13176 = vmatprep.mubr.msk.f32.mxu1 %vm16897_vm1, %v21426_v1  ;;  %v13794_v44 = vpack.c.bf16 %v2082_v42, %v2081_v41  ;;  %v2721_v42 = vld [vmem:[#allocation10 + $0xd0] sm:$0xff] }
 0x29a   :  { %13177 = vmatmul.mubr.msk.f32.gmra.mrb[68].mxu1 %vm265_vm0, %v848_v46  ;;  %v2400_v46 = vld [vmem:[#allocation10 + $0xa8] sm:$0xff] }
 0x29b   :  { %13187 = vmatprep.mubr.msk.f32.mxu1 %vm16897_vm1, %v21426_v1 }
 0x29e   :  { %13188 = vmatmul.mubr.msk.f32.vlgmr.msra.gmra.mrb[20].mxu1 %vm265_vm0, %v1413_v47  ;;  %v1757_v47 = vld [vmem:[#allocation2 + $0xcf] sm:$0xff] }
 0x29f   :  { %13190 = vmatprep.mubr.msk.f32.mxu1 %vm16897_vm1, %v21426_v1  ;;  %13786 = vmatpush3.bf16.msra.mxu1 %v13785_v48  ;;  %v13797_v48 = vpack.c.bf16 %v2400_v46, %v2399_v45  ;;  %v2373_v45 = vld [vmem:[#allocation2 + $0x11] sm:$0xff] }
 0x2a0   :  { %13787 = vmatprep.subr.bf16.mxu1 %v21429_v0 }
 0x2a2   :  { %13191 = vmatmul.mubr.msk.f32.gmra.mrb[22].mxu1 %vm265_vm0, %v17676_v52 }
 0x2a3   :  { %13193 = vmatprep.mubr.msk.f32.mxu1 %vm16897_vm1, %v21426_v1  ;;  %13789 = vmatpush3.bf16.msra.mxu1 %v13788_v51  ;;  %v2053_v51 = vld [vmem:[#allocation2 + $0x10] sm:$0xff] }
 0x2a4   :  { %13790 = vmatprep.subr.bf16.mxu1 %v21429_v0 }
 0x2a6   :  { %13194 = vmatmul.mubr.msk.f32.gmra.mrb[24].mxu1 %vm265_vm0, %v17683_v54 }
 0x2a7   :  { %13196 = vmatprep.mubr.msk.f32.mxu1 %vm16897_vm1, %v21426_v1 }
 0x2aa   :  { %13197 = vmatmul.mubr.msk.f32.gmra.mrb[26].mxu1 %vm265_vm0, %v17689_v57 }
 0x2ab   :  { %13199 = vmatprep.mubr.msk.f32.mxu1 %vm16897_vm1, %v21426_v1 }
 0x2ae   :  { %13200 = vmatmul.mubr.msk.f32.gmra.mrb[28].mxu1 %vm265_vm0, %v17695_v58 }
 0x2af   :  { %13202 = vmatprep.mubr.msk.f32.mxu1 %vm16897_vm1, %v21426_v1 }
 0x2b2   :  { %13203 = vmatmul.mubr.msk.f32.gmra.mrb[30].mxu1 %vm265_vm0, %v17701_v59 }
 0x2b3   :  { %13205 = vmatprep.mubr.msk.f32.mxu1 %vm16897_vm1, %v21426_v1 }
 0x2b6   :  { %13206 = vmatmul.mubr.msk.f32.gmra.mrb[32].mxu1 %vm265_vm0, %v17707_v60 }
 0x2b7   :  { %13208 = vmatprep.mubr.msk.f32.mxu1 %vm16897_vm1, %v21426_v1 }
 0x2ba   :  { %13209 = vmatmul.mubr.msk.f32.gmra.mrb[34].mxu1 %vm265_vm0, %v17713_v61 }
 0x2bb   :  { %13211 = vmatprep.mubr.msk.f32.mxu1 %vm16897_vm1, %v21426_v1 }
 0x2be   :  { %13212 = vmatmul.mubr.msk.f32.gmra.mrb[36].mxu1 %vm265_vm0, %v17719_v62 }
 0x2bf   :  { %13214 = vmatprep.mubr.msk.f32.mxu1 %vm16897_vm1, %v21426_v1 }
 0x2c2   :  { %13215 = vmatmul.mubr.msk.f32.gmra.mrb[38].mxu1 %vm265_vm0, %v17725_v63 }
 0x2c3   :  { %13217 = vmatprep.mubr.msk.f32.mxu1 %vm16897_vm1, %v21426_v1 }
 0x2c6   :  { %13218 = vmatmul.mubr.msk.f32.gmra.mrb[40].mxu1 %vm265_vm0, %v17731_v2 }
 0x2c7   :  { %13220 = vmatprep.mubr.msk.f32.mxu1 %vm16897_vm1, %v21426_v1 }
 0x2ca   :  { %13221 = vmatmul.mubr.msk.f32.gmra.mrb[42].mxu1 %vm265_vm0, %v17737_v3 }
 0x2cb   :  { %13223 = vmatprep.mubr.msk.f32.mxu1 %vm16897_vm1, %v21426_v1 }
 0x2ce   :  { %13224 = vmatmul.mubr.msk.f32.gmra.mrb[44].mxu1 %vm265_vm0, %v17743_v4 }
 0x2cf   :  { %13226 = vmatprep.mubr.msk.f32.mxu1 %vm16897_vm1, %v21426_v1 }
 0x2d2   :  { %13227 = vmatmul.mubr.msk.f32.gmra.mrb[46].mxu1 %vm265_vm0, %v17749_v5 }
 0x2d3   :  { %13229 = vmatprep.mubr.msk.f32.mxu1 %vm16897_vm1, %v21426_v1 }
 0x2d6   :  { %13230 = vmatmul.mubr.msk.f32.gmra.mrb[48].mxu1 %vm265_vm0, %v17755_v8 }
 0x2d7   :  { %13232 = vmatprep.mubr.msk.f32.mxu1 %vm16897_vm1, %v21426_v1 }
 0x2da   :  { %13233 = vmatmul.mubr.msk.f32.gmra.mrb[50].mxu1 %vm265_vm0, %v17761_v9 }
 0x2db   :  { %13235 = vmatprep.mubr.msk.f32.mxu1 %vm16897_vm1, %v21426_v1 }
 0x2de   :  { %13236 = vmatmul.mubr.msk.f32.gmra.mrb[52].mxu1 %vm265_vm0, %v17767_v27 }
 0x2df   :  { %13238 = vmatprep.mubr.msk.f32.mxu1 %vm16897_vm1, %v21426_v1 }
 0x2e2   :  { %13239 = vmatmul.mubr.msk.f32.gmra.mrb[54].mxu1 %vm265_vm0, %v17773_v28 }
 0x2e3   :  { %13241 = vmatprep.mubr.msk.f32.mxu1 %vm16897_vm1, %v21426_v1 }
 0x2e6   :  { %13242 = vmatmul.mubr.msk.f32.gmra.mrb[56].mxu1 %vm265_vm0, %v17779_v29 }
 0x2e7   :  { %13244 = vmatprep.mubr.msk.f32.mxu1 %vm16897_vm1, %v21426_v1 }
 0x2ea   :  { %13245 = vmatmul.mubr.msk.f32.gmra.mrb[58].mxu1 %vm265_vm0, %v17785_v30 }
 0x2eb   :  { %13247 = vmatprep.mubr.msk.f32.mxu1 %vm16897_vm1, %v21426_v1 }
 0x2ee   :  { %13248 = vmatmul.mubr.msk.f32.gmra.mrb[60].mxu1 %vm265_vm0, %v17791_v31 }
 0x2ef   :  { %13250 = vmatprep.mubr.msk.f32.mxu1 %vm16897_vm1, %v21426_v1 }
 0x2f2   :  { %13251 = vmatmul.mubr.msk.f32.gmra.mrb[62].mxu1 %vm265_vm0, %v1434_v33 }
 0x2f3   :  { %13253 = vmatprep.mubr.msk.f32.mxu1 %vm16897_vm1, %v21426_v1 }
 0x2f6   :  { %13254 = vmatmul.mubr.msk.f32.gmra.mrb[64].mxu1 %vm265_vm0, %v1435_v34 }
 0x2f7   :  { %13256 = vmatprep.mubr.msk.f32.mxu1 %vm16897_vm1, %v21426_v1 }
 0x2fa   :  { %13257 = vmatmul.mubr.msk.f32.gmra.mrb[66].mxu1 %vm265_vm0, %v1436_v35 }
 0x2fb   :  { %13259 = vmatprep.mubr.msk.f32.mxu1 %vm16897_vm1, %v21426_v1 }
 0x2fe   :  { %13260 = vmatmul.mubr.msk.f32.gmra.mrb[68].mxu1 %vm265_vm0, %v1437_v26 }
 0x2ff   :  { %13270 = vmatprep.mubr.msk.f32.mxu1 %vm16897_vm1, %v21426_v1 }
 0x302   :  { %13271 = vmatmul.mubr.msk.f32.vlgmr.msra.gmra.mrb[20].mxu1 %vm265_vm0, %v17676_v52  ;;  %v13800_v52 = vpack.c.bf16 %v2402_v50, %v2401_v49  ;;  %v18000_v49 = vld [vmem:[#allocation2 + $0x29] sm:$0xff]  ;;  %v18006_v50 = vld [vmem:[#allocation2 + $0x31] sm:$0xff] }
 0x303   :  { %13273 = vmatprep.mubr.msk.f32.mxu1 %vm16897_vm1, %v21426_v1  ;;  %13792 = vmatpush3.bf16.msra.mxu1 %v13791_v37  ;;  %v2077_v37 = vld [vmem:[#allocation2 + $0xd0] sm:$0xff] }
 0x304   :  { %13793 = vmatprep.subr.bf16.mxu1 %v21429_v0 }
 0x306   :  { %13274 = vmatmul.mubr.msk.f32.gmra.mrb[22].mxu1 %vm265_vm0, %v17683_v54  ;;  %v2054_v54 = vld [vmem:[#allocation2 + $0x18] sm:$0xff] }
 0x307   :  { %13276 = vmatprep.mubr.msk.f32.mxu1 %vm16897_vm1, %v21426_v1  ;;  %13795 = vmatpush3.bf16.msra.mxu1 %v13794_v44  ;;  %v2722_v44 = vld [vmem:[#allocation10 + $0xd8] sm:$0xff] }
 0x308   :  { %13796 = vmatprep.subr.bf16.mxu1 %v21429_v0  ;;  %v13806_v46 = vpack.c.bf16 %v2722_v44, %v2721_v42  ;;  %v3361_v44 = vld [vmem:[#allocation10 + $0x110] sm:$0xff] }
 0x30a   :  { %13277 = vmatmul.mubr.msk.f32.gmra.mrb[24].mxu1 %vm265_vm0, %v17689_v57  ;;  %v2055_v57 = vld [vmem:[#allocation2 + $0x20] sm:$0xff] }
 0x30b   :  { %13279 = vmatprep.mubr.msk.f32.mxu1 %vm16897_vm1, %v21426_v1 }
 0x30e   :  { %13280 = vmatmul.mubr.msk.f32.gmra.mrb[26].mxu1 %vm265_vm0, %v17695_v58  ;;  %v2056_v58 = vld [vmem:[#allocation2 + $0x28] sm:$0xff] }
 0x30f   :  { %13282 = vmatprep.mubr.msk.f32.mxu1 %vm16897_vm1, %v21426_v1 }
 0x312   :  { %13283 = vmatmul.mubr.msk.f32.gmra.mrb[28].mxu1 %vm265_vm0, %v17701_v59  ;;  %v2057_v59 = vld [vmem:[#allocation2 + $0x30] sm:$0xff] }
 0x313   :  { %13285 = vmatprep.mubr.msk.f32.mxu1 %vm16897_vm1, %v21426_v1 }
 0x316   :  { %13286 = vmatmul.mubr.msk.f32.gmra.mrb[30].mxu1 %vm265_vm0, %v17707_v60  ;;  %v2058_v60 = vld [vmem:[#allocation2 + $0x38] sm:$0xff] }
 0x317   :  { %13288 = vmatprep.mubr.msk.f32.mxu1 %vm16897_vm1, %v21426_v1 }
 0x31a   :  { %13289 = vmatmul.mubr.msk.f32.gmra.mrb[32].mxu1 %vm265_vm0, %v17713_v61  ;;  %v2059_v61 = vld [vmem:[#allocation2 + $0x40] sm:$0xff] }
 0x31b   :  { %13291 = vmatprep.mubr.msk.f32.mxu1 %vm16897_vm1, %v21426_v1 }
 0x31e   :  { %13292 = vmatmul.mubr.msk.f32.gmra.mrb[34].mxu1 %vm265_vm0, %v17719_v62  ;;  %v2060_v62 = vld [vmem:[#allocation2 + $0x48] sm:$0xff] }
 0x31f   :  { %13294 = vmatprep.mubr.msk.f32.mxu1 %vm16897_vm1, %v21426_v1 }
 0x322   :  { %13295 = vmatmul.mubr.msk.f32.gmra.mrb[36].mxu1 %vm265_vm0, %v17725_v63  ;;  %v2061_v63 = vld [vmem:[#allocation2 + $0x50] sm:$0xff] }
 0x323   :  { %13297 = vmatprep.mubr.msk.f32.mxu1 %vm16897_vm1, %v21426_v1 }
 0x326   :  { %13298 = vmatmul.mubr.msk.f32.gmra.mrb[38].mxu1 %vm265_vm0, %v17731_v2  ;;  %v2062_v2 = vld [vmem:[#allocation2 + $0x58] sm:$0xff] }
 0x327   :  { %13300 = vmatprep.mubr.msk.f32.mxu1 %vm16897_vm1, %v21426_v1 }
 0x32a   :  { %13301 = vmatmul.mubr.msk.f32.gmra.mrb[40].mxu1 %vm265_vm0, %v17737_v3  ;;  %v2063_v3 = vld [vmem:[#allocation2 + $0x60] sm:$0xff] }
 0x32b   :  { %13303 = vmatprep.mubr.msk.f32.mxu1 %vm16897_vm1, %v21426_v1 }
 0x32e   :  { %13304 = vmatmul.mubr.msk.f32.gmra.mrb[42].mxu1 %vm265_vm0, %v17743_v4  ;;  %v2064_v4 = vld [vmem:[#allocation2 + $0x68] sm:$0xff] }
 0x32f   :  { %13306 = vmatprep.mubr.msk.f32.mxu1 %vm16897_vm1, %v21426_v1 }
 0x332   :  { %13307 = vmatmul.mubr.msk.f32.gmra.mrb[44].mxu1 %vm265_vm0, %v17749_v5  ;;  %v2065_v5 = vld [vmem:[#allocation2 + $0x70] sm:$0xff] }
 0x333   :  { %13309 = vmatprep.mubr.msk.f32.mxu1 %vm16897_vm1, %v21426_v1 }
 0x336   :  { %13310 = vmatmul.mubr.msk.f32.gmra.mrb[46].mxu1 %vm265_vm0, %v17755_v8  ;;  %v2066_v8 = vld [vmem:[#allocation2 + $0x78] sm:$0xff] }
 0x337   :  { %13312 = vmatprep.mubr.msk.f32.mxu1 %vm16897_vm1, %v21426_v1 }
 0x33a   :  { %13313 = vmatmul.mubr.msk.f32.gmra.mrb[48].mxu1 %vm265_vm0, %v17761_v9  ;;  %v2067_v9 = vld [vmem:[#allocation2 + $0x80] sm:$0xff] }
 0x33b   :  { %13315 = vmatprep.mubr.msk.f32.mxu1 %vm16897_vm1, %v21426_v1 }
 0x33e   :  { %13316 = vmatmul.mubr.msk.f32.gmra.mrb[50].mxu1 %vm265_vm0, %v17767_v27  ;;  %v2068_v27 = vld [vmem:[#allocation2 + $0x88] sm:$0xff] }
 0x33f   :  { %13318 = vmatprep.mubr.msk.f32.mxu1 %vm16897_vm1, %v21426_v1 }
 0x342   :  { %13319 = vmatmul.mubr.msk.f32.gmra.mrb[52].mxu1 %vm265_vm0, %v17773_v28  ;;  %v2069_v28 = vld [vmem:[#allocation2 + $0x90] sm:$0xff] }
 0x343   :  { %13321 = vmatprep.mubr.msk.f32.mxu1 %vm16897_vm1, %v21426_v1 }
 0x346   :  { %13322 = vmatmul.mubr.msk.f32.gmra.mrb[54].mxu1 %vm265_vm0, %v17779_v29  ;;  %v2070_v29 = vld [vmem:[#allocation2 + $0x98] sm:$0xff] }
 0x347   :  { %13324 = vmatprep.mubr.msk.f32.mxu1 %vm16897_vm1, %v21426_v1 }
 0x34a   :  { %13325 = vmatmul.mubr.msk.f32.gmra.mrb[56].mxu1 %vm265_vm0, %v17785_v30  ;;  %v2071_v30 = vld [vmem:[#allocation2 + $0xa0] sm:$0xff] }
 0x34b   :  { %13327 = vmatprep.mubr.msk.f32.mxu1 %vm16897_vm1, %v21426_v1 }
 0x34e   :  { %13328 = vmatmul.mubr.msk.f32.gmra.mrb[58].mxu1 %vm265_vm0, %v17791_v31  ;;  %v2072_v31 = vld [vmem:[#allocation2 + $0xa8] sm:$0xff] }
 0x34f   :  { %13330 = vmatprep.mubr.msk.f32.mxu1 %vm16897_vm1, %v21426_v1 }
 0x352   :  { %13331 = vmatmul.mubr.msk.f32.gmra.mrb[60].mxu1 %vm265_vm0, %v1434_v33  ;;  %v2073_v33 = vld [vmem:[#allocation2 + $0xb0] sm:$0xff] }
 0x353   :  { %13333 = vmatprep.mubr.msk.f32.mxu1 %vm16897_vm1, %v21426_v1 }
 0x356   :  { %13334 = vmatmul.mubr.msk.f32.gmra.mrb[62].mxu1 %vm265_vm0, %v1435_v34  ;;  %v2074_v34 = vld [vmem:[#allocation2 + $0xb8] sm:$0xff] }
 0x357   :  { %13336 = vmatprep.mubr.msk.f32.mxu1 %vm16897_vm1, %v21426_v1 }
 0x35a   :  { %13337 = vmatmul.mubr.msk.f32.gmra.mrb[64].mxu1 %vm265_vm0, %v1436_v35  ;;  %v2075_v35 = vld [vmem:[#allocation2 + $0xc0] sm:$0xff] }
 0x35b   :  { %13339 = vmatprep.mubr.msk.f32.mxu1 %vm16897_vm1, %v21426_v1 }
 0x35e   :  { %13340 = vmatmul.mubr.msk.f32.gmra.mrb[66].mxu1 %vm265_vm0, %v1437_v26  ;;  %v2720_v26 = vld [vmem:[#allocation10 + $0xc8] sm:$0xff] }
 0x35f   :  { %13342 = vmatprep.mubr.msk.f32.mxu1 %vm16897_vm1, %v21426_v1  ;;  %v13803_v41 = vpack.c.bf16 %v2720_v26, %v2719_v36  ;;  %v2717_v26 = vld [vmem:[#allocation2 + $0xd9] sm:$0xff] }
 0x362   :  { %13343 = vmatmul.mubr.msk.f32.gmra.mrb[68].mxu1 %vm265_vm0, %v1757_v47  ;;  %v17987_v47 = vld [vmem:[#allocation2 + $0x19] sm:$0xff] }
 0x363   :  { %13353 = vmatprep.mubr.msk.f32.mxu1 %vm16897_vm1, %v21426_v1 }
 0x366   :  { %13354 = vmatmul.mubr.msk.f32.vlgmr.msra.gmra.mrb[20].mxu1 %vm265_vm0, %v2053_v51  ;;  %v18012_v51 = vld [vmem:[#allocation2 + $0x39] sm:$0xff] }
 0x367   :  { %13356 = vmatprep.mubr.msk.f32.mxu1 %vm16897_vm1, %v21426_v1  ;;  %13798 = vmatpush3.bf16.msra.mxu1 %v13797_v48  ;;  %v17994_v48 = vld [vmem:[#allocation2 + $0x21] sm:$0xff] }
 0x368   :  { %13799 = vmatprep.subr.bf16.mxu1 %v21429_v0 }
 0x36a   :  { %13357 = vmatmul.mubr.msk.f32.gmra.mrb[22].mxu1 %vm265_vm0, %v2054_v54  ;;  %v18024_v54 = vld [vmem:[#allocation2 + $0x49] sm:$0xff] }
 0x36b   :  { %13359 = vmatprep.mubr.msk.f32.mxu1 %vm16897_vm1, %v21426_v1  ;;  %13801 = vmatpush3.bf16.msra.mxu1 %v13800_v52  ;;  %v18018_v52 = vld [vmem:[#allocation2 + $0x41] sm:$0xff] }
 0x36c   :  { %13802 = vmatprep.subr.bf16.mxu1 %v21429_v0 }
 0x36e   :  { %13360 = vmatmul.mubr.msk.f32.gmra.mrb[24].mxu1 %vm265_vm0, %v2055_v57  ;;  %v18030_v57 = vld [vmem:[#allocation2 + $0x51] sm:$0xff] }
 0x36f   :  { %13362 = vmatprep.mubr.msk.f32.mxu1 %vm16897_vm1, %v21426_v1 }
 0x372   :  { %13363 = vmatmul.mubr.msk.f32.gmra.mrb[26].mxu1 %vm265_vm0, %v2056_v58  ;;  %v18036_v58 = vld [vmem:[#allocation2 + $0x59] sm:$0xff] }
 0x373   :  { %13365 = vmatprep.mubr.msk.f32.mxu1 %vm16897_vm1, %v21426_v1 }
 0x376   :  { %13366 = vmatmul.mubr.msk.f32.gmra.mrb[28].mxu1 %vm265_vm0, %v2057_v59  ;;  %v18042_v59 = vld [vmem:[#allocation2 + $0x61] sm:$0xff] }
 0x377   :  { %13368 = vmatprep.mubr.msk.f32.mxu1 %vm16897_vm1, %v21426_v1 }
 0x37a   :  { %13369 = vmatmul.mubr.msk.f32.gmra.mrb[30].mxu1 %vm265_vm0, %v2058_v60  ;;  %v18048_v60 = vld [vmem:[#allocation2 + $0x69] sm:$0xff] }
 0x37b   :  { %13371 = vmatprep.mubr.msk.f32.mxu1 %vm16897_vm1, %v21426_v1 }
 0x37e   :  { %13372 = vmatmul.mubr.msk.f32.gmra.mrb[32].mxu1 %vm265_vm0, %v2059_v61  ;;  %v18054_v61 = vld [vmem:[#allocation2 + $0x71] sm:$0xff] }
 0x37f   :  { %13374 = vmatprep.mubr.msk.f32.mxu1 %vm16897_vm1, %v21426_v1 }
 0x382   :  { %13375 = vmatmul.mubr.msk.f32.gmra.mrb[34].mxu1 %vm265_vm0, %v2060_v62  ;;  %v18060_v62 = vld [vmem:[#allocation2 + $0x79] sm:$0xff] }
 0x383   :  { %13377 = vmatprep.mubr.msk.f32.mxu1 %vm16897_vm1, %v21426_v1 }
 0x386   :  { %13378 = vmatmul.mubr.msk.f32.gmra.mrb[36].mxu1 %vm265_vm0, %v2061_v63  ;;  %v18066_v63 = vld [vmem:[#allocation2 + $0x81] sm:$0xff] }
 0x387   :  { %13380 = vmatprep.mubr.msk.f32.mxu1 %vm16897_vm1, %v21426_v1 }
 0x38a   :  { %13381 = vmatmul.mubr.msk.f32.gmra.mrb[38].mxu1 %vm265_vm0, %v2062_v2  ;;  %v18072_v2 = vld [vmem:[#allocation2 + $0x89] sm:$0xff] }
 0x38b   :  { %13383 = vmatprep.mubr.msk.f32.mxu1 %vm16897_vm1, %v21426_v1 }
 0x38e   :  { %13384 = vmatmul.mubr.msk.f32.gmra.mrb[40].mxu1 %vm265_vm0, %v2063_v3  ;;  %v18078_v3 = vld [vmem:[#allocation2 + $0x91] sm:$0xff] }
 0x38f   :  { %13386 = vmatprep.mubr.msk.f32.mxu1 %vm16897_vm1, %v21426_v1 }
 0x392   :  { %13387 = vmatmul.mubr.msk.f32.gmra.mrb[42].mxu1 %vm265_vm0, %v2064_v4  ;;  %v18084_v4 = vld [vmem:[#allocation2 + $0x99] sm:$0xff] }
 0x393   :  { %13389 = vmatprep.mubr.msk.f32.mxu1 %vm16897_vm1, %v21426_v1 }
 0x396   :  { %13390 = vmatmul.mubr.msk.f32.gmra.mrb[44].mxu1 %vm265_vm0, %v2065_v5  ;;  %v18090_v5 = vld [vmem:[#allocation2 + $0xa1] sm:$0xff] }
 0x397   :  { %13392 = vmatprep.mubr.msk.f32.mxu1 %vm16897_vm1, %v21426_v1 }
 0x39a   :  { %13393 = vmatmul.mubr.msk.f32.gmra.mrb[46].mxu1 %vm265_vm0, %v2066_v8  ;;  %v18096_v8 = vld [vmem:[#allocation2 + $0xa9] sm:$0xff] }
 0x39b   :  { %13395 = vmatprep.mubr.msk.f32.mxu1 %vm16897_vm1, %v21426_v1 }
 0x39e   :  { %13396 = vmatmul.mubr.msk.f32.gmra.mrb[48].mxu1 %vm265_vm0, %v2067_v9  ;;  %v18102_v9 = vld [vmem:[#allocation2 + $0xb1] sm:$0xff] }
 0x39f   :  { %13398 = vmatprep.mubr.msk.f32.mxu1 %vm16897_vm1, %v21426_v1 }
 0x3a2   :  { %13399 = vmatmul.mubr.msk.f32.gmra.mrb[50].mxu1 %vm265_vm0, %v2068_v27  ;;  %v2394_v27 = vld [vmem:[#allocation2 + $0xb9] sm:$0xff] }
 0x3a3   :  { %13401 = vmatprep.mubr.msk.f32.mxu1 %vm16897_vm1, %v21426_v1 }
 0x3a6   :  { %13402 = vmatmul.mubr.msk.f32.gmra.mrb[52].mxu1 %vm265_vm0, %v2069_v28  ;;  %v2395_v28 = vld [vmem:[#allocation2 + $0xc1] sm:$0xff] }
 0x3a7   :  { %13404 = vmatprep.mubr.msk.f32.mxu1 %vm16897_vm1, %v21426_v1 }
 0x3aa   :  { %13405 = vmatmul.mubr.msk.f32.gmra.mrb[54].mxu1 %vm265_vm0, %v2070_v29  ;;  %v2396_v29 = vld [vmem:[#allocation2 + $0xc9] sm:$0xff] }
 0x3ab   :  { %13407 = vmatprep.mubr.msk.f32.mxu1 %vm16897_vm1, %v21426_v1 }
 0x3ae   :  { %13408 = vmatmul.mubr.msk.f32.gmra.mrb[56].mxu1 %vm265_vm0, %v2071_v30  ;;  %v3039_v30 = vld [vmem:[#allocation10 + $0xe0] sm:$0xff] }
 0x3af   :  { %13410 = vmatprep.mubr.msk.f32.mxu1 %vm16897_vm1, %v21426_v1 }
 0x3b2   :  { %13411 = vmatmul.mubr.msk.f32.gmra.mrb[58].mxu1 %vm265_vm0, %v2072_v31  ;;  %v3040_v31 = vld [vmem:[#allocation10 + $0xe8] sm:$0xff] }
 0x3b3   :  { %13413 = vmatprep.mubr.msk.f32.mxu1 %vm16897_vm1, %v21426_v1 }
 0x3b6   :  { %13414 = vmatmul.mubr.msk.f32.gmra.mrb[60].mxu1 %vm265_vm0, %v2073_v33  ;;  %v2397_v33 = vld [vmem:[#allocation2 + $0xd1] sm:$0xff] }
 0x3b7   :  { %13416 = vmatprep.mubr.msk.f32.mxu1 %vm16897_vm1, %v21426_v1 }
 0x3ba   :  { %13417 = vmatmul.mubr.msk.f32.gmra.mrb[62].mxu1 %vm265_vm0, %v2074_v34  ;;  %v13809_v34 = vpack.c.bf16 %v3040_v31, %v3039_v30  ;;  %v3036_v30 = vld [vmem:[#allocation2 + $0xd2] sm:$0xff]  ;;  %v3037_v31 = vld [vmem:[#allocation2 + $0xda] sm:$0xff] }
 0x3bb   :  { %13419 = vmatprep.mubr.msk.f32.mxu1 %vm16897_vm1, %v21426_v1 }
 0x3be   :  { %13420 = vmatmul.mubr.msk.f32.gmra.mrb[64].mxu1 %vm265_vm0, %v2075_v35  ;;  %v3041_v35 = vld [vmem:[#allocation10 + $0xf0] sm:$0xff] }
 0x3bf   :  { %13422 = vmatprep.mubr.msk.f32.mxu1 %vm16897_vm1, %v21426_v1 }
 0x3c2   :  { %13423 = vmatmul.mubr.msk.f32.gmra.mrb[66].mxu1 %vm265_vm0, %v2076_v23  ;;  %v3042_v23 = vld [vmem:[#allocation10 + $0xf8] sm:$0xff] }
 0x3c3   :  { %13425 = vmatprep.mubr.msk.f32.mxu1 %vm16897_vm1, %v21426_v1  ;;  %v13812_v36 = vpack.c.bf16 %v3042_v23, %v3041_v35  ;;  %v3335_v35 = vld [vmem:[#allocation2 + $0x2b] sm:$0xff]  ;;  %v3336_v23 = vld [vmem:[#allocation2 + $0x33] sm:$0xff] }
 0x3c6   :  { %13426 = vmatmul.mubr.msk.f32.gmra.mrb[68].mxu1 %vm265_vm0, %v2077_v37  ;;  %v3359_v37 = vld [vmem:[#allocation10 + $0x100] sm:$0xff] }
 0x3c7   :  { %13436 = vmatprep.mubr.msk.f32.mxu1 %vm16897_vm1, %v21426_v1 }
 0x3ca   :  { %13437 = vmatmul.mubr.msk.f32.vlgmr.msra.gmra.mrb[20].mxu1 %vm265_vm0, %v2373_v45  ;;  %v3362_v45 = vld [vmem:[#allocation10 + $0x118] sm:$0xff] }
 0x3cb   :  { %13439 = vmatprep.mubr.msk.f32.mxu1 %vm16897_vm1, %v21426_v1  ;;  %13804 = vmatpush3.bf16.msra.mxu1 %v13803_v41  ;;  %v3360_v41 = vld [vmem:[#allocation10 + $0x108] sm:$0xff] }
 0x3cc   :  { %13805 = vmatprep.subr.bf16.mxu1 %v21429_v0  ;;  %v13815_v42 = vpack.c.bf16 %v3360_v41, %v3359_v37  ;;  %v3339_v37 = vld [vmem:[#allocation2 + $0x4b] sm:$0xff]  ;;  %v3340_v41 = vld [vmem:[#allocation2 + $0x53] sm:$0xff] }
 0x3ce   :  { %13440 = vmatmul.mubr.msk.f32.gmra.mrb[22].mxu1 %vm265_vm0, %v17987_v47 }
 0x3cf   :  { %13442 = vmatprep.mubr.msk.f32.mxu1 %vm16897_vm1, %v21426_v1  ;;  %13807 = vmatpush3.bf16.msra.mxu1 %v13806_v46  ;;  %v3013_v46 = vld [vmem:[#allocation2 + $0x1a] sm:$0xff] }
 0x3d0   :  { %13808 = vmatprep.subr.bf16.mxu1 %v21429_v0 }
 0x3d2   :  { %13443 = vmatmul.mubr.msk.f32.gmra.mrb[24].mxu1 %vm265_vm0, %v17994_v48 }
 0x3d3   :  { %13445 = vmatprep.mubr.msk.f32.mxu1 %vm16897_vm1, %v21426_v1 }
 0x3d6   :  { %13446 = vmatmul.mubr.msk.f32.gmra.mrb[26].mxu1 %vm265_vm0, %v18000_v49 }
 0x3d7   :  { %13448 = vmatprep.mubr.msk.f32.mxu1 %vm16897_vm1, %v21426_v1 }
 0x3da   :  { %13449 = vmatmul.mubr.msk.f32.gmra.mrb[28].mxu1 %vm265_vm0, %v18006_v50 }
 0x3db   :  { %13451 = vmatprep.mubr.msk.f32.mxu1 %vm16897_vm1, %v21426_v1 }
 0x3de   :  { %13452 = vmatmul.mubr.msk.f32.gmra.mrb[30].mxu1 %vm265_vm0, %v18012_v51 }
 0x3df   :  { %13454 = vmatprep.mubr.msk.f32.mxu1 %vm16897_vm1, %v21426_v1 }
 0x3e2   :  { %13455 = vmatmul.mubr.msk.f32.gmra.mrb[32].mxu1 %vm265_vm0, %v18018_v52 }
 0x3e3   :  { %13457 = vmatprep.mubr.msk.f32.mxu1 %vm16897_vm1, %v21426_v1 }
 0x3e6   :  { %13458 = vmatmul.mubr.msk.f32.gmra.mrb[34].mxu1 %vm265_vm0, %v18024_v54 }
 0x3e7   :  { %13460 = vmatprep.mubr.msk.f32.mxu1 %vm16897_vm1, %v21426_v1 }
 0x3ea   :  { %13461 = vmatmul.mubr.msk.f32.gmra.mrb[36].mxu1 %vm265_vm0, %v18030_v57 }
 0x3eb   :  { %13463 = vmatprep.mubr.msk.f32.mxu1 %vm16897_vm1, %v21426_v1 }
 0x3ee   :  { %13464 = vmatmul.mubr.msk.f32.gmra.mrb[38].mxu1 %vm265_vm0, %v18036_v58 }
 0x3ef   :  { %13466 = vmatprep.mubr.msk.f32.mxu1 %vm16897_vm1, %v21426_v1 }
 0x3f2   :  { %13467 = vmatmul.mubr.msk.f32.gmra.mrb[40].mxu1 %vm265_vm0, %v18042_v59 }
 0x3f3   :  { %13469 = vmatprep.mubr.msk.f32.mxu1 %vm16897_vm1, %v21426_v1 }
 0x3f6   :  { %13470 = vmatmul.mubr.msk.f32.gmra.mrb[42].mxu1 %vm265_vm0, %v18048_v60 }
 0x3f7   :  { %13472 = vmatprep.mubr.msk.f32.mxu1 %vm16897_vm1, %v21426_v1 }
 0x3fa   :  { %13473 = vmatmul.mubr.msk.f32.gmra.mrb[44].mxu1 %vm265_vm0, %v18054_v61 }
 0x3fb   :  { %13475 = vmatprep.mubr.msk.f32.mxu1 %vm16897_vm1, %v21426_v1 }
 0x3fe   :  { %13476 = vmatmul.mubr.msk.f32.gmra.mrb[46].mxu1 %vm265_vm0, %v18060_v62 }
 0x3ff   :  { %13478 = vmatprep.mubr.msk.f32.mxu1 %vm16897_vm1, %v21426_v1 }
 0x402   :  { %13479 = vmatmul.mubr.msk.f32.gmra.mrb[48].mxu1 %vm265_vm0, %v18066_v63 }
 0x403   :  { %13481 = vmatprep.mubr.msk.f32.mxu1 %vm16897_vm1, %v21426_v1 }
 0x406   :  { %13482 = vmatmul.mubr.msk.f32.gmra.mrb[50].mxu1 %vm265_vm0, %v18072_v2 }
 0x407   :  { %13484 = vmatprep.mubr.msk.f32.mxu1 %vm16897_vm1, %v21426_v1 }
 0x40a   :  { %13485 = vmatmul.mubr.msk.f32.gmra.mrb[52].mxu1 %vm265_vm0, %v18078_v3 }
 0x40b   :  { %13487 = vmatprep.mubr.msk.f32.mxu1 %vm16897_vm1, %v21426_v1 }
 0x40e   :  { %13488 = vmatmul.mubr.msk.f32.gmra.mrb[54].mxu1 %vm265_vm0, %v18084_v4 }
 0x40f   :  { %13490 = vmatprep.mubr.msk.f32.mxu1 %vm16897_vm1, %v21426_v1 }
 0x412   :  { %13491 = vmatmul.mubr.msk.f32.gmra.mrb[56].mxu1 %vm265_vm0, %v18090_v5 }
 0x413   :  { %13493 = vmatprep.mubr.msk.f32.mxu1 %vm16897_vm1, %v21426_v1 }
 0x416   :  { %13494 = vmatmul.mubr.msk.f32.gmra.mrb[58].mxu1 %vm265_vm0, %v18096_v8 }
 0x417   :  { %13496 = vmatprep.mubr.msk.f32.mxu1 %vm16897_vm1, %v21426_v1 }
 0x41a   :  { %13497 = vmatmul.mubr.msk.f32.gmra.mrb[60].mxu1 %vm265_vm0, %v18102_v9 }
 0x41b   :  { %13499 = vmatprep.mubr.msk.f32.mxu1 %vm16897_vm1, %v21426_v1 }
 0x41e   :  { %13500 = vmatmul.mubr.msk.f32.gmra.mrb[62].mxu1 %vm265_vm0, %v2394_v27 }
 0x41f   :  { %13502 = vmatprep.mubr.msk.f32.mxu1 %vm16897_vm1, %v21426_v1 }
 0x422   :  { %13503 = vmatmul.mubr.msk.f32.gmra.mrb[64].mxu1 %vm265_vm0, %v2395_v28 }
 0x423   :  { %13505 = vmatprep.mubr.msk.f32.mxu1 %vm16897_vm1, %v21426_v1 }
 0x426   :  { %13506 = vmatmul.mubr.msk.f32.gmra.mrb[66].mxu1 %vm265_vm0, %v2396_v29 }
 0x427   :  { %13508 = vmatprep.mubr.msk.f32.mxu1 %vm16897_vm1, %v21426_v1 }
 0x42a   :  { %13509 = vmatmul.mubr.msk.f32.gmra.mrb[68].mxu1 %vm265_vm0, %v2397_v33 }
 0x42b   :  { %13519 = vmatprep.mubr.msk.f32.mxu1 %vm16897_vm1, %v21426_v1 }
 0x42e   :  { %13520 = vmatmul.mubr.msk.f32.vlgmr.msra.gmra.mrb[20].mxu1 %vm265_vm0, %v17987_v47  ;;  %v13818_v47 = vpack.c.bf16 %v3362_v45, %v3361_v44  ;;  %v3342_v44 = vld [vmem:[#allocation2 + $0x63] sm:$0xff]  ;;  %v3343_v45 = vld [vmem:[#allocation2 + $0x6b] sm:$0xff] }
 0x42f   :  { %13522 = vmatprep.mubr.msk.f32.mxu1 %vm16897_vm1, %v21426_v1  ;;  %13810 = vmatpush3.bf16.msra.mxu1 %v13809_v34  ;;  %v3334_v34 = vld [vmem:[#allocation2 + $0x23] sm:$0xff] }
 0x430   :  { %13811 = vmatprep.subr.bf16.mxu1 %v21429_v0 }
 0x432   :  { %13523 = vmatmul.mubr.msk.f32.gmra.mrb[22].mxu1 %vm265_vm0, %v17994_v48  ;;  %v3014_v48 = vld [vmem:[#allocation2 + $0x22] sm:$0xff] }
 0x433   :  { %13525 = vmatprep.mubr.msk.f32.mxu1 %vm16897_vm1, %v21426_v1  ;;  %13813 = vmatpush3.bf16.msra.mxu1 %v13812_v36  ;;  %v3337_v36 = vld [vmem:[#allocation2 + $0x3b] sm:$0xff] }
 0x434   :  { %13814 = vmatprep.subr.bf16.mxu1 %v21429_v0 }
 0x436   :  { %13526 = vmatmul.mubr.msk.f32.gmra.mrb[24].mxu1 %vm265_vm0, %v18000_v49  ;;  %v3015_v49 = vld [vmem:[#allocation2 + $0x2a] sm:$0xff] }
 0x437   :  { %13528 = vmatprep.mubr.msk.f32.mxu1 %vm16897_vm1, %v21426_v1 }
 0x43a   :  { %13529 = vmatmul.mubr.msk.f32.gmra.mrb[26].mxu1 %vm265_vm0, %v18006_v50  ;;  %v3016_v50 = vld [vmem:[#allocation2 + $0x32] sm:$0xff] }
 0x43b   :  { %13531 = vmatprep.mubr.msk.f32.mxu1 %vm16897_vm1, %v21426_v1 }
 0x43e   :  { %13532 = vmatmul.mubr.msk.f32.gmra.mrb[28].mxu1 %vm265_vm0, %v18012_v51  ;;  %v3017_v51 = vld [vmem:[#allocation2 + $0x3a] sm:$0xff] }
 0x43f   :  { %13534 = vmatprep.mubr.msk.f32.mxu1 %vm16897_vm1, %v21426_v1 }
 0x442   :  { %13535 = vmatmul.mubr.msk.f32.gmra.mrb[30].mxu1 %vm265_vm0, %v18018_v52  ;;  %v3018_v52 = vld [vmem:[#allocation2 + $0x42] sm:$0xff] }
 0x443   :  { %13537 = vmatprep.mubr.msk.f32.mxu1 %vm16897_vm1, %v21426_v1 }
 0x446   :  { %13538 = vmatmul.mubr.msk.f32.gmra.mrb[32].mxu1 %vm265_vm0, %v18024_v54  ;;  %v3019_v54 = vld [vmem:[#allocation2 + $0x4a] sm:$0xff] }
 0x447   :  { %13540 = vmatprep.mubr.msk.f32.mxu1 %vm16897_vm1, %v21426_v1 }
 0x44a   :  { %13541 = vmatmul.mubr.msk.f32.gmra.mrb[34].mxu1 %vm265_vm0, %v18030_v57  ;;  %v3020_v57 = vld [vmem:[#allocation2 + $0x52] sm:$0xff] }
 0x44b   :  { %13543 = vmatprep.mubr.msk.f32.mxu1 %vm16897_vm1, %v21426_v1 }
 0x44e   :  { %13544 = vmatmul.mubr.msk.f32.gmra.mrb[36].mxu1 %vm265_vm0, %v18036_v58  ;;  %v3021_v58 = vld [vmem:[#allocation2 + $0x5a] sm:$0xff] }
 0x44f   :  { %13546 = vmatprep.mubr.msk.f32.mxu1 %vm16897_vm1, %v21426_v1 }
 0x452   :  { %13547 = vmatmul.mubr.msk.f32.gmra.mrb[38].mxu1 %vm265_vm0, %v18042_v59  ;;  %v3022_v59 = vld [vmem:[#allocation2 + $0x62] sm:$0xff] }
 0x453   :  { %13549 = vmatprep.mubr.msk.f32.mxu1 %vm16897_vm1, %v21426_v1 }
 0x456   :  { %13550 = vmatmul.mubr.msk.f32.gmra.mrb[40].mxu1 %vm265_vm0, %v18048_v60  ;;  %v3023_v60 = vld [vmem:[#allocation2 + $0x6a] sm:$0xff] }
 0x457   :  { %13552 = vmatprep.mubr.msk.f32.mxu1 %vm16897_vm1, %v21426_v1 }
 0x45a   :  { %13553 = vmatmul.mubr.msk.f32.gmra.mrb[42].mxu1 %vm265_vm0, %v18054_v61  ;;  %v3024_v61 = vld [vmem:[#allocation2 + $0x72] sm:$0xff] }
 0x45b   :  { %13555 = vmatprep.mubr.msk.f32.mxu1 %vm16897_vm1, %v21426_v1 }
 0x45e   :  { %13556 = vmatmul.mubr.msk.f32.gmra.mrb[44].mxu1 %vm265_vm0, %v18060_v62  ;;  %v3025_v62 = vld [vmem:[#allocation2 + $0x7a] sm:$0xff] }
 0x45f   :  { %13558 = vmatprep.mubr.msk.f32.mxu1 %vm16897_vm1, %v21426_v1 }
 0x462   :  { %13559 = vmatmul.mubr.msk.f32.gmra.mrb[46].mxu1 %vm265_vm0, %v18066_v63  ;;  %v3026_v63 = vld [vmem:[#allocation2 + $0x82] sm:$0xff] }
 0x463   :  { %13561 = vmatprep.mubr.msk.f32.mxu1 %vm16897_vm1, %v21426_v1 }
 0x466   :  { %13562 = vmatmul.mubr.msk.f32.gmra.mrb[48].mxu1 %vm265_vm0, %v18072_v2  ;;  %v3027_v2 = vld [vmem:[#allocation2 + $0x8a] sm:$0xff] }
 0x467   :  { %13564 = vmatprep.mubr.msk.f32.mxu1 %vm16897_vm1, %v21426_v1 }
 0x46a   :  { %13565 = vmatmul.mubr.msk.f32.gmra.mrb[50].mxu1 %vm265_vm0, %v18078_v3  ;;  %v3028_v3 = vld [vmem:[#allocation2 + $0x92] sm:$0xff] }
 0x46b   :  { %13567 = vmatprep.mubr.msk.f32.mxu1 %vm16897_vm1, %v21426_v1 }
 0x46e   :  { %13568 = vmatmul.mubr.msk.f32.gmra.mrb[52].mxu1 %vm265_vm0, %v18084_v4  ;;  %v3029_v4 = vld [vmem:[#allocation2 + $0x9a] sm:$0xff] }
 0x46f   :  { %13570 = vmatprep.mubr.msk.f32.mxu1 %vm16897_vm1, %v21426_v1 }
 0x472   :  { %13571 = vmatmul.mubr.msk.f32.gmra.mrb[54].mxu1 %vm265_vm0, %v18090_v5  ;;  %v3030_v5 = vld [vmem:[#allocation2 + $0xa2] sm:$0xff] }
 0x473   :  { %13573 = vmatprep.mubr.msk.f32.mxu1 %vm16897_vm1, %v21426_v1 }
 0x476   :  { %13574 = vmatmul.mubr.msk.f32.gmra.mrb[56].mxu1 %vm265_vm0, %v18096_v8  ;;  %v3031_v8 = vld [vmem:[#allocation2 + $0xaa] sm:$0xff] }
 0x477   :  { %13576 = vmatprep.mubr.msk.f32.mxu1 %vm16897_vm1, %v21426_v1 }
 0x47a   :  { %13577 = vmatmul.mubr.msk.f32.gmra.mrb[58].mxu1 %vm265_vm0, %v18102_v9  ;;  %v3032_v9 = vld [vmem:[#allocation2 + $0xb2] sm:$0xff] }
 0x47b   :  { %13579 = vmatprep.mubr.msk.f32.mxu1 %vm16897_vm1, %v21426_v1 }
 0x47e   :  { %13580 = vmatmul.mubr.msk.f32.gmra.mrb[60].mxu1 %vm265_vm0, %v2394_v27  ;;  %v3033_v27 = vld [vmem:[#allocation2 + $0xba] sm:$0xff] }
 0x47f   :  { %13582 = vmatprep.mubr.msk.f32.mxu1 %vm16897_vm1, %v21426_v1 }
 0x482   :  { %13583 = vmatmul.mubr.msk.f32.gmra.mrb[62].mxu1 %vm265_vm0, %v2395_v28  ;;  %v3034_v28 = vld [vmem:[#allocation2 + $0xc2] sm:$0xff] }
 0x483   :  { %13585 = vmatprep.mubr.msk.f32.mxu1 %vm16897_vm1, %v21426_v1 }
 0x486   :  { %13586 = vmatmul.mubr.msk.f32.gmra.mrb[64].mxu1 %vm265_vm0, %v2396_v29  ;;  %v3035_v29 = vld [vmem:[#allocation2 + $0xca] sm:$0xff] }
 0x487   :  { %13588 = vmatprep.mubr.msk.f32.mxu1 %vm16897_vm1, %v21426_v1 }
 0x48a   :  { %13589 = vmatmul.mubr.msk.f32.gmra.mrb[66].mxu1 %vm265_vm0, %v2397_v33  ;;  %v3333_v33 = vld [vmem:[#allocation2 + $0x1b] sm:$0xff] }
 0x48b   :  { %13591 = vmatprep.mubr.msk.f32.mxu1 %vm16897_vm1, %v21426_v1 }
 0x48e   :  { %13592 = vmatmul.mubr.msk.f32.gmra.mrb[68].mxu1 %vm265_vm0, %v2717_v26  ;;  %v3338_v26 = vld [vmem:[#allocation2 + $0x43] sm:$0xff] }
 0x48f   :  { %13602 = vmatprep.mubr.msk.f32.mxu1 %vm16897_vm1, %v21426_v1 }
 0x492   :  { %13603 = vmatmul.mubr.msk.f32.vlgmr.msra.gmra.mrb[20].mxu1 %vm265_vm0, %v3013_v46  ;;  %v3344_v46 = vld [vmem:[#allocation2 + $0x73] sm:$0xff] }
 0x493   :  { %13605 = vmatprep.mubr.msk.f32.mxu1 %vm16897_vm1, %v21426_v1  ;;  %13816 = vmatpush3.bf16.msra.mxu1 %v13815_v42  ;;  %v3341_v42 = vld [vmem:[#allocation2 + $0x5b] sm:$0xff] }
 0x494   :  { %13817 = vmatprep.subr.bf16.mxu1 %v21429_v0 }
 0x496   :  { %13606 = vmatmul.mubr.msk.f32.gmra.mrb[22].mxu1 %vm265_vm0, %v3014_v48  ;;  %v3346_v48 = vld [vmem:[#allocation2 + $0x83] sm:$0xff] }
 0x497   :  { %13608 = vmatprep.mubr.msk.f32.mxu1 %vm16897_vm1, %v21426_v1  ;;  %13819 = vmatpush3.bf16.msra.mxu1 %v13818_v47  ;;  %v3345_v47 = vld [vmem:[#allocation2 + $0x7b] sm:$0xff] }
 0x498   :  { %14620 = vmatprep.subr.bf16.mxu1 %v21429_v0 }
 0x49a   :  { %13609 = vmatmul.mubr.msk.f32.gmra.mrb[24].mxu1 %vm265_vm0, %v3015_v49  ;;  %v3347_v49 = vld [vmem:[#allocation2 + $0x8b] sm:$0xff] }
 0x49b   :  { %13611 = vmatprep.mubr.msk.f32.mxu1 %vm16897_vm1, %v21426_v1 }
 0x49e   :  { %13612 = vmatmul.mubr.msk.f32.gmra.mrb[26].mxu1 %vm265_vm0, %v3016_v50  ;;  %v3348_v50 = vld [vmem:[#allocation2 + $0x93] sm:$0xff] }
 0x49f   :  { %13614 = vmatprep.mubr.msk.f32.mxu1 %vm16897_vm1, %v21426_v1 }
 0x4a2   :  { %13615 = vmatmul.mubr.msk.f32.gmra.mrb[28].mxu1 %vm265_vm0, %v3017_v51  ;;  %v3349_v51 = vld [vmem:[#allocation2 + $0x9b] sm:$0xff] }
 0x4a3   :  { %13617 = vmatprep.mubr.msk.f32.mxu1 %vm16897_vm1, %v21426_v1 }
 0x4a6   :  { %13618 = vmatmul.mubr.msk.f32.gmra.mrb[30].mxu1 %vm265_vm0, %v3018_v52  ;;  %v3350_v52 = vld [vmem:[#allocation2 + $0xa3] sm:$0xff] }
 0x4a7   :  { %13620 = vmatprep.mubr.msk.f32.mxu1 %vm16897_vm1, %v21426_v1 }
 0x4aa   :  { %13621 = vmatmul.mubr.msk.f32.gmra.mrb[32].mxu1 %vm265_vm0, %v3019_v54  ;;  %v3351_v54 = vld [vmem:[#allocation2 + $0xab] sm:$0xff] }
 0x4ab   :  { %13623 = vmatprep.mubr.msk.f32.mxu1 %vm16897_vm1, %v21426_v1 }
 0x4ae   :  { %13624 = vmatmul.mubr.msk.f32.gmra.mrb[34].mxu1 %vm265_vm0, %v3020_v57  ;;  %v3352_v57 = vld [vmem:[#allocation2 + $0xb3] sm:$0xff] }
 0x4af   :  { %13626 = vmatprep.mubr.msk.f32.mxu1 %vm16897_vm1, %v21426_v1 }
 0x4b2   :  { %13627 = vmatmul.mubr.msk.f32.gmra.mrb[36].mxu1 %vm265_vm0, %v3021_v58  ;;  %v3353_v58 = vld [vmem:[#allocation2 + $0xbb] sm:$0xff] }
 0x4b3   :  { %13629 = vmatprep.mubr.msk.f32.mxu1 %vm16897_vm1, %v21426_v1 }
 0x4b6   :  { %13630 = vmatmul.mubr.msk.f32.gmra.mrb[38].mxu1 %vm265_vm0, %v3022_v59  ;;  %v3354_v59 = vld [vmem:[#allocation2 + $0xc3] sm:$0xff] }
 0x4b7   :  { %13632 = vmatprep.mubr.msk.f32.mxu1 %vm16897_vm1, %v21426_v1 }
 0x4ba   :  { %13633 = vmatmul.mubr.msk.f32.gmra.mrb[40].mxu1 %vm265_vm0, %v3023_v60  ;;  %v3355_v60 = vld [vmem:[#allocation2 + $0xcb] sm:$0xff] }
 0x4bb   :  { %13635 = vmatprep.mubr.msk.f32.mxu1 %vm16897_vm1, %v21426_v1 }
 0x4be   :  { %13636 = vmatmul.mubr.msk.f32.gmra.mrb[42].mxu1 %vm265_vm0, %v3024_v61  ;;  %v3356_v61 = vld [vmem:[#allocation2 + $0xd3] sm:$0xff] }
 0x4bf   :  { %13638 = vmatprep.mubr.msk.f32.mxu1 %vm16897_vm1, %v21426_v1 }
 0x4c2   :  { %13639 = vmatmul.mubr.msk.f32.gmra.mrb[44].mxu1 %vm265_vm0, %v3025_v62  ;;  %v3357_v62 = vld [vmem:[#allocation2 + $0xdb] sm:$0xff] }
 0x4c3   :  { %13641 = vmatprep.mubr.msk.f32.mxu1 %vm16897_vm1, %v21426_v1 }
 0x4c6   :  { %13642 = vmatmul.mubr.msk.f32.gmra.mrb[46].mxu1 %vm265_vm0, %v3026_v63  ;;  %v18425_v63 = vld [vmem:[#allocation19 + $0x8] sm:$0xff] }
 0x4c7   :  { %13644 = vmatprep.mubr.msk.f32.mxu1 %vm16897_vm1, %v21426_v1  ;;  %11944 = vmatprep.mubr.msk.f32.mxu0 %vm3855_vm3, %v18425_v63 }
 0x4ca   :  { %13645 = vmatmul.mubr.msk.f32.gmra.mrb[48].mxu1 %vm265_vm0, %v3027_v2  ;;  %v18431_v2 = vld [vmem:[#allocation12] ss:$0 sm:$0xff] }
 0x4cb   :  { %13647 = vmatprep.mubr.msk.f32.mxu1 %vm16897_vm1, %v21426_v1 }
 0x4ce   :  { %13648 = vmatmul.mubr.msk.f32.gmra.mrb[50].mxu1 %vm265_vm0, %v3028_v3 }
 0x4cf   :  { %13650 = vmatprep.mubr.msk.f32.mxu1 %vm16897_vm1, %v21426_v1 }
 0x4d2   :  { %13651 = vmatmul.mubr.msk.f32.gmra.mrb[52].mxu1 %vm265_vm0, %v3029_v4  ;;  %v18433_v4 = vld [vmem:[#allocation13] ss:$0 sm:$0xff] }
 0x4d3   :  { %13653 = vmatprep.mubr.msk.f32.mxu1 %vm16897_vm1, %v21426_v1 }
 0x4d6   :  { %13654 = vmatmul.mubr.msk.f32.gmra.mrb[54].mxu1 %vm265_vm0, %v3030_v5 }
 0x4d7   :  { %13656 = vmatprep.mubr.msk.f32.mxu1 %vm16897_vm1, %v21426_v1 }
 0x4da   :  { %13657 = vmatmul.mubr.msk.f32.gmra.mrb[56].mxu1 %vm265_vm0, %v3031_v8 }
 0x4db   :  { %13659 = vmatprep.mubr.msk.f32.mxu1 %vm16897_vm1, %v21426_v1 }
 0x4de   :  { %13660 = vmatmul.mubr.msk.f32.gmra.mrb[58].mxu1 %vm265_vm0, %v3032_v9 }
 0x4df   :  { %13662 = vmatprep.mubr.msk.f32.mxu1 %vm16897_vm1, %v21426_v1 }
 0x4e2   :  { %13663 = vmatmul.mubr.msk.f32.gmra.mrb[60].mxu1 %vm265_vm0, %v3033_v27 }
 0x4e3   :  { %13665 = vmatprep.mubr.msk.f32.mxu1 %vm16897_vm1, %v21426_v1 }
 0x4e6   :  { %13666 = vmatmul.mubr.msk.f32.gmra.mrb[62].mxu1 %vm265_vm0, %v3034_v28 }
 0x4e7   :  { %13668 = vmatprep.mubr.msk.f32.mxu1 %vm16897_vm1, %v21426_v1 }
 0x4ea   :  { %13669 = vmatmul.mubr.msk.f32.gmra.mrb[64].mxu1 %vm265_vm0, %v3035_v29 }
 0x4eb   :  { %13671 = vmatprep.mubr.msk.f32.mxu1 %vm16897_vm1, %v21426_v1 }
 0x4ee   :  { %13672 = vmatmul.mubr.msk.f32.gmra.mrb[66].mxu1 %vm265_vm0, %v3036_v30 }
 0x4ef   :  { %13674 = vmatprep.mubr.msk.f32.mxu1 %vm16897_vm1, %v21426_v1 }
 0x4f2   :  { %13675 = vmatmul.mubr.msk.f32.gmra.mrb[68].mxu1 %vm265_vm0, %v3037_v31 }
 0x4f3   :  { %13685 = vmatprep.mubr.msk.f32.mxu1 %vm16897_vm1, %v21426_v1 }
 0x4f6   :  { %13686 = vmatmul.mubr.msk.f32.vlgmr.msra.gmra.mrb[20].mxu1 %vm265_vm0, %v3333_v33 }
 0x4f7   :  { %13688 = vmatprep.mubr.msk.f32.mxu1 %vm16897_vm1, %v21426_v1 }
 0x4fa   :  { %13689 = vmatmul.mubr.msk.f32.gmra.mrb[22].mxu1 %vm265_vm0, %v3334_v34 }
 0x4fb   :  { %13691 = vmatprep.mubr.msk.f32.mxu1 %vm16897_vm1, %v21426_v1 }
 0x4fe   :  { %13692 = vmatmul.mubr.msk.f32.gmra.mrb[24].mxu1 %vm265_vm0, %v3335_v35 }
 0x4ff   :  { %13694 = vmatprep.mubr.msk.f32.mxu1 %vm16897_vm1, %v21426_v1 }
 0x502   :  { %13695 = vmatmul.mubr.msk.f32.gmra.mrb[26].mxu1 %vm265_vm0, %v3336_v23 }
 0x503   :  { %13697 = vmatprep.mubr.msk.f32.mxu1 %vm16897_vm1, %v21426_v1 }
 0x506   :  { %13698 = vmatmul.mubr.msk.f32.gmra.mrb[28].mxu1 %vm265_vm0, %v3337_v36 }
 0x507   :  { %13700 = vmatprep.mubr.msk.f32.mxu1 %vm16897_vm1, %v21426_v1 }
 0x50a   :  { %13701 = vmatmul.mubr.msk.f32.gmra.mrb[30].mxu1 %vm265_vm0, %v3338_v26 }
 0x50b   :  { %13703 = vmatprep.mubr.msk.f32.mxu1 %vm16897_vm1, %v21426_v1 }
 0x50e   :  { %13704 = vmatmul.mubr.msk.f32.gmra.mrb[32].mxu1 %vm265_vm0, %v3339_v37 }
 0x50f   :  { %13706 = vmatprep.mubr.msk.f32.mxu1 %vm16897_vm1, %v21426_v1 }
 0x512   :  { %13707 = vmatmul.mubr.msk.f32.gmra.mrb[34].mxu1 %vm265_vm0, %v3340_v41 }
 0x513   :  { %13709 = vmatprep.mubr.msk.f32.mxu1 %vm16897_vm1, %v21426_v1 }
 0x516   :  { %13710 = vmatmul.mubr.msk.f32.gmra.mrb[36].mxu1 %vm265_vm0, %v3341_v42 }
 0x517   :  { %13712 = vmatprep.mubr.msk.f32.mxu1 %vm16897_vm1, %v21426_v1 }
 0x51a   :  { %13713 = vmatmul.mubr.msk.f32.gmra.mrb[38].mxu1 %vm265_vm0, %v3342_v44 }
 0x51b   :  { %13715 = vmatprep.mubr.msk.f32.mxu1 %vm16897_vm1, %v21426_v1 }
 0x51e   :  { %13716 = vmatmul.mubr.msk.f32.gmra.mrb[40].mxu1 %vm265_vm0, %v3343_v45  ;;  %v3830_v45 = vld [vmem:[#allocation3 + $0x5] sm:$0xff] }
 0x51f   :  { %13718 = vmatprep.mubr.msk.f32.mxu1 %vm16897_vm1, %v21426_v1 }
 0x522   :  { %13719 = vmatmul.mubr.msk.f32.gmra.mrb[42].mxu1 %vm265_vm0, %v3344_v46 }
 0x523   :  { %13721 = vmatprep.mubr.msk.f32.mxu1 %vm16897_vm1, %v21426_v1 }
 0x526   :  { %13722 = vmatmul.mubr.msk.f32.gmra.mrb[44].mxu1 %vm265_vm0, %v3345_v47 }
 0x527   :  { %13724 = vmatprep.mubr.msk.f32.mxu1 %vm16897_vm1, %v21426_v1 }
 0x52a   :  { %13725 = vmatmul.mubr.msk.f32.gmra.mrb[46].mxu1 %vm265_vm0, %v3346_v48 }
 0x52b   :  { %13727 = vmatprep.mubr.msk.f32.mxu1 %vm16897_vm1, %v21426_v1 }
 0x52e   :  { %13728 = vmatmul.mubr.msk.f32.gmra.mrb[48].mxu1 %vm265_vm0, %v3347_v49 }
 0x52f   :  { %13730 = vmatprep.mubr.msk.f32.mxu1 %vm16897_vm1, %v21426_v1 }
 0x532   :  { %13731 = vmatmul.mubr.msk.f32.gmra.mrb[50].mxu1 %vm265_vm0, %v3348_v50 }
 0x533   :  { %13733 = vmatprep.mubr.msk.f32.mxu1 %vm16897_vm1, %v21426_v1 }
 0x536   :  { %13734 = vmatmul.mubr.msk.f32.gmra.mrb[52].mxu1 %vm265_vm0, %v3349_v51 }
 0x537   :  { %13736 = vmatprep.mubr.msk.f32.mxu1 %vm16897_vm1, %v21426_v1 }
 0x53a   :  { %13737 = vmatmul.mubr.msk.f32.gmra.mrb[54].mxu1 %vm265_vm0, %v3350_v52 }
 0x53b   :  { %13739 = vmatprep.mubr.msk.f32.mxu1 %vm16897_vm1, %v21426_v1 }
 0x53e   :  { %13740 = vmatmul.mubr.msk.f32.gmra.mrb[56].mxu1 %vm265_vm0, %v3351_v54 }
 0x53f   :  { %13742 = vmatprep.mubr.msk.f32.mxu1 %vm16897_vm1, %v21426_v1 }
 0x542   :  { %13743 = vmatmul.mubr.msk.f32.gmra.mrb[58].mxu1 %vm265_vm0, %v3352_v57 }
 0x543   :  { %13745 = vmatprep.mubr.msk.f32.mxu1 %vm16897_vm1, %v21426_v1 }
 0x546   :  { %13746 = vmatmul.mubr.msk.f32.gmra.mrb[60].mxu1 %vm265_vm0, %v3353_v58 }
 0x547   :  { %13748 = vmatprep.mubr.msk.f32.mxu1 %vm16897_vm1, %v21426_v1 }
 0x54a   :  { %13749 = vmatmul.mubr.msk.f32.gmra.mrb[62].mxu1 %vm265_vm0, %v3354_v59 }
 0x54b   :  { %13751 = vmatprep.mubr.msk.f32.mxu1 %vm16897_vm1, %v21426_v1 }
 0x54e   :  { %13752 = vmatmul.mubr.msk.f32.gmra.mrb[64].mxu1 %vm265_vm0, %v3355_v60 }
 0x54f   :  { %13754 = vmatprep.mubr.msk.f32.mxu1 %vm16897_vm1, %v21426_v1 }
 0x552   :  { %13755 = vmatmul.mubr.msk.f32.gmra.mrb[66].mxu1 %vm265_vm0, %v3356_v61 }
 0x553   :  { %13757 = vmatprep.mubr.msk.f32.mxu1 %vm16897_vm1, %v21426_v1 }
 0x556   :  { %13758 = vmatmul.mubr.msk.f32.gmra.mrb[68].mxu1 %vm265_vm0, %v3357_v62 }
 0x557   :  { %12552 = vmatprep.mubr.msk.f32.mxu1 %vm3855_vm3, %v18425_v63 }
 0x5c9   :  { %v3504_v3 = vpop.f32.mrb[20].mxu1 }
 0x5ca   :  { %v3660_v5 = vmul.f32 %v18431_v2, %v3504_v3  ;;  %v13687_v8 = vpop.f32.mrb[21].mxu1 }
 0x5cc   :  { %v3692_v9 = vadd.f32 %v18433_v4, %v3660_v5 }
 0x5cd   :  { %v3509_v27 = vpop.f32.mrb[22].mxu1 }
 0x5ce   :  { %v3717_v28 = vmax.f32 %v3692_v9, 0.0  ;;  %v3661_v29 = vmul.f32 %v18431_v2, %v3509_v27  ;;  %v13690_v30 = vpop.f32.mrb[23].mxu1 }
 0x5d0   :  { %v3742_v31 = vmul.f32 %v3717_v28, %v17369_v10  ;;  %v3693_v33 = vadd.f32 %v18433_v4, %v3661_v29 }
 0x5d1   :  { %v3514_v34 = vpop.f32.mrb[24].mxu1 }
 0x5d2   :  { %3797 = vst.msk [vmem:[#allocation3 + $0x10] sm:$0xff] %vm3767_vm2, %v3742_v31  ;;  %v3718_v35 = vmax.f32 %v3693_v33, 0.0  ;;  %v3662_v23 = vmul.f32 %v18431_v2, %v3514_v34  ;;  %v13693_v36 = vpop.f32.mrb[25].mxu1 }
 0x5d4   :  { %v3743_v26 = vmul.f32 %v3718_v35, %v17373_v12  ;;  %v3694_v37 = vadd.f32 %v18433_v4, %v3662_v23 }
 0x5d5   :  { %v3519_v41 = vpop.f32.mrb[26].mxu1 }
 0x5d6   :  { %3798 = vst.msk [vmem:[#allocation3 + $0x18] sm:$0xff] %vm3767_vm2, %v3743_v26  ;;  %v3719_v42 = vmax.f32 %v3694_v37, 0.0  ;;  %v3663_v44 = vmul.f32 %v18431_v2, %v3519_v41  ;;  %v13696_v10 = vpop.f32.mrb[27].mxu1 }
 0x5d8   :  { %v3744_v46 = vmul.f32 %v3719_v42, %v17371_v11  ;;  %v3695_v47 = vadd.f32 %v18433_v4, %v3663_v44 }
 0x5d9   :  { %v3524_v48 = vpop.f32.mrb[28].mxu1  ;;  %v3831_v49 = vld [vmem:[#allocation3 + $0xd] sm:$0xff] }
 0x5da   :  { %3799 = vst.msk [vmem:[#allocation3 + $0x20] sm:$0xff] %vm3767_vm2, %v3744_v46  ;;  %v3720_v50 = vmax.f32 %v3695_v47, 0.0  ;;  %v3664_v12 = vmul.f32 %v18431_v2, %v3524_v48  ;;  %v13699_v51 = vpop.f32.mrb[29].mxu1  ;;  %v13821_v52 = vpack.c.bf16 %v3831_v49, %v3830_v45  ;;  %v18453_v11 = vld [vmem:[#allocation3 + $0xf] sm:$0xff] }
 0x5dc   :  { %v3745_v54 = vmul.f32 %v3720_v50, %v17375_v13  ;;  %v3696_v57 = vadd.f32 %v18433_v4, %v3664_v12  ;;  %13822 = vmatpush1.bf16.msra.mxu0 %v13821_v52 }
 0x5dd   :  { %v3529_v58 = vpop.f32.mrb[30].mxu1  ;;  %13823 = vmatprep.subr.bf16.mxu0 %v21429_v0  ;;  %v18455_v59 = vld [vmem:[#allocation3 + $0x17] sm:$0xff] }
 0x5de   :  { %3800 = vst.msk [vmem:[#allocation3 + $0x28] sm:$0xff] %vm3767_vm2, %v3745_v54  ;;  %v3721_v60 = vmax.f32 %v3696_v57, 0.0  ;;  %v3665_v61 = vmul.f32 %v18431_v2, %v3529_v58  ;;  %v13702_v62 = vpop.f32.mrb[31].mxu1  ;;  %v3832_v9 = vld [vmem:[#allocation3 + $0x15] sm:$0xff] }
 0x5e0   :  { %v3746_v13 = vmul.f32 %v3721_v60, %v17377_v14  ;;  %v3697_v5 = vadd.f32 %v18433_v4, %v3665_v61 }
 0x5e1   :  { %v3534_v8 = vpop.f32.mrb[32].mxu1  ;;  %v3833_v27 = vld [vmem:[#allocation3 + $0x1d] sm:$0xff] }
 0x5e2   :  { %3801 = vst.msk [vmem:[#allocation3 + $0x30] sm:$0xff] %vm3767_vm2, %v3746_v13  ;;  %v3722_v28 = vmax.f32 %v3697_v5, 0.0  ;;  %v3666_v29 = vmul.f32 %v18431_v2, %v3534_v8  ;;  %v13705_v30 = vpop.f32.mrb[33].mxu1  ;;  %v13824_v31 = vpack.c.bf16 %v3833_v27, %v3832_v9  ;;  %v8378_v23 = vld [vmem:[#allocation3 + $0x1b] sm:$0xff] }
 0x5e3   :  { %v18468_v36 = vld [vmem:[#allocation3 + $0x1f] sm:$0xff] }
 0x5e4   :  { %v3747_v33 = vmul.f32 %v3722_v28, %v17379_v15  ;;  %v3698_v34 = vadd.f32 %v18433_v4, %v3666_v29  ;;  %13825 = vmatpush1.bf16.msra.mxu0 %v13824_v31  ;;  %v18474_v15 = vld [vmem:[#allocation3 + $0x19] sm:$0xff] }
 0x5e5   :  { %v3539_v35 = vpop.f32.mrb[34].mxu1  ;;  %v8379_v14 = vld [vmem:[#allocation3 + $0x23] sm:$0xff]  ;;  %13826 = vmatprep.subr.bf16.mxu0 %v21429_v0 }
 0x5e6   :  { %3802 = vst.msk [vmem:[#allocation3 + $0x38] sm:$0xff] %vm3767_vm2, %v3747_v33  ;;  %v3723_v26 = vmax.f32 %v3698_v34, 0.0  ;;  %v3667_v37 = vmul.f32 %v18431_v2, %v3539_v35  ;;  %v13708_v41 = vpop.f32.mrb[35].mxu1  ;;  %v14621_v42 = vpack.c.bf16 %v8379_v14, %v8378_v23  ;;  %v18472_v44 = vld [vmem:[#allocation3 + $0x27] sm:$0xff] }
 0x5e7   :  { %v18476_v10 = vld [vmem:[#allocation3 + $0x21] sm:$0xff] }
 0x5e8   :  { %v3748_v47 = vmul.f32 %v3723_v26, %v17381_v16  ;;  %v3699_v48 = vadd.f32 %v18433_v4, %v3667_v37  ;;  %14622 = vmatpush1.bf16.msra.mxu1 %v14621_v42  ;;  %v3834_v50 = vld [vmem:[#allocation3 + $0x25] sm:$0xff] }
 0x5e9   :  { %v3544_v49 = vpop.f32.mrb[36].mxu1  ;;  %v3835_v12 = vld [vmem:[#allocation3 + $0x2d] sm:$0xff]  ;;  %14623 = vmatprep.subr.bf16.mxu1 %v21429_v0 }
 0x5ea   :  { %3803 = vst.msk [vmem:[#allocation3 + $0x40] sm:$0xff] %vm3767_vm2, %v3748_v47  ;;  %v3724_v51 = vmax.f32 %v3699_v48, 0.0  ;;  %v3668_v52 = vmul.f32 %v18431_v2, %v3544_v49  ;;  %v13711_v54 = vpop.f32.mrb[37].mxu1  ;;  %v13827_v57 = vpack.c.bf16 %v3835_v12, %v3834_v50  ;;  %v8380_v61 = vld [vmem:[#allocation3 + $0x2b] sm:$0xff] }
 0x5eb   :  { %v18490_v13 = vld [vmem:[#allocation3 + $0x2f] sm:$0xff] }
 0x5ec   :  { %v3749_v58 = vmul.f32 %v3724_v51, %v17383_v17  ;;  %v3700_v60 = vadd.f32 %v18433_v4, %v3668_v52  ;;  %13828 = vmatpush1.bf16.msra.mxu0 %v13827_v57  ;;  %v18496_v17 = vld [vmem:[#allocation3 + $0x29] sm:$0xff] }
 0x5ed   :  { %v3549_v16 = vpop.f32.mrb[38].mxu1  ;;  %v8381_v62 = vld [vmem:[#allocation3 + $0x33] sm:$0xff]  ;;  %13829 = vmatprep.subr.bf16.mxu0 %v21429_v0 }
 0x5ee   :  { %3804 = vst.msk [vmem:[#allocation3 + $0x48] sm:$0xff] %vm3767_vm2, %v3749_v58  ;;  %v3725_v5 = vmax.f32 %v3700_v60, 0.0  ;;  %v3669_v8 = vmul.f32 %v18431_v2, %v3549_v16  ;;  %v13714_v9 = vpop.f32.mrb[39].mxu1  ;;  %v14624_v27 = vpack.c.bf16 %v8381_v62, %v8380_v61  ;;  %v18494_v28 = vld [vmem:[#allocation3 + $0x37] sm:$0xff] }
 0x5ef   :  { %v18498_v29 = vld [vmem:[#allocation3 + $0x31] sm:$0xff] }
 0x5f0   :  { %v3750_v33 = vmul.f32 %v3725_v5, %v17385_v18  ;;  %v3701_v34 = vadd.f32 %v18433_v4, %v3669_v8  ;;  %14625 = vmatpush1.bf16.msra.mxu1 %v14624_v27  ;;  %v3836_v23 = vld [vmem:[#allocation3 + $0x35] sm:$0xff] }
 0x5f1   :  { %v3554_v35 = vpop.f32.mrb[40].mxu1  ;;  %v3837_v14 = vld [vmem:[#allocation3 + $0x3d] sm:$0xff]  ;;  %14626 = vmatprep.subr.bf16.mxu1 %v21429_v0 }
 0x5f2   :  { %3805 = vst.msk [vmem:[#allocation3 + $0x50] sm:$0xff] %vm3767_vm2, %v3750_v33  ;;  %v3726_v26 = vmax.f32 %v3701_v34, 0.0  ;;  %v3670_v37 = vmul.f32 %v18431_v2, %v3554_v35  ;;  %v13717_v41 = vpop.f32.mrb[41].mxu1  ;;  %v13830_v42 = vpack.c.bf16 %v3837_v14, %v3836_v23  ;;  %v8382_v49 = vld [vmem:[#allocation3 + $0x3b] sm:$0xff] }
 0x5f3   :  { %v18512_v12 = vld [vmem:[#allocation3 + $0x3f] sm:$0xff] }
 0x5f4   :  { %v3751_v47 = vmul.f32 %v3726_v26, %v17387_v19  ;;  %v3702_v48 = vadd.f32 %v18433_v4, %v3670_v37  ;;  %13831 = vmatpush1.bf16.msra.mxu0 %v13830_v42  ;;  %v18518_v19 = vld [vmem:[#allocation3 + $0x39] sm:$0xff] }
 0x5f5   :  { %v3559_v18 = vpop.f32.mrb[42].mxu1  ;;  %v8383_v50 = vld [vmem:[#allocation3 + $0x43] sm:$0xff]  ;;  %13832 = vmatprep.subr.bf16.mxu0 %v21429_v0 }
 0x5f6   :  { %3806 = vst.msk [vmem:[#allocation3 + $0x58] sm:$0xff] %vm3767_vm2, %v3751_v47  ;;  %v3727_v51 = vmax.f32 %v3702_v48, 0.0  ;;  %v3671_v52 = vmul.f32 %v18431_v2, %v3559_v18  ;;  %v13720_v54 = vpop.f32.mrb[43].mxu1  ;;  %v14627_v57 = vpack.c.bf16 %v8383_v50, %v8382_v49  ;;  %v18516_v58 = vld [vmem:[#allocation3 + $0x47] sm:$0xff]  ;;  %v4024_v16 = vld [vmem:[#allocation3 + $0x3e] sm:$0xff] }
 0x5f7   :  { %v18520_v60 = vld [vmem:[#allocation3 + $0x41] sm:$0xff] }
 0x5f8   :  { %v3752_v62 = vmul.f32 %v3727_v51, %v17389_v20  ;;  %v3703_v5 = vadd.f32 %v18433_v4, %v3671_v52  ;;  %14628 = vmatpush1.bf16.msra.mxu1 %v14627_v57  ;;  %v3838_v9 = vld [vmem:[#allocation3 + $0x45] sm:$0xff] }
 0x5f9   :  { %v3564_v8 = vpop.f32.mrb[44].mxu1  ;;  %v3839_v27 = vld [vmem:[#allocation3 + $0x4d] sm:$0xff]  ;;  %14629 = vmatprep.subr.bf16.mxu1 %v21429_v0 }
 0x5fa   :  { %3807 = vst.msk [vmem:[#allocation3 + $0x60] sm:$0xff] %vm3767_vm2, %v3752_v62  ;;  %v3728_v33 = vmax.f32 %v3703_v5, 0.0  ;;  %v3672_v34 = vmul.f32 %v18431_v2, %v3564_v8  ;;  %v13723_v35 = vpop.f32.mrb[45].mxu1  ;;  %v13833_v23 = vpack.c.bf16 %v3839_v27, %v3838_v9  ;;  %v8384_v37 = vld [vmem:[#allocation3 + $0x4b] sm:$0xff] }
 0x5fb   :  { %v18534_v42 = vld [vmem:[#allocation3 + $0x4f] sm:$0xff] }
 0x5fc   :  { %v3753_v14 = vmul.f32 %v3728_v33, %v17391_v21  ;;  %v3704_v26 = vadd.f32 %v18433_v4, %v3672_v34  ;;  %13834 = vmatpush1.bf16.msra.mxu0 %v13833_v23  ;;  %v18540_v21 = vld [vmem:[#allocation3 + $0x49] sm:$0xff] }
 0x5fd   :  { %v3569_v20 = vpop.f32.mrb[46].mxu1  ;;  %v8385_v41 = vld [vmem:[#allocation3 + $0x53] sm:$0xff]  ;;  %13835 = vmatprep.subr.bf16.mxu0 %v21429_v0 }
 0x5fe   :  { %3808 = vst.msk [vmem:[#allocation3 + $0x68] sm:$0xff] %vm3767_vm2, %v3753_v14  ;;  %v3729_v47 = vmax.f32 %v3704_v26, 0.0  ;;  %v3673_v48 = vmul.f32 %v18431_v2, %v3569_v20  ;;  %v13726_v18 = vpop.f32.mrb[47].mxu1  ;;  %v14630_v49 = vpack.c.bf16 %v8385_v41, %v8384_v37  ;;  %v18538_v50 = vld [vmem:[#allocation3 + $0x57] sm:$0xff] }
 0x5ff   :  { %v18542_v51 = vld [vmem:[#allocation3 + $0x51] sm:$0xff] }
 0x600   :  { %v3754_v57 = vmul.f32 %v3729_v47, %v17393_v22  ;;  %v3705_v62 = vadd.f32 %v18433_v4, %v3673_v48  ;;  %14631 = vmatpush1.bf16.msra.mxu1 %v14630_v49  ;;  %v3840_v8 = vld [vmem:[#allocation3 + $0x55] sm:$0xff] }
 0x601   :  { %v3574_v5 = vpop.f32.mrb[48].mxu1  ;;  %v3841_v9 = vld [vmem:[#allocation3 + $0x5d] sm:$0xff]  ;;  %14632 = vmatprep.subr.bf16.mxu1 %v21429_v0 }
 0x602   :  { %3809 = vst.msk [vmem:[#allocation3 + $0x70] sm:$0xff] %vm3767_vm2, %v3754_v57  ;;  %v3730_v27 = vmax.f32 %v3705_v62, 0.0  ;;  %v3674_v33 = vmul.f32 %v18431_v2, %v3574_v5  ;;  %v13729_v34 = vpop.f32.mrb[49].mxu1  ;;  %v13836_v35 = vpack.c.bf16 %v3841_v9, %v3840_v8  ;;  %v8386_v26 = vld [vmem:[#allocation3 + $0x5b] sm:$0xff] }
 0x603   :  { %v18556_v37 = vld [vmem:[#allocation3 + $0x5f] sm:$0xff]  ;;  %v4027_v30 = vld [vmem:[#allocation3 + $0x56] sm:$0xff] }
 0x604   :  { %v3755_v23 = vmul.f32 %v3730_v27, %v17397_v24  ;;  %v3706_v14 = vadd.f32 %v18433_v4, %v3674_v33  ;;  %13837 = vmatpush1.bf16.msra.mxu0 %v13836_v35  ;;  %v18562_v24 = vld [vmem:[#allocation3 + $0x59] sm:$0xff] }
 0x605   :  { %v3579_v22 = vpop.f32.mrb[50].mxu1  ;;  %v8387_v20 = vld [vmem:[#allocation3 + $0x63] sm:$0xff]  ;;  %13838 = vmatprep.subr.bf16.mxu0 %v21429_v0 }
 0x606   :  { %3810 = vst.msk [vmem:[#allocation3 + $0x78] sm:$0xff] %vm3767_vm2, %v3755_v23  ;;  %v3731_v41 = vmax.f32 %v3706_v14, 0.0  ;;  %v3675_v47 = vmul.f32 %v18431_v2, %v3579_v22  ;;  %v13732_v48 = vpop.f32.mrb[51].mxu1  ;;  %v14633_v18 = vpack.c.bf16 %v8387_v20, %v8386_v26  ;;  %v18560_v49 = vld [vmem:[#allocation3 + $0x67] sm:$0xff] }
 0x607   :  { %v18564_v57 = vld [vmem:[#allocation3 + $0x61] sm:$0xff] }
 0x608   :  { %v3756_v8 = vmul.f32 %v3731_v41, %v17403_v32  ;;  %v3707_v9 = vadd.f32 %v18433_v4, %v3675_v47  ;;  %14634 = vmatpush1.bf16.msra.mxu1 %v14633_v18  ;;  %v3842_v33 = vld [vmem:[#allocation3 + $0x65] sm:$0xff] }
 0x609   :  { %v3584_v27 = vpop.f32.mrb[52].mxu1  ;;  %v3843_v34 = vld [vmem:[#allocation3 + $0x6d] sm:$0xff]  ;;  %14635 = vmatprep.subr.bf16.mxu1 %v21429_v0 }
 0x60a   :  { %3811 = vst.msk [vmem:[#allocation3 + $0x80] sm:$0xff] %vm3767_vm2, %v3756_v8  ;;  %v3732_v35 = vmax.f32 %v3707_v9, 0.0  ;;  %v3676_v23 = vmul.f32 %v18431_v2, %v3584_v27  ;;  %v13735_v14 = vpop.f32.mrb[53].mxu1  ;;  %v13839_v22 = vpack.c.bf16 %v3843_v34, %v3842_v33  ;;  %v8388_v41 = vld [vmem:[#allocation3 + $0x6b] sm:$0xff] }
 0x60b   :  { %v18578_v48 = vld [vmem:[#allocation3 + $0x6f] sm:$0xff] }
 0x60c   :  { %v3757_v26 = vmul.f32 %v3732_v35, %v17409_v43  ;;  %v3708_v20 = vadd.f32 %v18433_v4, %v3676_v23  ;;  %13840 = vmatpush1.bf16.msra.mxu0 %v13839_v22  ;;  %v18584_v43 = vld [vmem:[#allocation3 + $0x69] sm:$0xff] }
 0x60d   :  { %v3589_v32 = vpop.f32.mrb[54].mxu1  ;;  %v8389_v47 = vld [vmem:[#allocation3 + $0x73] sm:$0xff]  ;;  %13841 = vmatprep.subr.bf16.mxu0 %v21429_v0 }
 0x60e   :  { %3812 = vst.msk [vmem:[#allocation3 + $0x88] sm:$0xff] %vm3767_vm2, %v3757_v26  ;;  %v3733_v18 = vmax.f32 %v3708_v20, 0.0  ;;  %v3677_v8 = vmul.f32 %v18431_v2, %v3589_v32  ;;  %v13738_v9 = vpop.f32.mrb[55].mxu1  ;;  %v14636_v27 = vpack.c.bf16 %v8389_v47, %v8388_v41  ;;  %v18582_v33 = vld [vmem:[#allocation3 + $0x77] sm:$0xff]  ;;  %v4030_v3 = vld [vmem:[#allocation3 + $0x6e] sm:$0xff] }
 0x60f   :  { %v18586_v34 = vld [vmem:[#allocation3 + $0x71] sm:$0xff] }
 0x610   :  { %v3758_v14 = vmul.f32 %v3733_v18, %v17419_v56  ;;  %v3709_v22 = vadd.f32 %v18433_v4, %v3677_v8  ;;  %14637 = vmatpush1.bf16.msra.mxu1 %v14636_v27  ;;  %v3844_v20 = vld [vmem:[#allocation3 + $0x75] sm:$0xff] }
 0x611   :  { %v3594_v26 = vpop.f32.mrb[56].mxu1  ;;  %v3845_v32 = vld [vmem:[#allocation3 + $0x7d] sm:$0xff]  ;;  %14638 = vmatprep.subr.bf16.mxu1 %v21429_v0 }
 0x612   :  { %3813 = vst.msk [vmem:[#allocation3 + $0x90] sm:$0xff] %vm3767_vm2, %v3758_v14  ;;  %v3734_v41 = vmax.f32 %v3709_v22, 0.0  ;;  %v3678_v47 = vmul.f32 %v18431_v2, %v3594_v26  ;;  %v13741_v9 = vpop.f32.mrb[57].mxu1  ;;  %v13842_v5 = vpack.c.bf16 %v3845_v32, %v3844_v20  ;;  %v8390_v18 = vld [vmem:[#allocation3 + $0x7b] sm:$0xff] }
 0x613   :  { %v18600_v27 = vld [vmem:[#allocation3 + $0x7f] sm:$0xff] }
 0x614   :  { %v3759_v54 = vmul.f32 %v3734_v41, %v17429_v7  ;;  %v3710_v23 = vadd.f32 %v18433_v4, %v3678_v47  ;;  %13843 = vmatpush1.bf16.msra.mxu0 %v13842_v5  ;;  %v18606_v7 = vld [vmem:[#allocation3 + $0x79] sm:$0xff] }
 0x615   :  { %v3599_v56 = vpop.f32.mrb[58].mxu1  ;;  %v8391_v8 = vld [vmem:[#allocation3 + $0x83] sm:$0xff]  ;;  %13844 = vmatprep.subr.bf16.mxu0 %v21429_v0 }
 0x616   :  { %3814 = vst.msk [vmem:[#allocation3 + $0x98] sm:$0xff] %vm3767_vm2, %v3759_v54  ;;  %v3735_v14 = vmax.f32 %v3710_v23, 0.0  ;;  %v3679_v22 = vmul.f32 %v18431_v2, %v3599_v56  ;;  %v13744_v26 = vpop.f32.mrb[59].mxu1  ;;  %v14639_v9 = vpack.c.bf16 %v8391_v8, %v8390_v18  ;;  %v18604_v20 = vld [vmem:[#allocation3 + $0x87] sm:$0xff] }
 0x617   :  { %v18608_v32 = vld [vmem:[#allocation3 + $0x81] sm:$0xff] }
 0x618   :  { %v3760_v47 = vmul.f32 %v3735_v14, %v17440_v38  ;;  %v3711_v54 = vadd.f32 %v18433_v4, %v3679_v22  ;;  %14640 = vmatpush1.bf16.msra.mxu1 %v14639_v9  ;;  %v3846_v56 = vld [vmem:[#allocation3 + $0x85] sm:$0xff] }
 0x619   :  { %v3604_v23 = vpop.f32.mrb[60].mxu1  ;;  %v3847_v18 = vld [vmem:[#allocation3 + $0x8d] sm:$0xff]  ;;  %14641 = vmatprep.subr.bf16.mxu1 %v21429_v0 }
 0x61a   :  { %3815 = vst.msk [vmem:[#allocation3 + $0xa0] sm:$0xff] %vm3767_vm2, %v3760_v47  ;;  %v3736_v8 = vmax.f32 %v3711_v54, 0.0  ;;  %v3680_v26 = vmul.f32 %v18431_v2, %v3604_v23  ;;  %v13747_v61 = vpop.f32.mrb[61].mxu1  ;;  %v13845_v31 = vpack.c.bf16 %v3847_v18, %v3846_v56  ;;  %v8392_v14 = vld [vmem:[#allocation3 + $0x8b] sm:$0xff] }
 0x61b   :  { %v18622_v9 = vld [vmem:[#allocation3 + $0x8f] sm:$0xff] }
 0x61c   :  { %v3761_v46 = vmul.f32 %v3736_v8, %v17453_v53  ;;  %v3712_v41 = vadd.f32 %v18433_v4, %v3680_v26  ;;  %13846 = vmatpush1.bf16.msra.mxu0 %v13845_v31  ;;  %v18628_v53 = vld [vmem:[#allocation3 + $0x89] sm:$0xff] }
 0x61d   :  { %v3609_v38 = vpop.f32.mrb[62].mxu1  ;;  %v8393_v22 = vld [vmem:[#allocation3 + $0x93] sm:$0xff]  ;;  %13847 = vmatprep.subr.bf16.mxu0 %v21429_v0  ;;  %21437 = vst [vmem:[#allocation34_spill] sm:$0xff] %v18628_v53 }
 0x61e   :  { %3816 = vst.msk [vmem:[#allocation3 + $0xa8] sm:$0xff] %vm3767_vm2, %v3761_v46  ;;  %v3737_v47 = vmax.f32 %v3712_v41, 0.0  ;;  %v3681_v54 = vmul.f32 %v18431_v2, %v3609_v38  ;;  %v13750_v23 = vpop.f32.mrb[63].mxu1  ;;  %v14642_v61 = vpack.c.bf16 %v8393_v22, %v8392_v14  ;;  %v18626_v56 = vld [vmem:[#allocation3 + $0x97] sm:$0xff] }
 0x61f   :  { %v18630_v18 = vld [vmem:[#allocation3 + $0x91] sm:$0xff] }
 0x620   :  { %v3762_v26 = vmul.f32 %v3737_v47, %v17466_v6  ;;  %v3713_v46 = vadd.f32 %v18433_v4, %v3681_v54  ;;  %14643 = vmatpush1.bf16.msra.mxu1 %v14642_v61  ;;  %v3848_v38 = vld [vmem:[#allocation3 + $0x95] sm:$0xff] }
 0x621   :  { %v3614_v41 = vpop.f32.mrb[64].mxu1  ;;  %v3849_v14 = vld [vmem:[#allocation3 + $0x9d] sm:$0xff]  ;;  %14644 = vmatprep.subr.bf16.mxu1 %v21429_v0 }
 0x622   :  { %3817 = vst.msk [vmem:[#allocation3 + $0xb0] sm:$0xff] %vm3767_vm2, %v3762_v26  ;;  %v3738_v22 = vmax.f32 %v3713_v46, 0.0  ;;  %v3682_v23 = vmul.f32 %v18431_v2, %v3614_v41  ;;  %v13753_v5 = vpop.f32.mrb[65].mxu1  ;;  %v13848_v31 = vpack.c.bf16 %v3849_v14, %v3848_v38  ;;  %v8394_v47 = vld [vmem:[#allocation3 + $0x9b] sm:$0xff] }
 0x623   :  { %v18644_v61 = vld [vmem:[#allocation3 + $0x9f] sm:$0xff] }
 0x624   :  { %v3763_v35 = vmul.f32 %v3738_v22, %v17479_v39  ;;  %v3714_v8 = vadd.f32 %v18433_v4, %v3682_v23  ;;  %13849 = vmatpush1.bf16.msra.mxu0 %v13848_v31  ;;  %v18650_v39 = vld [vmem:[#allocation3 + $0x99] sm:$0xff] }
 0x625   :  { %v3619_v6 = vpop.f32.mrb[66].mxu1  ;;  %v8395_v54 = vld [vmem:[#allocation3 + $0xa3] sm:$0xff]  ;;  %13850 = vmatprep.subr.bf16.mxu0 %v21429_v0  ;;  %21438 = vst [vmem:[#allocation35_spill] sm:$0xff] %v18650_v39 }
 0x626   :  { %3818 = vst.msk [vmem:[#allocation3 + $0xb8] sm:$0xff] %vm3767_vm2, %v3763_v35  ;;  %v3739_v26 = vmax.f32 %v3714_v8, 0.0  ;;  %v3683_v46 = vmul.f32 %v18431_v2, %v3619_v6  ;;  %v13756_v41 = vpop.f32.mrb[67].mxu1  ;;  %v14645_v5 = vpack.c.bf16 %v8395_v54, %v8394_v47  ;;  %v18648_v38 = vld [vmem:[#allocation3 + $0xa7] sm:$0xff] }
 0x627   :  { %v18652_v14 = vld [vmem:[#allocation3 + $0xa1] sm:$0xff] }
 0x628   :  { %21439 = vst [vmem:[#allocation36_spill] sm:$0xff] %v18652_v14  ;;  %v3764_v23 = vmul.f32 %v3739_v26, %v17492_v55  ;;  %v3715_v35 = vadd.f32 %v18433_v4, %v3683_v46  ;;  %14646 = vmatpush1.bf16.msra.mxu1 %v14645_v5  ;;  %v3850_v6 = vld [vmem:[#allocation3 + $0xa5] sm:$0xff] }
 0x629   :  { %v3624_v8 = vpop.f32.mrb[68].mxu1  ;;  %v3851_v47 = vld [vmem:[#allocation3 + $0xad] sm:$0xff]  ;;  %14647 = vmatprep.subr.bf16.mxu1 %v21429_v0 }
 0x62a   :  { %3819 = vst.msk [vmem:[#allocation3 + $0xc0] sm:$0xff] %vm3767_vm2, %v3764_v23  ;;  %v3740_v54 = vmax.f32 %v3715_v35, 0.0  ;;  %v3684_v41 = vmul.f32 %v18431_v2, %v3624_v8  ;;  %v13759_v62 = vpop.f32.mrb[69].mxu1  ;;  %v13851_v31 = vpack.c.bf16 %v3851_v47, %v3850_v6  ;;  %v8396_v55 = vld [vmem:[#allocation3 + $0xab] sm:$0xff] }
 0x62b   :  { %v18666_v46 = vld [vmem:[#allocation3 + $0xaf] sm:$0xff] }
 0x62c   :  { %v3765_v52 = vmul.f32 %v3740_v54, %v17505_v25  ;;  %v3716_v22 = vadd.f32 %v18433_v4, %v3684_v41  ;;  %13852 = vmatpush1.bf16.msra.mxu0 %v13851_v31  ;;  %v18671_v2 = vld [vmem:[#allocation3 + $0xa9] sm:$0xff]  ;;  %v18696_v25 = vld [vmem:[#allocation19 + $0x10] sm:$0xff] }
 0x62d   :  { %v8397_v26 = vld [vmem:[#allocation3 + $0xb3] sm:$0xff]  ;;  %13853 = vmatprep.subr.bf16.mxu0 %v21429_v0  ;;  %21440 = vst [vmem:[#allocation37_spill] sm:$0xff] %v18671_v2 }
 0x62e   :  { %3820 = vst.msk [vmem:[#allocation3 + $0xc8] sm:$0xff] %vm3767_vm2, %v3765_v52  ;;  %v3741_v5 = vmax.f32 %v3716_v22, 0.0  ;;  %v14648_v23 = vpack.c.bf16 %v8397_v26, %v8396_v55  ;;  %v18669_v35 = vld [vmem:[#allocation3 + $0xb7] sm:$0xff]  ;;  %v4017_v22 = vld [vmem:[#allocation3 + $0x6] sm:$0xff]  ;;  %v4018_v41 = vld [vmem:[#allocation3 + $0xe] sm:$0xff] }
 0x62f   :  { %v18673_v62 = vld [vmem:[#allocation3 + $0xb1] sm:$0xff]  ;;  %v18683_v26 = vld [vmem:[#allocation19] sm:$0xff] }
 0x630   :  { %21441 = vst [vmem:[#allocation38_spill] sm:$0xff] %v18673_v62  ;;  %v3766_v31 = vmul.f32 %v3741_v5, %v17517_v40  ;;  %14649 = vmatpush1.bf16.msra.mxu1 %v14648_v23  ;;  %v3852_v8 = vld [vmem:[#allocation3 + $0xb5] sm:$0xff]  ;;  %v11994_v62 = vld [vmem:[%s21417_s7 + $0x350] sm:$0xff] }
 0x631   :  { %v3853_v6 = vld [vmem:[#allocation3 + $0xbd] sm:$0xff]  ;;  %14650 = vmatprep.subr.bf16.mxu1 %v21429_v0  ;;  %v11995_v2 = vld [vmem:[%s21417_s7 + $0x358] sm:$0xff] }
 0x632   :  { %3821 = vst.msk [vmem:[#allocation3 + $0xd0] sm:$0xff] %vm3767_vm2, %v3766_v31  ;;  %v13854_v52 = vpack.c.bf16 %v3853_v6, %v3852_v8  ;;  %v8398_v47 = vld [vmem:[#allocation3 + $0xbb] sm:$0xff]  ;;  %v13857_v31 = vpack.c.bf16 %v4018_v41, %v4017_v22  ;;  %v18701_v22 = vld [vmem:[#allocation19 + $0x28] sm:$0xff] }
 0x633   :  { %v18685_v4 = vld [vmem:[#allocation3 + $0xb9] sm:$0xff] }
 0x634   :  { %13855 = vmatpush1.bf16.msra.mxu0 %v13854_v52  ;;  %21442 = vst [vmem:[#allocation39_spill] sm:$0xff] %v18685_v4  ;;  %v18691_v8 = vld [vmem:[#allocation19 + $0x18] sm:$0xff]  ;;  %v4034_v4 = vld [vmem:[#allocation3 + $0x8e] sm:$0xff] }
 0x635   :  { %3916 = vmatprep.subr.mxu0 %v21426_v1  ;;  %v8399_v54 = vld [vmem:[#allocation3 + $0xc3] sm:$0xff] }
 0x636   :  { %v14651_v55 = vpack.c.bf16 %v8399_v54, %v8398_v47  ;;  %v18687_v40 = vld [vmem:[#allocation3 + $0xc1] sm:$0xff] }
 0x637   :  { %21443 = vst [vmem:[#allocation40_spill] sm:$0xff] %v18687_v40  ;;  %v3854_v5 = vld [vmem:[#allocation3 + $0xc5] sm:$0xff]  ;;  %v11987_v40 = vld [vmem:[%s21417_s7 + $0x318] sm:$0xff] }
 0x638   :  { %3917 = vmatpush1.msra.mxu0 %v3854_v5  ;;  %14652 = vmatpush1.bf16.msra.mxu1 %v14651_v55  ;;  %v4020_v47 = vld [vmem:[#allocation3 + $0x1e] sm:$0xff]  ;;  %v4019_v5 = vld [vmem:[#allocation3 + $0x16] sm:$0xff]  ;;  %v4022_v55 = vld [vmem:[#allocation3 + $0x2e] sm:$0xff] }
 0x639   :  { %3933 = vmatmul.mubr.f32.vlgmr.msra.gmra.mrb[30].mxu0 %v18683_v26  ;;  %13856 = vmatprep.subr.bf16.mxu0 %v21429_v0  ;;  %v8400_v6 = vld [vmem:[#allocation3 + $0xcb] sm:$0xff]  ;;  %v8401_v52 = vld [vmem:[#allocation3 + $0xd3] sm:$0xff]  ;;  %v13860_v41 = vpack.c.bf16 %v4020_v47, %v4019_v5 }
 0x63a   :  { %13858 = vmatpush1.bf16.msra.mxu0 %v13857_v31  ;;  %14653 = vmatprep.subr.bf16.mxu1 %v21429_v0  ;;  %v14654_v54 = vpack.c.bf16 %v8401_v52, %v8400_v6  ;;  %v18707_v31 = vld [vmem:[#allocation19 + $0x20] sm:$0xff]  ;;  %v18710_v52 = vld [vmem:[#allocation19 + $0x38] sm:$0xff]  ;;  %v18715_v47 = vld [vmem:[#allocation19 + $0x30] sm:$0xff] }
 0x63b   :  { %13859 = vmatprep.subr.bf16.mxu0 %v21429_v0  ;;  %11945 = vmatprep.mubr.msk.f32.mxu0 %vm3855_vm3, %v18691_v8  ;;  %v4021_v6 = vld [vmem:[#allocation3 + $0x26] sm:$0xff] }
 0x63c   :  { %14655 = vmatpush1.bf16.msra.mxu1 %v14654_v54  ;;  %v13863_v23 = vpack.c.bf16 %v4022_v55, %v4021_v6  ;;  %v4023_v54 = vld [vmem:[#allocation3 + $0x36] sm:$0xff]  ;;  %v4025_v55 = vld [vmem:[#allocation3 + $0x46] sm:$0xff]  ;;  %v4028_v6 = vld [vmem:[#allocation3 + $0x5e] sm:$0xff] }
 0x63d   :  { %3938 = vmatmul.mubr.f32.gmra.mrb[32].mxu0 %v18696_v25  ;;  %8451 = vmatprep.subr.mxu1 %v21426_v1  ;;  %v13866_v5 = vpack.c.bf16 %v4024_v16, %v4023_v54  ;;  %v13872_v45 = vpack.c.bf16 %v4028_v6, %v4027_v30  ;;  %v4029_v16 = vld [vmem:[#allocation3 + $0x66] sm:$0xff]  ;;  %v4038_v6 = vld [vmem:[#allocation3 + $0xae] sm:$0xff] }
 0x63e   :  { %13861 = vmatpush1.bf16.msra.mxu0 %v13860_v41  ;;  %11946 = vmatprep.mubr.msk.f32.mxu0 %vm3855_vm3, %v18701_v22  ;;  %v4026_v41 = vld [vmem:[#allocation3 + $0x4e] sm:$0xff]  ;;  %v13875_v54 = vpack.c.bf16 %v4030_v3, %v4029_v16  ;;  %v4037_v3 = vld [vmem:[#allocation3 + $0xa6] sm:$0xff] }
 0x63f   :  { %13862 = vmatprep.subr.bf16.mxu0 %v21429_v0  ;;  %v13887_v16 = vpack.c.bf16 %v4038_v6, %v4037_v3  ;;  %v11969_v3 = vld [vmem:[%s21417_s7 + $0x288] sm:$0xff] }
 0x641   :  { %3943 = vmatmul.mubr.f32.gmra.mrb[34].mxu0 %v18707_v31 }
 0x642   :  { %13864 = vmatpush1.bf16.msra.mxu0 %v13863_v23  ;;  %11947 = vmatprep.mubr.msk.f32.mxu0 %vm3855_vm3, %v18710_v52  ;;  %v13869_v23 = vpack.c.bf16 %v4026_v41, %v4025_v55  ;;  %v4033_v41 = vld [vmem:[#allocation3 + $0x86] sm:$0xff] }
 0x643   :  { %13865 = vmatprep.subr.bf16.mxu0 %v21429_v0  ;;  %v13881_v55 = vpack.c.bf16 %v4034_v4, %v4033_v41  ;;  %v21444_v4 = vmov 0.0   ;;  %v11953_v41 = vld [vmem:[%s21417_s7 + $0x208] sm:$0xff] }
 0x645   :  { %3948 = vmatmul.mubr.f32.gmra.mrb[36].mxu0 %v18715_v47 }
 0x646   :  { %13867 = vmatpush1.bf16.msra.mxu0 %v13866_v5  ;;  %11948 = vmatprep.mubr.msk.f32.mxu0 %vm3855_vm3, %v18425_v63  ;;  %v4032_v5 = vld [vmem:[#allocation3 + $0x7e] sm:$0xff]  ;;  %v4031_v63 = vld [vmem:[#allocation3 + $0x76] sm:$0xff] }
 0x647   :  { %13868 = vmatprep.subr.bf16.mxu0 %v21429_v0  ;;  %v13878_v1 = vpack.c.bf16 %v4032_v5, %v4031_v63  ;;  %v4041_v63 = vld [vmem:[#allocation3 + $0xc6] sm:$0xff] }
 0x64a   :  { %13870 = vmatpush1.bf16.msra.mxu0 %v13869_v23  ;;  %v4036_v23 = vld [vmem:[#allocation3 + $0x9e] sm:$0xff] }
 0x64b   :  { %13871 = vmatprep.subr.bf16.mxu0 %v21429_v0 }
 0x64e   :  { %13873 = vmatpush1.bf16.msra.mxu0 %v13872_v45  ;;  %v4035_v45 = vld [vmem:[#allocation3 + $0x96] sm:$0xff] }
 0x64f   :  { %13874 = vmatprep.subr.bf16.mxu0 %v21429_v0  ;;  %v13884_v30 = vpack.c.bf16 %v4036_v23, %v4035_v45  ;;  %v11952_v23 = vld [vmem:[%s21417_s7 + $0x200] sm:$0xff] }
 0x652   :  { %13876 = vmatpush1.bf16.msra.mxu0 %v13875_v54  ;;  %v4040_v54 = vld [vmem:[#allocation3 + $0xbe] sm:$0xff] }
 0x653   :  { %13877 = vmatprep.subr.bf16.mxu0 %v21429_v0 }
 0x656   :  { %13879 = vmatpush1.bf16.msra.mxu0 %v13878_v1  ;;  %v4039_v1 = vld [vmem:[#allocation3 + $0xb6] sm:$0xff] }
 0x657   :  { %13880 = vmatprep.subr.bf16.mxu0 %v21429_v0  ;;  %v13890_v5 = vpack.c.bf16 %v4040_v54, %v4039_v1  ;;  %v11968_v54 = vld [vmem:[%s21417_s7 + $0x280] sm:$0xff] }
 0x65a   :  { %13882 = vmatpush1.bf16.msra.mxu0 %v13881_v55  ;;  %v11961_v55 = vld [vmem:[%s21417_s7 + $0x248] sm:$0xff] }
 0x65b   :  { %13883 = vmatprep.subr.bf16.mxu0 %v21429_v0  ;;  %v13892_v45 = vpack.c.bf16 %v11961_v55, %v11953_v41  ;;  %v11985_v41 = vld [vmem:[%s21417_s7 + $0x308] sm:$0xff] }
 0x65c   :  { %v11993_v55 = vld [vmem:[%s21417_s7 + $0x348] sm:$0xff] }
 0x65e   :  { %13885 = vmatpush1.bf16.msra.mxu0 %v13884_v30  ;;  %v11960_v30 = vld [vmem:[%s21417_s7 + $0x240] sm:$0xff] }
 0x65f   :  { %13886 = vmatprep.subr.bf16.mxu0 %v21429_v0  ;;  %v13894_v6 = vpack.c.bf16 %v11960_v30, %v11952_v23  ;;  %v11984_v23 = vld [vmem:[%s21417_s7 + $0x300] sm:$0xff] }
 0x660   :  { %v11992_v30 = vld [vmem:[%s21417_s7 + $0x340] sm:$0xff] }
 0x662   :  { %13888 = vmatpush1.bf16.msra.mxu0 %v13887_v16  ;;  %v11977_v16 = vld [vmem:[%s21417_s7 + $0x2c8] sm:$0xff] }
 0x663   :  { %13889 = vmatprep.subr.bf16.mxu0 %v21429_v0  ;;  %v13896_v1 = vpack.c.bf16 %v11977_v16, %v11969_v3  ;;  %v12001_v3 = vld [vmem:[%s21417_s7 + $0x388] sm:$0xff] }
 0x664   :  { %v12009_v16 = vld [vmem:[%s21417_s7 + $0x3c8] sm:$0xff] }
 0x666   :  { %13891 = vmatpush1.bf16.msra.mxu0 %v13890_v5  ;;  %v11976_v5 = vld [vmem:[%s21417_s7 + $0x2c0] sm:$0xff] }
 0x667   :  { %4090 = vmatprep.subr.mxu0 %v21444_v4 }
 0x66a   :  { %4091 = vmatpush1.msra.mxu0 %v4041_v63  ;;  %v13898_v63 = vpack.c.bf16 %v11976_v5, %v11968_v54  ;;  %v12000_v54 = vld [vmem:[%s21417_s7 + $0x380] sm:$0xff] }
 0x66b   :  { %4107 = vmatmul.mubr.f32.vlgmr.msra.gmra.mrb[38].mxu0 %v18683_v26  ;;  %13893 = vmatprep.subr.bf16.mxu0 %v13892_v45  ;;  %v13900_v45 = vpack.c.bf16 %v11993_v55, %v11985_v41  ;;  %v12008_v5 = vld [vmem:[%s21417_s7 + $0x3c0] sm:$0xff]  ;;  %v11955_v41 = vld [vmem:[%s21417_s7 + $0x218] sm:$0xff] }
 0x66c   :  { %11949 = vmatprep.mubr.msk.f32.mxu0 %vm3855_vm3, %v18691_v8  ;;  %13895 = vmatpush1.bf16.msra.mxu0 %v13894_v6  ;;  %v13902_v6 = vpack.c.bf16 %v11992_v30, %v11984_v23  ;;  %v11963_v55 = vld [vmem:[%s21417_s7 + $0x258] sm:$0xff] }
 0x66d   :  { %13897 = vmatprep.subr.bf16.mxu0 %v13896_v1  ;;  %v13904_v1 = vpack.c.bf16 %v12009_v16, %v12001_v3  ;;  %v13908_v23 = vpack.c.bf16 %v11963_v55, %v11955_v41  ;;  %v11962_v41 = vld [vmem:[%s21417_s7 + $0x250] sm:$0xff]  ;;  %v11971_v55 = vld [vmem:[%s21417_s7 + $0x298] sm:$0xff] }
 0x66f   :  { %4112 = vmatmul.mubr.f32.gmra.mrb[40].mxu0 %v18696_v25 }
 0x670   :  { %11950 = vmatprep.mubr.msk.f32.mxu0 %vm3855_vm3, %v18701_v22  ;;  %13899 = vmatpush1.bf16.msra.mxu0 %v13898_v63  ;;  %v13906_v63 = vpack.c.bf16 %v12008_v5, %v12000_v54 }
 0x671   :  { %13901 = vmatprep.subr.bf16.mxu0 %v13900_v45 }
 0x673   :  { %4117 = vmatmul.mubr.f32.gmra.mrb[42].mxu0 %v18707_v31 }
 0x674   :  { %11951 = vmatprep.mubr.msk.f32.mxu0 %vm3855_vm3, %v18710_v52  ;;  %13903 = vmatpush1.bf16.msra.mxu0 %v13902_v6 }
 0x675   :  { %13905 = vmatprep.subr.bf16.mxu0 %v13904_v1 }
 0x677   :  { %4122 = vmatmul.mubr.f32.gmra.mrb[44].mxu0 %v18715_v47 }
 0x678   :  { %4268 = vmatprep.mubr.f32.mxu0 %v21444_v4  ;;  %13907 = vmatpush1.bf16.msra.mxu0 %v13906_v63  ;;  %v11954_v63 = vld [vmem:[%s21417_s7 + $0x210] sm:$0xff] }
 0x679   :  { %13909 = vmatprep.subr.bf16.mxu0 %v13908_v23  ;;  %v11979_v23 = vld [vmem:[%s21417_s7 + $0x2d8] sm:$0xff] }
 0x70c   :  { %v18795_v45 = vpop.f32.mrb[30].mxu0 }
 0x70d   :  { %v3936_v30 = vpop.f32.mrb[31].mxu0 }
 0x70e   :  { %v13910_v30 = vpack.c.bf16 %v11962_v41, %v11954_v63 }
 0x710   :  { %v18797_v6 = vpop.f32.mrb[32].mxu0 }
 0x711   :  { %v3941_v3 = vpop.f32.mrb[33].mxu0 }
 0x712   :  { %v13912_v3 = vpack.c.bf16 %v11979_v23, %v11971_v55  ;;  %v13916_v55 = vpack.c.bf16 %v11995_v2, %v11987_v40  ;;  %v11986_v23 = vld [vmem:[%s21417_s7 + $0x310] sm:$0xff] }
 0x713   :  { %v13918_v2 = vpack.c.bf16 %v11994_v62, %v11986_v23  ;;  %v11965_v62 = vld [vmem:[%s21417_s7 + $0x268] sm:$0xff] }
 0x714   :  { %v18799_v16 = vpop.f32.mrb[34].mxu0 }
 0x715   :  { %v3946_v54 = vpop.f32.mrb[35].mxu0 }
 0x716   :  { %v11970_v54 = vld [vmem:[%s21417_s7 + $0x290] sm:$0xff] }
 0x718   :  { %v18801_v1 = vpop.f32.mrb[36].mxu0 }
 0x719   :  { %v3951_v5 = vpop.f32.mrb[37].mxu0 }
 0x71a   :  { %v11978_v5 = vld [vmem:[%s21417_s7 + $0x2d0] sm:$0xff] }
 0x71b   :  { %v13914_v41 = vpack.c.bf16 %v11978_v5, %v11970_v54  ;;  %v12002_v54 = vld [vmem:[%s21417_s7 + $0x390] sm:$0xff] }
 0x71c   :  { %v12010_v5 = vld [vmem:[%s21417_s7 + $0x3d0] sm:$0xff] }
 0x73e   :  { %v18821_v0 = vpop.f32.mrb[38].mxu0 }
 0x73f   :  { %v4110_v63 = vpop.f32.mrb[39].mxu0  ;;  %12016 = vmatmul.mubr.msk.f32.vlgmr.msra.gmra.mrb[46].mxu0 %vm3767_vm2, %v18821_v0 }
 0x740   :  { %13911 = vmatpush1.bf16.msra.mxu0 %v13910_v30  ;;  %4274 = vmatprep.mubr.f32.mxu0 %v21444_v4  ;;  %v12003_v63 = vld [vmem:[%s21417_s7 + $0x398] sm:$0xff] }
 0x741   :  { %13913 = vmatprep.subr.bf16.mxu0 %v13912_v3  ;;  %v12011_v30 = vld [vmem:[%s21417_s7 + $0x3d8] sm:$0xff] }
 0x742   :  { %v18838_v39 = vpop.f32.mrb[40].mxu0  ;;  %v13920_v40 = vpack.c.bf16 %v12011_v30, %v12003_v63  ;;  %v11956_v63 = vld [vmem:[%s21417_s7 + $0x220] sm:$0xff] }
 0x743   :  { %v4115_v3 = vpop.f32.mrb[41].mxu0  ;;  %12017 = vmatmul.mubr.msk.f32.gmra.mrb[48].mxu0 %vm3767_vm2, %v18838_v39  ;;  %v11964_v30 = vld [vmem:[%s21417_s7 + $0x260] sm:$0xff] }
 0x744   :  { %13915 = vmatpush1.bf16.msra.mxu0 %v13914_v41  ;;  %4280 = vmatprep.mubr.f32.mxu0 %v21444_v4  ;;  %v11957_v3 = vld [vmem:[%s21417_s7 + $0x228] sm:$0xff] }
 0x745   :  { %13917 = vmatprep.subr.bf16.mxu0 %v13916_v55  ;;  %v13922_v55 = vpack.c.bf16 %v12010_v5, %v12002_v54  ;;  %v13924_v23 = vpack.c.bf16 %v11965_v62, %v11957_v3  ;;  %v13926_v54 = vpack.c.bf16 %v11964_v30, %v11956_v63  ;;  %v11972_v3 = vld [vmem:[%s21417_s7 + $0x2a0] sm:$0xff] }
 0x746   :  { %v18855_v14 = vpop.f32.mrb[42].mxu0  ;;  %v11980_v62 = vld [vmem:[%s21417_s7 + $0x2e0] sm:$0xff] }
 0x747   :  { %v4120_v41 = vpop.f32.mrb[43].mxu0  ;;  %12018 = vmatmul.mubr.msk.f32.gmra.mrb[50].mxu0 %vm3767_vm2, %v18855_v14  ;;  %v11988_v30 = vld [vmem:[%s21417_s7 + $0x320] sm:$0xff] }
 0x748   :  { %13919 = vmatpush1.bf16.msra.mxu0 %v13918_v2  ;;  %4286 = vmatprep.mubr.f32.mxu0 %v21444_v4  ;;  %v11973_v41 = vld [vmem:[%s21417_s7 + $0x2a8] sm:$0xff] }
 0x749   :  { %13921 = vmatprep.subr.bf16.mxu0 %v13920_v40  ;;  %v11981_v2 = vld [vmem:[%s21417_s7 + $0x2e8] sm:$0xff] }
 0x74a   :  { %v18872_v53 = vpop.f32.mrb[44].mxu0  ;;  %v13928_v5 = vpack.c.bf16 %v11981_v2, %v11973_v41  ;;  %v11996_v41 = vld [vmem:[%s21417_s7 + $0x360] sm:$0xff]  ;;  %v12005_v2 = vld [vmem:[%s21417_s7 + $0x3a8] sm:$0xff] }
 0x74b   :  { %v4125_v40 = vpop.f32.mrb[45].mxu0  ;;  %12019 = vmatmul.mubr.msk.f32.gmra.mrb[52].mxu0 %vm3767_vm2, %v18872_v53 }
 0x74c   :  { %13923 = vmatpush1.bf16.msra.mxu0 %v13922_v55  ;;  %4357 = vmatprep.mubr.f32.mxu0 %v21444_v4  ;;  %v11989_v40 = vld [vmem:[%s21417_s7 + $0x328] sm:$0xff] }
 0x74d   :  { %13925 = vmatprep.subr.bf16.mxu0 %v13924_v23  ;;  %v11997_v55 = vld [vmem:[%s21417_s7 + $0x368] sm:$0xff]  ;;  %v13930_v23 = vpack.c.bf16 %v11980_v62, %v11972_v3  ;;  %v12004_v62 = vld [vmem:[%s21417_s7 + $0x3a0] sm:$0xff] }
 0x74e   :  { %v13932_v63 = vpack.c.bf16 %v11997_v55, %v11989_v40  ;;  %v12012_v40 = vld [vmem:[%s21417_s7 + $0x3e0] sm:$0xff]  ;;  %v11959_v55 = vld [vmem:[%s21417_s7 + $0x238] sm:$0xff] }
 0x74f   :  { %12020 = vmatmul.mubr.msk.f32.vlgmr.msra.gmra.mrb[54].mxu0 %vm3767_vm2, %v18821_v0 }
 0x750   :  { %13927 = vmatpush1.bf16.msra.mxu0 %v13926_v54  ;;  %4363 = vmatprep.mubr.f32.mxu0 %v21444_v4  ;;  %v12013_v54 = vld [vmem:[%s21417_s7 + $0x3e8] sm:$0xff] }
 0x751   :  { %13929 = vmatprep.subr.bf16.mxu0 %v13928_v5  ;;  %v13934_v5 = vpack.c.bf16 %v11996_v41, %v11988_v30  ;;  %v13936_v3 = vpack.c.bf16 %v12013_v54, %v12005_v2  ;;  %v11958_v41 = vld [vmem:[%s21417_s7 + $0x230] sm:$0xff]  ;;  %v11975_v54 = vld [vmem:[%s21417_s7 + $0x2b8] sm:$0xff] }
 0x752   :  { %v11966_v2 = vld [vmem:[%s21417_s7 + $0x270] sm:$0xff] }
 0x753   :  { %12021 = vmatmul.mubr.msk.f32.gmra.mrb[56].mxu0 %vm3767_vm2, %v18838_v39 }
 0x754   :  { %13931 = vmatpush1.bf16.msra.mxu0 %v13930_v23  ;;  %4369 = vmatprep.mubr.f32.mxu0 %v21444_v4  ;;  %v11967_v23 = vld [vmem:[%s21417_s7 + $0x278] sm:$0xff] }
 0x755   :  { %13933 = vmatprep.subr.bf16.mxu0 %v13932_v63  ;;  %v13938_v63 = vpack.c.bf16 %v12012_v40, %v12004_v62  ;;  %v13940_v30 = vpack.c.bf16 %v11967_v23, %v11959_v55  ;;  %v11974_v40 = vld [vmem:[%s21417_s7 + $0x2b0] sm:$0xff]  ;;  %v11991_v23 = vld [vmem:[%s21417_s7 + $0x338] sm:$0xff] }
 0x756   :  { %v11982_v55 = vld [vmem:[%s21417_s7 + $0x2f0] sm:$0xff] }
 0x757   :  { %12022 = vmatmul.mubr.msk.f32.gmra.mrb[58].mxu0 %vm3767_vm2, %v18855_v14 }
 0x758   :  { %13935 = vmatpush1.bf16.msra.mxu0 %v13934_v5  ;;  %4375 = vmatprep.mubr.f32.mxu0 %v21444_v4  ;;  %v11983_v5 = vld [vmem:[%s21417_s7 + $0x2f8] sm:$0xff] }
 0x759   :  { %13937 = vmatprep.subr.bf16.mxu0 %v13936_v3  ;;  %v13942_v3 = vpack.c.bf16 %v11966_v2, %v11958_v41  ;;  %v13944_v62 = vpack.c.bf16 %v11983_v5, %v11975_v54  ;;  %v11990_v2 = vld [vmem:[%s21417_s7 + $0x330] sm:$0xff]  ;;  %v12007_v5 = vld [vmem:[%s21417_s7 + $0x3b8] sm:$0xff] }
 0x75a   :  { %v11998_v54 = vld [vmem:[%s21417_s7 + $0x370] sm:$0xff] }
 0x75b   :  { %12023 = vmatmul.mubr.msk.f32.gmra.mrb[60].mxu0 %vm3767_vm2, %v18872_v53 }
 0x75c   :  { %13939 = vmatpush1.bf16.msra.mxu0 %v13938_v63  ;;  %4446 = vmatprep.mubr.f32.mxu0 %v21444_v4  ;;  %v11999_v63 = vld [vmem:[%s21417_s7 + $0x378] sm:$0xff] }
 0x75d   :  { %13941 = vmatprep.subr.bf16.mxu0 %v13940_v30  ;;  %v13946_v30 = vpack.c.bf16 %v11982_v55, %v11974_v40  ;;  %v13948_v41 = vpack.c.bf16 %v11999_v63, %v11991_v23  ;;  %v12006_v55 = vld [vmem:[%s21417_s7 + $0x3b0] sm:$0xff]  ;;  %v3954_v63 = vld [vmem:[%s21417_s7 + $0x8] sm:$0xff] }
 0x75e   :  { %v12014_v23 = vld [vmem:[%s21417_s7 + $0x3f0] sm:$0xff] }
 0x75f   :  { %12024 = vmatmul.mubr.msk.f32.vlgmr.msra.gmra.mrb[62].mxu0 %vm3767_vm2, %v18821_v0 }
 0x760   :  { %13943 = vmatpush1.bf16.msra.mxu0 %v13942_v3  ;;  %4452 = vmatprep.mubr.f32.mxu0 %v21444_v4  ;;  %v12015_v3 = vld [vmem:[%s21417_s7 + $0x3f8] sm:$0xff] }
 0x761   :  { %13945 = vmatprep.subr.bf16.mxu0 %v13944_v62  ;;  %v13950_v62 = vpack.c.bf16 %v11998_v54, %v11990_v2  ;;  %v13952_v40 = vpack.c.bf16 %v12015_v3, %v12007_v5  ;;  %v3953_v54 = vld [vmem:[%s21417_s7] sm:$0xff]  ;;  %v3970_v3 = vld [vmem:[%s21417_s7 + $0x88] sm:$0xff] }
 0x762   :  { %v3961_v5 = vld [vmem:[%s21417_s7 + $0x40] sm:$0xff] }
 0x763   :  { %12025 = vmatmul.mubr.msk.f32.gmra.mrb[64].mxu0 %vm3767_vm2, %v18838_v39 }
 0x764   :  { %13947 = vmatpush1.bf16.msra.mxu0 %v13946_v30  ;;  %4458 = vmatprep.mubr.f32.mxu0 %v21444_v4  ;;  %v3962_v30 = vld [vmem:[%s21417_s7 + $0x48] sm:$0xff] }
 0x765   :  { %13949 = vmatprep.subr.bf16.mxu0 %v13948_v41  ;;  %v13954_v41 = vpack.c.bf16 %v12014_v23, %v12006_v55  ;;  %v13956_v2 = vpack.c.bf16 %v3962_v30, %v3954_v63  ;;  %v3969_v23 = vld [vmem:[%s21417_s7 + $0x80] sm:$0xff]  ;;  %v3986_v30 = vld [vmem:[%s21417_s7 + $0x108] sm:$0xff] }
 0x766   :  { %v3977_v63 = vld [vmem:[%s21417_s7 + $0xc0] sm:$0xff] }
 0x767   :  { %12026 = vmatmul.mubr.msk.f32.gmra.mrb[66].mxu0 %vm3767_vm2, %v18855_v14 }
 0x768   :  { %13951 = vmatpush1.bf16.msra.mxu0 %v13950_v62  ;;  %4464 = vmatprep.mubr.f32.mxu0 %v21444_v4  ;;  %v3978_v62 = vld [vmem:[%s21417_s7 + $0xc8] sm:$0xff] }
 0x769   :  { %13953 = vmatprep.subr.bf16.mxu0 %v13952_v40  ;;  %v13958_v40 = vpack.c.bf16 %v3961_v5, %v3953_v54  ;;  %v13960_v55 = vpack.c.bf16 %v3978_v62, %v3970_v3  ;;  %v3985_v5 = vld [vmem:[%s21417_s7 + $0x100] sm:$0xff]  ;;  %v4002_v62 = vld [vmem:[%s21417_s7 + $0x188] sm:$0xff] }
 0x76a   :  { %v3993_v3 = vld [vmem:[%s21417_s7 + $0x140] sm:$0xff] }
 0x76b   :  { %12027 = vmatmul.mubr.msk.f32.gmra.mrb[68].mxu0 %vm3767_vm2, %v18872_v53 }
 0x76c   :  { %13955 = vmatpush1.bf16.msra.mxu0 %v13954_v41  ;;  %4535 = vmatprep.mubr.f32.mxu0 %v21444_v4  ;;  %v3994_v41 = vld [vmem:[%s21417_s7 + $0x148] sm:$0xff] }
 0x76d   :  { %13957 = vmatprep.subr.bf16.mxu0 %v13956_v2  ;;  %v13962_v2 = vpack.c.bf16 %v3977_v63, %v3969_v23  ;;  %v13964_v54 = vpack.c.bf16 %v3994_v41, %v3986_v30  ;;  %v4001_v23 = vld [vmem:[%s21417_s7 + $0x180] sm:$0xff]  ;;  %v3956_v30 = vld [vmem:[%s21417_s7 + $0x18] sm:$0xff] }
 0x76e   :  { %v4009_v63 = vld [vmem:[%s21417_s7 + $0x1c0] sm:$0xff] }
 0x76f   :  { %12028 = vmatmul.mubr.msk.f32.vlgmr.msra.gmra.mrb[70].mxu0 %vm3767_vm2, %v18821_v0  ;;  %v4010_v0 = vld [vmem:[%s21417_s7 + $0x1c8] sm:$0xff]  ;;  %v13970_v41 = vpack.c.bf16 %v4009_v63, %v4001_v23  ;;  %v3988_v23 = vld [vmem:[%s21417_s7 + $0x118] sm:$0xff] }
 0x770   :  { %13959 = vmatpush1.bf16.msra.mxu0 %v13958_v40  ;;  %4541 = vmatprep.mubr.f32.mxu0 %v21444_v4  ;;  %v13966_v40 = vpack.c.bf16 %v3993_v3, %v3985_v5  ;;  %v3963_v5 = vld [vmem:[%s21417_s7 + $0x50] sm:$0xff]  ;;  %v3972_v3 = vld [vmem:[%s21417_s7 + $0x98] sm:$0xff] }
 0x771   :  { %13961 = vmatprep.subr.bf16.mxu0 %v13960_v55  ;;  %v13968_v55 = vpack.c.bf16 %v4010_v0, %v4002_v62 }
 0x773   :  { %12029 = vmatmul.mubr.msk.f32.gmra.mrb[72].mxu0 %vm3767_vm2, %v18838_v39  ;;  %v3964_v39 = vld [vmem:[%s21417_s7 + $0x58] sm:$0xff] }
 0x774   :  { %13963 = vmatpush1.bf16.msra.mxu0 %v13962_v2  ;;  %4547 = vmatprep.mubr.f32.mxu0 %v21444_v4  ;;  %v13972_v2 = vpack.c.bf16 %v3964_v39, %v3956_v30  ;;  %v3987_v39 = vld [vmem:[%s21417_s7 + $0x110] sm:$0xff] }
 0x775   :  { %13965 = vmatprep.subr.bf16.mxu0 %v13964_v54  ;;  %v3955_v54 = vld [vmem:[%s21417_s7 + $0x10] sm:$0xff] }
 0x776   :  { %v13974_v62 = vpack.c.bf16 %v3963_v5, %v3955_v54  ;;  %v4012_v54 = vld [vmem:[%s21417_s7 + $0x1d8] sm:$0xff] }
 0x777   :  { %12030 = vmatmul.mubr.msk.f32.gmra.mrb[74].mxu0 %vm3767_vm2, %v18855_v14  ;;  %v3980_v14 = vld [vmem:[%s21417_s7 + $0xd8] sm:$0xff] }
 0x778   :  { %13967 = vmatpush1.bf16.msra.mxu0 %v13966_v40  ;;  %4553 = vmatprep.mubr.f32.mxu0 %v21444_v4  ;;  %v13976_v0 = vpack.c.bf16 %v3980_v14, %v3972_v3  ;;  %v3971_v40 = vld [vmem:[%s21417_s7 + $0x90] sm:$0xff] }
 0x779   :  { %13969 = vmatprep.subr.bf16.mxu0 %v13968_v55  ;;  %v3979_v55 = vld [vmem:[%s21417_s7 + $0xd0] sm:$0xff] }
 0x77a   :  { %v13978_v63 = vpack.c.bf16 %v3979_v55, %v3971_v40  ;;  %v4003_v14 = vld [vmem:[%s21417_s7 + $0x190] sm:$0xff]  ;;  %v3966_v40 = vld [vmem:[%s21417_s7 + $0x68] sm:$0xff] }
 0x77b   :  { %12031 = vmatmul.mubr.msk.f32.gmra.mrb[76].mxu0 %vm3767_vm2, %v18872_v53  ;;  %v3996_v53 = vld [vmem:[%s21417_s7 + $0x158] sm:$0xff] }
 0x77c   :  { %13971 = vmatpush1.bf16.msra.mxu0 %v13970_v41  ;;  %4636 = vmatprep.mubr.f32.mxu0 %v21444_v4  ;;  %v13980_v30 = vpack.c.bf16 %v3996_v53, %v3988_v23  ;;  %v3995_v41 = vld [vmem:[%s21417_s7 + $0x150] sm:$0xff]  ;;  %v3957_v53 = vld [vmem:[%s21417_s7 + $0x20] sm:$0xff] }
 0x77d   :  { %13973 = vmatprep.subr.bf16.mxu0 %v13972_v2  ;;  %v4004_v2 = vld [vmem:[%s21417_s7 + $0x198] sm:$0xff]  ;;  %v13982_v5 = vpack.c.bf16 %v3995_v41, %v3987_v39  ;;  %v3982_v39 = vld [vmem:[%s21417_s7 + $0xe8] sm:$0xff] }
 0x77e   :  { %v13984_v3 = vpack.c.bf16 %v4012_v54, %v4004_v2  ;;  %v3973_v54 = vld [vmem:[%s21417_s7 + $0xa0] sm:$0xff] }
 0x77f   :  { %12032 = vmatmul.mubr.msk.f32.vlgmr.msra.gmra.mrb[46].mxu0 %vm3767_vm2, %v18795_v45 }
 0x780   :  { %13975 = vmatpush1.bf16.msra.mxu0 %v13974_v62  ;;  %4642 = vmatprep.mubr.f32.mxu0 %v21444_v4  ;;  %v4011_v62 = vld [vmem:[%s21417_s7 + $0x1d0] sm:$0xff] }
 0x781   :  { %13977 = vmatprep.subr.bf16.mxu0 %v13976_v0  ;;  %v3958_v0 = vld [vmem:[%s21417_s7 + $0x28] sm:$0xff]  ;;  %v13986_v55 = vpack.c.bf16 %v4011_v62, %v4003_v14 }
 0x782   :  { %v13988_v23 = vpack.c.bf16 %v3966_v40, %v3958_v0  ;;  %v3998_v14 = vld [vmem:[%s21417_s7 + $0x168] sm:$0xff]  ;;  %v3989_v40 = vld [vmem:[%s21417_s7 + $0x120] sm:$0xff] }
 0x783   :  { %12033 = vmatmul.mubr.msk.f32.gmra.mrb[48].mxu0 %vm3767_vm2, %v18797_v6 }
 0x784   :  { %13979 = vmatpush1.bf16.msra.mxu0 %v13978_v63  ;;  %4648 = vmatprep.mubr.f32.mxu0 %v21444_v4  ;;  %v3965_v63 = vld [vmem:[%s21417_s7 + $0x60] sm:$0xff] }
 0x785   :  { %13981 = vmatprep.subr.bf16.mxu0 %v13980_v30  ;;  %v3974_v30 = vld [vmem:[%s21417_s7 + $0xa8] sm:$0xff]  ;;  %v13990_v41 = vpack.c.bf16 %v3965_v63, %v3957_v53 }
 0x786   :  { %v13992_v2 = vpack.c.bf16 %v3982_v39, %v3974_v30  ;;  %v4014_v53 = vld [vmem:[%s21417_s7 + $0x1e8] sm:$0xff]  ;;  %v4005_v39 = vld [vmem:[%s21417_s7 + $0x1a0] sm:$0xff] }
 0x787   :  { %12034 = vmatmul.mubr.msk.f32.gmra.mrb[50].mxu0 %vm3767_vm2, %v18799_v16 }
 0x788   :  { %13983 = vmatpush1.bf16.msra.mxu0 %v13982_v5  ;;  %4654 = vmatprep.mubr.f32.mxu0 %v21444_v4  ;;  %v3981_v5 = vld [vmem:[%s21417_s7 + $0xe0] sm:$0xff] }
 0x789   :  { %13985 = vmatprep.subr.bf16.mxu0 %v13984_v3  ;;  %v3990_v3 = vld [vmem:[%s21417_s7 + $0x128] sm:$0xff]  ;;  %v13994_v62 = vpack.c.bf16 %v3981_v5, %v3973_v54  ;;  %v3968_v54 = vld [vmem:[%s21417_s7 + $0x78] sm:$0xff] }
 0x78a   :  { %v13996_v0 = vpack.c.bf16 %v3998_v14, %v3990_v3  ;;  %v3959_v14 = vld [vmem:[%s21417_s7 + $0x30] sm:$0xff] }
 0x78b   :  { %12035 = vmatmul.mubr.msk.f32.gmra.mrb[52].mxu0 %vm3767_vm2, %v18801_v1 }
 0x78c   :  { %13987 = vmatpush1.bf16.msra.mxu0 %v13986_v55  ;;  %4725 = vmatprep.mubr.f32.mxu0 %v21444_v4  ;;  %v3997_v55 = vld [vmem:[%s21417_s7 + $0x160] sm:$0xff] }
 0x78d   :  { %13989 = vmatprep.subr.bf16.mxu0 %v13988_v23  ;;  %v4006_v23 = vld [vmem:[%s21417_s7 + $0x1a8] sm:$0xff]  ;;  %v13998_v63 = vpack.c.bf16 %v3997_v55, %v3989_v40  ;;  %v3984_v40 = vld [vmem:[%s21417_s7 + $0xf8] sm:$0xff] }
 0x78e   :  { %v14000_v30 = vpack.c.bf16 %v4014_v53, %v4006_v23  ;;  %v3975_v53 = vld [vmem:[%s21417_s7 + $0xb0] sm:$0xff] }
 0x78f   :  { %12036 = vmatmul.mubr.msk.f32.vlgmr.msra.gmra.mrb[54].mxu0 %vm3767_vm2, %v18795_v45 }
 0x790   :  { %13991 = vmatpush1.bf16.msra.mxu0 %v13990_v41  ;;  %4731 = vmatprep.mubr.f32.mxu0 %v21444_v4  ;;  %v4013_v41 = vld [vmem:[%s21417_s7 + $0x1e0] sm:$0xff] }
 0x791   :  { %13993 = vmatprep.subr.bf16.mxu0 %v13992_v2  ;;  %v3960_v2 = vld [vmem:[%s21417_s7 + $0x38] sm:$0xff]  ;;  %v14002_v5 = vpack.c.bf16 %v4013_v41, %v4005_v39 }
 0x792   :  { %v14004_v3 = vpack.c.bf16 %v3968_v54, %v3960_v2  ;;  %v4000_v39 = vld [vmem:[%s21417_s7 + $0x178] sm:$0xff]  ;;  %v3991_v54 = vld [vmem:[%s21417_s7 + $0x130] sm:$0xff] }
 0x793   :  { %12037 = vmatmul.mubr.msk.f32.gmra.mrb[56].mxu0 %vm3767_vm2, %v18797_v6 }
 0x794   :  { %13995 = vmatpush1.bf16.msra.mxu0 %v13994_v62  ;;  %4737 = vmatprep.mubr.f32.mxu0 %v21444_v4  ;;  %v3967_v62 = vld [vmem:[%s21417_s7 + $0x70] sm:$0xff] }
 0x795   :  { %13997 = vmatprep.subr.bf16.mxu0 %v13996_v0  ;;  %v3976_v0 = vld [vmem:[%s21417_s7 + $0xb8] sm:$0xff]  ;;  %v14006_v55 = vpack.c.bf16 %v3967_v62, %v3959_v14 }
 0x796   :  { %v14008_v23 = vpack.c.bf16 %v3984_v40, %v3976_v0  ;;  %v4016_v14 = vld [vmem:[%s21417_s7 + $0x1f8] sm:$0xff]  ;;  %v4007_v40 = vld [vmem:[%s21417_s7 + $0x1b0] sm:$0xff] }
 0x797   :  { %12038 = vmatmul.mubr.msk.f32.gmra.mrb[58].mxu0 %vm3767_vm2, %v18799_v16 }
 0x798   :  { %13999 = vmatpush1.bf16.msra.mxu0 %v13998_v63  ;;  %4743 = vmatprep.mubr.f32.mxu0 %v21444_v4  ;;  %v3983_v63 = vld [vmem:[%s21417_s7 + $0xf0] sm:$0xff] }
 0x799   :  { %14001 = vmatprep.subr.bf16.mxu0 %v14000_v30  ;;  %v3992_v30 = vld [vmem:[%s21417_s7 + $0x138] sm:$0xff]  ;;  %v14010_v41 = vpack.c.bf16 %v3983_v63, %v3975_v53  ;;  %v4928_v53 = vld [vmem:[#allocation3 + $0x7] sm:$0xff]  ;;  %v21445_v63 = vmov 0.0|0.0  }
 0x79a   :  { %v14012_v2 = vpack.c.bf16 %v4000_v39, %v3992_v30  ;;  %v16495_v30 = vld [vmem:[#allocation3 + $0xf] sm:$0xff] }
 0x79b   :  { %12039 = vmatmul.mubr.msk.f32.gmra.mrb[60].mxu0 %vm3767_vm2, %v18801_v1  ;;  %v14021_v39 = vpack.c.bf16 %v16495_v30, %v4928_v53  ;;  %v16506_v53 = vld [vmem:[#allocation3 + $0x5f] sm:$0xff] }
 0x79c   :  { %14003 = vmatpush1.bf16.msra.mxu0 %v14002_v5  ;;  %4814 = vmatprep.mubr.f32.mxu0 %v21444_v4  ;;  %v3999_v5 = vld [vmem:[%s21417_s7 + $0x170] sm:$0xff] }
 0x79d   :  { %14005 = vmatprep.subr.bf16.mxu0 %v14004_v3  ;;  %v4008_v3 = vld [vmem:[%s21417_s7 + $0x1b8] sm:$0xff]  ;;  %v14014_v62 = vpack.c.bf16 %v3999_v5, %v3991_v54  ;;  %v16498_v5 = vld [vmem:[#allocation3 + $0x27] sm:$0xff] }
 0x79e   :  { %v14016_v0 = vpack.c.bf16 %v4016_v14, %v4008_v3  ;;  %v16499_v3 = vld [vmem:[#allocation3 + $0x2f] sm:$0xff] }
 0x79f   :  { %12040 = vmatmul.mubr.msk.f32.vlgmr.msra.gmra.mrb[62].mxu0 %vm3767_vm2, %v18795_v45  ;;  %v14027_v14 = vpack.c.bf16 %v16499_v3, %v16498_v5  ;;  %v16511_v3 = vld [vmem:[#allocation3 + $0x87] sm:$0xff] }
 0x7a0   :  { %14007 = vmatpush1.bf16.msra.mxu0 %v14006_v55  ;;  %4820 = vmatprep.mubr.f32.mxu0 %v21444_v4  ;;  %v4015_v55 = vld [vmem:[%s21417_s7 + $0x1f0] sm:$0xff] }
 0x7a1   :  { %14009 = vmatprep.subr.bf16.mxu0 %v14008_v23  ;;  %v14018_v23 = vpack.c.bf16 %v4015_v55, %v4007_v40  ;;  %v16504_v40 = vld [vmem:[#allocation3 + $0x4f] sm:$0xff] }
 0x7a3   :  { %12041 = vmatmul.mubr.msk.f32.gmra.mrb[64].mxu0 %vm3767_vm2, %v18797_v6 }
 0x7a4   :  { %14011 = vmatpush1.bf16.msra.mxu0 %v14010_v41  ;;  %4826 = vmatprep.mubr.f32.mxu0 %v21444_v4  ;;  %v16496_v41 = vld [vmem:[#allocation3 + $0x17] sm:$0xff] }
 0x7a5   :  { %14013 = vmatprep.subr.bf16.mxu0 %v14012_v2  ;;  %v16497_v2 = vld [vmem:[#allocation3 + $0x1f] sm:$0xff] }
 0x7a6   :  { %v14024_v54 = vpack.c.bf16 %v16497_v2, %v16496_v41  ;;  %v16509_v2 = vld [vmem:[#allocation3 + $0x77] sm:$0xff] }
 0x7a7   :  { %12042 = vmatmul.mubr.msk.f32.gmra.mrb[66].mxu0 %vm3767_vm2, %v18799_v16 }
 0x7a8   :  { %14015 = vmatpush1.bf16.msra.mxu0 %v14014_v62  ;;  %4832 = vmatprep.mubr.f32.mxu0 %v21444_v4  ;;  %v16501_v62 = vld [vmem:[#allocation3 + $0x3f] sm:$0xff] }
 0x7a9   :  { %14017 = vmatprep.subr.bf16.mxu0 %v14016_v0 }
 0x7ab   :  { %12043 = vmatmul.mubr.msk.f32.gmra.mrb[68].mxu0 %vm3767_vm2, %v18801_v1 }
 0x7ac   :  { %14019 = vmatpush1.bf16.msra.mxu0 %v14018_v23  ;;  %4903 = vmatprep.mubr.f32.mxu0 %v21444_v4  ;;  %v16505_v23 = vld [vmem:[#allocation3 + $0x57] sm:$0xff] }
 0x7ad   :  { %14020 = vmatprep.subr.bf16.mxu0 %v21445_v63  ;;  %v14036_v30 = vpack.c.bf16 %v16506_v53, %v16505_v23  ;;  %v12053_v53 = vld [vmem:[%s21417_s7 + $0x408] sm:$0xff] }
 0x7af   :  { %12044 = vmatmul.mubr.msk.f32.vlgmr.msra.gmra.mrb[70].mxu0 %vm3767_vm2, %v18795_v45  ;;  %v16500_v45 = vld [vmem:[#allocation3 + $0x37] sm:$0xff] }
 0x7b0   :  { %14022 = vmatpush1.bf16.msra.mxu0 %v14021_v39  ;;  %4909 = vmatprep.mubr.f32.mxu0 %v21444_v4  ;;  %v14030_v0 = vpack.c.bf16 %v16501_v62, %v16500_v45  ;;  %v16508_v39 = vld [vmem:[#allocation3 + $0x6f] sm:$0xff]  ;;  %v16513_v62 = vld [vmem:[#allocation3 + $0x97] sm:$0xff] }
 0x7b1   :  { %14023 = vmatprep.subr.bf16.mxu0 %v21445_v63 }
 0x7b3   :  { %12045 = vmatmul.mubr.msk.f32.gmra.mrb[72].mxu0 %vm3767_vm2, %v18797_v6  ;;  %v19240_v6 = vld [vmem:[#allocation19 + $0x8] sm:$0xff] }
 0x7b4   :  { %14025 = vmatpush1.bf16.msra.mxu0 %v14024_v54  ;;  %4915 = vmatprep.mubr.f32.mxu0 %v21444_v4  ;;  %v16510_v54 = vld [vmem:[#allocation3 + $0x7f] sm:$0xff] }
 0x7b5   :  { %14026 = vmatprep.subr.bf16.mxu0 %v21445_v63  ;;  %v14042_v5 = vpack.c.bf16 %v16510_v54, %v16509_v2  ;;  %v12077_v2 = vld [vmem:[%s21417_s7 + $0x4c8] sm:$0xff] }
 0x7b7   :  { %12046 = vmatmul.mubr.msk.f32.gmra.mrb[74].mxu0 %vm3767_vm2, %v18799_v16  ;;  %v16503_v16 = vld [vmem:[#allocation3 + $0x47] sm:$0xff] }
 0x7b8   :  { %14028 = vmatpush1.bf16.msra.mxu0 %v14027_v14  ;;  %4921 = vmatprep.mubr.f32.mxu0 %v21444_v4  ;;  %v14033_v55 = vpack.c.bf16 %v16504_v40, %v16503_v16  ;;  %v16512_v14 = vld [vmem:[#allocation3 + $0x8f] sm:$0xff]  ;;  %v14051_v40 = vpack.c.bf16 %v18666_v46, %v18648_v38 }
 0x7b9   :  { %14029 = vmatprep.subr.bf16.mxu0 %v21445_v63  ;;  %v14045_v45 = vpack.c.bf16 %v16512_v14, %v16511_v3  ;;  %v19277_v3 = vld [vmem:[#allocation3 + $0xc7] sm:$0xff] }
 0x7bb   :  { %12047 = vmatmul.mubr.msk.f32.gmra.mrb[76].mxu0 %vm3767_vm2, %v18801_v1  ;;  %v16507_v1 = vld [vmem:[#allocation3 + $0x67] sm:$0xff] }
 0x7bc   :  { %14031 = vmatpush1.bf16.msra.mxu0 %v14030_v0  ;;  %12048 = vmatprep.mubr.msk.f32.mxu0 %vm3855_vm3, %v19240_v6  ;;  %v14039_v41 = vpack.c.bf16 %v16508_v39, %v16507_v1  ;;  %v16514_v0 = vld [vmem:[#allocation3 + $0x9f] sm:$0xff] }
 0x7bd   :  { %14032 = vmatprep.subr.bf16.mxu0 %v21445_v63  ;;  %v14048_v16 = vpack.c.bf16 %v16514_v0, %v16513_v62  ;;  %v12052_v1 = vld [vmem:[%s21417_s7 + $0x400] sm:$0xff]  ;;  %v12085_v0 = vld [vmem:[%s21417_s7 + $0x508] sm:$0xff] }
 0x7be   :  { %v12060_v39 = vld [vmem:[%s21417_s7 + $0x440] sm:$0xff] }
 0x7bf   :  { %v12076_v62 = vld [vmem:[%s21417_s7 + $0x4c0] sm:$0xff] }
 0x7c0   :  { %14034 = vmatpush1.bf16.msra.mxu0 %v14033_v55  ;;  %v19253_v55 = vld [vmem:[#allocation3 + $0xbf] sm:$0xff] }
 0x7c1   :  { %14035 = vmatprep.subr.bf16.mxu0 %v21445_v63  ;;  %v14054_v23 = vpack.c.bf16 %v19253_v55, %v18669_v35 }
 0x7c4   :  { %14037 = vmatpush1.bf16.msra.mxu0 %v14036_v30  ;;  %v12061_v30 = vld [vmem:[%s21417_s7 + $0x448] sm:$0xff] }
 0x7c5   :  { %14038 = vmatprep.subr.bf16.mxu0 %v21445_v63  ;;  %v14056_v54 = vpack.c.bf16 %v12061_v30, %v12053_v53  ;;  %v12084_v53 = vld [vmem:[%s21417_s7 + $0x500] sm:$0xff] }
 0x7c6   :  { %v12092_v30 = vld [vmem:[%s21417_s7 + $0x540] sm:$0xff] }
 0x7c8   :  { %14040 = vmatpush1.bf16.msra.mxu0 %v14039_v41  ;;  %v12069_v41 = vld [vmem:[%s21417_s7 + $0x488] sm:$0xff] }
 0x7c9   :  { %14041 = vmatprep.subr.bf16.mxu0 %v21445_v63  ;;  %v14060_v14 = vpack.c.bf16 %v12077_v2, %v12069_v41  ;;  %v12100_v41 = vld [vmem:[%s21417_s7 + $0x580] sm:$0xff] }
 0x7ca   :  { %v12108_v2 = vld [vmem:[%s21417_s7 + $0x5c0] sm:$0xff] }
 0x7cc   :  { %14043 = vmatpush1.bf16.msra.mxu0 %v14042_v5  ;;  %v14058_v5 = vpack.c.bf16 %v12060_v39, %v12052_v1  ;;  %v14066_v1 = vpack.c.bf16 %v12092_v30, %v12084_v53  ;;  %v12095_v53 = vld [vmem:[%s21417_s7 + $0x558] sm:$0xff] }
 0x7cd   :  { %14044 = vmatprep.subr.bf16.mxu0 %v21445_v63 }
 0x7d0   :  { %14046 = vmatpush1.bf16.msra.mxu0 %v14045_v45  ;;  %v12068_v45 = vld [vmem:[%s21417_s7 + $0x480] sm:$0xff] }
 0x7d1   :  { %14047 = vmatprep.subr.bf16.mxu0 %v21445_v63 }
 0x7d4   :  { %14049 = vmatpush1.bf16.msra.mxu0 %v14048_v16  ;;  %v12093_v16 = vld [vmem:[%s21417_s7 + $0x548] sm:$0xff] }
 0x7d5   :  { %14050 = vmatprep.subr.bf16.mxu0 %v21445_v63 }
 0x7d8   :  { %14052 = vmatpush1.bf16.msra.mxu0 %v14051_v40  ;;  %v14062_v40 = vpack.c.bf16 %v12076_v62, %v12068_v45 }
 0x7d9   :  { %14053 = vmatprep.subr.bf16.mxu0 %v21445_v63 }
 0x7dc   :  { %14055 = vmatpush1.bf16.msra.mxu0 %v14054_v23  ;;  %v14064_v23 = vpack.c.bf16 %v12093_v16, %v12085_v0  ;;  %v12070_v0 = vld [vmem:[%s21417_s7 + $0x490] sm:$0xff] }
 0x7dd   :  { %5001 = vmatprep.subr.mxu0 %v21444_v4  ;;  %v12078_v16 = vld [vmem:[%s21417_s7 + $0x4d0] sm:$0xff] }
 0x7e0   :  { %5002 = vmatpush1.msra.mxu0 %v19277_v3 }
 0x7e1   :  { %5018 = vmatmul.mubr.f32.vlgmr.msra.gmra.mrb[78].mxu0 %v18683_v26  ;;  %14057 = vmatprep.subr.bf16.mxu0 %v14056_v54  ;;  %v12101_v26 = vld [vmem:[%s21417_s7 + $0x588] sm:$0xff]  ;;  %v12063_v54 = vld [vmem:[%s21417_s7 + $0x458] sm:$0xff] }
 0x7e2   :  { %12049 = vmatprep.mubr.msk.f32.mxu0 %vm3855_vm3, %v18691_v8  ;;  %14059 = vmatpush1.bf16.msra.mxu0 %v14058_v5  ;;  %v12109_v8 = vld [vmem:[%s21417_s7 + $0x5c8] sm:$0xff]  ;;  %v12071_v5 = vld [vmem:[%s21417_s7 + $0x498] sm:$0xff] }
 0x7e3   :  { %14061 = vmatprep.subr.bf16.mxu0 %v14060_v14  ;;  %v14068_v39 = vpack.c.bf16 %v12109_v8, %v12101_v26  ;;  %v12079_v14 = vld [vmem:[%s21417_s7 + $0x4d8] sm:$0xff]  ;;  %v14078_v26 = vpack.c.bf16 %v12078_v16, %v12070_v0 }
 0x7e4   :  { %v14076_v62 = vpack.c.bf16 %v12079_v14, %v12071_v5  ;;  %v12057_v14 = vld [vmem:[%s21417_s7 + $0x428] sm:$0xff] }
 0x7e5   :  { %5023 = vmatmul.mubr.f32.gmra.mrb[80].mxu0 %v18696_v25  ;;  %v14070_v25 = vpack.c.bf16 %v12108_v2, %v12100_v41  ;;  %v12103_v2 = vld [vmem:[%s21417_s7 + $0x598] sm:$0xff] }
 0x7e6   :  { %12050 = vmatprep.mubr.msk.f32.mxu0 %vm3855_vm3, %v18701_v22  ;;  %14063 = vmatpush1.bf16.msra.mxu0 %v14062_v40  ;;  %v12055_v22 = vld [vmem:[%s21417_s7 + $0x418] sm:$0xff] }
 0x7e7   :  { %14065 = vmatprep.subr.bf16.mxu0 %v14064_v23  ;;  %v12087_v23 = vld [vmem:[%s21417_s7 + $0x518] sm:$0xff] }
 0x7e8   :  { %v14080_v8 = vpack.c.bf16 %v12095_v53, %v12087_v23  ;;  %v12056_v23 = vld [vmem:[%s21417_s7 + $0x420] sm:$0xff] }
 0x7e9   :  { %5028 = vmatmul.mubr.f32.gmra.mrb[82].mxu0 %v18707_v31  ;;  %v14072_v31 = vpack.c.bf16 %v12063_v54, %v12055_v22  ;;  %v12064_v53 = vld [vmem:[%s21417_s7 + $0x460] sm:$0xff] }
 0x7ea   :  { %12051 = vmatprep.mubr.msk.f32.mxu0 %vm3855_vm3, %v18710_v52  ;;  %14067 = vmatpush1.bf16.msra.mxu0 %v14066_v1  ;;  %v12054_v52 = vld [vmem:[%s21417_s7 + $0x410] sm:$0xff] }
 0x7eb   :  { %14069 = vmatprep.subr.bf16.mxu0 %v14068_v39  ;;  %v12086_v1 = vld [vmem:[%s21417_s7 + $0x510] sm:$0xff] }
 0x7ec   :  { %v12094_v39 = vld [vmem:[%s21417_s7 + $0x550] sm:$0xff] }
 0x7ed   :  { %5033 = vmatmul.mubr.f32.gmra.mrb[84].mxu0 %v18715_v47  ;;  %v12062_v47 = vld [vmem:[%s21417_s7 + $0x450] sm:$0xff]  ;;  %v14082_v54 = vpack.c.bf16 %v12094_v39, %v12086_v1  ;;  %v14090_v39 = vpack.c.bf16 %v12064_v53, %v12056_v23  ;;  %v12104_v53 = vld [vmem:[%s21417_s7 + $0x5a0] sm:$0xff] }
 0x7ee   :  { %14071 = vmatpush1.bf16.msra.mxu0 %v14070_v25  ;;  %5179 = vmatprep.mubr.f32.mxu0 %v21444_v4  ;;  %v14074_v45 = vpack.c.bf16 %v12062_v47, %v12054_v52  ;;  %v12111_v25 = vld [vmem:[%s21417_s7 + $0x5d8] sm:$0xff]  ;;  %v12102_v52 = vld [vmem:[%s21417_s7 + $0x590] sm:$0xff] }
 0x7ef   :  { %14073 = vmatprep.subr.bf16.mxu0 %v14072_v31  ;;  %v14084_v31 = vpack.c.bf16 %v12111_v25, %v12103_v2  ;;  %v12110_v47 = vld [vmem:[%s21417_s7 + $0x5d0] sm:$0xff]  ;;  %v12072_v25 = vld [vmem:[%s21417_s7 + $0x4a0] sm:$0xff] }
 0x7f0   :  { %v14086_v0 = vpack.c.bf16 %v12110_v47, %v12102_v52 }
 0x8b4   :  { %v19345_v40 = vpop.f32.mrb[78].mxu0 }
 0x8b5   :  { %v5021_v30 = vpop.f32.mrb[79].mxu0  ;;  %12116 = vmatmul.mubr.msk.f32.vlgmr.msra.gmra.mrb[46].mxu0 %vm3767_vm2, %v19345_v40 }
 0x8b6   :  { %14075 = vmatpush1.bf16.msra.mxu0 %v14074_v45  ;;  %5185 = vmatprep.mubr.f32.mxu0 %v21444_v4  ;;  %v12065_v45 = vld [vmem:[%s21417_s7 + $0x468] sm:$0xff] }
 0x8b7   :  { %14077 = vmatprep.subr.bf16.mxu0 %v14076_v62  ;;  %v14088_v16 = vpack.c.bf16 %v12065_v45, %v12057_v14  ;;  %v12088_v14 = vld [vmem:[%s21417_s7 + $0x520] sm:$0xff] }
 0x8b8   :  { %v19362_v41 = vpop.f32.mrb[80].mxu0  ;;  %v12096_v45 = vld [vmem:[%s21417_s7 + $0x560] sm:$0xff] }
 0x8b9   :  { %v5026_v22 = vpop.f32.mrb[81].mxu0  ;;  %12117 = vmatmul.mubr.msk.f32.gmra.mrb[48].mxu0 %vm3767_vm2, %v19362_v41 }
 0x8ba   :  { %14079 = vmatpush1.bf16.msra.mxu0 %v14078_v26  ;;  %5191 = vmatprep.mubr.f32.mxu0 %v21444_v4  ;;  %v12073_v26 = vld [vmem:[%s21417_s7 + $0x4a8] sm:$0xff]  ;;  %v12080_v22 = vld [vmem:[%s21417_s7 + $0x4e0] sm:$0xff] }
 0x8bb   :  { %14081 = vmatprep.subr.bf16.mxu0 %v14080_v8  ;;  %v12081_v8 = vld [vmem:[%s21417_s7 + $0x4e8] sm:$0xff]  ;;  %v14094_v52 = vpack.c.bf16 %v12080_v22, %v12072_v25  ;;  %v12058_v25 = vld [vmem:[%s21417_s7 + $0x430] sm:$0xff] }
 0x8bc   :  { %v19379_v5 = vpop.f32.mrb[82].mxu0  ;;  %v14092_v2 = vpack.c.bf16 %v12081_v8, %v12073_v26  ;;  %v12112_v26 = vld [vmem:[%s21417_s7 + $0x5e0] sm:$0xff]  ;;  %v12059_v8 = vld [vmem:[%s21417_s7 + $0x438] sm:$0xff]  ;;  %v12066_v22 = vld [vmem:[%s21417_s7 + $0x470] sm:$0xff] }
 0x8bd   :  { %v5031_v62 = vpop.f32.mrb[83].mxu0  ;;  %12118 = vmatmul.mubr.msk.f32.gmra.mrb[50].mxu0 %vm3767_vm2, %v19379_v5 }
 0x8be   :  { %14083 = vmatpush1.bf16.msra.mxu0 %v14082_v54  ;;  %5197 = vmatprep.mubr.f32.mxu0 %v21444_v4  ;;  %v12089_v54 = vld [vmem:[%s21417_s7 + $0x528] sm:$0xff] }
 0x8bf   :  { %14085 = vmatprep.subr.bf16.mxu0 %v14084_v31  ;;  %v12097_v31 = vld [vmem:[%s21417_s7 + $0x568] sm:$0xff] }
 0x8c0   :  { %v19396_v30 = vpop.f32.mrb[84].mxu0  ;;  %v14096_v47 = vpack.c.bf16 %v12097_v31, %v12089_v54  ;;  %v12105_v62 = vld [vmem:[%s21417_s7 + $0x5a8] sm:$0xff]  ;;  %v12075_v54 = vld [vmem:[%s21417_s7 + $0x4b8] sm:$0xff] }
 0x8c1   :  { %v5036_v1 = vpop.f32.mrb[85].mxu0  ;;  %12119 = vmatmul.mubr.msk.f32.gmra.mrb[52].mxu0 %vm3767_vm2, %v19396_v30  ;;  %v12083_v31 = vld [vmem:[%s21417_s7 + $0x4f8] sm:$0xff] }
 0x8c2   :  { %14087 = vmatpush1.bf16.msra.mxu0 %v14086_v0  ;;  %5268 = vmatprep.mubr.f32.mxu0 %v21444_v4  ;;  %v12113_v0 = vld [vmem:[%s21417_s7 + $0x5e8] sm:$0xff]  ;;  %v12067_v1 = vld [vmem:[%s21417_s7 + $0x478] sm:$0xff] }
 0x8c3   :  { %14089 = vmatprep.subr.bf16.mxu0 %v14088_v16  ;;  %v14098_v16 = vpack.c.bf16 %v12096_v45, %v12088_v14  ;;  %v14100_v23 = vpack.c.bf16 %v12113_v0, %v12105_v62  ;;  %v12074_v14 = vld [vmem:[%s21417_s7 + $0x4b0] sm:$0xff]  ;;  %v12091_v62 = vld [vmem:[%s21417_s7 + $0x538] sm:$0xff] }
 0x8c4   :  { %v12082_v45 = vld [vmem:[%s21417_s7 + $0x4f0] sm:$0xff]  ;;  %v12099_v0 = vld [vmem:[%s21417_s7 + $0x578] sm:$0xff] }
 0x8c5   :  { %12120 = vmatmul.mubr.msk.f32.vlgmr.msra.gmra.mrb[54].mxu0 %vm3767_vm2, %v19345_v40 }
 0x8c6   :  { %14091 = vmatpush1.bf16.msra.mxu0 %v14090_v39  ;;  %5274 = vmatprep.mubr.f32.mxu0 %v21444_v4  ;;  %v14102_v39 = vpack.c.bf16 %v12112_v26, %v12104_v53  ;;  %v12090_v53 = vld [vmem:[%s21417_s7 + $0x530] sm:$0xff] }
 0x8c7   :  { %14093 = vmatprep.subr.bf16.mxu0 %v14092_v2  ;;  %v14104_v2 = vpack.c.bf16 %v12067_v1, %v12059_v8  ;;  %v12098_v26 = vld [vmem:[%s21417_s7 + $0x570] sm:$0xff]  ;;  %v12107_v8 = vld [vmem:[%s21417_s7 + $0x5b8] sm:$0xff] }
 0x8c8   :  { %v12115_v1 = vld [vmem:[%s21417_s7 + $0x5f8] sm:$0xff] }
 0x8c9   :  { %12121 = vmatmul.mubr.msk.f32.gmra.mrb[56].mxu0 %vm3767_vm2, %v19362_v41 }
 0x8ca   :  { %14095 = vmatpush1.bf16.msra.mxu0 %v14094_v52  ;;  %5280 = vmatprep.mubr.f32.mxu0 %v21444_v4  ;;  %v14106_v52 = vpack.c.bf16 %v12066_v22, %v12058_v25  ;;  %v12106_v25 = vld [vmem:[%s21417_s7 + $0x5b0] sm:$0xff] }
 0x8cb   :  { %14097 = vmatprep.subr.bf16.mxu0 %v14096_v47  ;;  %v14108_v47 = vpack.c.bf16 %v12083_v31, %v12075_v54  ;;  %v12114_v22 = vld [vmem:[%s21417_s7 + $0x5f0] sm:$0xff]  ;;  %v21446_v31 = vpack.c.bf16 %v18455_v59, %v18453_v11  ;;  %v21448_v11 = vpack.c.bf16 %v18494_v28, %v18490_v13  ;;  %v21449_v59 = vpack.c.bf16 %v18516_v58, %v18512_v12 }
 0x8cc   :  { %v14118_v54 = vpack.c.bf16 %v12114_v22, %v12106_v25  ;;  %v21452_v13 = vpack.c.bf16 %v18582_v33, %v18578_v48  ;;  %v21453_v28 = vpack.c.bf16 %v18604_v20, %v18600_v27  ;;  %v21454_v12 = vpack.c.bf16 %v18626_v56, %v18622_v9  ;;  %v12136_v48 = vld [vmem:[%s21417_s7 + $0x600] sm:$0xff]  ;;  %v12153_v27 = vld [vmem:[%s21417_s7 + $0x688] sm:$0xff]  ;;  %v12139_v22 = vld [vmem:[%s21417_s7 + $0x618] sm:$0xff] }
 0x8cd   :  { %12122 = vmatmul.mubr.msk.f32.gmra.mrb[58].mxu0 %vm3767_vm2, %v19379_v5  ;;  %v21455_v58 = vpack.c.bf16 %v18648_v38, %v18644_v61  ;;  %v12144_v33 = vld [vmem:[%s21417_s7 + $0x640] sm:$0xff]  ;;  %v12161_v20 = vld [vmem:[%s21417_s7 + $0x6c8] sm:$0xff]  ;;  %v5527_v61 = vld [vmem:[#allocation3 + $0xcf] sm:$0xff] }
 0x8ce   :  { %14099 = vmatpush1.bf16.msra.mxu0 %v14098_v16  ;;  %5286 = vmatprep.mubr.f32.mxu0 %v21444_v4  ;;  %v14110_v16 = vpack.c.bf16 %v12082_v45, %v12074_v14  ;;  %v14158_v56 = vpack.c.bf16 %v12144_v33, %v12136_v48  ;;  %v14160_v38 = vpack.c.bf16 %v12161_v20, %v12153_v27  ;;  %v12176_v14 = vld [vmem:[%s21417_s7 + $0x740] sm:$0xff]  ;;  %v12185_v45 = vld [vmem:[%s21417_s7 + $0x788] sm:$0xff]  ;;  %v12170_v33 = vld [vmem:[%s21417_s7 + $0x710] sm:$0xff] }
 0x8cf   :  { %14101 = vmatprep.subr.bf16.mxu0 %v14100_v23  ;;  %v14112_v23 = vpack.c.bf16 %v12099_v0, %v12091_v62  ;;  %v12193_v62 = vld [vmem:[%s21417_s7 + $0x7c8] sm:$0xff]  ;;  %v19619_v0 = vld [vmem:[#allocation19 + $0x10] sm:$0xff]  ;;  %v12178_v27 = vld [vmem:[%s21417_s7 + $0x750] sm:$0xff] }
 0x8d0   :  { %v19639_v25 = vld [vmem:[#allocation19 + $0x30] sm:$0xff] }
 0x8d1   :  { %12123 = vmatmul.mubr.msk.f32.gmra.mrb[60].mxu0 %vm3767_vm2, %v19396_v30 }
 0x8d2   :  { %14103 = vmatpush1.bf16.msra.mxu0 %v14102_v39  ;;  %5357 = vmatprep.mubr.f32.mxu0 %v21444_v4  ;;  %v14114_v39 = vpack.c.bf16 %v12098_v26, %v12090_v53  ;;  %v14168_v53 = vpack.c.bf16 %v12193_v62, %v12185_v45  ;;  %v12184_v26 = vld [vmem:[%s21417_s7 + $0x780] sm:$0xff] }
 0x8d3   :  { %14105 = vmatprep.subr.bf16.mxu0 %v14104_v2  ;;  %v14116_v2 = vpack.c.bf16 %v12115_v1, %v12107_v8  ;;  %v12192_v8 = vld [vmem:[%s21417_s7 + $0x7c0] sm:$0xff]  ;;  %v19632_v1 = vld [vmem:[#allocation19 + $0x20] sm:$0xff] }
 0x8d4   :  { %v12140_v62 = vld [vmem:[%s21417_s7 + $0x620] sm:$0xff] }
 0x8d5   :  { %12124 = vmatmul.mubr.msk.f32.vlgmr.msra.gmra.mrb[62].mxu0 %vm3767_vm2, %v19345_v40 }
 0x8d6   :  { %14107 = vmatpush1.bf16.msra.mxu0 %v14106_v52  ;;  %5363 = vmatprep.mubr.f32.mxu0 %v21444_v4  ;;  %v21447_v52 = vpack.c.bf16 %v18472_v44, %v18468_v36  ;;  %v21450_v36 = vpack.c.bf16 %v18538_v50, %v18534_v42  ;;  %v21451_v44 = vpack.c.bf16 %v18560_v49, %v18556_v37  ;;  %v12137_v37 = vld [vmem:[%s21417_s7 + $0x608] sm:$0xff] }
 0x8d7   :  { %14109 = vmatprep.subr.bf16.mxu0 %v14108_v47  ;;  %v21456_v42 = vpack.c.bf16 %v18669_v35, %v18666_v46  ;;  %v14154_v50 = vpack.c.bf16 %v19277_v3, %v19253_v55  ;;  %v12145_v49 = vld [vmem:[%s21417_s7 + $0x648] sm:$0xff]  ;;  %v12152_v46 = vld [vmem:[%s21417_s7 + $0x680] sm:$0xff] }
 0x8d8   :  { %v14156_v9 = vpack.c.bf16 %v12145_v49, %v12137_v37  ;;  %v12160_v35 = vld [vmem:[%s21417_s7 + $0x6c0] sm:$0xff]  ;;  %v12169_v55 = vld [vmem:[%s21417_s7 + $0x708] sm:$0xff] }
 0x8d9   :  { %12125 = vmatmul.mubr.msk.f32.gmra.mrb[64].mxu0 %vm3767_vm2, %v19362_v41  ;;  %v12177_v3 = vld [vmem:[%s21417_s7 + $0x748] sm:$0xff]  ;;  %v12168_v47 = vld [vmem:[%s21417_s7 + $0x700] sm:$0xff] }
 0x8da   :  { %14111 = vmatpush1.bf16.msra.mxu0 %v14110_v16  ;;  %5369 = vmatprep.mubr.f32.mxu0 %v21444_v4  ;;  %v19622_v16 = vld [vmem:[#allocation19 + $0x28] sm:$0xff] }
 0x8db   :  { %14113 = vmatprep.subr.bf16.mxu0 %v14112_v23  ;;  %v14166_v23 = vpack.c.bf16 %v12176_v14, %v12168_v47 }
 0x8dd   :  { %12126 = vmatmul.mubr.msk.f32.gmra.mrb[66].mxu0 %vm3767_vm2, %v19379_v5 }
 0x8de   :  { %14115 = vmatpush1.bf16.msra.mxu0 %v14114_v39  ;;  %5375 = vmatprep.mubr.f32.mxu0 %v21444_v4  ;;  %v19635_v39 = vld [vmem:[#allocation19 + $0x38] sm:$0xff] }
 0x8df   :  { %14117 = vmatprep.subr.bf16.mxu0 %v14116_v2  ;;  %v14170_v2 = vpack.c.bf16 %v12192_v8, %v12184_v26  ;;  %v12157_v26 = vld [vmem:[%s21417_s7 + $0x6a8] sm:$0xff] }
 0x8e0   :  { %v12165_v8 = vld [vmem:[%s21417_s7 + $0x6e8] sm:$0xff] }
 0x8e1   :  { %12127 = vmatmul.mubr.msk.f32.gmra.mrb[68].mxu0 %vm3767_vm2, %v19396_v30 }
 0x8e2   :  { %14119 = vmatpush1.bf16.msra.mxu0 %v14118_v54  ;;  %5446 = vmatprep.mubr.f32.mxu0 %v21444_v4  ;;  %v12147_v54 = vld [vmem:[%s21417_s7 + $0x658] sm:$0xff] }
 0x8e3   :  { %14120 = vmatprep.subr.bf16.mxu0 %v21445_v63 }
 0x8e5   :  { %12128 = vmatmul.mubr.msk.f32.vlgmr.msra.gmra.mrb[70].mxu0 %vm3767_vm2, %v19345_v40  ;;  %v19600_v40 = vld [vmem:[#allocation19] sm:$0xff] }
 0x8e6   :  { %14122 = vmatpush1.bf16.msra.mxu0 %v21446_v31  ;;  %5452 = vmatprep.mubr.f32.mxu0 %v21444_v4  ;;  %v14172_v31 = vpack.c.bf16 %v12147_v54, %v12139_v22  ;;  %v14192_v54 = vpack.c.bf16 %v12165_v8, %v12157_v26  ;;  %v12174_v26 = vld [vmem:[%s21417_s7 + $0x730] sm:$0xff] }
 0x8e7   :  { %14123 = vmatprep.subr.bf16.mxu0 %v21445_v63  ;;  %v12182_v8 = vld [vmem:[%s21417_s7 + $0x770] sm:$0xff] }
 0x8e9   :  { %12129 = vmatmul.mubr.msk.f32.gmra.mrb[72].mxu0 %vm3767_vm2, %v19362_v41  ;;  %v19603_v41 = vld [vmem:[#allocation19 + $0x18] sm:$0xff] }
 0x8ea   :  { %14125 = vmatpush1.bf16.msra.mxu0 %v21447_v52  ;;  %5458 = vmatprep.mubr.f32.mxu0 %v21444_v4  ;;  %v12138_v52 = vld [vmem:[%s21417_s7 + $0x610] sm:$0xff] }
 0x8eb   :  { %14126 = vmatprep.subr.bf16.mxu0 %v21445_v63 }
 0x8ed   :  { %12130 = vmatmul.mubr.msk.f32.gmra.mrb[74].mxu0 %vm3767_vm2, %v19379_v5  ;;  %v14162_v5 = vpack.c.bf16 %v12160_v35, %v12152_v46  ;;  %v12186_v35 = vld [vmem:[%s21417_s7 + $0x790] sm:$0xff] }
 0x8ee   :  { %14128 = vmatpush1.bf16.msra.mxu0 %v21448_v11  ;;  %5464 = vmatprep.mubr.f32.mxu0 %v21444_v4  ;;  %v12146_v11 = vld [vmem:[%s21417_s7 + $0x650] sm:$0xff] }
 0x8ef   :  { %14129 = vmatprep.subr.bf16.mxu0 %v21445_v63 }
 0x8f1   :  { %12131 = vmatmul.mubr.msk.f32.gmra.mrb[76].mxu0 %vm3767_vm2, %v19396_v30  ;;  %v14164_v30 = vpack.c.bf16 %v12177_v3, %v12169_v55  ;;  %v12194_v55 = vld [vmem:[%s21417_s7 + $0x7d0] sm:$0xff] }
 0x8f2   :  { %14131 = vmatpush1.bf16.msra.mxu0 %v21449_v59  ;;  %12132 = vmatprep.mubr.msk.f32.mxu0 %vm3855_vm3, %v19240_v6  ;;  %v12155_v59 = vld [vmem:[%s21417_s7 + $0x698] sm:$0xff]  ;;  %v14186_v14 = vpack.c.bf16 %v12194_v55, %v12186_v35 }
 0x8f3   :  { %14132 = vmatprep.subr.bf16.mxu0 %v21445_v63  ;;  %v12167_v35 = vld [vmem:[%s21417_s7 + $0x6f8] sm:$0xff] }
 0x8f6   :  { %14134 = vmatpush1.bf16.msra.mxu0 %v21450_v36  ;;  %v12163_v36 = vld [vmem:[%s21417_s7 + $0x6d8] sm:$0xff] }
 0x8f7   :  { %14135 = vmatprep.subr.bf16.mxu0 %v21445_v63 }
 0x8fa   :  { %14137 = vmatpush1.bf16.msra.mxu0 %v21451_v44  ;;  %v14174_v44 = vpack.c.bf16 %v12146_v11, %v12138_v52  ;;  %v12164_v52 = vld [vmem:[%s21417_s7 + $0x6e0] sm:$0xff]  ;;  %v12173_v11 = vld [vmem:[%s21417_s7 + $0x728] sm:$0xff] }
 0x8fb   :  { %14138 = vmatprep.subr.bf16.mxu0 %v21445_v63 }
 0x8fe   :  { %14140 = vmatpush1.bf16.msra.mxu0 %v21452_v13  ;;  %v14176_v13 = vpack.c.bf16 %v12163_v36, %v12155_v59  ;;  %v12181_v59 = vld [vmem:[%s21417_s7 + $0x768] sm:$0xff] }
 0x8ff   :  { %14141 = vmatprep.subr.bf16.mxu0 %v21445_v63 }
 0x902   :  { %14143 = vmatpush1.bf16.msra.mxu0 %v21453_v28  ;;  %v12154_v28 = vld [vmem:[%s21417_s7 + $0x690] sm:$0xff] }
 0x903   :  { %14144 = vmatprep.subr.bf16.mxu0 %v21445_v63 }
 0x906   :  { %14146 = vmatpush1.bf16.msra.mxu0 %v21454_v12  ;;  %v12162_v12 = vld [vmem:[%s21417_s7 + $0x6d0] sm:$0xff] }
 0x907   :  { %14147 = vmatprep.subr.bf16.mxu0 %v21445_v63  ;;  %v14178_v49 = vpack.c.bf16 %v12162_v12, %v12154_v28  ;;  %v12180_v28 = vld [vmem:[%s21417_s7 + $0x760] sm:$0xff]  ;;  %v12189_v12 = vld [vmem:[%s21417_s7 + $0x7a8] sm:$0xff] }
 0x90a   :  { %14149 = vmatpush1.bf16.msra.mxu0 %v21455_v58 }
 0x90b   :  { %14150 = vmatprep.subr.bf16.mxu0 %v21445_v63 }
 0x90e   :  { %14152 = vmatpush1.bf16.msra.mxu0 %v21456_v42  ;;  %v12171_v42 = vld [vmem:[%s21417_s7 + $0x718] sm:$0xff] }
 0x90f   :  { %14153 = vmatprep.subr.bf16.mxu0 %v21445_v63 }
 0x912   :  { %14155 = vmatpush1.bf16.msra.mxu0 %v14154_v50  ;;  %v12179_v50 = vld [vmem:[%s21417_s7 + $0x758] sm:$0xff] }
 0x913   :  { %5576 = vmatprep.subr.mxu0 %v21444_v4  ;;  %v14180_v48 = vpack.c.bf16 %v12179_v50, %v12171_v42  ;;  %v12197_v42 = vld [vmem:[%s21417_s7 + $0x7e8] sm:$0xff] }
 0x916   :  { %5577 = vmatpush1.msra.mxu0 %v5527_v61 }
 0x917   :  { %5593 = vmatmul.mubr.f32.vlgmr.msra.gmra.mrb[86].mxu0 %v19600_v40  ;;  %14157 = vmatprep.subr.bf16.mxu0 %v14156_v9  ;;  %v12187_v9 = vld [vmem:[%s21417_s7 + $0x798] sm:$0xff] }
 0x918   :  { %12133 = vmatprep.mubr.msk.f32.mxu0 %vm3855_vm3, %v19603_v41  ;;  %14159 = vmatpush1.bf16.msra.mxu0 %v14158_v56  ;;  %v12195_v56 = vld [vmem:[%s21417_s7 + $0x7d8] sm:$0xff] }
 0x919   :  { %14161 = vmatprep.subr.bf16.mxu0 %v14160_v38  ;;  %v14182_v38 = vpack.c.bf16 %v12178_v27, %v12170_v33  ;;  %v14184_v46 = vpack.c.bf16 %v12195_v56, %v12187_v9  ;;  %v12143_v33 = vld [vmem:[%s21417_s7 + $0x638] sm:$0xff] }
 0x91a   :  { %v12151_v27 = vld [vmem:[%s21417_s7 + $0x678] sm:$0xff] }
 0x91b   :  { %5598 = vmatmul.mubr.f32.gmra.mrb[88].mxu0 %v19619_v0  ;;  %v14204_v56 = vpack.c.bf16 %v12151_v27, %v12143_v33  ;;  %v6086_v27 = vld [vmem:[#allocation3 + $0x50] sm:$0xff] }
 0x91c   :  { %12134 = vmatprep.mubr.msk.f32.mxu0 %vm3855_vm3, %v19622_v16  ;;  %14163 = vmatpush1.bf16.msra.mxu0 %v14162_v5  ;;  %v12141_v5 = vld [vmem:[%s21417_s7 + $0x628] sm:$0xff] }
 0x91d   :  { %14165 = vmatprep.subr.bf16.mxu0 %v14164_v30  ;;  %v12149_v30 = vld [vmem:[%s21417_s7 + $0x668] sm:$0xff] }
 0x91e   :  { %v14188_v45 = vpack.c.bf16 %v12149_v30, %v12141_v5  ;;  %v12158_v30 = vld [vmem:[%s21417_s7 + $0x6b0] sm:$0xff] }
 0x91f   :  { %5603 = vmatmul.mubr.f32.gmra.mrb[90].mxu0 %v19632_v1 }
 0x920   :  { %12135 = vmatprep.mubr.msk.f32.mxu0 %vm3855_vm3, %v19635_v39  ;;  %14167 = vmatpush1.bf16.msra.mxu0 %v14166_v23  ;;  %v12148_v23 = vld [vmem:[%s21417_s7 + $0x660] sm:$0xff] }
 0x921   :  { %14169 = vmatprep.subr.bf16.mxu0 %v14168_v53  ;;  %v14190_v22 = vpack.c.bf16 %v12148_v23, %v12140_v62 }
 0x923   :  { %5608 = vmatmul.mubr.f32.gmra.mrb[92].mxu0 %v19639_v25 }
 0x924   :  { %14171 = vmatpush1.bf16.msra.mxu0 %v14170_v2  ;;  %5754 = vmatprep.mubr.f32.mxu0 %v21444_v4 }
 0x925   :  { %14173 = vmatprep.subr.bf16.mxu0 %v14172_v31  ;;  %v12156_v31 = vld [vmem:[%s21417_s7 + $0x6a0] sm:$0xff] }
 0x926   :  { %v14194_v36 = vpack.c.bf16 %v12164_v52, %v12156_v31  ;;  %v12190_v52 = vld [vmem:[%s21417_s7 + $0x7b0] sm:$0xff] }
 0x9ea   :  { %v19667_v58 = vpop.f32.mrb[86].mxu0 }
 0x9eb   :  { %v5596_v37 = vpop.f32.mrb[87].mxu0  ;;  %12200 = vmatmul.mubr.msk.f32.vlgmr.msra.gmra.mrb[46].mxu0 %vm3767_vm2, %v19667_v58 }
 0x9ec   :  { %14175 = vmatpush1.bf16.msra.mxu0 %v14174_v44  ;;  %5760 = vmatprep.mubr.f32.mxu0 %v21444_v4  ;;  %v14196_v44 = vpack.c.bf16 %v12181_v59, %v12173_v11  ;;  %v14200_v37 = vpack.c.bf16 %v12197_v42, %v12189_v12  ;;  %v12198_v11 = vld [vmem:[%s21417_s7 + $0x7f0] sm:$0xff]  ;;  %v6080_v12 = vld [vmem:[#allocation3 + $0x20] sm:$0xff] }
 0x9ed   :  { %14177 = vmatprep.subr.bf16.mxu0 %v14176_v13  ;;  %v12172_v13 = vld [vmem:[%s21417_s7 + $0x720] sm:$0xff]  ;;  %v14218_v59 = vpack.c.bf16 %v12198_v11, %v12190_v52  ;;  %v12229_v52 = vld [vmem:[%s21417_s7 + $0x848] sm:$0xff] }
 0x9ee   :  { %v19684_v20 = vpop.f32.mrb[88].mxu0  ;;  %v14198_v50 = vpack.c.bf16 %v12180_v28, %v12172_v13  ;;  %v6081_v28 = vld [vmem:[#allocation3 + $0x28] sm:$0xff]  ;;  %v12220_v11 = vld [vmem:[%s21417_s7 + $0x800] sm:$0xff] }
 0x9ef   :  { %v5601_v61 = vpop.f32.mrb[89].mxu0  ;;  %12201 = vmatmul.mubr.msk.f32.gmra.mrb[48].mxu0 %vm3767_vm2, %v19684_v20  ;;  %v14224_v42 = vpack.c.bf16 %v6081_v28, %v6080_v12  ;;  %v6102_v12 = vld [vmem:[#allocation3 + $0xd0] sm:$0xff] }
 0x9f0   :  { %14179 = vmatpush1.bf16.msra.mxu0 %v14178_v49  ;;  %5766 = vmatprep.mubr.f32.mxu0 %v21444_v4  ;;  %v12188_v49 = vld [vmem:[%s21417_s7 + $0x7a0] sm:$0xff]  ;;  %v12142_v61 = vld [vmem:[%s21417_s7 + $0x630] sm:$0xff] }
 0x9f1   :  { %14181 = vmatprep.subr.bf16.mxu0 %v14180_v48  ;;  %v12196_v48 = vld [vmem:[%s21417_s7 + $0x7e0] sm:$0xff] }
 0x9f2   :  { %v19701_v3 = vpop.f32.mrb[90].mxu0  ;;  %v14202_v9 = vpack.c.bf16 %v12196_v48, %v12188_v49  ;;  %v6084_v48 = vld [vmem:[#allocation3 + $0x40] sm:$0xff] }
 0x9f3   :  { %v5606_v47 = vpop.f32.mrb[91].mxu0  ;;  %12202 = vmatmul.mubr.msk.f32.gmra.mrb[50].mxu0 %vm3767_vm2, %v19701_v3 }
 0x9f4   :  { %14183 = vmatpush1.bf16.msra.mxu0 %v14182_v38  ;;  %5772 = vmatprep.mubr.f32.mxu0 %v21444_v4  ;;  %v12150_v38 = vld [vmem:[%s21417_s7 + $0x670] sm:$0xff] }
 0x9f5   :  { %14185 = vmatprep.subr.bf16.mxu0 %v14184_v46  ;;  %v12159_v46 = vld [vmem:[%s21417_s7 + $0x6b8] sm:$0xff]  ;;  %v14206_v55 = vpack.c.bf16 %v12150_v38, %v12142_v61  ;;  %v12166_v47 = vld [vmem:[%s21417_s7 + $0x6f0] sm:$0xff]  ;;  %v6091_v38 = vld [vmem:[#allocation3 + $0x78] sm:$0xff] }
 0x9f6   :  { %v19718_v53 = vpop.f32.mrb[92].mxu0  ;;  %v14208_v5 = vpack.c.bf16 %v12167_v35, %v12159_v46  ;;  %v14210_v62 = vpack.c.bf16 %v12166_v47, %v12158_v30  ;;  %v6093_v35 = vld [vmem:[#allocation3 + $0x88] sm:$0xff]  ;;  %v6094_v30 = vld [vmem:[#allocation3 + $0x90] sm:$0xff] }
 0x9f7   :  { %v5611_v2 = vpop.f32.mrb[93].mxu0  ;;  %12203 = vmatmul.mubr.msk.f32.gmra.mrb[52].mxu0 %vm3767_vm2, %v19718_v53 }
 0x9f8   :  { %14187 = vmatpush1.bf16.msra.mxu0 %v14186_v14  ;;  %5843 = vmatprep.mubr.f32.mxu0 %v21444_v4  ;;  %v12175_v14 = vld [vmem:[%s21417_s7 + $0x738] sm:$0xff] }
 0x9f9   :  { %14189 = vmatprep.subr.bf16.mxu0 %v14188_v45  ;;  %v12183_v45 = vld [vmem:[%s21417_s7 + $0x778] sm:$0xff] }
 0x9fa   :  { %v14212_v23 = vpack.c.bf16 %v12183_v45, %v12175_v14  ;;  %v12191_v2 = vld [vmem:[%s21417_s7 + $0x7b8] sm:$0xff]  ;;  %v6097_v14 = vld [vmem:[#allocation3 + $0xa8] sm:$0xff]  ;;  %v6096_v45 = vld [vmem:[#allocation3 + $0xa0] sm:$0xff] }
 0x9fb   :  { %12204 = vmatmul.mubr.msk.f32.vlgmr.msra.gmra.mrb[54].mxu0 %vm3767_vm2, %v19667_v58 }
 0x9fc   :  { %14191 = vmatpush1.bf16.msra.mxu0 %v14190_v22  ;;  %5849 = vmatprep.mubr.f32.mxu0 %v21444_v4  ;;  %v12199_v22 = vld [vmem:[%s21417_s7 + $0x7f8] sm:$0xff] }
 0x9fd   :  { %14193 = vmatprep.subr.bf16.mxu0 %v14192_v54  ;;  %v14214_v54 = vpack.c.bf16 %v12182_v8, %v12174_v26  ;;  %v14216_v31 = vpack.c.bf16 %v12199_v22, %v12191_v2  ;;  %v6098_v26 = vld [vmem:[#allocation3 + $0xb0] sm:$0xff]  ;;  %v6101_v2 = vld [vmem:[#allocation3 + $0xc8] sm:$0xff]  ;;  %v6100_v22 = vld [vmem:[#allocation3 + $0xc0] sm:$0xff] }
 0x9ff   :  { %12205 = vmatmul.mubr.msk.f32.gmra.mrb[56].mxu0 %vm3767_vm2, %v19684_v20 }
 0xa00   :  { %14195 = vmatpush1.bf16.msra.mxu0 %v14194_v36  ;;  %5855 = vmatprep.mubr.f32.mxu0 %v21444_v4  ;;  %v6079_v36 = vld [vmem:[#allocation3 + $0x18] sm:$0xff] }
 0xa01   :  { %14197 = vmatprep.subr.bf16.mxu0 %v14196_v44  ;;  %v6078_v44 = vld [vmem:[#allocation3 + $0x10] sm:$0xff] }
 0xa02   :  { %v14221_v13 = vpack.c.bf16 %v6079_v36, %v6078_v44  ;;  %v12237_v36 = vld [vmem:[%s21417_s7 + $0x888] sm:$0xff] }
 0xa03   :  { %12206 = vmatmul.mubr.msk.f32.gmra.mrb[58].mxu0 %vm3767_vm2, %v19701_v3  ;;  %v12245_v44 = vld [vmem:[%s21417_s7 + $0x8c8] sm:$0xff] }
 0xa04   :  { %14199 = vmatpush1.bf16.msra.mxu0 %v14198_v50  ;;  %5861 = vmatprep.mubr.f32.mxu0 %v21444_v4  ;;  %v6083_v50 = vld [vmem:[#allocation3 + $0x38] sm:$0xff] }
 0xa05   :  { %14201 = vmatprep.subr.bf16.mxu0 %v14200_v37  ;;  %v6082_v37 = vld [vmem:[#allocation3 + $0x30] sm:$0xff] }
 0xa06   :  { %v14227_v49 = vpack.c.bf16 %v6083_v50, %v6082_v37  ;;  %v12236_v50 = vld [vmem:[%s21417_s7 + $0x880] sm:$0xff] }
 0xa07   :  { %12207 = vmatmul.mubr.msk.f32.gmra.mrb[60].mxu0 %vm3767_vm2, %v19718_v53  ;;  %v12244_v37 = vld [vmem:[%s21417_s7 + $0x8c0] sm:$0xff] }
 0xa08   :  { %14203 = vmatpush1.bf16.msra.mxu0 %v14202_v9  ;;  %5932 = vmatprep.mubr.f32.mxu0 %v21444_v4  ;;  %v6089_v9 = vld [vmem:[#allocation3 + $0x68] sm:$0xff] }
 0xa09   :  { %14205 = vmatprep.subr.bf16.mxu0 %v14204_v56  ;;  %v6088_v56 = vld [vmem:[#allocation3 + $0x60] sm:$0xff] }
 0xa0a   :  { %v14236_v61 = vpack.c.bf16 %v6089_v9, %v6088_v56  ;;  %v12277_v9 = vld [vmem:[%s21417_s7 + $0x9c8] sm:$0xff] }
 0xa0b   :  { %12208 = vmatmul.mubr.msk.f32.vlgmr.msra.gmra.mrb[62].mxu0 %vm3767_vm2, %v19667_v58 }
 0xa0c   :  { %14207 = vmatpush1.bf16.msra.mxu0 %v14206_v55  ;;  %5938 = vmatprep.mubr.f32.mxu0 %v21444_v4 }
 0xa0d   :  { %14209 = vmatprep.subr.bf16.mxu0 %v14208_v5  ;;  %v6095_v5 = vld [vmem:[#allocation3 + $0x98] sm:$0xff] }
 0xa0e   :  { %v14245_v47 = vpack.c.bf16 %v6095_v5, %v6094_v30  ;;  %v12222_v5 = vld [vmem:[%s21417_s7 + $0x810] sm:$0xff] }
 0xa0f   :  { %12209 = vmatmul.mubr.msk.f32.gmra.mrb[64].mxu0 %vm3767_vm2, %v19684_v20  ;;  %v12230_v30 = vld [vmem:[%s21417_s7 + $0x850] sm:$0xff] }
 0xa10   :  { %14211 = vmatpush1.bf16.msra.mxu0 %v14210_v62  ;;  %5944 = vmatprep.mubr.f32.mxu0 %v21444_v4  ;;  %v14248_v62 = vpack.c.bf16 %v6097_v14, %v6096_v45  ;;  %v12247_v14 = vld [vmem:[%s21417_s7 + $0x8d8] sm:$0xff]  ;;  %v14274_v45 = vpack.c.bf16 %v12230_v30, %v12222_v5  ;;  %v12257_v5 = vld [vmem:[%s21417_s7 + $0x928] sm:$0xff] }
 0xa11   :  { %14213 = vmatprep.subr.bf16.mxu0 %v14212_v23  ;;  %v6099_v23 = vld [vmem:[#allocation3 + $0xb8] sm:$0xff]  ;;  %v12265_v30 = vld [vmem:[%s21417_s7 + $0x968] sm:$0xff] }
 0xa12   :  { %v14251_v8 = vpack.c.bf16 %v6099_v23, %v6098_v26  ;;  %v12238_v23 = vld [vmem:[%s21417_s7 + $0x890] sm:$0xff] }
 0xa13   :  { %12210 = vmatmul.mubr.msk.f32.gmra.mrb[66].mxu0 %vm3767_vm2, %v19701_v3  ;;  %v12246_v26 = vld [vmem:[%s21417_s7 + $0x8d0] sm:$0xff] }
 0xa14   :  { %14215 = vmatpush1.bf16.msra.mxu0 %v14214_v54  ;;  %5950 = vmatprep.mubr.f32.mxu0 %v21444_v4  ;;  %v14254_v54 = vpack.c.bf16 %v6101_v2, %v6100_v22  ;;  %v12255_v2 = vld [vmem:[%s21417_s7 + $0x918] sm:$0xff] }
 0xa15   :  { %14217 = vmatprep.subr.bf16.mxu0 %v14216_v31  ;;  %v12221_v31 = vld [vmem:[%s21417_s7 + $0x808] sm:$0xff]  ;;  %v12263_v22 = vld [vmem:[%s21417_s7 + $0x958] sm:$0xff] }
 0xa17   :  { %12211 = vmatmul.mubr.msk.f32.gmra.mrb[68].mxu0 %vm3767_vm2, %v19718_v53 }
 0xa18   :  { %14219 = vmatpush1.bf16.msra.mxu0 %v14218_v59  ;;  %6021 = vmatprep.mubr.f32.mxu0 %v21444_v4  ;;  %v12228_v59 = vld [vmem:[%s21417_s7 + $0x840] sm:$0xff] }
 0xa19   :  { %14220 = vmatprep.subr.bf16.mxu0 %v21445_v63  ;;  %v14258_v28 = vpack.c.bf16 %v12228_v59, %v12220_v11  ;;  %v12254_v11 = vld [vmem:[%s21417_s7 + $0x910] sm:$0xff] }
 0xa1a   :  { %v12262_v59 = vld [vmem:[%s21417_s7 + $0x950] sm:$0xff] }
 0xa1b   :  { %12212 = vmatmul.mubr.msk.f32.vlgmr.msra.gmra.mrb[70].mxu0 %vm3767_vm2, %v19667_v58  ;;  %v6085_v58 = vld [vmem:[#allocation3 + $0x48] sm:$0xff] }
 0xa1c   :  { %14222 = vmatpush1.bf16.msra.mxu0 %v14221_v13  ;;  %6027 = vmatprep.mubr.f32.mxu0 %v21444_v4  ;;  %v14230_v33 = vpack.c.bf16 %v6085_v58, %v6084_v48  ;;  %v14256_v13 = vpack.c.bf16 %v12229_v52, %v12221_v31  ;;  %v12261_v58 = vld [vmem:[%s21417_s7 + $0x948] sm:$0xff]  ;;  %v14262_v48 = vpack.c.bf16 %v12244_v37, %v12236_v50  ;;  %v12270_v50 = vld [vmem:[%s21417_s7 + $0x990] sm:$0xff] }
 0xa1d   :  { %14223 = vmatprep.subr.bf16.mxu0 %v21445_v63  ;;  %v14278_v31 = vpack.c.bf16 %v12246_v26, %v12238_v23  ;;  %v14280_v52 = vpack.c.bf16 %v12263_v22, %v12255_v2  ;;  %v12278_v37 = vld [vmem:[%s21417_s7 + $0x9d0] sm:$0xff]  ;;  %v12273_v23 = vld [vmem:[%s21417_s7 + $0x9a8] sm:$0xff] }
 0xa1e   :  { %v12281_v26 = vld [vmem:[%s21417_s7 + $0x9e8] sm:$0xff] }
 0xa1f   :  { %12213 = vmatmul.mubr.msk.f32.gmra.mrb[72].mxu0 %vm3767_vm2, %v19684_v20  ;;  %v6087_v20 = vld [vmem:[#allocation3 + $0x58] sm:$0xff]  ;;  %v14300_v22 = vpack.c.bf16 %v12281_v26, %v12273_v23 }
 0xa20   :  { %14225 = vmatpush1.bf16.msra.mxu0 %v14224_v42  ;;  %6033 = vmatprep.mubr.f32.mxu0 %v21444_v4  ;;  %v14260_v42 = vpack.c.bf16 %v12245_v44, %v12237_v36  ;;  %v12271_v44 = vld [vmem:[%s21417_s7 + $0x998] sm:$0xff] }
 0xa21   :  { %14226 = vmatprep.subr.bf16.mxu0 %v21445_v63  ;;  %v16525_v26 = vld [vmem:[#allocation3 + $0x31] sm:$0xff] }
 0xa23   :  { %12214 = vmatmul.mubr.msk.f32.gmra.mrb[74].mxu0 %vm3767_vm2, %v19701_v3  ;;  %v14233_v3 = vpack.c.bf16 %v6087_v20, %v6086_v27  ;;  %v12252_v20 = vld [vmem:[%s21417_s7 + $0x900] sm:$0xff] }
 0xa24   :  { %14228 = vmatpush1.bf16.msra.mxu0 %v14227_v49  ;;  %6039 = vmatprep.mubr.f32.mxu0 %v21444_v4  ;;  %v12253_v49 = vld [vmem:[%s21417_s7 + $0x908] sm:$0xff]  ;;  %v12260_v27 = vld [vmem:[%s21417_s7 + $0x940] sm:$0xff] }
 0xa25   :  { %14229 = vmatprep.subr.bf16.mxu0 %v21445_v63  ;;  %v14266_v56 = vpack.c.bf16 %v12260_v27, %v12252_v20  ;;  %v14286_v20 = vpack.c.bf16 %v12278_v37, %v12270_v50 }
 0xa27   :  { %12215 = vmatmul.mubr.msk.f32.gmra.mrb[76].mxu0 %vm3767_vm2, %v19718_v53  ;;  %v6090_v53 = vld [vmem:[#allocation3 + $0x70] sm:$0xff] }
 0xa28   :  { %14231 = vmatpush1.bf16.msra.mxu0 %v14230_v33  ;;  %12216 = vmatprep.mubr.msk.f32.mxu0 %vm3855_vm3, %v19240_v6  ;;  %v14239_v46 = vpack.c.bf16 %v6091_v38, %v6090_v53  ;;  %v6092_v6 = vld [vmem:[#allocation3 + $0x80] sm:$0xff]  ;;  %v14264_v33 = vpack.c.bf16 %v12261_v58, %v12253_v49  ;;  %v12268_v38 = vld [vmem:[%s21417_s7 + $0x980] sm:$0xff] }
 0xa29   :  { %14232 = vmatprep.subr.bf16.mxu0 %v21445_v63  ;;  %v14242_v55 = vpack.c.bf16 %v6093_v35, %v6092_v6  ;;  %v12276_v53 = vld [vmem:[%s21417_s7 + $0x9c0] sm:$0xff]  ;;  %v12223_v35 = vld [vmem:[%s21417_s7 + $0x818] sm:$0xff]  ;;  %v12225_v58 = vld [vmem:[%s21417_s7 + $0x828] sm:$0xff] }
 0xa2a   :  { %v12231_v6 = vld [vmem:[%s21417_s7 + $0x858] sm:$0xff] }
 0xa2c   :  { %14234 = vmatpush1.bf16.msra.mxu0 %v14233_v3  ;;  %v12269_v3 = vld [vmem:[%s21417_s7 + $0x988] sm:$0xff] }
 0xa2d   :  { %14235 = vmatprep.subr.bf16.mxu0 %v21445_v63 }
 0xa30   :  { %14237 = vmatpush1.bf16.msra.mxu0 %v14236_v61  ;;  %v14268_v61 = vpack.c.bf16 %v12277_v9, %v12269_v3  ;;  %v12224_v3 = vld [vmem:[%s21417_s7 + $0x820] sm:$0xff] }
 0xa31   :  { %14238 = vmatprep.subr.bf16.mxu0 %v21445_v63  ;;  %v12232_v9 = vld [vmem:[%s21417_s7 + $0x860] sm:$0xff] }
 0xa34   :  { %14240 = vmatpush1.bf16.msra.mxu0 %v14239_v46  ;;  %v14270_v46 = vpack.c.bf16 %v12276_v53, %v12268_v38  ;;  %v12249_v38 = vld [vmem:[%s21417_s7 + $0x8e8] sm:$0xff] }
 0xa35   :  { %14241 = vmatprep.subr.bf16.mxu0 %v21445_v63 }
 0xa38   :  { %14243 = vmatpush1.bf16.msra.mxu0 %v14242_v55  ;;  %v14272_v55 = vpack.c.bf16 %v12231_v6, %v12223_v35  ;;  %v12240_v6 = vld [vmem:[%s21417_s7 + $0x8a0] sm:$0xff] }
 0xa39   :  { %14244 = vmatprep.subr.bf16.mxu0 %v21445_v63 }
 0xa3c   :  { %14246 = vmatpush1.bf16.msra.mxu0 %v14245_v47  ;;  %v12239_v47 = vld [vmem:[%s21417_s7 + $0x898] sm:$0xff] }
 0xa3d   :  { %14247 = vmatprep.subr.bf16.mxu0 %v21445_v63 }
 0xa40   :  { %14249 = vmatpush1.bf16.msra.mxu0 %v14248_v62  ;;  %v14276_v62 = vpack.c.bf16 %v12247_v14, %v12239_v47  ;;  %v14296_v14 = vpack.c.bf16 %v12265_v30, %v12257_v5  ;;  %v6653_v30 = vld [vmem:[#allocation3 + $0x11] sm:$0xff] }
 0xa41   :  { %14250 = vmatprep.subr.bf16.mxu0 %v21445_v63 }
 0xa44   :  { %14252 = vmatpush1.bf16.msra.mxu0 %v14251_v8 }
 0xa45   :  { %14253 = vmatprep.subr.bf16.mxu0 %v21445_v63 }
 0xa48   :  { %14255 = vmatpush1.bf16.msra.mxu0 %v14254_v54 }
 0xa49   :  { %6151 = vmatprep.subr.mxu0 %v21444_v4 }
 0xa4c   :  { %6152 = vmatpush1.msra.mxu0 %v6102_v12  ;;  %v14282_v12 = vpack.c.bf16 %v12262_v59, %v12254_v11  ;;  %v12235_v11 = vld [vmem:[%s21417_s7 + $0x878] sm:$0xff] }
 0xa4d   :  { %6168 = vmatmul.mubr.f32.vlgmr.msra.gmra.mrb[94].mxu0 %v19600_v40  ;;  %14257 = vmatprep.subr.bf16.mxu0 %v14256_v13  ;;  %v12279_v13 = vld [vmem:[%s21417_s7 + $0x9d8] sm:$0xff] }
 0xa4e   :  { %12217 = vmatprep.mubr.msk.f32.mxu0 %vm3855_vm3, %v19603_v41  ;;  %14259 = vmatpush1.bf16.msra.mxu0 %v14258_v28 }
 0xa4f   :  { %14261 = vmatprep.subr.bf16.mxu0 %v14260_v42  ;;  %v14284_v42 = vpack.c.bf16 %v12279_v13, %v12271_v44  ;;  %v12226_v13 = vld [vmem:[%s21417_s7 + $0x830] sm:$0xff] }
 0xa51   :  { %6173 = vmatmul.mubr.f32.gmra.mrb[96].mxu0 %v19619_v0 }
 0xa52   :  { %12218 = vmatprep.mubr.msk.f32.mxu0 %vm3855_vm3, %v19622_v16  ;;  %14263 = vmatpush1.bf16.msra.mxu0 %v14262_v48  ;;  %v12233_v48 = vld [vmem:[%s21417_s7 + $0x868] sm:$0xff] }
 0xa53   :  { %14265 = vmatprep.subr.bf16.mxu0 %v14264_v33  ;;  %v14288_v27 = vpack.c.bf16 %v12233_v48, %v12225_v58  ;;  %v12242_v58 = vld [vmem:[%s21417_s7 + $0x8b0] sm:$0xff] }
 0xa54   :  { %v12250_v48 = vld [vmem:[%s21417_s7 + $0x8f0] sm:$0xff] }
 0xa55   :  { %6178 = vmatmul.mubr.f32.gmra.mrb[98].mxu0 %v19632_v1 }
 0xa56   :  { %12219 = vmatprep.mubr.msk.f32.mxu0 %vm3855_vm3, %v19635_v39  ;;  %14267 = vmatpush1.bf16.msra.mxu0 %v14266_v56 }
 0xa57   :  { %14269 = vmatprep.subr.bf16.mxu0 %v14268_v61  ;;  %v12241_v61 = vld [vmem:[%s21417_s7 + $0x8a8] sm:$0xff] }
 0xa58   :  { %v14292_v35 = vpack.c.bf16 %v12249_v38, %v12241_v61  ;;  %v12266_v61 = vld [vmem:[%s21417_s7 + $0x970] sm:$0xff]  ;;  %v12275_v38 = vld [vmem:[%s21417_s7 + $0x9b8] sm:$0xff] }
 0xa59   :  { %6183 = vmatmul.mubr.f32.gmra.mrb[100].mxu0 %v19639_v25 }
 0xa5a   :  { %14271 = vmatpush1.bf16.msra.mxu0 %v14270_v46  ;;  %6329 = vmatprep.mubr.f32.mxu0 %v21444_v4  ;;  %v14290_v46 = vpack.c.bf16 %v12232_v9, %v12224_v3  ;;  %v12258_v9 = vld [vmem:[%s21417_s7 + $0x930] sm:$0xff] }
 0xa5b   :  { %14273 = vmatprep.subr.bf16.mxu0 %v14272_v55  ;;  %v12248_v55 = vld [vmem:[%s21417_s7 + $0x8e0] sm:$0xff] }
 0xa5c   :  { %v14294_v47 = vpack.c.bf16 %v12248_v55, %v12240_v6  ;;  %v12274_v6 = vld [vmem:[%s21417_s7 + $0x9b0] sm:$0xff] }
 0xa5d   :  { %v12282_v55 = vld [vmem:[%s21417_s7 + $0x9f0] sm:$0xff] }
 0xa5e   :  { %v14318_v5 = vpack.c.bf16 %v12282_v55, %v12274_v6  ;;  %v12305_v6 = vld [vmem:[%s21417_s7 + $0xa08] sm:$0xff] }
 0xa5f   :  { %v12313_v55 = vld [vmem:[%s21417_s7 + $0xa48] sm:$0xff] }
 0xb20   :  { %v19940_v8 = vpop.f32.mrb[94].mxu0 }
 0xb21   :  { %v6171_v54 = vpop.f32.mrb[95].mxu0  ;;  %12284 = vmatmul.mubr.msk.f32.vlgmr.msra.gmra.mrb[46].mxu0 %vm3767_vm2, %v19940_v8 }
 0xb22   :  { %14275 = vmatpush1.bf16.msra.mxu0 %v14274_v45  ;;  %6335 = vmatprep.mubr.f32.mxu0 %v21444_v4  ;;  %v12256_v45 = vld [vmem:[%s21417_s7 + $0x920] sm:$0xff] }
 0xb23   :  { %14277 = vmatprep.subr.bf16.mxu0 %v14276_v62  ;;  %v12264_v62 = vld [vmem:[%s21417_s7 + $0x960] sm:$0xff] }
 0xb24   :  { %v19957_v36 = vpop.f32.mrb[96].mxu0  ;;  %v14298_v2 = vpack.c.bf16 %v12264_v62, %v12256_v45  ;;  %v12272_v54 = vld [vmem:[%s21417_s7 + $0x9a0] sm:$0xff]  ;;  %v16523_v45 = vld [vmem:[#allocation3 + $0x21] sm:$0xff]  ;;  %v16524_v62 = vld [vmem:[#allocation3 + $0x29] sm:$0xff] }
 0xb25   :  { %v6176_v28 = vpop.f32.mrb[97].mxu0  ;;  %12285 = vmatmul.mubr.msk.f32.gmra.mrb[48].mxu0 %vm3767_vm2, %v19957_v36  ;;  %v14324_v23 = vpack.c.bf16 %v16524_v62, %v16523_v45  ;;  %v14356_v45 = vpack.c.bf16 %v12313_v55, %v12305_v6  ;;  %v12355_v6 = vld [vmem:[%s21417_s7 + $0xb98] sm:$0xff] }
 0xb26   :  { %14279 = vmatpush1.bf16.msra.mxu0 %v14278_v31  ;;  %6341 = vmatprep.mubr.f32.mxu0 %v21444_v4  ;;  %v12280_v31 = vld [vmem:[%s21417_s7 + $0x9e0] sm:$0xff]  ;;  %v12234_v28 = vld [vmem:[%s21417_s7 + $0x870] sm:$0xff]  ;;  %v12363_v55 = vld [vmem:[%s21417_s7 + $0xbd8] sm:$0xff] }
 0xb27   :  { %14281 = vmatprep.subr.bf16.mxu0 %v14280_v52  ;;  %v12227_v52 = vld [vmem:[%s21417_s7 + $0x838] sm:$0xff]  ;;  %v14302_v59 = vpack.c.bf16 %v12280_v31, %v12272_v54  ;;  %v14306_v50 = vpack.c.bf16 %v12234_v28, %v12226_v13  ;;  %v16535_v28 = vld [vmem:[#allocation3 + $0x79] sm:$0xff] }
 0xb28   :  { %v19974_v49 = vpop.f32.mrb[98].mxu0  ;;  %v14304_v44 = vpack.c.bf16 %v12235_v11, %v12227_v52  ;;  %v16528_v54 = vld [vmem:[#allocation3 + $0x49] sm:$0xff]  ;;  %v16531_v52 = vld [vmem:[#allocation3 + $0x59] sm:$0xff] }
 0xb29   :  { %v6181_v33 = vpop.f32.mrb[99].mxu0  ;;  %12286 = vmatmul.mubr.msk.f32.gmra.mrb[50].mxu0 %vm3767_vm2, %v19974_v49 }
 0xb2a   :  { %14283 = vmatpush1.bf16.msra.mxu0 %v14282_v12  ;;  %6347 = vmatprep.mubr.f32.mxu0 %v21444_v4  ;;  %v12243_v12 = vld [vmem:[%s21417_s7 + $0x8b8] sm:$0xff] }
 0xb2b   :  { %14285 = vmatprep.subr.bf16.mxu0 %v14284_v42  ;;  %v12251_v42 = vld [vmem:[%s21417_s7 + $0x8f8] sm:$0xff] }
 0xb2c   :  { %v19991_v56 = vpop.f32.mrb[100].mxu0  ;;  %v14308_v37 = vpack.c.bf16 %v12251_v42, %v12243_v12  ;;  %v12259_v33 = vld [vmem:[%s21417_s7 + $0x938] sm:$0xff]  ;;  %v16536_v42 = vld [vmem:[#allocation3 + $0x81] sm:$0xff] }
 0xb2d   :  { %v6186_v53 = vpop.f32.mrb[101].mxu0  ;;  %12287 = vmatmul.mubr.msk.f32.gmra.mrb[52].mxu0 %vm3767_vm2, %v19991_v56 }
 0xb2e   :  { %14287 = vmatpush1.bf16.msra.mxu0 %v14286_v20  ;;  %6418 = vmatprep.mubr.f32.mxu0 %v21444_v4  ;;  %v12267_v20 = vld [vmem:[%s21417_s7 + $0x978] sm:$0xff] }
 0xb2f   :  { %14289 = vmatprep.subr.bf16.mxu0 %v14288_v27  ;;  %v14310_v27 = vpack.c.bf16 %v12250_v48, %v12242_v58  ;;  %v14312_v3 = vpack.c.bf16 %v12267_v20, %v12259_v33  ;;  %v12283_v53 = vld [vmem:[%s21417_s7 + $0x9f8] sm:$0xff]  ;;  %v16539_v48 = vld [vmem:[#allocation3 + $0x99] sm:$0xff]  ;;  %v16540_v20 = vld [vmem:[#allocation3 + $0xa1] sm:$0xff] }
 0xb30   :  { %v16538_v58 = vld [vmem:[#allocation3 + $0x91] sm:$0xff] }
 0xb31   :  { %12288 = vmatmul.mubr.msk.f32.vlgmr.msra.gmra.mrb[54].mxu0 %vm3767_vm2, %v19940_v8  ;;  %v14345_v33 = vpack.c.bf16 %v16539_v48, %v16538_v58  ;;  %v12322_v58 = vld [vmem:[%s21417_s7 + $0xa90] sm:$0xff] }
 0xb32   :  { %14291 = vmatpush1.bf16.msra.mxu0 %v14290_v46  ;;  %6424 = vmatprep.mubr.f32.mxu0 %v21444_v4  ;;  %v14314_v46 = vpack.c.bf16 %v12266_v61, %v12258_v9  ;;  %v16542_v9 = vld [vmem:[#allocation3 + $0xb1] sm:$0xff]  ;;  %v16543_v61 = vld [vmem:[#allocation3 + $0xb9] sm:$0xff]  ;;  %v12330_v48 = vld [vmem:[%s21417_s7 + $0xad0] sm:$0xff] }
 0xb33   :  { %14293 = vmatprep.subr.bf16.mxu0 %v14292_v35  ;;  %v14316_v35 = vpack.c.bf16 %v12283_v53, %v12275_v38  ;;  %v14351_v38 = vpack.c.bf16 %v16543_v61, %v16542_v9  ;;  %v20130_v53 = vld [vmem:[#allocation3 + $0xc9] sm:$0xff]  ;;  %v14378_v9 = vpack.c.bf16 %v12330_v48, %v12322_v58  ;;  %v12356_v58 = vld [vmem:[%s21417_s7 + $0xba0] sm:$0xff] }
 0xb34   :  { %v12364_v48 = vld [vmem:[%s21417_s7 + $0xbe0] sm:$0xff] }
 0xb35   :  { %12289 = vmatmul.mubr.msk.f32.gmra.mrb[56].mxu0 %vm3767_vm2, %v19957_v36 }
 0xb36   :  { %14295 = vmatpush1.bf16.msra.mxu0 %v14294_v47  ;;  %6430 = vmatprep.mubr.f32.mxu0 %v21444_v4  ;;  %v16522_v47 = vld [vmem:[#allocation3 + $0x19] sm:$0xff] }
 0xb37   :  { %14297 = vmatprep.subr.bf16.mxu0 %v14296_v14  ;;  %v14321_v14 = vpack.c.bf16 %v16522_v47, %v6653_v30  ;;  %v12312_v30 = vld [vmem:[%s21417_s7 + $0xa40] sm:$0xff]  ;;  %v12321_v47 = vld [vmem:[%s21417_s7 + $0xa88] sm:$0xff] }
 0xb39   :  { %12290 = vmatmul.mubr.msk.f32.gmra.mrb[58].mxu0 %vm3767_vm2, %v19974_v49 }
 0xb3a   :  { %14299 = vmatpush1.bf16.msra.mxu0 %v14298_v2  ;;  %6436 = vmatprep.mubr.f32.mxu0 %v21444_v4  ;;  %v16526_v2 = vld [vmem:[#allocation3 + $0x39] sm:$0xff] }
 0xb3b   :  { %14301 = vmatprep.subr.bf16.mxu0 %v14300_v22  ;;  %v14327_v22 = vpack.c.bf16 %v16526_v2, %v16525_v26  ;;  %v12320_v2 = vld [vmem:[%s21417_s7 + $0xa80] sm:$0xff] }
 0xb3d   :  { %12291 = vmatmul.mubr.msk.f32.gmra.mrb[60].mxu0 %vm3767_vm2, %v19991_v56 }
 0xb3e   :  { %14303 = vmatpush1.bf16.msra.mxu0 %v14302_v59  ;;  %6507 = vmatprep.mubr.f32.mxu0 %v21444_v4  ;;  %v16532_v59 = vld [vmem:[#allocation3 + $0x61] sm:$0xff] }
 0xb3f   :  { %14305 = vmatprep.subr.bf16.mxu0 %v14304_v44  ;;  %v16533_v44 = vld [vmem:[#allocation3 + $0x69] sm:$0xff] }
 0xb40   :  { %v14336_v13 = vpack.c.bf16 %v16533_v44, %v16532_v59 }
 0xb41   :  { %12292 = vmatmul.mubr.msk.f32.vlgmr.msra.gmra.mrb[62].mxu0 %vm3767_vm2, %v19940_v8 }
 0xb42   :  { %14307 = vmatpush1.bf16.msra.mxu0 %v14306_v50  ;;  %6513 = vmatprep.mubr.f32.mxu0 %v21444_v4  ;;  %v16537_v50 = vld [vmem:[#allocation3 + $0x89] sm:$0xff] }
 0xb43   :  { %14309 = vmatprep.subr.bf16.mxu0 %v14308_v37  ;;  %v14342_v37 = vpack.c.bf16 %v16537_v50, %v16536_v42  ;;  %v12331_v42 = vld [vmem:[%s21417_s7 + $0xad8] sm:$0xff] }
 0xb45   :  { %12293 = vmatmul.mubr.msk.f32.gmra.mrb[64].mxu0 %vm3767_vm2, %v19957_v36 }
 0xb46   :  { %14311 = vmatpush1.bf16.msra.mxu0 %v14310_v27  ;;  %6519 = vmatprep.mubr.f32.mxu0 %v21444_v4  ;;  %v16541_v27 = vld [vmem:[#allocation3 + $0xa9] sm:$0xff] }
 0xb47   :  { %14313 = vmatprep.subr.bf16.mxu0 %v14312_v3  ;;  %v14348_v3 = vpack.c.bf16 %v16541_v27, %v16540_v20  ;;  %v12339_v20 = vld [vmem:[%s21417_s7 + $0xb18] sm:$0xff] }
 0xb48   :  { %v12347_v27 = vld [vmem:[%s21417_s7 + $0xb58] sm:$0xff] }
 0xb49   :  { %12294 = vmatmul.mubr.msk.f32.gmra.mrb[66].mxu0 %vm3767_vm2, %v19974_v49  ;;  %v14380_v61 = vpack.c.bf16 %v12347_v27, %v12339_v20  ;;  %v12311_v20 = vld [vmem:[%s21417_s7 + $0xa38] sm:$0xff] }
 0xb4a   :  { %14315 = vmatpush1.bf16.msra.mxu0 %v14314_v46  ;;  %6525 = vmatprep.mubr.f32.mxu0 %v21444_v4  ;;  %v16544_v46 = vld [vmem:[#allocation3 + $0xc1] sm:$0xff]  ;;  %v12319_v27 = vld [vmem:[%s21417_s7 + $0xa78] sm:$0xff] }
 0xb4b   :  { %14317 = vmatprep.subr.bf16.mxu0 %v14316_v35  ;;  %v14354_v35 = vpack.c.bf16 %v20130_v53, %v16544_v46  ;;  %v12346_v46 = vld [vmem:[%s21417_s7 + $0xb50] sm:$0xff] }
 0xb4d   :  { %12295 = vmatmul.mubr.msk.f32.gmra.mrb[68].mxu0 %vm3767_vm2, %v19991_v56 }
 0xb4e   :  { %14319 = vmatpush1.bf16.msra.mxu0 %v14318_v5  ;;  %6596 = vmatprep.mubr.f32.mxu0 %v21444_v4  ;;  %v12304_v5 = vld [vmem:[%s21417_s7 + $0xa00] sm:$0xff] }
 0xb4f   :  { %14320 = vmatprep.subr.bf16.mxu0 %v21445_v63  ;;  %v14358_v62 = vpack.c.bf16 %v12312_v30, %v12304_v5 }
 0xb51   :  { %12296 = vmatmul.mubr.msk.f32.vlgmr.msra.gmra.mrb[70].mxu0 %vm3767_vm2, %v19940_v8  ;;  %v16527_v8 = vld [vmem:[#allocation3 + $0x41] sm:$0xff] }
 0xb52   :  { %14322 = vmatpush1.bf16.msra.mxu0 %v14321_v14  ;;  %6602 = vmatprep.mubr.f32.mxu0 %v21444_v4  ;;  %v14330_v31 = vpack.c.bf16 %v16528_v54, %v16527_v8  ;;  %v12329_v14 = vld [vmem:[%s21417_s7 + $0xac8] sm:$0xff] }
 0xb53   :  { %14323 = vmatprep.subr.bf16.mxu0 %v21445_v63  ;;  %v14360_v26 = vpack.c.bf16 %v12329_v14, %v12321_v47  ;;  %v12337_v8 = vld [vmem:[%s21417_s7 + $0xb08] sm:$0xff]  ;;  %v14384_v47 = vpack.c.bf16 %v12363_v55, %v12355_v6  ;;  %v12354_v14 = vld [vmem:[%s21417_s7 + $0xb90] sm:$0xff]  ;;  %v12335_v6 = vld [vmem:[%s21417_s7 + $0xaf8] sm:$0xff] }
 0xb54   :  { %v12345_v54 = vld [vmem:[%s21417_s7 + $0xb48] sm:$0xff] }
 0xb55   :  { %12297 = vmatmul.mubr.msk.f32.gmra.mrb[72].mxu0 %vm3767_vm2, %v19957_v36  ;;  %v20119_v36 = vld [vmem:[#allocation19 + $0x8] sm:$0xff] }
 0xb56   :  { %14325 = vmatpush1.bf16.msra.mxu0 %v14324_v23  ;;  %6608 = vmatprep.mubr.f32.mxu0 %v21444_v4  ;;  %v20153_v23 = vld [vmem:[#allocation3 + $0xd1] sm:$0xff] }
 0xb57   :  { %14326 = vmatprep.subr.bf16.mxu0 %v21445_v63 }
 0xb59   :  { %12298 = vmatmul.mubr.msk.f32.gmra.mrb[74].mxu0 %vm3767_vm2, %v19974_v49  ;;  %v16530_v49 = vld [vmem:[#allocation3 + $0x51] sm:$0xff] }
 0xb5a   :  { %14328 = vmatpush1.bf16.msra.mxu0 %v14327_v22  ;;  %6614 = vmatprep.mubr.f32.mxu0 %v21444_v4  ;;  %v14333_v11 = vpack.c.bf16 %v16531_v52, %v16530_v49  ;;  %v12328_v22 = vld [vmem:[%s21417_s7 + $0xac0] sm:$0xff]  ;;  %v14364_v49 = vpack.c.bf16 %v12345_v54, %v12337_v8 }
 0xb5b   :  { %14329 = vmatprep.subr.bf16.mxu0 %v21445_v63  ;;  %v12336_v52 = vld [vmem:[%s21417_s7 + $0xb00] sm:$0xff] }
 0xb5d   :  { %12299 = vmatmul.mubr.msk.f32.gmra.mrb[76].mxu0 %vm3767_vm2, %v19991_v56  ;;  %v16534_v56 = vld [vmem:[#allocation3 + $0x71] sm:$0xff] }
 0xb5e   :  { %14331 = vmatpush1.bf16.msra.mxu0 %v14330_v31  ;;  %12300 = vmatprep.mubr.msk.f32.mxu0 %vm3855_vm3, %v20119_v36  ;;  %v14339_v12 = vpack.c.bf16 %v16535_v28, %v16534_v56  ;;  %v14362_v31 = vpack.c.bf16 %v12328_v22, %v12320_v2  ;;  %v12360_v56 = vld [vmem:[%s21417_s7 + $0xbc0] sm:$0xff]  ;;  %v12315_v28 = vld [vmem:[%s21417_s7 + $0xa58] sm:$0xff]  ;;  %v12317_v2 = vld [vmem:[%s21417_s7 + $0xa68] sm:$0xff] }
 0xb5f   :  { %14332 = vmatprep.subr.bf16.mxu0 %v21445_v63 }
 0xb62   :  { %14334 = vmatpush1.bf16.msra.mxu0 %v14333_v11  ;;  %v12344_v11 = vld [vmem:[%s21417_s7 + $0xb40] sm:$0xff] }
 0xb63   :  { %14335 = vmatprep.subr.bf16.mxu0 %v21445_v63  ;;  %v14366_v59 = vpack.c.bf16 %v12344_v11, %v12336_v52  ;;  %v12325_v11 = vld [vmem:[%s21417_s7 + $0xaa8] sm:$0xff] }
 0xb66   :  { %14337 = vmatpush1.bf16.msra.mxu0 %v14336_v13  ;;  %v12352_v13 = vld [vmem:[%s21417_s7 + $0xb80] sm:$0xff] }
 0xb67   :  { %14338 = vmatprep.subr.bf16.mxu0 %v21445_v63 }
 0xb6a   :  { %14340 = vmatpush1.bf16.msra.mxu0 %v14339_v12  ;;  %v12323_v12 = vld [vmem:[%s21417_s7 + $0xa98] sm:$0xff] }
 0xb6b   :  { %14341 = vmatprep.subr.bf16.mxu0 %v21445_v63 }
 0xb6e   :  { %14343 = vmatpush1.bf16.msra.mxu0 %v14342_v37  ;;  %v14376_v37 = vpack.c.bf16 %v12331_v42, %v12323_v12  ;;  %v12357_v12 = vld [vmem:[%s21417_s7 + $0xba8] sm:$0xff] }
 0xb6f   :  { %14344 = vmatprep.subr.bf16.mxu0 %v21445_v63  ;;  %v12365_v42 = vld [vmem:[%s21417_s7 + $0xbe8] sm:$0xff] }
 0xb72   :  { %14346 = vmatpush1.bf16.msra.mxu0 %v14345_v33 }
 0xb73   :  { %14347 = vmatprep.subr.bf16.mxu0 %v21445_v63 }
 0xb76   :  { %14349 = vmatpush1.bf16.msra.mxu0 %v14348_v3 }
 0xb77   :  { %14350 = vmatprep.subr.bf16.mxu0 %v21445_v63 }
 0xb7a   :  { %14352 = vmatpush1.bf16.msra.mxu0 %v14351_v38  ;;  %v12338_v38 = vld [vmem:[%s21417_s7 + $0xb10] sm:$0xff] }
 0xb7b   :  { %14353 = vmatprep.subr.bf16.mxu0 %v21445_v63  ;;  %v14382_v30 = vpack.c.bf16 %v12346_v46, %v12338_v38  ;;  %v12318_v38 = vld [vmem:[%s21417_s7 + $0xa70] sm:$0xff]  ;;  %v12327_v46 = vld [vmem:[%s21417_s7 + $0xab8] sm:$0xff] }
 0xb7e   :  { %14355 = vmatpush1.bf16.msra.mxu0 %v14354_v35 }
 0xb7f   :  { %6726 = vmatprep.subr.mxu0 %v21444_v4 }
 0xb82   :  { %6727 = vmatpush1.msra.mxu0 %v20153_v23 }
 0xb83   :  { %6743 = vmatmul.mubr.f32.vlgmr.msra.gmra.mrb[102].mxu0 %v19600_v40  ;;  %14357 = vmatprep.subr.bf16.mxu0 %v14356_v45  ;;  %v12353_v40 = vld [vmem:[%s21417_s7 + $0xb88] sm:$0xff]  ;;  %v12362_v45 = vld [vmem:[%s21417_s7 + $0xbd0] sm:$0xff] }
 0xb84   :  { %12301 = vmatprep.mubr.msk.f32.mxu0 %vm3855_vm3, %v19603_v41  ;;  %14359 = vmatpush1.bf16.msra.mxu0 %v14358_v62  ;;  %v12361_v41 = vld [vmem:[%s21417_s7 + $0xbc8] sm:$0xff]  ;;  %v14386_v8 = vpack.c.bf16 %v12362_v45, %v12354_v14  ;;  %v12343_v14 = vld [vmem:[%s21417_s7 + $0xb38] sm:$0xff] }
 0xb85   :  { %14361 = vmatprep.subr.bf16.mxu0 %v14360_v26  ;;  %v14368_v44 = vpack.c.bf16 %v12361_v41, %v12353_v40  ;;  %v12309_v26 = vld [vmem:[%s21417_s7 + $0xa28] sm:$0xff]  ;;  %v12351_v45 = vld [vmem:[%s21417_s7 + $0xb78] sm:$0xff] }
 0xb86   :  { %v14388_v54 = vpack.c.bf16 %v12317_v2, %v12309_v26  ;;  %v12333_v40 = vld [vmem:[%s21417_s7 + $0xae8] sm:$0xff]  ;;  %v14412_v2 = vpack.c.bf16 %v12351_v45, %v12343_v14 }
 0xb87   :  { %6748 = vmatmul.mubr.f32.gmra.mrb[104].mxu0 %v19619_v0  ;;  %v14370_v0 = vpack.c.bf16 %v12360_v56, %v12352_v13  ;;  %v12324_v13 = vld [vmem:[%s21417_s7 + $0xaa0] sm:$0xff]  ;;  %v20511_v14 = vld [vmem:[#allocation19 + $0x38] sm:$0xff] }
 0xb88   :  { %12302 = vmatprep.mubr.msk.f32.mxu0 %vm3855_vm3, %v19622_v16  ;;  %14363 = vmatpush1.bf16.msra.mxu0 %v14362_v31  ;;  %v12307_v16 = vld [vmem:[%s21417_s7 + $0xa18] sm:$0xff]  ;;  %v12308_v31 = vld [vmem:[%s21417_s7 + $0xa20] sm:$0xff] }
 0xb89   :  { %14365 = vmatprep.subr.bf16.mxu0 %v14364_v49  ;;  %v12316_v49 = vld [vmem:[%s21417_s7 + $0xa60] sm:$0xff] }
 0xb8a   :  { %v12332_v56 = vld [vmem:[%s21417_s7 + $0xae0] sm:$0xff] }
 0xb8b   :  { %6753 = vmatmul.mubr.f32.gmra.mrb[106].mxu0 %v19632_v1  ;;  %v14372_v1 = vpack.c.bf16 %v12315_v28, %v12307_v16  ;;  %v12349_v16 = vld [vmem:[%s21417_s7 + $0xb68] sm:$0xff]  ;;  %v14394_v28 = vpack.c.bf16 %v12332_v56, %v12324_v13  ;;  %v21458_v13 = vpack.c.bf16 %v18498_v29, %v18496_v17  ;;  %v21461_v17 = vpack.c.bf16 %v18564_v57, %v18562_v24  ;;  %v21467_v24 = vld [vmem:[#allocation35_spill] sm:$0xff]  ;;  %v12388_v56 = vld [vmem:[%s21417_s7 + $0xc00] sm:$0xff] }
 0xb8c   :  { %12303 = vmatprep.mubr.msk.f32.mxu0 %vm3855_vm3, %v19635_v39  ;;  %14367 = vmatpush1.bf16.msra.mxu0 %v14366_v59  ;;  %v12306_v39 = vld [vmem:[%s21417_s7 + $0xa10] sm:$0xff]  ;;  %v14390_v59 = vpack.c.bf16 %v12316_v49, %v12308_v31  ;;  %v12367_v31 = vld [vmem:[%s21417_s7 + $0xbf8] sm:$0xff]  ;;  %v21462_v29 = vpack.c.bf16 %v18586_v34, %v18584_v43  ;;  %v21470_v34 = vld [vmem:[#allocation37_spill] sm:$0xff] }
 0xb8d   :  { %14369 = vmatprep.subr.bf16.mxu0 %v14368_v44  ;;  %v14392_v44 = vpack.c.bf16 %v12333_v40, %v12325_v11  ;;  %v12358_v40 = vld [vmem:[%s21417_s7 + $0xbb0] sm:$0xff] }
 0xb8e   :  { %v21469_v43 = vld [vmem:[#allocation38_spill] sm:$0xff] }
 0xb8f   :  { %6758 = vmatmul.mubr.f32.gmra.mrb[108].mxu0 %v19639_v25  ;;  %v12314_v25 = vld [vmem:[%s21417_s7 + $0xa50] sm:$0xff] }
 0xb90   :  { %14371 = vmatpush1.bf16.msra.mxu0 %v14370_v0  ;;  %6904 = vmatprep.mubr.f32.mxu0 %v21444_v4  ;;  %v14374_v50 = vpack.c.bf16 %v12314_v25, %v12306_v39  ;;  %v12341_v0 = vld [vmem:[%s21417_s7 + $0xb28] sm:$0xff]  ;;  %v12340_v39 = vld [vmem:[%s21417_s7 + $0xb20] sm:$0xff] }
 0xb91   :  { %14373 = vmatprep.subr.bf16.mxu0 %v14372_v1  ;;  %v14396_v1 = vpack.c.bf16 %v12349_v16, %v12341_v0  ;;  %v12348_v25 = vld [vmem:[%s21417_s7 + $0xb60] sm:$0xff] }
 0xb92   :  { %v12396_v0 = vld [vmem:[%s21417_s7 + $0xc40] sm:$0xff] }
 0xb93   :  { %v7252_v16 = vld [vmem:[#allocation3 + $0xd9] sm:$0xff] }
 0xc56   :  { %v20221_v33 = vpop.f32.mrb[102].mxu0 }
 0xc57   :  { %v6746_v3 = vpop.f32.mrb[103].mxu0  ;;  %12368 = vmatmul.mubr.msk.f32.vlgmr.msra.gmra.mrb[46].mxu0 %vm3767_vm2, %v20221_v33 }
 0xc58   :  { %14375 = vmatpush1.bf16.msra.mxu0 %v14374_v50  ;;  %6910 = vmatprep.mubr.f32.mxu0 %v21444_v4  ;;  %v14398_v50 = vpack.c.bf16 %v12348_v25, %v12340_v39  ;;  %v14402_v3 = vpack.c.bf16 %v12364_v48, %v12356_v58  ;;  %v12404_v25 = vld [vmem:[%s21417_s7 + $0xc80] sm:$0xff]  ;;  %v20479_v58 = vld [vmem:[#allocation19 + $0x18] sm:$0xff] }
 0xc59   :  { %14377 = vmatprep.subr.bf16.mxu0 %v14376_v37  ;;  %v14400_v37 = vpack.c.bf16 %v12365_v42, %v12357_v12  ;;  %v12412_v12 = vld [vmem:[%s21417_s7 + $0xcc0] sm:$0xff]  ;;  %v12421_v42 = vld [vmem:[%s21417_s7 + $0xd08] sm:$0xff] }
 0xc5a   :  { %v20238_v35 = vpop.f32.mrb[104].mxu0  ;;  %v14462_v48 = vpack.c.bf16 %v12412_v12, %v12404_v25 }
 0xc5b   :  { %v6751_v5 = vpop.f32.mrb[105].mxu0  ;;  %12369 = vmatmul.mubr.msk.f32.gmra.mrb[48].mxu0 %vm3767_vm2, %v20238_v35 }
 0xc5c   :  { %14379 = vmatpush1.bf16.msra.mxu0 %v14378_v9  ;;  %6916 = vmatprep.mubr.f32.mxu0 %v21444_v4  ;;  %v14404_v9 = vpack.c.bf16 %v12319_v27, %v12311_v20  ;;  %v14408_v5 = vpack.c.bf16 %v12335_v6, %v12327_v46  ;;  %v12420_v27 = vld [vmem:[%s21417_s7 + $0xd00] sm:$0xff]  ;;  %v20498_v46 = vld [vmem:[#allocation19 + $0x28] sm:$0xff] }
 0xc5d   :  { %14381 = vmatprep.subr.bf16.mxu0 %v14380_v61  ;;  %v12310_v61 = vld [vmem:[%s21417_s7 + $0xa30] sm:$0xff] }
 0xc5e   :  { %v20255_v62 = vpop.f32.mrb[106].mxu0  ;;  %v14406_v55 = vpack.c.bf16 %v12318_v38, %v12310_v61  ;;  %v12445_v61 = vld [vmem:[%s21417_s7 + $0xdc8] sm:$0xff]  ;;  %v20495_v38 = vld [vmem:[#allocation19 + $0x10] sm:$0xff] }
 0xc5f   :  { %v6756_v22 = vpop.f32.mrb[107].mxu0  ;;  %12370 = vmatmul.mubr.msk.f32.gmra.mrb[50].mxu0 %vm3767_vm2, %v20255_v62 }
 0xc60   :  { %14383 = vmatpush1.bf16.msra.mxu0 %v14382_v30  ;;  %6922 = vmatprep.mubr.f32.mxu0 %v21444_v4  ;;  %v12326_v30 = vld [vmem:[%s21417_s7 + $0xab0] sm:$0xff] }
 0xc61   :  { %14385 = vmatprep.subr.bf16.mxu0 %v14384_v47  ;;  %v12334_v47 = vld [vmem:[%s21417_s7 + $0xaf0] sm:$0xff] }
 0xc62   :  { %v20272_v52 = vpop.f32.mrb[108].mxu0  ;;  %v14410_v26 = vpack.c.bf16 %v12334_v47, %v12326_v30  ;;  %v12342_v22 = vld [vmem:[%s21417_s7 + $0xb30] sm:$0xff]  ;;  %v12444_v30 = vld [vmem:[%s21417_s7 + $0xdc0] sm:$0xff] }
 0xc63   :  { %v6761_v41 = vpop.f32.mrb[109].mxu0  ;;  %12371 = vmatmul.mubr.msk.f32.gmra.mrb[52].mxu0 %vm3767_vm2, %v20272_v52  ;;  %v20508_v47 = vld [vmem:[#allocation19 + $0x20] sm:$0xff] }
 0xc64   :  { %14387 = vmatpush1.bf16.msra.mxu0 %v14386_v8  ;;  %6993 = vmatprep.mubr.f32.mxu0 %v21444_v4  ;;  %v12350_v8 = vld [vmem:[%s21417_s7 + $0xb70] sm:$0xff] }
 0xc65   :  { %14389 = vmatprep.subr.bf16.mxu0 %v14388_v54  ;;  %v12359_v54 = vld [vmem:[%s21417_s7 + $0xbb8] sm:$0xff]  ;;  %v14414_v49 = vpack.c.bf16 %v12350_v8, %v12342_v22  ;;  %v12366_v41 = vld [vmem:[%s21417_s7 + $0xbf0] sm:$0xff] }
 0xc66   :  { %v14416_v11 = vpack.c.bf16 %v12367_v31, %v12359_v54  ;;  %v12399_v22 = vld [vmem:[%s21417_s7 + $0xc58] sm:$0xff]  ;;  %v8402_v54 = vld [vmem:[#allocation3 + $0xdb] sm:$0xff]  ;;  %v12390_v31 = vld [vmem:[%s21417_s7 + $0xc10] sm:$0xff] }
 0xc67   :  { %12372 = vmatmul.mubr.msk.f32.vlgmr.msra.gmra.mrb[54].mxu0 %vm3767_vm2, %v20221_v33  ;;  %8452 = vmatpush1.msra.mxu1 %v8402_v54  ;;  %v12403_v54 = vld [vmem:[%s21417_s7 + $0xc78] sm:$0xff] }
 0xc68   :  { %14391 = vmatpush1.bf16.msra.mxu0 %v14390_v59  ;;  %6999 = vmatprep.mubr.f32.mxu0 %v21444_v4  ;;  %v14418_v59 = vpack.c.bf16 %v12366_v41, %v12358_v40  ;;  %v12415_v40 = vld [vmem:[%s21417_s7 + $0xcd8] sm:$0xff] }
 0xc69   :  { %14393 = vmatprep.subr.bf16.mxu0 %v14392_v44  ;;  %v21457_v44 = vpack.c.bf16 %v18476_v10, %v18474_v15  ;;  %v21459_v15 = vpack.c.bf16 %v18520_v60, %v18518_v19  ;;  %v21460_v10 = vpack.c.bf16 %v18542_v51, %v18540_v21  ;;  %v21463_v19 = vpack.c.bf16 %v18608_v32, %v18606_v7  ;;  %v21464_v60 = vld [vmem:[#allocation34_spill] sm:$0xff]  ;;  %v21466_v51 = vld [vmem:[#allocation36_spill] sm:$0xff]  ;;  %v21473_v32 = vld [vmem:[#allocation39_spill] sm:$0xff] }
 0xc6a   :  { %v21465_v21 = vpack.c.bf16 %v18630_v18, %v21464_v60  ;;  %v21468_v57 = vpack.c.bf16 %v21466_v51, %v21467_v24  ;;  %v21472_v7 = vld [vmem:[#allocation40_spill] sm:$0xff]  ;;  %v14454_v18 = vpack.c.bf16 %v20153_v23, %v20130_v53  ;;  %v12405_v53 = vld [vmem:[%s21417_s7 + $0xc88] sm:$0xff]  ;;  %v12430_v51 = vld [vmem:[%s21417_s7 + $0xd50] sm:$0xff] }
 0xc6b   :  { %12373 = vmatmul.mubr.msk.f32.gmra.mrb[56].mxu0 %vm3767_vm2, %v20238_v35  ;;  %v12413_v23 = vld [vmem:[%s21417_s7 + $0xcc8] sm:$0xff] }
 0xc6c   :  { %14395 = vmatpush1.bf16.msra.mxu0 %v14394_v28  ;;  %7005 = vmatprep.mubr.f32.mxu0 %v21444_v4  ;;  %v14460_v39 = vpack.c.bf16 %v12413_v23, %v12405_v53  ;;  %v12392_v23 = vld [vmem:[%s21417_s7 + $0xc20] sm:$0xff] }
 0xc6d   :  { %14397 = vmatprep.subr.bf16.mxu0 %v14396_v1  ;;  %v14458_v1 = vpack.c.bf16 %v12396_v0, %v12388_v56 }
 0xc6f   :  { %12374 = vmatmul.mubr.msk.f32.gmra.mrb[58].mxu0 %vm3767_vm2, %v20255_v62 }
 0xc70   :  { %14399 = vmatpush1.bf16.msra.mxu0 %v14398_v50  ;;  %7011 = vmatprep.mubr.f32.mxu0 %v21444_v4  ;;  %v12429_v50 = vld [vmem:[%s21417_s7 + $0xd48] sm:$0xff] }
 0xc71   :  { %14401 = vmatprep.subr.bf16.mxu0 %v14400_v37  ;;  %v20476_v37 = vld [vmem:[#allocation19] sm:$0xff]  ;;  %v14464_v20 = vpack.c.bf16 %v12429_v50, %v12421_v42  ;;  %v12408_v50 = vld [vmem:[%s21417_s7 + $0xca0] sm:$0xff] }
 0xc72   :  { %8468 = vmatmul.mubr.f32.vlgmr.msra.gmra.mrb[70].mxu1 %v20476_v37 }
 0xc73   :  { %12375 = vmatmul.mubr.msk.f32.gmra.mrb[60].mxu0 %vm3767_vm2, %v20272_v52  ;;  %12553 = vmatprep.mubr.msk.f32.mxu1 %vm3855_vm3, %v20479_v58 }
 0xc74   :  { %14403 = vmatpush1.bf16.msra.mxu0 %v14402_v3  ;;  %7082 = vmatprep.mubr.f32.mxu0 %v21444_v4  ;;  %v12428_v3 = vld [vmem:[%s21417_s7 + $0xd40] sm:$0xff] }
 0xc75   :  { %14405 = vmatprep.subr.bf16.mxu0 %v14404_v9  ;;  %v12437_v9 = vld [vmem:[%s21417_s7 + $0xd88] sm:$0xff]  ;;  %v14466_v6 = vpack.c.bf16 %v12428_v3, %v12420_v27 }
 0xc76   :  { %8473 = vmatmul.mubr.f32.gmra.mrb[72].mxu1 %v20495_v38  ;;  %v12433_v27 = vld [vmem:[%s21417_s7 + $0xd68] sm:$0xff] }
 0xc77   :  { %12376 = vmatmul.mubr.msk.f32.vlgmr.msra.gmra.mrb[62].mxu0 %vm3767_vm2, %v20221_v33  ;;  %12554 = vmatprep.mubr.msk.f32.mxu1 %vm3855_vm3, %v20498_v46 }
 0xc78   :  { %14407 = vmatpush1.bf16.msra.mxu0 %v14406_v55  ;;  %7088 = vmatprep.mubr.f32.mxu0 %v21444_v4  ;;  %v14468_v55 = vpack.c.bf16 %v12445_v61, %v12437_v9  ;;  %v12424_v61 = vld [vmem:[%s21417_s7 + $0xd20] sm:$0xff] }
 0xc79   :  { %14409 = vmatprep.subr.bf16.mxu0 %v14408_v5  ;;  %v12436_v5 = vld [vmem:[%s21417_s7 + $0xd80] sm:$0xff] }
 0xc7a   :  { %v14470_v45 = vpack.c.bf16 %v12444_v30, %v12436_v5  ;;  %8478 = vmatmul.mubr.f32.gmra.mrb[74].mxu1 %v20508_v47  ;;  %v12449_v5 = vld [vmem:[%s21417_s7 + $0xde8] sm:$0xff] }
 0xc7b   :  { %12377 = vmatmul.mubr.msk.f32.gmra.mrb[64].mxu0 %vm3767_vm2, %v20238_v35  ;;  %12555 = vmatprep.mubr.msk.f32.mxu1 %vm3855_vm3, %v20511_v14 }
 0xc7c   :  { %14411 = vmatpush1.bf16.msra.mxu0 %v14410_v26  ;;  %7094 = vmatprep.mubr.f32.mxu0 %v21444_v4  ;;  %v20515_v26 = vld [vmem:[#allocation19 + $0x30] sm:$0xff] }
 0xc7d   :  { %14413 = vmatprep.subr.bf16.mxu0 %v14412_v2  ;;  %v12391_v2 = vld [vmem:[%s21417_s7 + $0xc18] sm:$0xff] }
 0xc7e   :  { %v14472_v8 = vpack.c.bf16 %v12399_v22, %v12391_v2  ;;  %8483 = vmatmul.mubr.f32.gmra.mrb[76].mxu1 %v20515_v26  ;;  %v12440_v2 = vld [vmem:[%s21417_s7 + $0xda0] sm:$0xff] }
 0xc7f   :  { %12378 = vmatmul.mubr.msk.f32.gmra.mrb[66].mxu0 %vm3767_vm2, %v20255_v62  ;;  %9201 = vmatprep.mubr.f32.mxu1 %v21444_v4  ;;  %v12448_v22 = vld [vmem:[%s21417_s7 + $0xde0] sm:$0xff] }
 0xc80   :  { %14415 = vmatpush1.bf16.msra.mxu0 %v14414_v49  ;;  %7100 = vmatprep.mubr.f32.mxu0 %v21444_v4  ;;  %v12398_v49 = vld [vmem:[%s21417_s7 + $0xc50] sm:$0xff] }
 0xc81   :  { %14417 = vmatprep.subr.bf16.mxu0 %v14416_v11  ;;  %v12407_v11 = vld [vmem:[%s21417_s7 + $0xc98] sm:$0xff]  ;;  %v14474_v41 = vpack.c.bf16 %v12398_v49, %v12390_v31  ;;  %v14502_v31 = vpack.c.bf16 %v12448_v22, %v12440_v2 }
 0xc82   :  { %v7821_v2 = vld [vmem:[#allocation3 + $0xaa] sm:$0xff] }
 0xc83   :  { %12379 = vmatmul.mubr.msk.f32.gmra.mrb[68].mxu0 %vm3767_vm2, %v20272_v52 }
 0xc84   :  { %14419 = vmatpush1.bf16.msra.mxu0 %v14418_v59  ;;  %7171 = vmatprep.mubr.f32.mxu0 %v21444_v4  ;;  %v14476_v59 = vpack.c.bf16 %v12415_v40, %v12407_v11  ;;  %v12394_v11 = vld [vmem:[%s21417_s7 + $0xc30] sm:$0xff] }
 0xc85   :  { %14420 = vmatprep.subr.bf16.mxu0 %v21445_v63  ;;  %v12402_v40 = vld [vmem:[%s21417_s7 + $0xc70] sm:$0xff] }
 0xc87   :  { %12380 = vmatmul.mubr.msk.f32.vlgmr.msra.gmra.mrb[70].mxu0 %vm3767_vm2, %v20221_v33  ;;  %v21471_v33 = vpack.c.bf16 %v21469_v43, %v21470_v34  ;;  %v12447_v43 = vld [vmem:[%s21417_s7 + $0xdd8] sm:$0xff] }
 0xc88   :  { %14422 = vmatpush1.bf16.msra.mxu0 %v21457_v44  ;;  %7177 = vmatprep.mubr.f32.mxu0 %v21444_v4  ;;  %v12406_v44 = vld [vmem:[%s21417_s7 + $0xc90] sm:$0xff] }
 0xc89   :  { %14423 = vmatprep.subr.bf16.mxu0 %v21445_v63 }
 0xc8b   :  { %12381 = vmatmul.mubr.msk.f32.gmra.mrb[72].mxu0 %vm3767_vm2, %v20238_v35  ;;  %v21474_v35 = vpack.c.bf16 %v21472_v7, %v21473_v32  ;;  %v12438_v32 = vld [vmem:[%s21417_s7 + $0xd90] sm:$0xff] }
 0xc8c   :  { %14425 = vmatpush1.bf16.msra.mxu0 %v21458_v13  ;;  %7183 = vmatprep.mubr.f32.mxu0 %v21444_v4  ;;  %v12414_v13 = vld [vmem:[%s21417_s7 + $0xcd0] sm:$0xff] }
 0xc8d   :  { %14426 = vmatprep.subr.bf16.mxu0 %v21445_v63 }
 0xc8f   :  { %12382 = vmatmul.mubr.msk.f32.gmra.mrb[74].mxu0 %vm3767_vm2, %v20255_v62  ;;  %v12389_v62 = vld [vmem:[%s21417_s7 + $0xc08] sm:$0xff] }
 0xc90   :  { %14428 = vmatpush1.bf16.msra.mxu0 %v21459_v15  ;;  %7189 = vmatprep.mubr.f32.mxu0 %v21444_v4 }
 0xc91   :  { %14429 = vmatprep.subr.bf16.mxu0 %v21445_v63 }
 0xc93   :  { %12383 = vmatmul.mubr.msk.f32.gmra.mrb[76].mxu0 %vm3767_vm2, %v20272_v52  ;;  %v12397_v52 = vld [vmem:[%s21417_s7 + $0xc48] sm:$0xff] }
 0xc94   :  { %14431 = vmatpush1.bf16.msra.mxu0 %v21460_v10  ;;  %12384 = vmatprep.mubr.msk.f32.mxu0 %vm3855_vm3, %v20119_v36  ;;  %v14456_v28 = vpack.c.bf16 %v12397_v52, %v12389_v62  ;;  %v12423_v10 = vld [vmem:[%s21417_s7 + $0xd18] sm:$0xff]  ;;  %v12393_v62 = vld [vmem:[%s21417_s7 + $0xc28] sm:$0xff] }
 0xc95   :  { %14432 = vmatprep.subr.bf16.mxu0 %v21445_v63  ;;  %v12401_v52 = vld [vmem:[%s21417_s7 + $0xc68] sm:$0xff] }
 0xc96   :  { %v14488_v53 = vpack.c.bf16 %v12401_v52, %v12393_v62  ;;  %v7804_v52 = vld [vmem:[#allocation3 + $0x22] sm:$0xff] }
 0xc98   :  { %14434 = vmatpush1.bf16.msra.mxu0 %v21461_v17  ;;  %v12431_v17 = vld [vmem:[%s21417_s7 + $0xd58] sm:$0xff] }
 0xc99   :  { %14435 = vmatprep.subr.bf16.mxu0 %v21445_v63  ;;  %v14480_v60 = vpack.c.bf16 %v12431_v17, %v12423_v10  ;;  %v12410_v10 = vld [vmem:[%s21417_s7 + $0xcb0] sm:$0xff] }
 0xc9a   :  { %v12418_v17 = vld [vmem:[%s21417_s7 + $0xcf0] sm:$0xff] }
 0xc9c   :  { %14437 = vmatpush1.bf16.msra.mxu0 %v21462_v29 }
 0xc9d   :  { %14438 = vmatprep.subr.bf16.mxu0 %v21445_v63 }
 0xca0   :  { %14440 = vmatpush1.bf16.msra.mxu0 %v21463_v19  ;;  %v14478_v19 = vpack.c.bf16 %v12414_v13, %v12406_v44  ;;  %v14506_v44 = vpack.c.bf16 %v12402_v40, %v12394_v11  ;;  %v7826_v11 = vld [vmem:[#allocation3 + $0xd2] sm:$0xff] }
 0xca1   :  { %14441 = vmatprep.subr.bf16.mxu0 %v21445_v63 }
 0xca4   :  { %14443 = vmatpush1.bf16.msra.mxu0 %v21465_v21  ;;  %v12422_v21 = vld [vmem:[%s21417_s7 + $0xd10] sm:$0xff] }
 0xca5   :  { %14444 = vmatprep.subr.bf16.mxu0 %v21445_v63 }
 0xca8   :  { %14446 = vmatpush1.bf16.msra.mxu0 %v21468_v57  ;;  %v12439_v57 = vld [vmem:[%s21417_s7 + $0xd98] sm:$0xff] }
 0xca9   :  { %14447 = vmatprep.subr.bf16.mxu0 %v21445_v63  ;;  %v14484_v7 = vpack.c.bf16 %v12447_v43, %v12439_v57  ;;  %v12434_v57 = vld [vmem:[%s21417_s7 + $0xd70] sm:$0xff]  ;;  %v12443_v43 = vld [vmem:[%s21417_s7 + $0xdb8] sm:$0xff] }
 0xcac   :  { %14449 = vmatpush1.bf16.msra.mxu0 %v21471_v33  ;;  %v14482_v33 = vpack.c.bf16 %v12430_v51, %v12422_v21  ;;  %v12426_v51 = vld [vmem:[%s21417_s7 + $0xd30] sm:$0xff] }
 0xcad   :  { %14450 = vmatprep.subr.bf16.mxu0 %v21445_v63 }
 0xcb0   :  { %14452 = vmatpush1.bf16.msra.mxu0 %v21474_v35  ;;  %v12446_v35 = vld [vmem:[%s21417_s7 + $0xdd0] sm:$0xff] }
 0xcb1   :  { %14453 = vmatprep.subr.bf16.mxu0 %v21445_v63  ;;  %v14486_v0 = vpack.c.bf16 %v12446_v35, %v12438_v32  ;;  %v12442_v32 = vld [vmem:[%s21417_s7 + $0xdb0] sm:$0xff] }
 0xcb2   :  { %v12450_v35 = vld [vmem:[%s21417_s7 + $0xdf0] sm:$0xff] }
 0xcb3   :  { %v14518_v62 = vpack.c.bf16 %v12450_v35, %v12442_v32  ;;  %v12512_v32 = vld [vmem:[%s21417_s7 + $0xf40] sm:$0xff] }
 0xcb4   :  { %14455 = vmatpush1.bf16.msra.mxu0 %v14454_v18 }
 0xcb5   :  { %7301 = vmatprep.subr.mxu0 %v21444_v4 }
 0xcb8   :  { %7302 = vmatpush1.msra.mxu0 %v7252_v16  ;;  %v12400_v16 = vld [vmem:[%s21417_s7 + $0xc60] sm:$0xff] }
 0xcb9   :  { %7318 = vmatmul.mubr.f32.vlgmr.msra.gmra.mrb[110].mxu0 %v20476_v37  ;;  %14457 = vmatprep.subr.bf16.mxu0 %v14456_v28  ;;  %v14490_v12 = vpack.c.bf16 %v12400_v16, %v12392_v23  ;;  %v7805_v23 = vld [vmem:[#allocation3 + $0x2a] sm:$0xff] }
 0xcba   :  { %12385 = vmatprep.mubr.msk.f32.mxu0 %vm3855_vm3, %v20479_v58  ;;  %14459 = vmatpush1.bf16.msra.mxu0 %v14458_v1  ;;  %v12409_v1 = vld [vmem:[%s21417_s7 + $0xca8] sm:$0xff] }
 0xcbb   :  { %14461 = vmatprep.subr.bf16.mxu0 %v14460_v39  ;;  %v12417_v39 = vld [vmem:[%s21417_s7 + $0xce8] sm:$0xff] }
 0xcbc   :  { %v14492_v42 = vpack.c.bf16 %v12417_v39, %v12409_v1  ;;  %v7808_v1 = vld [vmem:[#allocation3 + $0x42] sm:$0xff]  ;;  %v7807_v39 = vld [vmem:[#allocation3 + $0x3a] sm:$0xff] }
 0xcbd   :  { %7323 = vmatmul.mubr.f32.gmra.mrb[112].mxu0 %v20495_v38 }
 0xcbe   :  { %12386 = vmatprep.mubr.msk.f32.mxu0 %vm3855_vm3, %v20498_v46  ;;  %14463 = vmatpush1.bf16.msra.mxu0 %v14462_v48  ;;  %v12416_v48 = vld [vmem:[%s21417_s7 + $0xce0] sm:$0xff] }
 0xcbf   :  { %14465 = vmatprep.subr.bf16.mxu0 %v14464_v20  ;;  %v12425_v20 = vld [vmem:[%s21417_s7 + $0xd28] sm:$0xff]  ;;  %v14494_v3 = vpack.c.bf16 %v12416_v48, %v12408_v50  ;;  %v7814_v48 = vld [vmem:[#allocation3 + $0x72] sm:$0xff] }
 0xcc0   :  { %v14496_v9 = vpack.c.bf16 %v12433_v27, %v12425_v20  ;;  %v7811_v50 = vld [vmem:[#allocation3 + $0x5a] sm:$0xff]  ;;  %v7813_v20 = vld [vmem:[#allocation3 + $0x6a] sm:$0xff] }
 0xcc1   :  { %7328 = vmatmul.mubr.f32.gmra.mrb[114].mxu0 %v20508_v47  ;;  %v14536_v27 = vpack.c.bf16 %v7814_v48, %v7813_v20  ;;  %v12490_v48 = vld [vmem:[%s21417_s7 + $0xe90] sm:$0xff] }
 0xcc2   :  { %12387 = vmatprep.mubr.msk.f32.mxu0 %vm3855_vm3, %v20511_v14  ;;  %14467 = vmatpush1.bf16.msra.mxu0 %v14466_v6  ;;  %v12432_v6 = vld [vmem:[%s21417_s7 + $0xd60] sm:$0xff]  ;;  %v12498_v20 = vld [vmem:[%s21417_s7 + $0xed0] sm:$0xff] }
 0xcc3   :  { %14469 = vmatprep.subr.bf16.mxu0 %v14468_v55  ;;  %v12441_v55 = vld [vmem:[%s21417_s7 + $0xda8] sm:$0xff]  ;;  %v14498_v30 = vpack.c.bf16 %v12432_v6, %v12424_v61  ;;  %v7818_v61 = vld [vmem:[#allocation3 + $0x92] sm:$0xff] }
 0xcc5   :  { %7333 = vmatmul.mubr.f32.gmra.mrb[116].mxu0 %v20515_v26 }
 0xcc6   :  { %14471 = vmatpush1.bf16.msra.mxu0 %v14470_v45  ;;  %7479 = vmatprep.mubr.f32.mxu0 %v21444_v4  ;;  %v14500_v45 = vpack.c.bf16 %v12449_v5, %v12441_v55  ;;  %v7820_v55 = vld [vmem:[#allocation3 + $0xa2] sm:$0xff]  ;;  %v7819_v5 = vld [vmem:[#allocation3 + $0x9a] sm:$0xff] }
 0xcc7   :  { %14473 = vmatprep.subr.bf16.mxu0 %v14472_v8  ;;  %v12395_v8 = vld [vmem:[%s21417_s7 + $0xc38] sm:$0xff] }
 0xcc8   :  { %v14504_v49 = vpack.c.bf16 %v12403_v54, %v12395_v8  ;;  %v7824_v8 = vld [vmem:[#allocation3 + $0xc2] sm:$0xff]  ;;  %v7823_v54 = vld [vmem:[#allocation3 + $0xba] sm:$0xff] }
 0xd8c   :  { %v20554_v15 = vpop.f32.mrb[110].mxu0 }
 0xd8d   :  { %v7321_v29 = vpop.f32.mrb[111].mxu0  ;;  %12452 = vmatmul.mubr.msk.f32.vlgmr.msra.gmra.mrb[46].mxu0 %vm3767_vm2, %v20554_v15 }
 0xd8e   :  { %14475 = vmatpush1.bf16.msra.mxu0 %v14474_v41  ;;  %7485 = vmatprep.mubr.f32.mxu0 %v21444_v4  ;;  %v12411_v41 = vld [vmem:[%s21417_s7 + $0xcb8] sm:$0xff] }
 0xd8f   :  { %14477 = vmatprep.subr.bf16.mxu0 %v14476_v59  ;;  %v12419_v59 = vld [vmem:[%s21417_s7 + $0xcf8] sm:$0xff] }
 0xd90   :  { %v20571_v24 = vpop.f32.mrb[112].mxu0  ;;  %v14508_v13 = vpack.c.bf16 %v12419_v59, %v12411_v41  ;;  %v12427_v29 = vld [vmem:[%s21417_s7 + $0xd38] sm:$0xff]  ;;  %v12473_v41 = vld [vmem:[%s21417_s7 + $0xe08] sm:$0xff] }
 0xd91   :  { %v7326_v34 = vpop.f32.mrb[113].mxu0  ;;  %12453 = vmatmul.mubr.msk.f32.gmra.mrb[48].mxu0 %vm3767_vm2, %v20571_v24  ;;  %v12481_v59 = vld [vmem:[%s21417_s7 + $0xe48] sm:$0xff] }
 0xd92   :  { %14479 = vmatpush1.bf16.msra.mxu0 %v14478_v19  ;;  %7491 = vmatprep.mubr.f32.mxu0 %v21444_v4  ;;  %v12435_v19 = vld [vmem:[%s21417_s7 + $0xd78] sm:$0xff] }
 0xd93   :  { %14481 = vmatprep.subr.bf16.mxu0 %v14480_v60  ;;  %v14510_v60 = vpack.c.bf16 %v12418_v17, %v12410_v10  ;;  %v14512_v21 = vpack.c.bf16 %v12435_v19, %v12427_v29  ;;  %v12451_v34 = vld [vmem:[%s21417_s7 + $0xdf8] sm:$0xff]  ;;  %v12497_v10 = vld [vmem:[%s21417_s7 + $0xec8] sm:$0xff]  ;;  %v14556_v29 = vpack.c.bf16 %v12481_v59, %v12473_v41 }
 0xd94   :  { %v20588_v18 = vpop.f32.mrb[114].mxu0  ;;  %v7827_v17 = vld [vmem:[#allocation3 + $0xda] sm:$0xff] }
 0xd95   :  { %v7331_v56 = vpop.f32.mrb[115].mxu0  ;;  %12454 = vmatmul.mubr.msk.f32.gmra.mrb[50].mxu0 %vm3767_vm2, %v20588_v18 }
 0xd96   :  { %14483 = vmatpush1.bf16.msra.mxu0 %v14482_v33  ;;  %7497 = vmatprep.mubr.f32.mxu0 %v21444_v4  ;;  %v14514_v33 = vpack.c.bf16 %v12434_v57, %v12426_v51  ;;  %v7803_v56 = vld [vmem:[#allocation3 + $0x1a] sm:$0xff] }
 0xd97   :  { %14485 = vmatprep.subr.bf16.mxu0 %v14484_v7  ;;  %v14516_v7 = vpack.c.bf16 %v12451_v34, %v12443_v43  ;;  %v12496_v51 = vld [vmem:[%s21417_s7 + $0xec0] sm:$0xff]  ;;  %v12505_v57 = vld [vmem:[%s21417_s7 + $0xf08] sm:$0xff] }
 0xd98   :  { %v20605_v28 = vpop.f32.mrb[116].mxu0  ;;  %v12513_v43 = vld [vmem:[%s21417_s7 + $0xf48] sm:$0xff] }
 0xd99   :  { %v7336_v25 = vpop.f32.mrb[117].mxu0  ;;  %12455 = vmatmul.mubr.msk.f32.gmra.mrb[52].mxu0 %vm3767_vm2, %v20605_v28 }
 0xd9a   :  { %14487 = vmatpush1.bf16.msra.mxu0 %v14486_v0  ;;  %7568 = vmatprep.mubr.f32.mxu0 %v21444_v4  ;;  %v14521_v0 = vpack.c.bf16 %v7804_v52, %v7803_v56  ;;  %v14527_v25 = vpack.c.bf16 %v7808_v1, %v7807_v39  ;;  %v12520_v52 = vld [vmem:[%s21417_s7 + $0xf80] sm:$0xff] }
 0xd9b   :  { %14489 = vmatprep.subr.bf16.mxu0 %v14488_v53  ;;  %v7806_v53 = vld [vmem:[#allocation3 + $0x32] sm:$0xff] }
 0xd9c   :  { %v14524_v16 = vpack.c.bf16 %v7806_v53, %v7805_v23  ;;  %v12528_v56 = vld [vmem:[%s21417_s7 + $0xfc0] sm:$0xff]  ;;  %v20809_v53 = vpop.f32.mrb[70].mxu1 }
 0xd9d   :  { %12456 = vmatmul.mubr.msk.f32.vlgmr.msra.gmra.mrb[54].mxu0 %vm3767_vm2, %v20554_v15 }
 0xd9e   :  { %14491 = vmatpush1.bf16.msra.mxu0 %v14490_v12  ;;  %7574 = vmatprep.mubr.f32.mxu0 %v21444_v4  ;;  %v7809_v12 = vld [vmem:[#allocation3 + $0x4a] sm:$0xff] }
 0xd9f   :  { %14493 = vmatprep.subr.bf16.mxu0 %v14492_v42 }
 0xda1   :  { %12457 = vmatmul.mubr.msk.f32.gmra.mrb[56].mxu0 %vm3767_vm2, %v20571_v24 }
 0xda2   :  { %14495 = vmatpush1.bf16.msra.mxu0 %v14494_v3  ;;  %7580 = vmatprep.mubr.f32.mxu0 %v21444_v4  ;;  %v7816_v3 = vld [vmem:[#allocation3 + $0x82] sm:$0xff] }
 0xda3   :  { %14497 = vmatprep.subr.bf16.mxu0 %v14496_v9 }
 0xda5   :  { %12458 = vmatmul.mubr.msk.f32.gmra.mrb[58].mxu0 %vm3767_vm2, %v20588_v18 }
 0xda6   :  { %14499 = vmatpush1.bf16.msra.mxu0 %v14498_v30  ;;  %7586 = vmatprep.mubr.f32.mxu0 %v21444_v4  ;;  %v14545_v30 = vpack.c.bf16 %v7820_v55, %v7819_v5  ;;  %v12514_v55 = vld [vmem:[%s21417_s7 + $0xf50] sm:$0xff] }
 0xda7   :  { %14501 = vmatprep.subr.bf16.mxu0 %v14500_v45  ;;  %v7822_v45 = vld [vmem:[#allocation3 + $0xb2] sm:$0xff] }
 0xda8   :  { %v14548_v22 = vpack.c.bf16 %v7822_v45, %v7821_v2  ;;  %v12531_v45 = vld [vmem:[%s21417_s7 + $0xfd8] sm:$0xff] }
 0xda9   :  { %12459 = vmatmul.mubr.msk.f32.gmra.mrb[60].mxu0 %vm3767_vm2, %v20605_v28 }
 0xdaa   :  { %14503 = vmatpush1.bf16.msra.mxu0 %v14502_v31  ;;  %7657 = vmatprep.mubr.f32.mxu0 %v21444_v4  ;;  %v14551_v31 = vpack.c.bf16 %v7824_v8, %v7823_v54  ;;  %v12522_v54 = vld [vmem:[%s21417_s7 + $0xf90] sm:$0xff] }
 0xdab   :  { %14505 = vmatprep.subr.bf16.mxu0 %v14504_v49  ;;  %v7825_v49 = vld [vmem:[#allocation3 + $0xca] sm:$0xff] }
 0xdac   :  { %v14554_v40 = vpack.c.bf16 %v7826_v11, %v7825_v49  ;;  %v12477_v11 = vld [vmem:[%s21417_s7 + $0xe28] sm:$0xff] }
 0xdad   :  { %12460 = vmatmul.mubr.msk.f32.vlgmr.msra.gmra.mrb[62].mxu0 %vm3767_vm2, %v20554_v15 }
 0xdae   :  { %14507 = vmatpush1.bf16.msra.mxu0 %v14506_v44  ;;  %7663 = vmatprep.mubr.f32.mxu0 %v21444_v4  ;;  %v12472_v44 = vld [vmem:[%s21417_s7 + $0xe00] sm:$0xff] }
 0xdaf   :  { %14509 = vmatprep.subr.bf16.mxu0 %v14508_v13  ;;  %v12480_v13 = vld [vmem:[%s21417_s7 + $0xe40] sm:$0xff] }
 0xdb0   :  { %v14558_v19 = vpack.c.bf16 %v12480_v13, %v12472_v44  ;;  %v12476_v13 = vld [vmem:[%s21417_s7 + $0xe20] sm:$0xff] }
 0xdb1   :  { %12461 = vmatmul.mubr.msk.f32.gmra.mrb[64].mxu0 %vm3767_vm2, %v20571_v24 }
 0xdb2   :  { %14511 = vmatpush1.bf16.msra.mxu0 %v14510_v60  ;;  %7669 = vmatprep.mubr.f32.mxu0 %v21444_v4 }
 0xdb3   :  { %14513 = vmatprep.subr.bf16.mxu0 %v14512_v21  ;;  %v12488_v21 = vld [vmem:[%s21417_s7 + $0xe80] sm:$0xff] }
 0xdb4   :  { %v14562_v34 = vpack.c.bf16 %v12496_v51, %v12488_v21  ;;  %v12492_v51 = vld [vmem:[%s21417_s7 + $0xea0] sm:$0xff] }
 0xdb5   :  { %12462 = vmatmul.mubr.msk.f32.gmra.mrb[66].mxu0 %vm3767_vm2, %v20588_v18 }
 0xdb6   :  { %14515 = vmatpush1.bf16.msra.mxu0 %v14514_v33  ;;  %7675 = vmatprep.mubr.f32.mxu0 %v21444_v4  ;;  %v14564_v33 = vpack.c.bf16 %v12513_v43, %v12505_v57  ;;  %v12500_v57 = vld [vmem:[%s21417_s7 + $0xee0] sm:$0xff]  ;;  %v12509_v43 = vld [vmem:[%s21417_s7 + $0xf28] sm:$0xff] }
 0xdb7   :  { %14517 = vmatprep.subr.bf16.mxu0 %v14516_v7  ;;  %v12504_v7 = vld [vmem:[%s21417_s7 + $0xf00] sm:$0xff] }
 0xdb8   :  { %v14566_v35 = vpack.c.bf16 %v12512_v32, %v12504_v7  ;;  %v12508_v32 = vld [vmem:[%s21417_s7 + $0xf20] sm:$0xff] }
 0xdb9   :  { %12463 = vmatmul.mubr.msk.f32.gmra.mrb[68].mxu0 %vm3767_vm2, %v20605_v28 }
 0xdba   :  { %14519 = vmatpush1.bf16.msra.mxu0 %v14518_v62  ;;  %7746 = vmatprep.mubr.f32.mxu0 %v21444_v4 }
 0xdbb   :  { %14520 = vmatprep.subr.bf16.mxu0 %v21445_v63 }
 0xdbd   :  { %12464 = vmatmul.mubr.msk.f32.vlgmr.msra.gmra.mrb[70].mxu0 %vm3767_vm2, %v20554_v15  ;;  %v7810_v15 = vld [vmem:[#allocation3 + $0x52] sm:$0xff] }
 0xdbe   :  { %14522 = vmatpush1.bf16.msra.mxu0 %v14521_v0  ;;  %7752 = vmatprep.mubr.f32.mxu0 %v21444_v4  ;;  %v14530_v42 = vpack.c.bf16 %v7810_v15, %v7809_v12  ;;  %v12483_v0 = vld [vmem:[%s21417_s7 + $0xe58] sm:$0xff]  ;;  %v12474_v15 = vld [vmem:[%s21417_s7 + $0xe10] sm:$0xff] }
 0xdbf   :  { %14523 = vmatprep.subr.bf16.mxu0 %v21445_v63  ;;  %v12482_v12 = vld [vmem:[%s21417_s7 + $0xe50] sm:$0xff] }
 0xdc1   :  { %12465 = vmatmul.mubr.msk.f32.gmra.mrb[72].mxu0 %vm3767_vm2, %v20571_v24  ;;  %v7812_v24 = vld [vmem:[#allocation3 + $0x62] sm:$0xff] }
 0xdc2   :  { %14525 = vmatpush1.bf16.msra.mxu0 %v14524_v16  ;;  %7758 = vmatprep.mubr.f32.mxu0 %v21444_v4 }
 0xdc3   :  { %14526 = vmatprep.subr.bf16.mxu0 %v21445_v63 }
 0xdc5   :  { %12466 = vmatmul.mubr.msk.f32.gmra.mrb[74].mxu0 %vm3767_vm2, %v20588_v18  ;;  %v14533_v18 = vpack.c.bf16 %v7812_v24, %v7811_v50  ;;  %v12499_v24 = vld [vmem:[%s21417_s7 + $0xed8] sm:$0xff]  ;;  %v14574_v50 = vpack.c.bf16 %v12482_v12, %v12474_v15 }
 0xdc6   :  { %14528 = vmatpush1.bf16.msra.mxu0 %v14527_v25  ;;  %7764 = vmatprep.mubr.f32.mxu0 %v21444_v4  ;;  %v12503_v15 = vld [vmem:[%s21417_s7 + $0xef8] sm:$0xff] }
 0xdc7   :  { %14529 = vmatprep.subr.bf16.mxu0 %v21445_v63 }
 0xdc9   :  { %12467 = vmatmul.mubr.msk.f32.gmra.mrb[76].mxu0 %vm3767_vm2, %v20605_v28  ;;  %v7815_v28 = vld [vmem:[#allocation3 + $0x7a] sm:$0xff] }
 0xdca   :  { %14531 = vmatpush1.bf16.msra.mxu0 %v14530_v42  ;;  %12468 = vmatprep.mubr.msk.f32.mxu0 %vm3855_vm3, %v20119_v36  ;;  %v14539_v9 = vpack.c.bf16 %v7816_v3, %v7815_v28  ;;  %v7817_v36 = vld [vmem:[#allocation3 + $0x8a] sm:$0xff] }
 0xdcb   :  { %14532 = vmatprep.subr.bf16.mxu0 %v21445_v63  ;;  %v14542_v6 = vpack.c.bf16 %v7818_v61, %v7817_v36  ;;  %v12491_v42 = vld [vmem:[%s21417_s7 + $0xe98] sm:$0xff]  ;;  %v14578_v61 = vpack.c.bf16 %v12498_v20, %v12490_v48 }
 0xdcc   :  { %v12507_v3 = vld [vmem:[%s21417_s7 + $0xf18] sm:$0xff] }
 0xdcd   :  { %v12515_v28 = vld [vmem:[%s21417_s7 + $0xf58] sm:$0xff] }
 0xdce   :  { %14534 = vmatpush1.bf16.msra.mxu0 %v14533_v18  ;;  %v14576_v18 = vpack.c.bf16 %v12499_v24, %v12491_v42  ;;  %v14580_v36 = vpack.c.bf16 %v12515_v28, %v12507_v3  ;;  %v12494_v24 = vld [vmem:[%s21417_s7 + $0xeb0] sm:$0xff]  ;;  %v12519_v48 = vld [vmem:[%s21417_s7 + $0xf78] sm:$0xff] }
 0xdcf   :  { %14535 = vmatprep.subr.bf16.mxu0 %v21445_v63  ;;  %v12510_v28 = vld [vmem:[%s21417_s7 + $0xf30] sm:$0xff] }
 0xdd2   :  { %14537 = vmatpush1.bf16.msra.mxu0 %v14536_v27 }
 0xdd3   :  { %14538 = vmatprep.subr.bf16.mxu0 %v21445_v63 }
 0xdd6   :  { %14540 = vmatpush1.bf16.msra.mxu0 %v14539_v9 }
 0xdd7   :  { %14541 = vmatprep.subr.bf16.mxu0 %v21445_v63 }
 0xdda   :  { %14543 = vmatpush1.bf16.msra.mxu0 %v14542_v6  ;;  %v12506_v6 = vld [vmem:[%s21417_s7 + $0xf10] sm:$0xff] }
 0xddb   :  { %14544 = vmatprep.subr.bf16.mxu0 %v21445_v63 }
 0xdde   :  { %14546 = vmatpush1.bf16.msra.mxu0 %v14545_v30  ;;  %v12523_v30 = vld [vmem:[%s21417_s7 + $0xf98] sm:$0xff] }
 0xddf   :  { %14547 = vmatprep.subr.bf16.mxu0 %v21445_v63  ;;  %v14584_v8 = vpack.c.bf16 %v12531_v45, %v12523_v30  ;;  %v12526_v30 = vld [vmem:[%s21417_s7 + $0xfb0] sm:$0xff] }
 0xde0   :  { %v12534_v45 = vld [vmem:[%s21417_s7 + $0xff0] sm:$0xff] }
 0xde2   :  { %14549 = vmatpush1.bf16.msra.mxu0 %v14548_v22  ;;  %v14582_v22 = vpack.c.bf16 %v12514_v55, %v12506_v6 }
 0xde3   :  { %14550 = vmatprep.subr.bf16.mxu0 %v21445_v63 }
 0xde6   :  { %14552 = vmatpush1.bf16.msra.mxu0 %v14551_v31  ;;  %v12530_v31 = vld [vmem:[%s21417_s7 + $0xfd0] sm:$0xff] }
 0xde7   :  { %14553 = vmatprep.subr.bf16.mxu0 %v21445_v63  ;;  %v12489_v63 = vld [vmem:[%s21417_s7 + $0xe88] sm:$0xff]  ;;  %v14586_v59 = vpack.c.bf16 %v12530_v31, %v12522_v54  ;;  %v12556_v31 = vld [vmem:[%s21417_s7 + $0x1000] sm:$0xff] }
 0xde8   :  { %v14560_v60 = vpack.c.bf16 %v12497_v10, %v12489_v63  ;;  %v12484_v63 = vld [vmem:[%s21417_s7 + $0xe60] sm:$0xff] }
 0xdea   :  { %14555 = vmatpush1.bf16.msra.mxu0 %v14554_v40  ;;  %v12485_v40 = vld [vmem:[%s21417_s7 + $0xe68] sm:$0xff] }
 0xdeb   :  { %7876 = vmatprep.subr.mxu0 %v21444_v4  ;;  %v14588_v44 = vpack.c.bf16 %v12485_v40, %v12477_v11  ;;  %v12564_v11 = vld [vmem:[%s21417_s7 + $0x1040] sm:$0xff]  ;;  %v12573_v40 = vld [vmem:[%s21417_s7 + $0x1088] sm:$0xff] }
 0xdee   :  { %7877 = vmatpush1.msra.mxu0 %v7827_v17  ;;  %v12493_v17 = vld [vmem:[%s21417_s7 + $0xea8] sm:$0xff] }
 0xdef   :  { %7893 = vmatmul.mubr.f32.vlgmr.msra.gmra.mrb[118].mxu0 %v20476_v37  ;;  %14557 = vmatprep.subr.bf16.mxu0 %v14556_v29  ;;  %v12521_v37 = vld [vmem:[%s21417_s7 + $0xf88] sm:$0xff] }
 0xdf0   :  { %12469 = vmatprep.mubr.msk.f32.mxu0 %vm3855_vm3, %v20479_v58  ;;  %14559 = vmatpush1.bf16.msra.mxu0 %v14558_v19  ;;  %v12529_v58 = vld [vmem:[%s21417_s7 + $0xfc8] sm:$0xff] }
 0xdf1   :  { %14561 = vmatprep.subr.bf16.mxu0 %v14560_v60  ;;  %v14568_v62 = vpack.c.bf16 %v12529_v58, %v12521_v37  ;;  %v12501_v29 = vld [vmem:[%s21417_s7 + $0xee8] sm:$0xff]  ;;  %v14590_v60 = vpack.c.bf16 %v12484_v63, %v12476_v13  ;;  %v12516_v37 = vld [vmem:[%s21417_s7 + $0xf60] sm:$0xff] }
 0xdf2   :  { %v14592_v21 = vpack.c.bf16 %v12501_v29, %v12493_v17  ;;  %v12525_v58 = vld [vmem:[%s21417_s7 + $0xfa8] sm:$0xff]  ;;  %v12572_v13 = vld [vmem:[%s21417_s7 + $0x1080] sm:$0xff] }
 0xdf3   :  { %7898 = vmatmul.mubr.f32.gmra.mrb[120].mxu0 %v20495_v38  ;;  %v14570_v38 = vpack.c.bf16 %v12528_v56, %v12520_v52  ;;  %v12524_v56 = vld [vmem:[%s21417_s7 + $0xfa0] sm:$0xff]  ;;  %v12589_v17 = vld [vmem:[%s21417_s7 + $0x1108] sm:$0xff] }
 0xdf4   :  { %12470 = vmatprep.mubr.msk.f32.mxu0 %vm3855_vm3, %v20498_v46  ;;  %14563 = vmatpush1.bf16.msra.mxu0 %v14562_v34  ;;  %v12475_v46 = vld [vmem:[%s21417_s7 + $0xe18] sm:$0xff]  ;;  %v12517_v34 = vld [vmem:[%s21417_s7 + $0xf68] sm:$0xff]  ;;  %v12580_v63 = vld [vmem:[%s21417_s7 + $0x10c0] sm:$0xff] }
 0xdf5   :  { %14565 = vmatprep.subr.bf16.mxu0 %v14564_v33  ;;  %v14594_v33 = vpack.c.bf16 %v12500_v57, %v12492_v51  ;;  %v14596_v7 = vpack.c.bf16 %v12517_v34, %v12509_v43  ;;  %v12597_v29 = vld [vmem:[%s21417_s7 + $0x1148] sm:$0xff]  ;;  %v12596_v51 = vld [vmem:[%s21417_s7 + $0x1140] sm:$0xff] }
 0xdf6   :  { %v12605_v57 = vld [vmem:[%s21417_s7 + $0x1188] sm:$0xff] }
 0xdf7   :  { %7903 = vmatmul.mubr.f32.gmra.mrb[122].mxu0 %v20508_v47  ;;  %v14572_v47 = vpack.c.bf16 %v12483_v0, %v12475_v46  ;;  %v12479_v46 = vld [vmem:[%s21417_s7 + $0xe38] sm:$0xff] }
 0xdf8   :  { %12471 = vmatprep.mubr.msk.f32.mxu0 %vm3855_vm3, %v20511_v14  ;;  %14567 = vmatpush1.bf16.msra.mxu0 %v14566_v35  ;;  %v8471_v14 = vpop.f32.mrb[71].mxu1  ;;  %v12533_v35 = vld [vmem:[%s21417_s7 + $0xfe8] sm:$0xff]  ;;  %v12487_v0 = vld [vmem:[%s21417_s7 + $0xe78] sm:$0xff] }
 0xdf9   :  { %14569 = vmatprep.subr.bf16.mxu0 %v14568_v62  ;;  %v20811_v23 = vpop.f32.mrb[72].mxu1  ;;  %v14598_v62 = vpack.c.bf16 %v12516_v37, %v12508_v32  ;;  %v14600_v52 = vpack.c.bf16 %v12533_v35, %v12525_v58  ;;  %v14604_v14 = vpack.c.bf16 %v12487_v0, %v12479_v46  ;;  %v12559_v32 = vld [vmem:[%s21417_s7 + $0x1018] sm:$0xff]  ;;  %v12558_v35 = vld [vmem:[%s21417_s7 + $0x1010] sm:$0xff] }
 0xdfa   :  { %v8476_v16 = vpop.f32.mrb[73].mxu1  ;;  %v12574_v46 = vld [vmem:[%s21417_s7 + $0x1090] sm:$0xff] }
 0xdfb   :  { %7908 = vmatmul.mubr.f32.gmra.mrb[124].mxu0 %v20515_v26  ;;  %v20813_v26 = vpop.f32.mrb[74].mxu1  ;;  %v12478_v16 = vld [vmem:[%s21417_s7 + $0xe30] sm:$0xff] }
 0xdfc   :  { %14571 = vmatpush1.bf16.msra.mxu0 %v14570_v38  ;;  %8054 = vmatprep.mubr.f32.mxu0 %v21444_v4  ;;  %v8481_v1 = vpop.f32.mrb[75].mxu1  ;;  %v12532_v38 = vld [vmem:[%s21417_s7 + $0xfe0] sm:$0xff]  ;;  %v12582_v0 = vld [vmem:[%s21417_s7 + $0x10d0] sm:$0xff] }
 0xdfd   :  { %14573 = vmatprep.subr.bf16.mxu0 %v14572_v47  ;;  %v20815_v39 = vpop.f32.mrb[76].mxu1  ;;  %v14602_v47 = vpack.c.bf16 %v12532_v38, %v12524_v56  ;;  %v12486_v1 = vld [vmem:[%s21417_s7 + $0xe70] sm:$0xff] }
 0xdfe   :  { %v8486_v25 = vpop.f32.mrb[77].mxu1  ;;  %v14606_v12 = vpack.c.bf16 %v12486_v1, %v12478_v16  ;;  %v12590_v1 = vld [vmem:[%s21417_s7 + $0x1110] sm:$0xff] }
 0xdff   :  { %v12495_v25 = vld [vmem:[%s21417_s7 + $0xeb8] sm:$0xff] }
 0xe00   :  { %v14608_v42 = vpack.c.bf16 %v12503_v15, %v12495_v25  ;;  %v12598_v25 = vld [vmem:[%s21417_s7 + $0x1150] sm:$0xff]  ;;  %v12607_v15 = vld [vmem:[%s21417_s7 + $0x1198] sm:$0xff] }
 0xec2   :  { %v20835_v27 = vpop.f32.mrb[118].mxu0 }
 0xec3   :  { %v7896_v9 = vpop.f32.mrb[119].mxu0  ;;  %12536 = vmatmul.mubr.msk.f32.vlgmr.msra.gmra.mrb[46].mxu0 %vm3767_vm2, %v20835_v27 }
 0xec4   :  { %14575 = vmatpush1.bf16.msra.mxu0 %v14574_v50  ;;  %8060 = vmatprep.mubr.f32.mxu0 %v21444_v4  ;;  %v12502_v50 = vld [vmem:[%s21417_s7 + $0xef0] sm:$0xff] }
 0xec5   :  { %14577 = vmatprep.subr.bf16.mxu0 %v14576_v18  ;;  %v12511_v18 = vld [vmem:[%s21417_s7 + $0xf38] sm:$0xff]  ;;  %v14610_v20 = vpack.c.bf16 %v12502_v50, %v12494_v24  ;;  %v12518_v9 = vld [vmem:[%s21417_s7 + $0xf70] sm:$0xff] }
 0xec6   :  { %v20852_v5 = vpop.f32.mrb[120].mxu0  ;;  %v14612_v3 = vpack.c.bf16 %v12519_v48, %v12511_v18  ;;  %v14614_v6 = vpack.c.bf16 %v12518_v9, %v12510_v28  ;;  %v12606_v50 = vld [vmem:[%s21417_s7 + $0x1190] sm:$0xff]  ;;  %v12561_v48 = vld [vmem:[%s21417_s7 + $0x1028] sm:$0xff]  ;;  %v12560_v9 = vld [vmem:[%s21417_s7 + $0x1020] sm:$0xff] }
 0xec7   :  { %v7901_v2 = vpop.f32.mrb[121].mxu0  ;;  %12537 = vmatmul.mubr.msk.f32.gmra.mrb[48].mxu0 %vm3767_vm2, %v20852_v5  ;;  %v12614_v18 = vld [vmem:[%s21417_s7 + $0x11d0] sm:$0xff] }
 0xec8   :  { %14579 = vmatpush1.bf16.msra.mxu0 %v14578_v61  ;;  %8066 = vmatprep.mubr.f32.mxu0 %v21444_v4  ;;  %v12527_v61 = vld [vmem:[%s21417_s7 + $0xfb8] sm:$0xff]  ;;  %v12557_v2 = vld [vmem:[%s21417_s7 + $0x1008] sm:$0xff] }
 0xec9   :  { %14581 = vmatprep.subr.bf16.mxu0 %v14580_v36  ;;  %v12535_v36 = vld [vmem:[%s21417_s7 + $0xff8] sm:$0xff] }
 0xeca   :  { %v20869_v49 = vpop.f32.mrb[122].mxu0  ;;  %v14616_v55 = vpack.c.bf16 %v12535_v36, %v12527_v61  ;;  %v12568_v61 = vld [vmem:[%s21417_s7 + $0x1060] sm:$0xff]  ;;  %v12577_v36 = vld [vmem:[%s21417_s7 + $0x10a8] sm:$0xff] }
 0xecb   :  { %v7906_v41 = vpop.f32.mrb[123].mxu0  ;;  %12538 = vmatmul.mubr.msk.f32.gmra.mrb[50].mxu0 %vm3767_vm2, %v20869_v49 }
 0xecc   :  { %14583 = vmatpush1.bf16.msra.mxu0 %v14582_v22  ;;  %8072 = vmatprep.mubr.f32.mxu0 %v21444_v4  ;;  %v12565_v22 = vld [vmem:[%s21417_s7 + $0x1048] sm:$0xff] }
 0xecd   :  { %14585 = vmatprep.subr.bf16.mxu0 %v14584_v8  ;;  %v14618_v8 = vpack.c.bf16 %v12534_v45, %v12526_v30  ;;  %v14656_v54 = vpack.c.bf16 %v12565_v22, %v12557_v2  ;;  %v12581_v41 = vld [vmem:[%s21417_s7 + $0x10c8] sm:$0xff]  ;;  %v12576_v45 = vld [vmem:[%s21417_s7 + $0x10a0] sm:$0xff] }
 0xece   :  { %v20886_v10 = vpop.f32.mrb[124].mxu0  ;;  %v12584_v2 = vld [vmem:[%s21417_s7 + $0x10e0] sm:$0xff]  ;;  %v12593_v22 = vld [vmem:[%s21417_s7 + $0x1128] sm:$0xff] }
 0xecf   :  { %v7911_v19 = vpop.f32.mrb[125].mxu0  ;;  %12539 = vmatmul.mubr.msk.f32.gmra.mrb[52].mxu0 %vm3767_vm2, %v20886_v10 }
 0xed0   :  { %14587 = vmatpush1.bf16.msra.mxu0 %v14586_v59  ;;  %8143 = vmatprep.mubr.f32.mxu0 %v21444_v4  ;;  %v14658_v59 = vpack.c.bf16 %v12564_v11, %v12556_v31  ;;  %v14662_v19 = vpack.c.bf16 %v12580_v63, %v12572_v13  ;;  %v12592_v11 = vld [vmem:[%s21417_s7 + $0x1120] sm:$0xff] }
 0xed1   :  { %14589 = vmatprep.subr.bf16.mxu0 %v14588_v44  ;;  %v14660_v44 = vpack.c.bf16 %v12581_v41, %v12573_v40  ;;  %v12600_v40 = vld [vmem:[%s21417_s7 + $0x1160] sm:$0xff]  ;;  %v12609_v41 = vld [vmem:[%s21417_s7 + $0x11a8] sm:$0xff] }
 0xed2   :  { %v12608_v63 = vld [vmem:[%s21417_s7 + $0x11a0] sm:$0xff] }
 0xed3   :  { %12540 = vmatmul.mubr.msk.f32.vlgmr.msra.gmra.mrb[54].mxu0 %vm3767_vm2, %v20835_v27 }
 0xed4   :  { %14591 = vmatpush1.bf16.msra.mxu0 %v14590_v60  ;;  %8149 = vmatprep.mubr.f32.mxu0 %v21444_v4  ;;  %v14664_v60 = vpack.c.bf16 %v12597_v29, %v12589_v17  ;;  %v12616_v17 = vld [vmem:[%s21417_s7 + $0x11e0] sm:$0xff]  ;;  %v12563_v29 = vld [vmem:[%s21417_s7 + $0x1038] sm:$0xff] }
 0xed5   :  { %14593 = vmatprep.subr.bf16.mxu0 %v14592_v21  ;;  %v12588_v21 = vld [vmem:[%s21417_s7 + $0x1100] sm:$0xff] }
 0xed6   :  { %v14666_v43 = vpack.c.bf16 %v12596_v51, %v12588_v21  ;;  %v12562_v51 = vld [vmem:[%s21417_s7 + $0x1030] sm:$0xff] }
 0xed7   :  { %12541 = vmatmul.mubr.msk.f32.gmra.mrb[56].mxu0 %vm3767_vm2, %v20852_v5 }
 0xed8   :  { %14595 = vmatpush1.bf16.msra.mxu0 %v14594_v33  ;;  %8155 = vmatprep.mubr.f32.mxu0 %v21444_v4  ;;  %v12604_v33 = vld [vmem:[%s21417_s7 + $0x1180] sm:$0xff] }
 0xed9   :  { %14597 = vmatprep.subr.bf16.mxu0 %v14596_v7  ;;  %v12612_v7 = vld [vmem:[%s21417_s7 + $0x11c0] sm:$0xff] }
 0xeda   :  { %v14670_v37 = vpack.c.bf16 %v12612_v7, %v12604_v33  ;;  %v12578_v7 = vld [vmem:[%s21417_s7 + $0x10b0] sm:$0xff] }
 0xedb   :  { %12542 = vmatmul.mubr.msk.f32.gmra.mrb[58].mxu0 %vm3767_vm2, %v20869_v49 }
 0xedc   :  { %14599 = vmatpush1.bf16.msra.mxu0 %v14598_v62  ;;  %8161 = vmatprep.mubr.f32.mxu0 %v21444_v4  ;;  %v12566_v62 = vld [vmem:[%s21417_s7 + $0x1050] sm:$0xff] }
 0xedd   :  { %14601 = vmatprep.subr.bf16.mxu0 %v14600_v52  ;;  %v12575_v52 = vld [vmem:[%s21417_s7 + $0x1098] sm:$0xff]  ;;  %v14674_v56 = vpack.c.bf16 %v12566_v62, %v12558_v35  ;;  %v12594_v62 = vld [vmem:[%s21417_s7 + $0x1130] sm:$0xff] }
 0xedf   :  { %12543 = vmatmul.mubr.msk.f32.gmra.mrb[60].mxu0 %vm3767_vm2, %v20886_v10 }
 0xee0   :  { %14603 = vmatpush1.bf16.msra.mxu0 %v14602_v47  ;;  %8232 = vmatprep.mubr.f32.mxu0 %v21444_v4  ;;  %v12591_v47 = vld [vmem:[%s21417_s7 + $0x1118] sm:$0xff] }
 0xee1   :  { %14605 = vmatprep.subr.bf16.mxu0 %v14604_v14  ;;  %v14678_v14 = vpack.c.bf16 %v12582_v0, %v12574_v46  ;;  %v12610_v0 = vld [vmem:[%s21417_s7 + $0x11b0] sm:$0xff] }
 0xee3   :  { %12544 = vmatmul.mubr.msk.f32.vlgmr.msra.gmra.mrb[62].mxu0 %vm3767_vm2, %v20835_v27 }
 0xee4   :  { %14607 = vmatpush1.bf16.msra.mxu0 %v14606_v12  ;;  %8238 = vmatprep.mubr.f32.mxu0 %v21444_v4  ;;  %v12615_v12 = vld [vmem:[%s21417_s7 + $0x11d8] sm:$0xff] }
 0xee5   :  { %14609 = vmatprep.subr.bf16.mxu0 %v14608_v42  ;;  %v14682_v42 = vpack.c.bf16 %v12598_v25, %v12590_v1  ;;  %v14684_v24 = vpack.c.bf16 %v12615_v12, %v12607_v15  ;;  %v9431_v25 = vld [vmem:[#allocation22 + $0x50] sm:$0xff]  ;;  %v9440_v12 = vld [vmem:[#allocation22 + $0x98] sm:$0xff] }
 0xee7   :  { %12545 = vmatmul.mubr.msk.f32.gmra.mrb[64].mxu0 %vm3767_vm2, %v20852_v5 }
 0xee8   :  { %14611 = vmatpush1.bf16.msra.mxu0 %v14610_v20  ;;  %8244 = vmatprep.mubr.f32.mxu0 %v21444_v4  ;;  %v12569_v20 = vld [vmem:[%s21417_s7 + $0x1068] sm:$0xff] }
 0xee9   :  { %14613 = vmatprep.subr.bf16.mxu0 %v14612_v3  ;;  %v14686_v3 = vpack.c.bf16 %v12614_v18, %v12606_v50  ;;  %v14688_v28 = vpack.c.bf16 %v12569_v20, %v12561_v48  ;;  %v9447_v50 = vld [vmem:[#allocation22 + $0xd0] sm:$0xff]  ;;  %v9456_v18 = vld [vmem:[#allocation22 + $0x118] sm:$0xff] }
 0xeea   :  { %v9464_v48 = vld [vmem:[#allocation22 + $0x158] sm:$0xff] }
 0xeeb   :  { %12546 = vmatmul.mubr.msk.f32.gmra.mrb[66].mxu0 %vm3767_vm2, %v20869_v49  ;;  %v15016_v20 = vpack.c.bf16 %v9464_v48, %v9456_v18  ;;  %v9624_v18 = vld [vmem:[#allocation22 + $0x658] sm:$0xff] }
 0xeec   :  { %14615 = vmatpush1.bf16.msra.mxu0 %v14614_v6  ;;  %8250 = vmatprep.mubr.f32.mxu0 %v21444_v4  ;;  %v12585_v6 = vld [vmem:[%s21417_s7 + $0x10e8] sm:$0xff] }
 0xeed   :  { %14617 = vmatprep.subr.bf16.mxu0 %v14616_v55  ;;  %v14690_v55 = vpack.c.bf16 %v12568_v61, %v12560_v9  ;;  %v14692_v30 = vpack.c.bf16 %v12585_v6, %v12577_v36  ;;  %v9472_v9 = vld [vmem:[#allocation22 + $0x198] sm:$0xff]  ;;  %v9471_v6 = vld [vmem:[#allocation22 + $0x190] sm:$0xff] }
 0xeee   :  { %v9480_v61 = vld [vmem:[#allocation22 + $0x1d8] sm:$0xff] }
 0xeef   :  { %12547 = vmatmul.mubr.msk.f32.gmra.mrb[68].mxu0 %vm3767_vm2, %v20886_v10  ;;  %v15020_v36 = vpack.c.bf16 %v9480_v61, %v9472_v9  ;;  %v9623_v9 = vld [vmem:[#allocation22 + $0x650] sm:$0xff] }
 0xef0   :  { %14619 = vmatpush1.bf16.msra.mxu0 %v14618_v8  ;;  %8321 = vmatprep.mubr.f32.mxu0 %v21444_v4  ;;  %v12601_v8 = vld [vmem:[%s21417_s7 + $0x1168] sm:$0xff] }
 0xef1   :  { %14657 = vmatprep.subr.bf16.mxu0 %v14656_v54  ;;  %v14694_v54 = vpack.c.bf16 %v12584_v2, %v12576_v45  ;;  %v14696_v31 = vpack.c.bf16 %v12601_v8, %v12593_v22  ;;  %v9488_v45 = vld [vmem:[#allocation22 + $0x218] sm:$0xff]  ;;  %v9487_v8 = vld [vmem:[#allocation22 + $0x210] sm:$0xff] }
 0xef2   :  { %v9496_v2 = vld [vmem:[#allocation22 + $0x258] sm:$0xff] }
 0xef3   :  { %12548 = vmatmul.mubr.msk.f32.vlgmr.msra.gmra.mrb[70].mxu0 %vm3767_vm2, %v20835_v27  ;;  %v12613_v27 = vld [vmem:[%s21417_s7 + $0x11c8] sm:$0xff]  ;;  %v15024_v22 = vpack.c.bf16 %v9496_v2, %v9488_v45  ;;  %v21262_v45 = vld [vmem:[#allocation16] sm:$0xff] }
 0xef4   :  { %14659 = vmatpush1.bf16.msra.mxu0 %v14658_v59  ;;  %8327 = vmatprep.mubr.f32.mxu0 %v21444_v4  ;;  %v14668_v34 = vpack.c.bf16 %v12613_v27, %v12605_v57  ;;  %v12617_v59 = vld [vmem:[%s21417_s7 + $0x11e8] sm:$0xff]  ;;  %v12570_v57 = vld [vmem:[%s21417_s7 + $0x1070] sm:$0xff]  ;;  %v12579_v27 = vld [vmem:[%s21417_s7 + $0x10b8] sm:$0xff] }
 0xef5   :  { %14661 = vmatprep.subr.bf16.mxu0 %v14660_v44  ;;  %v14698_v44 = vpack.c.bf16 %v12600_v40, %v12592_v11  ;;  %v14700_v13 = vpack.c.bf16 %v12617_v59, %v12609_v41  ;;  %v9504_v11 = vld [vmem:[#allocation22 + $0x298] sm:$0xff]  ;;  %v9503_v59 = vld [vmem:[#allocation22 + $0x290] sm:$0xff] }
 0xef6   :  { %v9512_v40 = vld [vmem:[#allocation22 + $0x2d8] sm:$0xff] }
 0xef7   :  { %12549 = vmatmul.mubr.msk.f32.gmra.mrb[72].mxu0 %vm3767_vm2, %v20852_v5  ;;  %v12567_v5 = vld [vmem:[%s21417_s7 + $0x1058] sm:$0xff]  ;;  %v15028_v41 = vpack.c.bf16 %v9512_v40, %v9504_v11  ;;  %v9648_v11 = vld [vmem:[#allocation22 + $0x718] sm:$0xff] }
 0xef8   :  { %14663 = vmatpush1.bf16.msra.mxu0 %v14662_v19  ;;  %8333 = vmatprep.mubr.f32.mxu0 %v21444_v4  ;;  %v14672_v58 = vpack.c.bf16 %v12567_v5, %v12559_v32  ;;  %v12571_v19 = vld [vmem:[%s21417_s7 + $0x1078] sm:$0xff]  ;;  %v12586_v32 = vld [vmem:[%s21417_s7 + $0x10f0] sm:$0xff] }
 0xef9   :  { %14665 = vmatprep.subr.bf16.mxu0 %v14664_v60  ;;  %v14702_v60 = vpack.c.bf16 %v12616_v17, %v12608_v63  ;;  %v14704_v21 = vpack.c.bf16 %v12571_v19, %v12563_v29  ;;  %v12595_v5 = vld [vmem:[%s21417_s7 + $0x1138] sm:$0xff]  ;;  %v9520_v63 = vld [vmem:[#allocation22 + $0x318] sm:$0xff]  ;;  %v9519_v19 = vld [vmem:[#allocation22 + $0x310] sm:$0xff] }
 0xefa   :  { %v9528_v17 = vld [vmem:[#allocation22 + $0x358] sm:$0xff] }
 0xefb   :  { %12550 = vmatmul.mubr.msk.f32.gmra.mrb[74].mxu0 %vm3767_vm2, %v20869_v49  ;;  %v12583_v49 = vld [vmem:[%s21417_s7 + $0x10d8] sm:$0xff]  ;;  %v15032_v29 = vpack.c.bf16 %v9528_v17, %v9520_v63  ;;  %v9656_v40 = vld [vmem:[#allocation22 + $0x758] sm:$0xff] }
 0xefc   :  { %14667 = vmatpush1.bf16.msra.mxu0 %v14666_v43  ;;  %8339 = vmatprep.mubr.f32.mxu0 %v21444_v4  ;;  %v14676_v38 = vpack.c.bf16 %v12583_v49, %v12575_v52  ;;  %v12587_v43 = vld [vmem:[%s21417_s7 + $0x10f8] sm:$0xff]  ;;  %v12602_v52 = vld [vmem:[%s21417_s7 + $0x1170] sm:$0xff] }
 0xefd   :  { %14669 = vmatprep.subr.bf16.mxu0 %v14668_v34  ;;  %v14706_v34 = vpack.c.bf16 %v12570_v57, %v12562_v51  ;;  %v14708_v33 = vpack.c.bf16 %v12587_v43, %v12579_v27  ;;  %v12611_v49 = vld [vmem:[%s21417_s7 + $0x11b8] sm:$0xff]  ;;  %v9536_v51 = vld [vmem:[#allocation22 + $0x398] sm:$0xff]  ;;  %v9535_v43 = vld [vmem:[#allocation22 + $0x390] sm:$0xff] }
 0xefe   :  { %v9544_v57 = vld [vmem:[#allocation22 + $0x3d8] sm:$0xff] }
 0xeff   :  { %12551 = vmatmul.mubr.msk.f32.gmra.mrb[76].mxu0 %vm3767_vm2, %v20886_v10  ;;  %v12599_v10 = vld [vmem:[%s21417_s7 + $0x1158] sm:$0xff]  ;;  %v15036_v27 = vpack.c.bf16 %v9544_v57, %v9536_v51  ;;  %v9664_v51 = vld [vmem:[#allocation22 + $0x798] sm:$0xff] }
 0xf00   :  { %14671 = vmatpush1.bf16.msra.mxu0 %v14670_v37  ;;  %8629 = vmatprep.mubr.f32.mxu0 %v21444_v4  ;;  %v14680_v16 = vpack.c.bf16 %v12599_v10, %v12591_v47  ;;  %v12603_v37 = vld [vmem:[%s21417_s7 + $0x1178] sm:$0xff]  ;;  %v12618_v47 = vld [vmem:[%s21417_s7 + $0x11f0] sm:$0xff] }
 0xf01   :  { %14673 = vmatprep.subr.bf16.mxu0 %v14672_v58  ;;  %v14710_v58 = vpack.c.bf16 %v12586_v32, %v12578_v7  ;;  %v14712_v35 = vpack.c.bf16 %v12603_v37, %v12595_v5  ;;  %v14718_v10 = vpack.c.bf16 %v12618_v47, %v12610_v0  ;;  %v9552_v7 = vld [vmem:[#allocation22 + $0x418] sm:$0xff]  ;;  %v9551_v37 = vld [vmem:[#allocation22 + $0x410] sm:$0xff] }
 0xf02   :  { %v9560_v32 = vld [vmem:[#allocation22 + $0x458] sm:$0xff] }
 0xf03   :  { %12620 = vmatmul.mubr.msk.f32.vlgmr.msra.gmra.mrb[46].mxu0 %vm3767_vm2, %v20809_v53  ;;  %v15040_v5 = vpack.c.bf16 %v9560_v32, %v9552_v7  ;;  %v9584_v0 = vld [vmem:[#allocation22 + $0x518] sm:$0xff] }
 0xf04   :  { %14675 = vmatpush1.bf16.msra.mxu0 %v14674_v56  ;;  %8635 = vmatprep.mubr.f32.mxu0 %v21444_v4  ;;  %v12619_v56 = vld [vmem:[%s21417_s7 + $0x11f8] sm:$0xff]  ;;  %v9592_v47 = vld [vmem:[#allocation22 + $0x558] sm:$0xff]  ;;  %s16900_s7 = smov [#allocation25]  }
 0xf05   :  { %14677 = vmatprep.subr.bf16.mxu0 %v14676_v38  ;;  %v14714_v38 = vpack.c.bf16 %v12602_v52, %v12594_v62  ;;  %v14716_v46 = vpack.c.bf16 %v12619_v56, %v12611_v49  ;;  %v9568_v62 = vld [vmem:[#allocation22 + $0x498] sm:$0xff]  ;;  %v9567_v56 = vld [vmem:[#allocation22 + $0x490] sm:$0xff]  ;;  %s11675_s10 = sshll.u32 %s16900_s7, 4  ;;  %s11676_s10 = int_to_ptr.vmem [resolvable:$true] %s11675_s10 }
 0xf06   :  { %v9576_v52 = vld [vmem:[#allocation22 + $0x4d8] sm:$0xff]  ;;  %s16838_s19 = scalar_lea.vmem %s11676_s10, 256  ;;  %p16843_p7 = scmp.lt.s32.totalorder %s11676_s10, %s11676_s10 }
 0xf07   :  { %12621 = vmatmul.mubr.msk.f32.gmra.mrb[48].mxu0 %vm3767_vm2, %v20811_v23  ;;  %v15044_v49 = vpack.c.bf16 %v9576_v52, %v9568_v62  ;;  %v9672_v57 = vld [vmem:[#allocation22 + $0x7d8] sm:$0xff]  ;;  %p16839_p6 = scmp.ne.s32.totalorder %s11676_s10, %s16838_s19  ;;  %p16844_p8 = scmp.lt.s32.totalorder %s16838_s19, %s16838_s19 }
 0xf08   :  { %14679 = vmatpush1.bf16.msra.mxu0 %v14678_v14  ;;  %8641 = vmatprep.mubr.f32.mxu0 %v21444_v4  ;;  %v9424_v14 = vld [vmem:[#allocation22 + $0x18] sm:$0xff] }
 0xf09   :  { %14681 = vmatprep.subr.bf16.mxu0 %v14680_v16  ;;  %v9432_v16 = vld [vmem:[#allocation22 + $0x58] sm:$0xff]  ;;  %p16845_p9 = por %p16844_p8, %p16843_p7 }
 0xf0a   :  { %v15008_v1 = vpack.c.bf16 %v9432_v16, %v9424_v14  ;;  %v15048_v14 = vpack.c.bf16 %v9592_v47, %v9584_v0  ;;  %v9583_v16 = vld [vmem:[#allocation22 + $0x510] sm:$0xff] }
 0xf0b   :  { %12622 = vmatmul.mubr.msk.f32.gmra.mrb[50].mxu0 %vm3767_vm2, %v20813_v26  ;;  %p16846_p10 = pnand %p16845_p9, %p16839_p6 }
 0xf0c   :  { %14683 = vmatpush1.bf16.msra.mxu0 %v14682_v42  ;;  %8647 = vmatprep.mubr.f32.mxu0 %v21444_v4  ;;  %v9448_v42 = vld [vmem:[#allocation22 + $0xd8] sm:$0xff] }
 0xf0d   :  { %14685 = vmatprep.subr.bf16.mxu0 %v14684_v24  ;;  %v9439_v24 = vld [vmem:[#allocation22 + $0x90] sm:$0xff] }
 0xf0f   :  { %12623 = vmatmul.mubr.msk.f32.gmra.mrb[52].mxu0 %vm3767_vm2, %v20815_v39 }
 0xf10   :  { %14687 = vmatpush1.bf16.msra.mxu0 %v14686_v3  ;;  %8718 = vmatprep.mubr.f32.mxu0 %v21444_v4  ;;  %v9463_v3 = vld [vmem:[#allocation22 + $0x150] sm:$0xff] }
 0xf11   :  { %14689 = vmatprep.subr.bf16.mxu0 %v14688_v28 }
 0xf13   :  { %12624 = vmatmul.mubr.msk.f32.vlgmr.msra.gmra.mrb[54].mxu0 %vm3767_vm2, %v20809_v53 }
 0xf14   :  { %14691 = vmatpush1.bf16.msra.mxu0 %v14690_v55  ;;  %8724 = vmatprep.mubr.f32.mxu0 %v21444_v4  ;;  %v9479_v55 = vld [vmem:[#allocation22 + $0x1d0] sm:$0xff] }
 0xf15   :  { %14693 = vmatprep.subr.bf16.mxu0 %v14692_v30  ;;  %v15022_v30 = vpack.c.bf16 %v9479_v55, %v9471_v6  ;;  %v9640_v6 = vld [vmem:[#allocation22 + $0x6d8] sm:$0xff] }
 0xf17   :  { %12625 = vmatmul.mubr.msk.f32.gmra.mrb[56].mxu0 %vm3767_vm2, %v20811_v23 }
 0xf18   :  { %14695 = vmatpush1.bf16.msra.mxu0 %v14694_v54  ;;  %8730 = vmatprep.mubr.f32.mxu0 %v21444_v4  ;;  %v9495_v54 = vld [vmem:[#allocation22 + $0x250] sm:$0xff] }
 0xf19   :  { %14697 = vmatprep.subr.bf16.mxu0 %v14696_v31  ;;  %v15026_v31 = vpack.c.bf16 %v9495_v54, %v9487_v8  ;;  %v9639_v8 = vld [vmem:[#allocation22 + $0x6d0] sm:$0xff] }
 0xf1b   :  { %12626 = vmatmul.mubr.msk.f32.gmra.mrb[58].mxu0 %vm3767_vm2, %v20813_v26 }
 0xf1c   :  { %14699 = vmatpush1.bf16.msra.mxu0 %v14698_v44  ;;  %8736 = vmatprep.mubr.f32.mxu0 %v21444_v4  ;;  %v9511_v44 = vld [vmem:[#allocation22 + $0x2d0] sm:$0xff] }
 0xf1d   :  { %14701 = vmatprep.subr.bf16.mxu0 %v14700_v13  ;;  %v15030_v13 = vpack.c.bf16 %v9511_v44, %v9503_v59 }
 0xf1f   :  { %12627 = vmatmul.mubr.msk.f32.gmra.mrb[60].mxu0 %vm3767_vm2, %v20815_v39 }
 0xf20   :  { %14703 = vmatpush1.bf16.msra.mxu0 %v14702_v60  ;;  %8807 = vmatprep.mubr.f32.mxu0 %v21444_v4  ;;  %v9527_v60 = vld [vmem:[#allocation22 + $0x350] sm:$0xff] }
 0xf21   :  { %14705 = vmatprep.subr.bf16.mxu0 %v14704_v21  ;;  %v15034_v21 = vpack.c.bf16 %v9527_v60, %v9519_v19  ;;  %v9655_v19 = vld [vmem:[#allocation22 + $0x750] sm:$0xff] }
 0xf23   :  { %12628 = vmatmul.mubr.msk.f32.vlgmr.msra.gmra.mrb[62].mxu0 %vm3767_vm2, %v20809_v53 }
 0xf24   :  { %14707 = vmatpush1.bf16.msra.mxu0 %v14706_v34  ;;  %8813 = vmatprep.mubr.f32.mxu0 %v21444_v4  ;;  %v9543_v34 = vld [vmem:[#allocation22 + $0x3d0] sm:$0xff] }
 0xf25   :  { %14709 = vmatprep.subr.bf16.mxu0 %v14708_v33  ;;  %v15038_v33 = vpack.c.bf16 %v9543_v34, %v9535_v43 }
 0xf27   :  { %12629 = vmatmul.mubr.msk.f32.gmra.mrb[64].mxu0 %vm3767_vm2, %v20811_v23 }
 0xf28   :  { %14711 = vmatpush1.bf16.msra.mxu0 %v14710_v58  ;;  %8819 = vmatprep.mubr.f32.mxu0 %v21444_v4  ;;  %v9559_v58 = vld [vmem:[#allocation22 + $0x450] sm:$0xff] }
 0xf29   :  { %14713 = vmatprep.subr.bf16.mxu0 %v14712_v35  ;;  %v15042_v35 = vpack.c.bf16 %v9559_v58, %v9551_v37  ;;  %v9663_v37 = vld [vmem:[#allocation22 + $0x790] sm:$0xff] }
 0xf2a   :  { %v9671_v58 = vld [vmem:[#allocation22 + $0x7d0] sm:$0xff] }
 0xf2b   :  { %12630 = vmatmul.mubr.msk.f32.gmra.mrb[66].mxu0 %vm3767_vm2, %v20813_v26  ;;  %v15070_v52 = vpack.c.bf16 %v9671_v58, %v9663_v37 }
 0xf2c   :  { %14715 = vmatpush1.bf16.msra.mxu0 %v14714_v38  ;;  %8825 = vmatprep.mubr.f32.mxu0 %v21444_v4  ;;  %v9575_v38 = vld [vmem:[#allocation22 + $0x4d0] sm:$0xff] }
 0xf2d   :  { %14717 = vmatprep.subr.bf16.mxu0 %v14716_v46  ;;  %v15046_v46 = vpack.c.bf16 %v9575_v38, %v9567_v56 }
 0xf2f   :  { %12631 = vmatmul.mubr.msk.f32.gmra.mrb[68].mxu0 %vm3767_vm2, %v20815_v39 }
 0xf30   :  { %14719 = vmatpush1.bf16.msra.mxu0 %v14718_v10  ;;  %8896 = vmatprep.mubr.f32.mxu0 %v21444_v4  ;;  %v8955_v10 = vlaneseq }
 0xf31   :  { %15009 = vmatprep.subr.bf16.mxu0 %v15008_v1  ;;  %v9591_v1 = vld [vmem:[#allocation22 + $0x550] sm:$0xff] }
 0xf33   :  { %12632 = vmatmul.mubr.msk.f32.vlgmr.msra.gmra.mrb[70].mxu0 %vm3767_vm2, %v20809_v53  ;;  %v9423_v53 = vld [vmem:[#allocation22 + $0x10] sm:$0xff] }
 0xf34   :  { %8902 = vmatprep.mubr.f32.mxu0 %v21444_v4  ;;  %v15010_v15 = vpack.c.bf16 %v9431_v25, %v9423_v53  ;;  %v15050_v53 = vpack.c.bf16 %v9591_v1, %v9583_v16  ;;  %v9600_v25 = vld [vmem:[#allocation22 + $0x598] sm:$0xff] }
 0xf36   :  { %15011 = vmatpush1.bf16.msra.mxu0 %v15010_v15  ;;  %v9608_v15 = vld [vmem:[#allocation22 + $0x5d8] sm:$0xff] }
 0xf37   :  { %12633 = vmatmul.mubr.msk.f32.gmra.mrb[72].mxu0 %vm3767_vm2, %v20811_v23  ;;  %v15012_v23 = vpack.c.bf16 %v9448_v42, %v9440_v12  ;;  %v21250_v12 = vshrl.u32 %v8955_v10, 7  ;;  %v15052_v42 = vpack.c.bf16 %v9608_v15, %v9600_v25 }
 0xf38   :  { %8908 = vmatprep.mubr.f32.mxu0 %v21444_v4 }
 0xf39   :  { %15013 = vmatprep.subr.bf16.mxu0 %v15012_v23  ;;  %v9599_v23 = vld [vmem:[#allocation22 + $0x590] sm:$0xff]  ;;  %v21253_v48 = vsub.s32 0, %v21250_v12  ;;  %v21271_v0 = vsub.s32 2, %v21250_v12  ;;  %v21274_v16 = vsub.s32 3, %v21250_v12 }
 0xf3b   :  { %12634 = vmatmul.mubr.msk.f32.gmra.mrb[74].mxu0 %vm3767_vm2, %v20813_v26  ;;  %v15014_v26 = vpack.c.bf16 %v9447_v50, %v9439_v24  ;;  %v9607_v24 = vld [vmem:[#allocation22 + $0x5d0] sm:$0xff]  ;;  %v9032_v59 = vrot.slane %v21262_v45, %v21253_v48 }
 0xf3c   :  { %8914 = vmatprep.mubr.f32.mxu0 %v21444_v4  ;;  %v15054_v50 = vpack.c.bf16 %v9607_v24, %v9599_v23 }
 0xf3d   :  { %15015 = vmatpush1.bf16.msra.mxu0 %v15014_v26  ;;  %v9616_v26 = vld [vmem:[#allocation22 + $0x618] sm:$0xff] }
 0xf3e   :  { %15017 = vmatprep.subr.bf16.mxu0 %v15016_v20  ;;  %v15056_v20 = vpack.c.bf16 %v9624_v18, %v9616_v26 }
 0xf3f   :  { %12635 = vmatmul.mubr.msk.f32.gmra.mrb[76].mxu0 %vm3767_vm2, %v20815_v39  ;;  %v9455_v39 = vld [vmem:[#allocation22 + $0x110] sm:$0xff] }
 0xf40   :  { %v15018_v28 = vpack.c.bf16 %v9463_v3, %v9455_v39  ;;  %v21255_v39 = vld [vmem:[#allocation15] sm:$0xff]  ;;  %v21258_v3 = vsub.s32 1, %v21250_v12 }
 0xf41   :  { %v8958_v55 = vrot.slane %v21255_v39, %v21253_v48  ;;  %v8966_v24 = vrot.slane %v21255_v39, %v21271_v0  ;;  %v8970_v18 = vrot.slane %v21255_v39, %v21274_v16 }
 0xf42   :  { %15019 = vmatpush1.bf16.msra.mxu0 %v15018_v28  ;;  %v9615_v28 = vld [vmem:[#allocation22 + $0x610] sm:$0xff]  ;;  %v8962_v2 = vrot.slane %v21255_v39, %v21258_v3  ;;  %v9036_v17 = vrot.slane %v21262_v45, %v21258_v3 }
 0xf43   :  { %15021 = vmatprep.subr.bf16.mxu0 %v15020_v36  ;;  %v15058_v61 = vpack.c.bf16 %v9623_v9, %v9615_v28  ;;  %v9632_v36 = vld [vmem:[#allocation22 + $0x698] sm:$0xff] }
 0xf46   :  { %15023 = vmatpush1.bf16.msra.mxu0 %v15022_v30  ;;  %v15060_v30 = vpack.c.bf16 %v9640_v6, %v9632_v36 }
 0xf47   :  { %15025 = vmatprep.subr.bf16.mxu0 %v15024_v22  ;;  %v9631_v22 = vld [vmem:[#allocation22 + $0x690] sm:$0xff] }
 0xf4a   :  { %15027 = vmatpush1.bf16.msra.mxu0 %v15026_v31  ;;  %v15062_v31 = vpack.c.bf16 %v9639_v8, %v9631_v22 }
 0xf4b   :  { %15029 = vmatprep.subr.bf16.mxu0 %v15028_v41 }
 0xf4e   :  { %15031 = vmatpush1.bf16.msra.mxu0 %v15030_v13  ;;  %v15064_v13 = vpack.c.bf16 %v9656_v40, %v9648_v11 }
 0xf4f   :  { %15033 = vmatprep.subr.bf16.mxu0 %v15032_v29  ;;  %v9647_v29 = vld [vmem:[#allocation22 + $0x710] sm:$0xff] }
 0xf52   :  { %15035 = vmatpush1.bf16.msra.mxu0 %v15034_v21  ;;  %v15066_v21 = vpack.c.bf16 %v9655_v19, %v9647_v29  ;;  %v21284_v29 = vld [vmem:[#allocation21] sm:$0x3] }
 0xf53   :  { %15037 = vmatprep.subr.bf16.mxu0 %v15036_v27 }
 0xf56   :  { %15039 = vmatpush1.bf16.msra.mxu0 %v15038_v33  ;;  %v15068_v33 = vpack.c.bf16 %v9672_v57, %v9664_v51 }
 0xf57   :  { %15041 = vmatprep.subr.bf16.mxu0 %v15040_v5 }
 0xf5a   :  { %15043 = vmatpush1.bf16.msra.mxu0 %v15042_v35 }
 0xf5b   :  { %15045 = vmatprep.subr.bf16.mxu0 %v15044_v49 }
 0xf5e   :  { %15047 = vmatpush1.bf16.msra.mxu0 %v15046_v46 }
 0xf5f   :  { %15049 = vmatprep.subr.bf16.mxu0 %v15048_v14 }
 0xf62   :  { %15051 = vmatpush1.bf16.msra.mxu0 %v15050_v53 }
 0xf63   :  { %15053 = vmatprep.subr.bf16.mxu0 %v15052_v42 }
 0xf66   :  { %15055 = vmatpush1.bf16.msra.mxu0 %v15054_v50 }
 0xf67   :  { %15057 = vmatprep.subr.bf16.mxu0 %v15056_v20 }
 0xf6a   :  { %15059 = vmatpush1.bf16.msra.mxu0 %v15058_v61 }
 0xf6b   :  { %15061 = vmatprep.subr.bf16.mxu0 %v15060_v30 }
 0xf6e   :  { %15063 = vmatpush1.bf16.msra.mxu0 %v15062_v31 }
 0xf6f   :  { %15065 = vmatprep.subr.bf16.mxu0 %v15064_v13 }
 0xf72   :  { %15067 = vmatpush1.bf16.msra.mxu0 %v15066_v21 }
 0xf73   :  { %15069 = vmatprep.subr.bf16.mxu0 %v15068_v33 }
 0xf76   :  { %15071 = vmatpush1.bf16.msra.mxu0 %v15070_v52 }
 0xfd6   :  { %v8631_v54 = vpop.f32.mrb[46].mxu0 }
 0xfd7   :  { %v8995_v41 = vmul.f32 %v8958_v55, %v8631_v54  ;;  %v8633_v44 = vpop.f32.mrb[47].mxu0 }
 0xfd8   :  { %v8996_v63 = vmul.f32 %v8962_v2, %v8633_v44 }
 0xfd9   :  { %v9069_v27 = vadd.f32 %v9032_v59, %v8995_v41 }
 0xfda   :  { %v8637_v60 = vpop.f32.mrb[48].mxu0  ;;  %v9070_v7 = vadd.f32 %v9036_v17, %v8996_v63 }
 0xfdb   :  { %v9003_v43 = vmul.f32 %v8958_v55, %v8637_v60  ;;  %v8639_v34 = vpop.f32.mrb[49].mxu0  ;;  %v9101_v49 = vmax.f32 %v9069_v27, 0.0 }
 0xfdc   :  { %v9004_v32 = vmul.f32 %v8962_v2, %v8639_v34  ;;  %v9102_v47 = vmax.f32 %v9070_v7, 0.0 }
 0xfdd   :  { %v9077_v5 = vadd.f32 %v9032_v59, %v9003_v43  ;;  %v21287_v43 = vsub.s32 4, %v21250_v12 }
 0xfde   :  { %v9078_v35 = vadd.f32 %v9036_v17, %v9004_v32  ;;  %v8643_v62 = vpop.f32.mrb[50].mxu0  ;;  %v21292_v32 = vsub.s32 5, %v21250_v12 }
 0xfdf   :  { %v9109_v56 = vmax.f32 %v9077_v5, 0.0  ;;  %v9011_v38 = vmul.f32 %v8958_v55, %v8643_v62  ;;  %v8645_v46 = vpop.f32.mrb[51].mxu0 }
 0xfe0   :  { %v9110_v10 = vmax.f32 %v9078_v35, 0.0  ;;  %v9012_v14 = vmul.f32 %v8962_v2, %v8645_v46  ;;  %v8978_v46 = vrot.slane %v21255_v39, %v21292_v32 }
 0xfe1   :  { %v14722_v1 = vpack.c.bf16 %v9109_v56, %v9101_v49  ;;  %v9085_v15 = vadd.f32 %v9032_v59, %v9011_v38  ;;  %v8974_v49 = vrot.slane %v21255_v39, %v21287_v43 }
 0xfe2   :  { %v8649_v53 = vpop.f32.mrb[52].mxu0  ;;  %v14720_v25 = vpack.c.bf16 %v9110_v10, %v9102_v47  ;;  %v9086_v50 = vadd.f32 %v9036_v17, %v9012_v14 }
 0xfe3   :  { %v9019_v42 = vmul.f32 %v8958_v55, %v8649_v53  ;;  %v8651_v23 = vpop.f32.mrb[53].mxu0  ;;  %v9117_v61 = vmax.f32 %v9085_v15, 0.0  ;;  %v9040_v55 = vrot.slane %v21262_v45, %v21271_v0  ;;  %v9048_v15 = vrot.slane %v21262_v45, %v21287_v43 }
 0xfe4   :  { %v9020_v26 = vmul.f32 %v8962_v2, %v8651_v23  ;;  %14721 = vmatprep.subr.bf16.mxu1 %v14720_v25  ;;  %v9118_v22 = vmax.f32 %v9086_v50, 0.0  ;;  %v9044_v2 = vrot.slane %v21262_v45, %v21274_v16 }
 0xfe5   :  { %v9093_v20 = vadd.f32 %v9032_v59, %v9019_v42  ;;  %14723 = vmatpush1.bf16.msra.mxu1 %v14722_v1 }
 0xfe6   :  { %v9094_v28 = vadd.f32 %v9036_v17, %v9020_v26  ;;  %v8720_v9 = vpop.f32.mrb[54].mxu0  ;;  %v9052_v26 = vrot.slane %v21262_v45, %v21292_v32 }
 0xfe7   :  { %v9125_v36 = vmax.f32 %v9093_v20, 0.0  ;;  %v8997_v6 = vmul.f32 %v8966_v24, %v8720_v9  ;;  %v8722_v30 = vpop.f32.mrb[55].mxu0 }
 0xfe8   :  { %v9126_v8 = vmax.f32 %v9094_v28, 0.0  ;;  %v8998_v54 = vmul.f32 %v8970_v18, %v8722_v30 }
 0xfe9   :  { %v14726_v31 = vpack.c.bf16 %v9125_v36, %v9117_v61  ;;  %v9071_v41 = vadd.f32 %v9040_v55, %v8997_v6 }
 0xfea   :  { %v8726_v11 = vpop.f32.mrb[56].mxu0  ;;  %v14724_v40 = vpack.c.bf16 %v9126_v8, %v9118_v22  ;;  %v9072_v13 = vadd.f32 %v9044_v2, %v8998_v54 }
 0xfeb   :  { %v9005_v59 = vmul.f32 %v8966_v24, %v8726_v11  ;;  %v8728_v44 = vpop.f32.mrb[57].mxu0  ;;  %v9103_v21 = vmax.f32 %v9071_v41, 0.0 }
 0xfec   :  { %v9006_v63 = vmul.f32 %v8970_v18, %v8728_v44  ;;  %14725 = vmatprep.subr.bf16.mxu1 %v14724_v40  ;;  %v9104_v34 = vmax.f32 %v9072_v13, 0.0  ;;  %v21304_v40 = vsub.s32 6, %v21250_v12  ;;  %v21309_v13 = vsub.s32 7, %v21250_v12 }
 0xfed   :  { %v9079_v17 = vadd.f32 %v9040_v55, %v9005_v59  ;;  %14727 = vmatpush1.bf16.msra.mxu1 %v14726_v31 }
 0xfee   :  { %v9080_v19 = vadd.f32 %v9044_v2, %v9006_v63  ;;  %v8732_v60 = vpop.f32.mrb[58].mxu0 }
 0xfef   :  { %v9111_v51 = vmax.f32 %v9079_v17, 0.0  ;;  %v9013_v57 = vmul.f32 %v8966_v24, %v8732_v60  ;;  %v8734_v27 = vpop.f32.mrb[59].mxu0 }
 0xff0   :  { %v9112_v33 = vmax.f32 %v9080_v19, 0.0  ;;  %v9014_v7 = vmul.f32 %v8970_v18, %v8734_v27  ;;  %12636 = vmatmul.mubr.msk.f32.vlgmr.msra.gmra.mrb[78].mxu1 %vm265_vm0, %v21284_v29 }
 0xff1   :  { %v14730_v5 = vpack.c.bf16 %v9111_v51, %v9103_v21  ;;  %9272 = vmatprep.mubr.f32.mxu1 %v21444_v4  ;;  %v9087_v35 = vadd.f32 %v9040_v55, %v9013_v57  ;;  %v8982_v57 = vrot.slane %v21255_v39, %v21304_v40 }
 0xff2   :  { %v8738_v37 = vpop.f32.mrb[60].mxu0  ;;  %v14728_v58 = vpack.c.bf16 %v9112_v33, %v9104_v34  ;;  %v9088_v56 = vadd.f32 %v9044_v2, %v9014_v7  ;;  %v8986_v33 = vrot.slane %v21255_v39, %v21309_v13 }
 0xff3   :  { %v9021_v62 = vmul.f32 %v8966_v24, %v8738_v37  ;;  %v8740_v52 = vpop.f32.mrb[61].mxu0  ;;  %v9119_v1 = vmax.f32 %v9087_v35, 0.0 }
 0xff4   :  { %v9022_v38 = vmul.f32 %v8970_v18, %v8740_v52  ;;  %14729 = vmatprep.subr.bf16.mxu1 %v14728_v58  ;;  %v9120_v23 = vmax.f32 %v9088_v56, 0.0  ;;  %v9056_v52 = vrot.slane %v21262_v45, %v21304_v40 }
 0xff5   :  { %v9095_v47 = vadd.f32 %v9040_v55, %v9021_v62  ;;  %14731 = vmatpush1.bf16.msra.mxu1 %v14730_v5 }
 0xff6   :  { %v9096_v10 = vadd.f32 %v9044_v2, %v9022_v38  ;;  %v8809_v14 = vpop.f32.mrb[62].mxu0 }
 0xff7   :  { %v9127_v53 = vmax.f32 %v9095_v47, 0.0  ;;  %v8999_v25 = vmul.f32 %v8974_v49, %v8809_v14  ;;  %v8811_v42 = vpop.f32.mrb[63].mxu0 }
 0xff8   :  { %v9128_v24 = vmax.f32 %v9096_v10, 0.0  ;;  %v9000_v50 = vmul.f32 %v8978_v46, %v8811_v42 }
 0xff9   :  { %v14734_v18 = vpack.c.bf16 %v9127_v53, %v9119_v1  ;;  %v9073_v9 = vadd.f32 %v9048_v15, %v8999_v25 }
 0xffa   :  { %v8815_v20 = vpop.f32.mrb[64].mxu0  ;;  %v14732_v28 = vpack.c.bf16 %v9128_v24, %v9120_v23  ;;  %v9074_v6 = vadd.f32 %v9052_v26, %v9000_v50 }
 0xffb   :  { %v9007_v61 = vmul.f32 %v8974_v49, %v8815_v20  ;;  %v8817_v36 = vpop.f32.mrb[65].mxu0  ;;  %v9105_v54 = vmax.f32 %v9073_v9, 0.0 }
 0xffc   :  { %v9008_v55 = vmul.f32 %v8978_v46, %v8817_v36  ;;  %14733 = vmatprep.subr.bf16.mxu1 %v14732_v28  ;;  %v9106_v41 = vmax.f32 %v9074_v6, 0.0 }
 0xffd   :  { %v9081_v30 = vadd.f32 %v9048_v15, %v9007_v61  ;;  %14735 = vmatpush1.bf16.msra.mxu1 %v14734_v18 }
 0xffe   :  { %v9082_v22 = vadd.f32 %v9052_v26, %v9008_v55  ;;  %v8821_v8 = vpop.f32.mrb[66].mxu0 }
 0xfff   :  { %v9113_v2 = vmax.f32 %v9081_v30, 0.0  ;;  %v9015_v31 = vmul.f32 %v8974_v49, %v8821_v8  ;;  %v8823_v11 = vpop.f32.mrb[67].mxu0 }
0x1000   :  { %v9114_v59 = vmax.f32 %v9082_v22, 0.0  ;;  %v9016_v44 = vmul.f32 %v8978_v46, %v8823_v11  ;;  %12637 = vmatmul.mubr.msk.f32.vlgmr.msra.gmra.mrb[80].mxu1 %vm265_vm0, %v21284_v29 }
0x1001   :  { %v14738_v63 = vpack.c.bf16 %v9113_v2, %v9105_v54  ;;  %9343 = vmatprep.mubr.f32.mxu1 %v21444_v4  ;;  %v9089_v60 = vadd.f32 %v9048_v15, %v9015_v31 }
0x1002   :  { %v8827_v17 = vpop.f32.mrb[68].mxu0  ;;  %v14736_v19 = vpack.c.bf16 %v9114_v59, %v9106_v41  ;;  %v9090_v27 = vadd.f32 %v9052_v26, %v9016_v44  ;;  %v9422_v44 = vld [vmem:[#allocation22 + $0x8] sm:$0xff] }
0x1003   :  { %v9023_v21 = vmul.f32 %v8974_v49, %v8827_v17  ;;  %v8829_v51 = vpop.f32.mrb[69].mxu0  ;;  %v9121_v58 = vmax.f32 %v9089_v60, 0.0 }
0x1004   :  { %v9024_v34 = vmul.f32 %v8978_v46, %v8829_v51  ;;  %14737 = vmatprep.subr.bf16.mxu1 %v14736_v19  ;;  %v9122_v56 = vmax.f32 %v9090_v27, 0.0  ;;  %v9060_v46 = vrot.slane %v21262_v45, %v21309_v13  ;;  %v9421_v51 = vld [vmem:[#allocation22] sm:$0xff] }
0x1005   :  { %v9097_v7 = vadd.f32 %v9048_v15, %v9023_v21  ;;  %14739 = vmatpush1.bf16.msra.mxu1 %v14738_v63  ;;  %v9430_v63 = vld [vmem:[#allocation22 + $0x48] sm:$0xff]  ;;  %v9429_v27 = vld [vmem:[#allocation22 + $0x40] sm:$0xff] }
0x1006   :  { %v9098_v5 = vadd.f32 %v9052_v26, %v9024_v34  ;;  %v8898_v37 = vpop.f32.mrb[70].mxu0  ;;  %v9438_v34 = vld [vmem:[#allocation22 + $0x88] sm:$0xff] }
0x1007   :  { %v9129_v35 = vmax.f32 %v9097_v7, 0.0  ;;  %v9001_v62 = vmul.f32 %v8982_v57, %v8898_v37  ;;  %v8900_v49 = vpop.f32.mrb[71].mxu0  ;;  %v9445_v37 = vld [vmem:[#allocation22 + $0xc0] sm:$0xff] }
0x1008   :  { %v9130_v38 = vmax.f32 %v9098_v5, 0.0  ;;  %v9002_v47 = vmul.f32 %v8986_v33, %v8900_v49  ;;  %v9437_v5 = vld [vmem:[#allocation22 + $0x80] sm:$0xff] }
0x1009   :  { %v14742_v10 = vpack.c.bf16 %v9129_v35, %v9121_v58  ;;  %v9075_v1 = vadd.f32 %v9056_v52, %v9001_v62  ;;  %v9454_v58 = vld [vmem:[#allocation22 + $0x108] sm:$0xff]  ;;  %v14758_v62 = vpack.c.bf16 %v9445_v37, %v9437_v5  ;;  %v9453_v49 = vld [vmem:[#allocation22 + $0x100] sm:$0xff] }
0x100a   :  { %v8904_v14 = vpop.f32.mrb[72].mxu0  ;;  %v14740_v39 = vpack.c.bf16 %v9130_v38, %v9122_v56  ;;  %v9076_v15 = vadd.f32 %v9060_v46, %v9002_v47  ;;  %v9462_v35 = vld [vmem:[#allocation22 + $0x148] sm:$0xff]  ;;  %v9461_v56 = vld [vmem:[#allocation22 + $0x140] sm:$0xff] }
0x100b   :  { %v9009_v53 = vmul.f32 %v8982_v57, %v8904_v14  ;;  %v8906_v25 = vpop.f32.mrb[73].mxu0  ;;  %v9107_v26 = vmax.f32 %v9075_v1, 0.0  ;;  %v9470_v38 = vld [vmem:[#allocation22 + $0x188] sm:$0xff]  ;;  %v9469_v14 = vld [vmem:[#allocation22 + $0x180] sm:$0xff] }
0x100c   :  { %v9010_v42 = vmul.f32 %v8986_v33, %v8906_v25  ;;  %14741 = vmatprep.subr.bf16.mxu1 %v14740_v39  ;;  %v9108_v9 = vmax.f32 %v9076_v15, 0.0  ;;  %v9478_v47 = vld [vmem:[#allocation22 + $0x1c8] sm:$0xff]  ;;  %v9477_v39 = vld [vmem:[#allocation22 + $0x1c0] sm:$0xff] }
0x100d   :  { %v9083_v23 = vadd.f32 %v9056_v52, %v9009_v53  ;;  %14743 = vmatpush1.bf16.msra.mxu1 %v14742_v10  ;;  %v14764_v10 = vpack.c.bf16 %v9478_v47, %v9470_v38  ;;  %v9486_v1 = vld [vmem:[#allocation22 + $0x208] sm:$0xff]  ;;  %v14766_v25 = vpack.c.bf16 %v9477_v39, %v9469_v14  ;;  %v9485_v15 = vld [vmem:[#allocation22 + $0x200] sm:$0xff]  ;;  %v9688_v38 = vld [vmem:[#allocation22 + $0x858] sm:$0xff] }
0x100e   :  { %v9084_v24 = vadd.f32 %v9060_v46, %v9010_v42  ;;  %v8910_v50 = vpop.f32.mrb[74].mxu0  ;;  %v9494_v53 = vld [vmem:[#allocation22 + $0x248] sm:$0xff]  ;;  %v9493_v42 = vld [vmem:[#allocation22 + $0x240] sm:$0xff] }
0x100f   :  { %v9115_v18 = vmax.f32 %v9083_v23, 0.0  ;;  %v9017_v20 = vmul.f32 %v8982_v57, %v8910_v50  ;;  %v8912_v28 = vpop.f32.mrb[75].mxu0  ;;  %v9502_v23 = vld [vmem:[#allocation22 + $0x288] sm:$0xff]  ;;  %v14770_v50 = vpack.c.bf16 %v9493_v42, %v9485_v15  ;;  %v9589_v5 = vld [vmem:[#allocation22 + $0x540] sm:$0xff] }
0x1010   :  { %v9116_v61 = vmax.f32 %v9084_v24, 0.0  ;;  %v9018_v45 = vmul.f32 %v8986_v33, %v8912_v28  ;;  %12638 = vmatmul.mubr.msk.f32.vlgmr.msra.gmra.mrb[82].mxu1 %vm265_vm0, %v21284_v29  ;;  %v9510_v24 = vld [vmem:[#allocation22 + $0x2c8] sm:$0xff] }
0x1011   :  { %v14746_v36 = vpack.c.bf16 %v9115_v18, %v9107_v26  ;;  %9414 = vmatprep.mubr.f32.mxu1 %v21444_v4  ;;  %v9091_v30 = vadd.f32 %v9056_v52, %v9017_v20  ;;  %v14752_v4 = vpack.c.bf16 %v9430_v63, %v9422_v44  ;;  %v14772_v26 = vpack.c.bf16 %v9510_v24, %v9502_v23  ;;  %v9501_v18 = vld [vmem:[#allocation22 + $0x280] sm:$0xff]  ;;  %v9518_v28 = vld [vmem:[#allocation22 + $0x308] sm:$0xff] }
0x1012   :  { %v8916_v6 = vpop.f32.mrb[76].mxu0  ;;  %v14744_v55 = vpack.c.bf16 %v9116_v61, %v9108_v9  ;;  %v9092_v54 = vadd.f32 %v9060_v46, %v9018_v45  ;;  %v9509_v20 = vld [vmem:[#allocation22 + $0x2c0] sm:$0xff]  ;;  %v9526_v9 = vld [vmem:[#allocation22 + $0x348] sm:$0xff] }
0x1013   :  { %v9025_v22 = vmul.f32 %v8982_v57, %v8916_v6  ;;  %v8918_v8 = vpop.f32.mrb[77].mxu0  ;;  %v9123_v41 = vmax.f32 %v9091_v30, 0.0  ;;  %v9446_v57 = vld [vmem:[#allocation22 + $0xc8] sm:$0xff]  ;;  %v14774_v61 = vpack.c.bf16 %v9509_v20, %v9501_v18  ;;  %v14776_v45 = vpack.c.bf16 %v9526_v9, %v9518_v28  ;;  %v9525_v6 = vld [vmem:[#allocation22 + $0x340] sm:$0xff] }
0x1014   :  { %v9026_v2 = vmul.f32 %v8986_v33, %v8918_v8  ;;  %14745 = vmatprep.subr.bf16.mxu1 %v14744_v55  ;;  %v9124_v17 = vmax.f32 %v9092_v54, 0.0  ;;  %v14754_v33 = vpack.c.bf16 %v9429_v27, %v9421_v51  ;;  %v14756_v7 = vpack.c.bf16 %v9446_v57, %v9438_v34  ;;  %v9534_v55 = vld [vmem:[#allocation22 + $0x388] sm:$0xff]  ;;  %v9533_v54 = vld [vmem:[#allocation22 + $0x380] sm:$0xff] }
0x1015   :  { %v9099_v31 = vadd.f32 %v9056_v52, %v9025_v22  ;;  %14747 = vmatpush1.bf16.msra.mxu1 %v14746_v36  ;;  %v14760_v52 = vpack.c.bf16 %v9462_v35, %v9454_v58  ;;  %v9517_v36 = vld [vmem:[#allocation22 + $0x300] sm:$0xff]  ;;  %v9542_v30 = vld [vmem:[#allocation22 + $0x3c8] sm:$0xff] }
0x1016   :  { %v9100_v11 = vadd.f32 %v9060_v46, %v9026_v2  ;;  %v14762_v46 = vpack.c.bf16 %v9461_v56, %v9453_v49  ;;  %v14778_v22 = vpack.c.bf16 %v9525_v6, %v9517_v36  ;;  %v14780_v8 = vpack.c.bf16 %v9542_v30, %v9534_v55  ;;  %v9541_v2 = vld [vmem:[#allocation22 + $0x3c0] sm:$0xff]  ;;  %v9582_v27 = vld [vmem:[#allocation22 + $0x508] sm:$0xff] }
0x1017   :  { %v9131_v59 = vmax.f32 %v9099_v31, 0.0  ;;  %v9550_v31 = vld [vmem:[#allocation22 + $0x408] sm:$0xff]  ;;  %v9549_v44 = vld [vmem:[#allocation22 + $0x400] sm:$0xff] }
0x1018   :  { %v9132_v19 = vmax.f32 %v9100_v11, 0.0  ;;  %v9558_v11 = vld [vmem:[#allocation22 + $0x448] sm:$0xff]  ;;  %v9557_v63 = vld [vmem:[#allocation22 + $0x440] sm:$0xff] }
0x1019   :  { %v14750_v60 = vpack.c.bf16 %v9131_v59, %v9123_v41  ;;  %v14782_v41 = vpack.c.bf16 %v9541_v2, %v9533_v54  ;;  %v14784_v59 = vpack.c.bf16 %v9558_v11, %v9550_v31  ;;  %v9573_v51 = vld [vmem:[#allocation22 + $0x4c0] sm:$0xff]  ;;  %v9590_v34 = vld [vmem:[#allocation22 + $0x548] sm:$0xff] }
0x101a   :  { %v14748_v21 = vpack.c.bf16 %v9132_v19, %v9124_v17  ;;  %v9566_v17 = vld [vmem:[#allocation22 + $0x488] sm:$0xff]  ;;  %v9597_v49 = vld [vmem:[#allocation22 + $0x580] sm:$0xff] }
0x101b   :  { %v9574_v19 = vld [vmem:[#allocation22 + $0x4c8] sm:$0xff]  ;;  %v9605_v56 = vld [vmem:[#allocation22 + $0x5c0] sm:$0xff] }
0x101c   :  { %14749 = vmatprep.subr.bf16.mxu1 %v14748_v21  ;;  %v14788_v21 = vpack.c.bf16 %v9574_v19, %v9566_v17  ;;  %v9598_v37 = vld [vmem:[#allocation22 + $0x588] sm:$0xff]  ;;  %v14798_v14 = vpack.c.bf16 %v9605_v56, %v9597_v49  ;;  %v9629_v23 = vld [vmem:[#allocation22 + $0x680] sm:$0xff]  ;;  %v9696_v17 = vld [vmem:[#allocation22 + $0x898] sm:$0xff] }
0x101d   :  { %14751 = vmatpush1.bf16.msra.mxu1 %v14750_v60  ;;  %v14786_v60 = vpack.c.bf16 %v9557_v63, %v9549_v44  ;;  %v9606_v58 = vld [vmem:[#allocation22 + $0x5c8] sm:$0xff]  ;;  %v9637_v24 = vld [vmem:[#allocation22 + $0x6c0] sm:$0xff]  ;;  %v9704_v19 = vld [vmem:[#allocation22 + $0x8d8] sm:$0xff] }
0x101e   :  { %14753 = vmatprep.subr.bf16.mxu1 %v14752_v4  ;;  %v9565_v4 = vld [vmem:[#allocation22 + $0x480] sm:$0xff]  ;;  %v9614_v47 = vld [vmem:[#allocation22 + $0x608] sm:$0xff]  ;;  %v14806_v18 = vpack.c.bf16 %v9637_v24, %v9629_v23 }
0x101f   :  { %v14790_v57 = vpack.c.bf16 %v9573_v51, %v9565_v4  ;;  %v9645_v28 = vld [vmem:[#allocation22 + $0x700] sm:$0xff]  ;;  %v9694_v44 = vld [vmem:[#allocation22 + $0x888] sm:$0xff] }
0x1020   :  { %12639 = vmatmul.mubr.msk.f32.vlgmr.msra.gmra.mrb[84].mxu1 %vm265_vm0, %v21284_v29  ;;  %v14768_v29 = vpack.c.bf16 %v9494_v53, %v9486_v1  ;;  %v9613_v1 = vld [vmem:[#allocation22 + $0x600] sm:$0xff]  ;;  %v9702_v63 = vld [vmem:[#allocation22 + $0x8c8] sm:$0xff] }
0x1021   :  { %14755 = vmatpush1.bf16.msra.mxu1 %v14754_v33  ;;  %v14792_v33 = vpack.c.bf16 %v9590_v34, %v9582_v27  ;;  %v9621_v53 = vld [vmem:[#allocation22 + $0x640] sm:$0xff] }
0x1022   :  { %14757 = vmatprep.subr.bf16.mxu1 %v14756_v7  ;;  %v9581_v7 = vld [vmem:[#allocation22 + $0x500] sm:$0xff]  ;;  %v14802_v15 = vpack.c.bf16 %v9621_v53, %v9613_v1  ;;  %v9734_v1 = vld [vmem:[#allocation22 + $0x9c8] sm:$0xff]  ;;  %v9728_v53 = vld [vmem:[#allocation22 + $0x998] sm:$0xff] }
0x1023   :  { %v14794_v35 = vpack.c.bf16 %v9589_v5, %v9581_v7  ;;  %v9653_v9 = vld [vmem:[#allocation22 + $0x740] sm:$0xff]  ;;  %v9695_v7 = vld [vmem:[#allocation22 + $0x890] sm:$0xff] }
0x1024   :  { %v14810_v36 = vpack.c.bf16 %v9653_v9, %v9645_v28  ;;  %v9661_v55 = vld [vmem:[#allocation22 + $0x780] sm:$0xff]  ;;  %v9703_v5 = vld [vmem:[#allocation22 + $0x8d0] sm:$0xff]  ;;  %v9750_v28 = vld [vmem:[#allocation22 + $0xa48] sm:$0xff] }
0x1025   :  { %14759 = vmatpush1.bf16.msra.mxu1 %v14758_v62  ;;  %v9680_v62 = vld [vmem:[#allocation22 + $0x818] sm:$0xff]  ;;  %v9669_v30 = vld [vmem:[#allocation22 + $0x7c0] sm:$0xff]  ;;  %v15078_v49 = vpack.c.bf16 %v9703_v5, %v9695_v7  ;;  %v9782_v7 = vld [vmem:[#allocation22 + $0xb48] sm:$0xff] }
0x1026   :  { %14761 = vmatprep.subr.bf16.mxu1 %v14760_v52  ;;  %v14796_v52 = vpack.c.bf16 %v9606_v58, %v9598_v37  ;;  %v14814_v54 = vpack.c.bf16 %v9669_v30, %v9661_v55  ;;  %v9677_v31 = vld [vmem:[#allocation22 + $0x800] sm:$0xff]  ;;  %v9710_v37 = vld [vmem:[#allocation22 + $0x908] sm:$0xff]  ;;  %v9744_v9 = vld [vmem:[#allocation22 + $0xa18] sm:$0xff] }
0x1027   :  { %v9685_v11 = vld [vmem:[#allocation22 + $0x840] sm:$0xff]  ;;  %v9718_v58 = vld [vmem:[#allocation22 + $0x948] sm:$0xff]  ;;  %v9776_v5 = vld [vmem:[#allocation22 + $0xb18] sm:$0xff] }
0x1028   :  { %v9693_v51 = vld [vmem:[#allocation22 + $0x880] sm:$0xff] }
0x1029   :  { %14763 = vmatpush1.bf16.msra.mxu1 %v14762_v46  ;;  %v9622_v46 = vld [vmem:[#allocation22 + $0x648] sm:$0xff]  ;;  %v9701_v27 = vld [vmem:[#allocation22 + $0x8c0] sm:$0xff] }
0x102a   :  { %14765 = vmatprep.subr.bf16.mxu1 %v14764_v10  ;;  %v15072_v10 = vpack.c.bf16 %v9688_v38, %v9680_v62  ;;  %v14800_v39 = vpack.c.bf16 %v9622_v46, %v9614_v47  ;;  %v9720_v62 = vld [vmem:[#allocation22 + $0x958] sm:$0xff]  ;;  %v9709_v56 = vld [vmem:[#allocation22 + $0x900] sm:$0xff]  ;;  %v14824_v47 = vpack.c.bf16 %v9718_v58, %v9710_v37 }
0x102b   :  { %v9717_v38 = vld [vmem:[#allocation22 + $0x940] sm:$0xff]  ;;  %v9784_v37 = vld [vmem:[#allocation22 + $0xb58] sm:$0xff] }
0x102c   :  { %15073 = vmatprep.subr.bf16.mxu0 %v15072_v10  ;;  %v9711_v10 = vld [vmem:[#allocation22 + $0x910] sm:$0xff]  ;;  %v9733_v23 = vld [vmem:[#allocation22 + $0x9c0] sm:$0xff] }
0x102d   :  { %14767 = vmatpush1.bf16.msra.mxu1 %v14766_v25  ;;  %v9630_v25 = vld [vmem:[#allocation22 + $0x688] sm:$0xff]  ;;  %v9749_v55 = vld [vmem:[#allocation22 + $0xa40] sm:$0xff] }
0x102e   :  { %14769 = vmatprep.subr.bf16.mxu1 %v14768_v29  ;;  %v9638_v29 = vld [vmem:[#allocation22 + $0x6c8] sm:$0xff] }
0x102f   :  { %v14804_v42 = vpack.c.bf16 %v9638_v29, %v9630_v25  ;;  %v9736_v25 = vld [vmem:[#allocation22 + $0x9d8] sm:$0xff]  ;;  %v14826_v29 = vpack.c.bf16 %v9717_v38, %v9709_v56  ;;  %v15096_v56 = vpack.c.bf16 %v9784_v37, %v9776_v5  ;;  %v9775_v38 = vld [vmem:[#allocation22 + $0xb10] sm:$0xff] }
0x1030   :  { %v9848_v5 = vld [vmem:[#allocation22 + $0xd58] sm:$0xff] }
0x1031   :  { %14771 = vmatpush1.bf16.msra.mxu1 %v14770_v50  ;;  %v9646_v50 = vld [vmem:[#allocation22 + $0x708] sm:$0xff] }
0x1032   :  { %14773 = vmatprep.subr.bf16.mxu1 %v14772_v26  ;;  %v9654_v26 = vld [vmem:[#allocation22 + $0x748] sm:$0xff] }
0x1033   :  { %v14808_v20 = vpack.c.bf16 %v9654_v26, %v9646_v50  ;;  %v15084_v50 = vpack.c.bf16 %v9736_v25, %v9728_v53  ;;  %v9727_v26 = vld [vmem:[#allocation22 + $0x990] sm:$0xff]  ;;  %v9789_v25 = vld [vmem:[#allocation22 + $0xb80] sm:$0xff] }
0x1035   :  { %14775 = vmatpush1.bf16.msra.mxu1 %v14774_v61  ;;  %v9662_v61 = vld [vmem:[#allocation22 + $0x788] sm:$0xff] }
0x1036   :  { %14777 = vmatprep.subr.bf16.mxu1 %v14776_v45  ;;  %v9670_v45 = vld [vmem:[#allocation22 + $0x7c8] sm:$0xff] }
0x1037   :  { %v14812_v6 = vpack.c.bf16 %v9670_v45, %v9662_v61  ;;  %v9752_v61 = vld [vmem:[#allocation22 + $0xa58] sm:$0xff] }
0x1039   :  { %14779 = vmatpush1.bf16.msra.mxu1 %v14778_v22  ;;  %v9678_v22 = vld [vmem:[#allocation22 + $0x808] sm:$0xff] }
0x103a   :  { %14781 = vmatprep.subr.bf16.mxu1 %v14780_v8  ;;  %v9686_v8 = vld [vmem:[#allocation22 + $0x848] sm:$0xff] }
0x103b   :  { %v14816_v2 = vpack.c.bf16 %v9686_v8, %v9678_v22  ;;  %v15088_v22 = vpack.c.bf16 %v9752_v61, %v9744_v9  ;;  %v9743_v8 = vld [vmem:[#allocation22 + $0xa10] sm:$0xff]  ;;  %v9805_v61 = vld [vmem:[#allocation22 + $0xc00] sm:$0xff] }
0x103d   :  { %14783 = vmatpush1.bf16.msra.mxu1 %v14782_v41  ;;  %v9679_v41 = vld [vmem:[#allocation22 + $0x810] sm:$0xff] }
0x103e   :  { %14785 = vmatprep.subr.bf16.mxu1 %v14784_v59  ;;  %v9687_v59 = vld [vmem:[#allocation22 + $0x850] sm:$0xff] }
0x103f   :  { %v15074_v4 = vpack.c.bf16 %v9687_v59, %v9679_v41  ;;  %v9768_v41 = vld [vmem:[#allocation22 + $0xad8] sm:$0xff] }
0x1041   :  { %14787 = vmatpush1.bf16.msra.mxu1 %v14786_v60 }
0x1042   :  { %14789 = vmatprep.subr.bf16.mxu1 %v14788_v21  ;;  %v14818_v21 = vpack.c.bf16 %v9685_v11, %v9677_v31  ;;  %v9766_v31 = vld [vmem:[#allocation22 + $0xac8] sm:$0xff]  ;;  %v9760_v11 = vld [vmem:[#allocation22 + $0xa98] sm:$0xff] }
0x1045   :  { %14791 = vmatpush1.bf16.msra.mxu1 %v14790_v57  ;;  %v14820_v57 = vpack.c.bf16 %v9702_v63, %v9694_v44  ;;  %v9757_v63 = vld [vmem:[#allocation22 + $0xa80] sm:$0xff] }
0x1046   :  { %14793 = vmatprep.subr.bf16.mxu1 %v14792_v33  ;;  %v15076_v33 = vpack.c.bf16 %v9704_v19, %v9696_v17  ;;  %v9765_v17 = vld [vmem:[#allocation22 + $0xac0] sm:$0xff] }
0x1047   :  { %v14838_v58 = vpack.c.bf16 %v9765_v17, %v9757_v63 }
0x1049   :  { %14795 = vmatpush1.bf16.msra.mxu1 %v14794_v35  ;;  %v9712_v35 = vld [vmem:[#allocation22 + $0x918] sm:$0xff] }
0x104a   :  { %14797 = vmatprep.subr.bf16.mxu1 %v14796_v52  ;;  %v14822_v52 = vpack.c.bf16 %v9701_v27, %v9693_v51  ;;  %v15080_v46 = vpack.c.bf16 %v9720_v62, %v9712_v35  ;;  %v9759_v51 = vld [vmem:[#allocation22 + $0xa90] sm:$0xff]  ;;  %v9773_v62 = vld [vmem:[#allocation22 + $0xb00] sm:$0xff] }
0x104b   :  { %v9767_v27 = vld [vmem:[#allocation22 + $0xad0] sm:$0xff] }
0x104c   :  { %v15094_v35 = vpack.c.bf16 %v9767_v27, %v9759_v51  ;;  %v9838_v51 = vld [vmem:[#allocation22 + $0xd08] sm:$0xff] }
0x104d   :  { %14799 = vmatpush1.bf16.msra.mxu1 %v14798_v14  ;;  %v9719_v14 = vld [vmem:[#allocation22 + $0x950] sm:$0xff] }
0x104e   :  { %14801 = vmatprep.subr.bf16.mxu1 %v14800_v39  ;;  %v9726_v39 = vld [vmem:[#allocation22 + $0x988] sm:$0xff] }
0x104f   :  { %v14828_v24 = vpack.c.bf16 %v9734_v1, %v9726_v39  ;;  %v9800_v39 = vld [vmem:[#allocation22 + $0xbd8] sm:$0xff] }
0x1051   :  { %14803 = vmatpush1.bf16.msra.mxu1 %v14802_v15  ;;  %v15082_v15 = vpack.c.bf16 %v9719_v14, %v9711_v10  ;;  %v9798_v10 = vld [vmem:[#allocation22 + $0xbc8] sm:$0xff]  ;;  %v9792_v14 = vld [vmem:[#allocation22 + $0xb98] sm:$0xff] }
0x1052   :  { %14805 = vmatprep.subr.bf16.mxu1 %v14804_v42  ;;  %v9725_v42 = vld [vmem:[#allocation22 + $0x980] sm:$0xff] }
0x1053   :  { %v14830_v45 = vpack.c.bf16 %v9733_v23, %v9725_v42  ;;  %v15100_v42 = vpack.c.bf16 %v9800_v39, %v9792_v14  ;;  %v9791_v23 = vld [vmem:[#allocation22 + $0xb90] sm:$0xff]  ;;  %v9864_v14 = vld [vmem:[#allocation22 + $0xdd8] sm:$0xff] }
0x1055   :  { %14807 = vmatpush1.bf16.msra.mxu1 %v14806_v18  ;;  %v9735_v18 = vld [vmem:[#allocation22 + $0x9d0] sm:$0xff] }
0x1056   :  { %14809 = vmatprep.subr.bf16.mxu1 %v14808_v20  ;;  %v9742_v20 = vld [vmem:[#allocation22 + $0xa08] sm:$0xff] }
0x1057   :  { %v14832_v30 = vpack.c.bf16 %v9750_v28, %v9742_v20  ;;  %v9816_v20 = vld [vmem:[#allocation22 + $0xc58] sm:$0xff] }
0x1059   :  { %14811 = vmatpush1.bf16.msra.mxu1 %v14810_v36  ;;  %v15086_v36 = vpack.c.bf16 %v9735_v18, %v9727_v26  ;;  %v9814_v26 = vld [vmem:[#allocation22 + $0xc48] sm:$0xff]  ;;  %v9808_v18 = vld [vmem:[#allocation22 + $0xc18] sm:$0xff] }
0x105a   :  { %14813 = vmatprep.subr.bf16.mxu1 %v14812_v6  ;;  %v9741_v6 = vld [vmem:[#allocation22 + $0xa00] sm:$0xff] }
0x105b   :  { %v14834_v59 = vpack.c.bf16 %v9749_v55, %v9741_v6  ;;  %v15104_v6 = vpack.c.bf16 %v9816_v20, %v9808_v18  ;;  %v9807_v55 = vld [vmem:[#allocation22 + $0xc10] sm:$0xff]  ;;  %v9880_v18 = vld [vmem:[#allocation22 + $0xe58] sm:$0xff] }
0x105d   :  { %14815 = vmatpush1.bf16.msra.mxu1 %v14814_v54  ;;  %v9751_v54 = vld [vmem:[#allocation22 + $0xa50] sm:$0xff] }
0x105e   :  { %14817 = vmatprep.subr.bf16.mxu1 %v14816_v2  ;;  %v9758_v2 = vld [vmem:[#allocation22 + $0xa88] sm:$0xff]  ;;  %v15090_v44 = vpack.c.bf16 %v9751_v54, %v9743_v8  ;;  %v9824_v54 = vld [vmem:[#allocation22 + $0xc98] sm:$0xff] }
0x105f   :  { %v9830_v8 = vld [vmem:[#allocation22 + $0xcc8] sm:$0xff] }
0x10c3   :  { %v21325_v60 = vpop.f32.mrb[78].mxu1 }
0x10c4   :  { %v21327_v34 = vpop.f32.mrb[79].mxu1 }
0x10c5   :  { %10551 = vmatprep.mubr.f32.mxu1 %v21327_v34  ;;  %10835 = vmatprep.mubr.f32.mxu0 %v21327_v34 }
0x10c6   :  { %10552 = vmatmul.mubr.f32.vlgmr.msra.gmra.mrb[86].mxu1 %v21325_v60  ;;  %10836 = vmatmul.mubr.f32.vlgmr.msra.gmra.mrb[126].mxu0 %v21325_v60 }
0x10c7   :  { %14819 = vmatpush1.bf16.msra.mxu1 %v14818_v21  ;;  %15075 = vmatpush1.bf16.msra.mxu0 %v15074_v4  ;;  %v14836_v21 = vpack.c.bf16 %v9766_v31, %v9758_v2  ;;  %v15092_v4 = vpack.c.bf16 %v9768_v41, %v9760_v11  ;;  %v9832_v2 = vld [vmem:[#allocation22 + $0xcd8] sm:$0xff]  ;;  %v9821_v41 = vld [vmem:[#allocation22 + $0xc80] sm:$0xff] }
0x10c8   :  { %14821 = vmatprep.subr.bf16.mxu1 %v14820_v57  ;;  %15077 = vmatprep.subr.bf16.mxu0 %v15076_v33  ;;  %v9774_v57 = vld [vmem:[#allocation22 + $0xb08] sm:$0xff]  ;;  %v15108_v17 = vpack.c.bf16 %v9832_v2, %v9824_v54  ;;  %v9896_v54 = vld [vmem:[#allocation22 + $0xed8] sm:$0xff] }
0x10cb   :  { %14823 = vmatpush1.bf16.msra.mxu1 %v14822_v52  ;;  %15079 = vmatpush1.bf16.msra.mxu0 %v15078_v49  ;;  %v9781_v52 = vld [vmem:[#allocation22 + $0xb40] sm:$0xff]  ;;  %v14840_v49 = vpack.c.bf16 %v9782_v7, %v9774_v57  ;;  %v9846_v57 = vld [vmem:[#allocation22 + $0xd48] sm:$0xff]  ;;  %v9840_v7 = vld [vmem:[#allocation22 + $0xd18] sm:$0xff] }
0x10cc   :  { %14825 = vmatprep.subr.bf16.mxu1 %v14824_v47  ;;  %15081 = vmatprep.subr.bf16.mxu0 %v15080_v46  ;;  %v9783_v47 = vld [vmem:[#allocation22 + $0xb50] sm:$0xff]  ;;  %v9790_v46 = vld [vmem:[#allocation22 + $0xb88] sm:$0xff]  ;;  %v14842_v1 = vpack.c.bf16 %v9781_v52, %v9773_v62  ;;  %v9845_v62 = vld [vmem:[#allocation22 + $0xd40] sm:$0xff]  ;;  %v14856_v52 = vpack.c.bf16 %v9846_v57, %v9838_v51 }
0x10cd   :  { %v15098_v53 = vpack.c.bf16 %v9783_v47, %v9775_v38  ;;  %v9847_v38 = vld [vmem:[#allocation22 + $0xd50] sm:$0xff]  ;;  %v9854_v47 = vld [vmem:[#allocation22 + $0xd88] sm:$0xff] }
0x10ce   :  { %v9902_v51 = vld [vmem:[#allocation22 + $0xf08] sm:$0xff] }
0x10cf   :  { %14827 = vmatpush1.bf16.msra.mxu1 %v14826_v29  ;;  %15083 = vmatpush1.bf16.msra.mxu0 %v15082_v15  ;;  %v9797_v29 = vld [vmem:[#allocation22 + $0xbc0] sm:$0xff]  ;;  %v14844_v15 = vpack.c.bf16 %v9798_v10, %v9790_v46  ;;  %v9862_v46 = vld [vmem:[#allocation22 + $0xdc8] sm:$0xff]  ;;  %v9856_v10 = vld [vmem:[#allocation22 + $0xd98] sm:$0xff] }
0x10d0   :  { %14829 = vmatprep.subr.bf16.mxu1 %v14828_v24  ;;  %15085 = vmatprep.subr.bf16.mxu0 %v15084_v50  ;;  %v9799_v24 = vld [vmem:[#allocation22 + $0xbd0] sm:$0xff]  ;;  %v9806_v50 = vld [vmem:[#allocation22 + $0xc08] sm:$0xff]  ;;  %v14846_v28 = vpack.c.bf16 %v9797_v29, %v9789_v25  ;;  %v9861_v25 = vld [vmem:[#allocation22 + $0xdc0] sm:$0xff]  ;;  %v14860_v29 = vpack.c.bf16 %v9862_v46, %v9854_v47 }
0x10d1   :  { %v15102_v9 = vpack.c.bf16 %v9799_v24, %v9791_v23  ;;  %v9863_v23 = vld [vmem:[#allocation22 + $0xdd0] sm:$0xff]  ;;  %v9870_v24 = vld [vmem:[#allocation22 + $0xe08] sm:$0xff] }
0x10d2   :  { %v9911_v47 = vld [vmem:[#allocation22 + $0xf50] sm:$0xff]  ;;  %v9918_v46 = vld [vmem:[#allocation22 + $0xf88] sm:$0xff] }
0x10d3   :  { %14831 = vmatpush1.bf16.msra.mxu1 %v14830_v45  ;;  %15087 = vmatpush1.bf16.msra.mxu0 %v15086_v36  ;;  %v21333_v19 = vpop.f32.mrb[80].mxu1  ;;  %v9813_v45 = vld [vmem:[#allocation22 + $0xc40] sm:$0xff]  ;;  %v14848_v36 = vpack.c.bf16 %v9814_v26, %v9806_v50  ;;  %v9878_v50 = vld [vmem:[#allocation22 + $0xe48] sm:$0xff]  ;;  %v9872_v26 = vld [vmem:[#allocation22 + $0xe18] sm:$0xff] }
0x10d4   :  { %14833 = vmatprep.subr.bf16.mxu1 %v14832_v30  ;;  %15089 = vmatprep.subr.bf16.mxu0 %v15088_v22  ;;  %v21335_v33 = vpop.f32.mrb[81].mxu1  ;;  %v9815_v30 = vld [vmem:[#allocation22 + $0xc50] sm:$0xff]  ;;  %v9822_v22 = vld [vmem:[#allocation22 + $0xc88] sm:$0xff]  ;;  %v14850_v31 = vpack.c.bf16 %v9813_v45, %v9805_v61  ;;  %v9877_v61 = vld [vmem:[#allocation22 + $0xe40] sm:$0xff]  ;;  %v14864_v45 = vpack.c.bf16 %v9878_v50, %v9870_v24 }
0x10d5   :  { %10622 = vmatprep.mubr.f32.mxu1 %v21335_v33  ;;  %10906 = vmatprep.mubr.f32.mxu0 %v21335_v33  ;;  %v15106_v11 = vpack.c.bf16 %v9815_v30, %v9807_v55  ;;  %v14852_v63 = vpack.c.bf16 %v9830_v8, %v9822_v22  ;;  %v9879_v55 = vld [vmem:[#allocation22 + $0xe50] sm:$0xff]  ;;  %v9886_v30 = vld [vmem:[#allocation22 + $0xe88] sm:$0xff]  ;;  %v9888_v8 = vld [vmem:[#allocation22 + $0xe98] sm:$0xff] }
0x10d6   :  { %v9894_v22 = vld [vmem:[#allocation22 + $0xec8] sm:$0xff]  ;;  %v9927_v24 = vld [vmem:[#allocation22 + $0xfd0] sm:$0xff] }
0x10d7   :  { %14835 = vmatpush1.bf16.msra.mxu1 %v14834_v59  ;;  %15091 = vmatpush1.bf16.msra.mxu0 %v15090_v44  ;;  %v9829_v59 = vld [vmem:[#allocation22 + $0xcc0] sm:$0xff]  ;;  %v9934_v50 = vld [vmem:[#allocation22 + $0x1008] sm:$0xff] }
0x10d8   :  { %14837 = vmatprep.subr.bf16.mxu1 %v14836_v21  ;;  %15093 = vmatprep.subr.bf16.mxu0 %v15092_v4  ;;  %v9823_v21 = vld [vmem:[#allocation22 + $0xc90] sm:$0xff]  ;;  %v14854_v37 = vpack.c.bf16 %v9829_v59, %v9821_v41  ;;  %v9893_v41 = vld [vmem:[#allocation22 + $0xec0] sm:$0xff] }
0x10d9   :  { %v9831_v4 = vld [vmem:[#allocation22 + $0xcd0] sm:$0xff] }
0x10db   :  { %14839 = vmatpush1.bf16.msra.mxu1 %v14838_v58  ;;  %15095 = vmatpush1.bf16.msra.mxu0 %v15094_v35  ;;  %v15110_v58 = vpack.c.bf16 %v9831_v4, %v9823_v21  ;;  %v9837_v35 = vld [vmem:[#allocation22 + $0xd00] sm:$0xff]  ;;  %v9887_v21 = vld [vmem:[#allocation22 + $0xe90] sm:$0xff] }
0x10dc   :  { %14841 = vmatprep.subr.bf16.mxu1 %v14840_v49  ;;  %15097 = vmatprep.subr.bf16.mxu0 %v15096_v56  ;;  %v15112_v49 = vpack.c.bf16 %v9848_v5, %v9840_v7  ;;  %v9839_v56 = vld [vmem:[#allocation22 + $0xd10] sm:$0xff]  ;;  %v14858_v39 = vpack.c.bf16 %v9845_v62, %v9837_v35  ;;  %v9910_v7 = vld [vmem:[#allocation22 + $0xf48] sm:$0xff]  ;;  %v9904_v5 = vld [vmem:[#allocation22 + $0xf18] sm:$0xff] }
0x10dd   :  { %v9895_v4 = vld [vmem:[#allocation22 + $0xed0] sm:$0xff]  ;;  %v9901_v62 = vld [vmem:[#allocation22 + $0xf00] sm:$0xff] }
0x10de   :  { %v15126_v35 = vpack.c.bf16 %v9895_v4, %v9887_v21  ;;  %v9951_v4 = vld [vmem:[#allocation22 + $0x1090] sm:$0xff] }
0x10df   :  { %14843 = vmatpush1.bf16.msra.mxu1 %v14842_v1  ;;  %15099 = vmatpush1.bf16.msra.mxu0 %v15098_v53  ;;  %v15114_v1 = vpack.c.bf16 %v9847_v38, %v9839_v56  ;;  %v9853_v53 = vld [vmem:[#allocation22 + $0xd80] sm:$0xff]  ;;  %v9903_v38 = vld [vmem:[#allocation22 + $0xf10] sm:$0xff] }
0x10e0   :  { %14845 = vmatprep.subr.bf16.mxu1 %v14844_v15  ;;  %15101 = vmatprep.subr.bf16.mxu0 %v15100_v42  ;;  %v15116_v15 = vpack.c.bf16 %v9864_v14, %v9856_v10  ;;  %v9855_v42 = vld [vmem:[#allocation22 + $0xd90] sm:$0xff]  ;;  %v14862_v20 = vpack.c.bf16 %v9861_v25, %v9853_v53  ;;  %v9926_v10 = vld [vmem:[#allocation22 + $0xfc8] sm:$0xff]  ;;  %v9920_v14 = vld [vmem:[#allocation22 + $0xf98] sm:$0xff]  ;;  %v15130_v53 = vpack.c.bf16 %v9911_v47, %v9903_v38 }
0x10e1   :  { %v9917_v25 = vld [vmem:[#allocation22 + $0xf80] sm:$0xff]  ;;  %v9967_v47 = vld [vmem:[#allocation22 + $0x1110] sm:$0xff] }
0x10e3   :  { %14847 = vmatpush1.bf16.msra.mxu1 %v14846_v28  ;;  %15103 = vmatpush1.bf16.msra.mxu0 %v15102_v9  ;;  %v21339_v44 = vpop.f32.mrb[82].mxu1  ;;  %v15118_v28 = vpack.c.bf16 %v9863_v23, %v9855_v42  ;;  %v9869_v9 = vld [vmem:[#allocation22 + $0xe00] sm:$0xff]  ;;  %v9919_v23 = vld [vmem:[#allocation22 + $0xf90] sm:$0xff] }
0x10e4   :  { %14849 = vmatprep.subr.bf16.mxu1 %v14848_v36  ;;  %15105 = vmatprep.subr.bf16.mxu0 %v15104_v6  ;;  %v21341_v27 = vpop.f32.mrb[83].mxu1  ;;  %v15120_v36 = vpack.c.bf16 %v9880_v18, %v9872_v26  ;;  %v9871_v6 = vld [vmem:[#allocation22 + $0xe10] sm:$0xff]  ;;  %v14866_v2 = vpack.c.bf16 %v9877_v61, %v9869_v9  ;;  %v9942_v26 = vld [vmem:[#allocation22 + $0x1048] sm:$0xff]  ;;  %v9936_v18 = vld [vmem:[#allocation22 + $0x1018] sm:$0xff]  ;;  %v15134_v9 = vpack.c.bf16 %v9927_v24, %v9919_v23 }
0x10e5   :  { %v9933_v61 = vld [vmem:[#allocation22 + $0x1000] sm:$0xff]  ;;  %v9983_v24 = vld [vmem:[#allocation22 + $0x1190] sm:$0xff] }
0x10e7   :  { %14851 = vmatpush1.bf16.msra.mxu1 %v14850_v31  ;;  %15107 = vmatpush1.bf16.msra.mxu0 %v15106_v11  ;;  %v15122_v31 = vpack.c.bf16 %v9879_v55, %v9871_v6  ;;  %v9885_v11 = vld [vmem:[#allocation22 + $0xe80] sm:$0xff]  ;;  %v9935_v55 = vld [vmem:[#allocation22 + $0x1010] sm:$0xff] }
0x10e8   :  { %14853 = vmatprep.subr.bf16.mxu1 %v14852_v63  ;;  %15109 = vmatprep.subr.bf16.mxu0 %v15108_v17  ;;  %v14868_v63 = vpack.c.bf16 %v9894_v22, %v9886_v30  ;;  %v15124_v17 = vpack.c.bf16 %v9896_v54, %v9888_v8  ;;  %v9943_v30 = vld [vmem:[#allocation22 + $0x1050] sm:$0xff]  ;;  %v9950_v22 = vld [vmem:[#allocation22 + $0x1088] sm:$0xff]  ;;  %v9952_v54 = vld [vmem:[#allocation22 + $0x1098] sm:$0xff] }
0x10e9   :  { %v9958_v8 = vld [vmem:[#allocation22 + $0x10c8] sm:$0xff] }
0x10eb   :  { %14855 = vmatpush1.bf16.msra.mxu1 %v14854_v37  ;;  %15111 = vmatpush1.bf16.msra.mxu0 %v15110_v58  ;;  %v9912_v37 = vld [vmem:[#allocation22 + $0xf58] sm:$0xff]  ;;  %v14870_v58 = vpack.c.bf16 %v9893_v41, %v9885_v11  ;;  %v15138_v11 = vpack.c.bf16 %v9943_v30, %v9935_v55  ;;  %v9949_v41 = vld [vmem:[#allocation22 + $0x1080] sm:$0xff]  ;;  %v9999_v30 = vld [vmem:[#allocation22 + $0x1210] sm:$0xff] }
0x10ec   :  { %14857 = vmatprep.subr.bf16.mxu1 %v14856_v52  ;;  %15113 = vmatprep.subr.bf16.mxu0 %v15112_v49  ;;  %v9909_v52 = vld [vmem:[#allocation22 + $0xf40] sm:$0xff]  ;;  %v14872_v49 = vpack.c.bf16 %v9910_v7, %v9902_v51  ;;  %v15128_v56 = vpack.c.bf16 %v9912_v37, %v9904_v5  ;;  %v9959_v51 = vld [vmem:[#allocation22 + $0x10d0] sm:$0xff]  ;;  %v9966_v7 = vld [vmem:[#allocation22 + $0x1108] sm:$0xff] }
0x10ed   :  { %v9974_v5 = vld [vmem:[#allocation22 + $0x1148] sm:$0xff]  ;;  %v9968_v37 = vld [vmem:[#allocation22 + $0x1118] sm:$0xff] }
0x10ef   :  { %14859 = vmatpush1.bf16.msra.mxu1 %v14858_v39  ;;  %15115 = vmatpush1.bf16.msra.mxu0 %v15114_v1  ;;  %v9928_v39 = vld [vmem:[#allocation22 + $0xfd8] sm:$0xff]  ;;  %v14874_v1 = vpack.c.bf16 %v9909_v52, %v9901_v62  ;;  %v15142_v62 = vpack.c.bf16 %v9959_v51, %v9951_v4  ;;  %v9965_v52 = vld [vmem:[#allocation22 + $0x1100] sm:$0xff]  ;;  %v10015_v51 = vld [vmem:[#allocation22 + $0x1290] sm:$0xff] }
0x10f0   :  { %14861 = vmatprep.subr.bf16.mxu1 %v14860_v29  ;;  %15117 = vmatprep.subr.bf16.mxu0 %v15116_v15  ;;  %v9925_v29 = vld [vmem:[#allocation22 + $0xfc0] sm:$0xff]  ;;  %v14876_v15 = vpack.c.bf16 %v9926_v10, %v9918_v46  ;;  %v15132_v42 = vpack.c.bf16 %v9928_v39, %v9920_v14  ;;  %v9975_v46 = vld [vmem:[#allocation22 + $0x1150] sm:$0xff]  ;;  %v9982_v10 = vld [vmem:[#allocation22 + $0x1188] sm:$0xff] }
0x10f1   :  { %v9990_v14 = vld [vmem:[#allocation22 + $0x11c8] sm:$0xff]  ;;  %v9984_v39 = vld [vmem:[#allocation22 + $0x1198] sm:$0xff] }
0x10f3   :  { %14863 = vmatpush1.bf16.msra.mxu1 %v14862_v20  ;;  %15119 = vmatpush1.bf16.msra.mxu0 %v15118_v28  ;;  %v21343_v59 = vpop.f32.mrb[84].mxu1  ;;  %v9944_v20 = vld [vmem:[#allocation22 + $0x1058] sm:$0xff]  ;;  %v14878_v28 = vpack.c.bf16 %v9925_v29, %v9917_v25  ;;  %v15146_v25 = vpack.c.bf16 %v9975_v46, %v9967_v47  ;;  %v9981_v29 = vld [vmem:[#allocation22 + $0x1180] sm:$0xff]  ;;  %v10031_v46 = vld [vmem:[#allocation22 + $0x1310] sm:$0xff] }
0x10f4   :  { %14865 = vmatprep.subr.bf16.mxu1 %v14864_v45  ;;  %15121 = vmatprep.subr.bf16.mxu0 %v15120_v36  ;;  %v21345_v57 = vpop.f32.mrb[85].mxu1  ;;  %v9941_v45 = vld [vmem:[#allocation22 + $0x1040] sm:$0xff]  ;;  %v14880_v36 = vpack.c.bf16 %v9942_v26, %v9934_v50  ;;  %v15136_v6 = vpack.c.bf16 %v9944_v20, %v9936_v18  ;;  %v9991_v50 = vld [vmem:[#allocation22 + $0x11d0] sm:$0xff]  ;;  %v9998_v26 = vld [vmem:[#allocation22 + $0x1208] sm:$0xff] }
0x10f5   :  { %v10006_v18 = vld [vmem:[#allocation22 + $0x1248] sm:$0xff]  ;;  %v10000_v20 = vld [vmem:[#allocation22 + $0x1218] sm:$0xff] }
0x10f7   :  { %14867 = vmatpush1.bf16.msra.mxu1 %v14866_v2  ;;  %15123 = vmatpush1.bf16.msra.mxu0 %v15122_v31  ;;  %v9960_v2 = vld [vmem:[#allocation22 + $0x10d8] sm:$0xff]  ;;  %v14882_v31 = vpack.c.bf16 %v9941_v45, %v9933_v61  ;;  %v15150_v61 = vpack.c.bf16 %v9991_v50, %v9983_v24  ;;  %v9997_v45 = vld [vmem:[#allocation22 + $0x1200] sm:$0xff]  ;;  %v10047_v50 = vld [vmem:[#allocation22 + $0x1390] sm:$0xff] }
0x10f8   :  { %14869 = vmatprep.subr.bf16.mxu1 %v14868_v63  ;;  %15125 = vmatprep.subr.bf16.mxu0 %v15124_v17  ;;  %v9957_v63 = vld [vmem:[#allocation22 + $0x10c0] sm:$0xff]  ;;  %v14884_v17 = vpack.c.bf16 %v9958_v8, %v9950_v22  ;;  %v15140_v21 = vpack.c.bf16 %v9960_v2, %v9952_v54  ;;  %v10007_v22 = vld [vmem:[#allocation22 + $0x1250] sm:$0xff]  ;;  %v10014_v8 = vld [vmem:[#allocation22 + $0x1288] sm:$0xff] }
0x10f9   :  { %v10022_v54 = vld [vmem:[#allocation22 + $0x12c8] sm:$0xff]  ;;  %v10016_v2 = vld [vmem:[#allocation22 + $0x1298] sm:$0xff] }
0x10fb   :  { %14871 = vmatpush1.bf16.msra.mxu1 %v14870_v58  ;;  %15127 = vmatpush1.bf16.msra.mxu0 %v15126_v35  ;;  %v9976_v58 = vld [vmem:[#allocation22 + $0x1158] sm:$0xff]  ;;  %v14886_v35 = vpack.c.bf16 %v9957_v63, %v9949_v41  ;;  %v15154_v41 = vpack.c.bf16 %v10007_v22, %v9999_v30  ;;  %v10013_v63 = vld [vmem:[#allocation22 + $0x1280] sm:$0xff]  ;;  %v10063_v22 = vld [vmem:[#allocation22 + $0x1410] sm:$0xff] }
0x10fc   :  { %14873 = vmatprep.subr.bf16.mxu1 %v14872_v49  ;;  %15129 = vmatprep.subr.bf16.mxu0 %v15128_v56  ;;  %v9973_v49 = vld [vmem:[#allocation22 + $0x1140] sm:$0xff]  ;;  %v14888_v56 = vpack.c.bf16 %v9974_v5, %v9966_v7  ;;  %v15144_v38 = vpack.c.bf16 %v9976_v58, %v9968_v37  ;;  %v10023_v7 = vld [vmem:[#allocation22 + $0x12d0] sm:$0xff]  ;;  %v10030_v5 = vld [vmem:[#allocation22 + $0x1308] sm:$0xff] }
0x10fd   :  { %v10038_v37 = vld [vmem:[#allocation22 + $0x1348] sm:$0xff]  ;;  %v10032_v58 = vld [vmem:[#allocation22 + $0x1318] sm:$0xff] }
0x10ff   :  { %14875 = vmatpush1.bf16.msra.mxu1 %v14874_v1  ;;  %15131 = vmatpush1.bf16.msra.mxu0 %v15130_v53  ;;  %v9992_v1 = vld [vmem:[#allocation22 + $0x11d8] sm:$0xff]  ;;  %v14890_v53 = vpack.c.bf16 %v9973_v49, %v9965_v52  ;;  %v15158_v52 = vpack.c.bf16 %v10023_v7, %v10015_v51  ;;  %v10029_v49 = vld [vmem:[#allocation22 + $0x1300] sm:$0xff]  ;;  %v10079_v7 = vld [vmem:[#allocation22 + $0x1490] sm:$0xff] }
0x1100   :  { %14877 = vmatprep.subr.bf16.mxu1 %v14876_v15  ;;  %15133 = vmatprep.subr.bf16.mxu0 %v15132_v42  ;;  %v9989_v15 = vld [vmem:[#allocation22 + $0x11c0] sm:$0xff]  ;;  %v14892_v42 = vpack.c.bf16 %v9990_v14, %v9982_v10  ;;  %v15148_v23 = vpack.c.bf16 %v9992_v1, %v9984_v39  ;;  %v10039_v10 = vld [vmem:[#allocation22 + $0x1350] sm:$0xff]  ;;  %v10046_v14 = vld [vmem:[#allocation22 + $0x1388] sm:$0xff] }
0x1101   :  { %v10054_v39 = vld [vmem:[#allocation22 + $0x13c8] sm:$0xff]  ;;  %v10048_v1 = vld [vmem:[#allocation22 + $0x1398] sm:$0xff] }
0x1103   :  { %14879 = vmatpush1.bf16.msra.mxu1 %v14878_v28  ;;  %15135 = vmatpush1.bf16.msra.mxu0 %v15134_v9  ;;  %v10008_v28 = vld [vmem:[#allocation22 + $0x1258] sm:$0xff]  ;;  %v14894_v9 = vpack.c.bf16 %v9989_v15, %v9981_v29  ;;  %v15162_v29 = vpack.c.bf16 %v10039_v10, %v10031_v46  ;;  %v10045_v15 = vld [vmem:[#allocation22 + $0x1380] sm:$0xff]  ;;  %v10095_v10 = vld [vmem:[#allocation22 + $0x1510] sm:$0xff] }
0x1104   :  { %14881 = vmatprep.subr.bf16.mxu1 %v14880_v36  ;;  %15137 = vmatprep.subr.bf16.mxu0 %v15136_v6  ;;  %v10005_v36 = vld [vmem:[#allocation22 + $0x1240] sm:$0xff]  ;;  %v14896_v6 = vpack.c.bf16 %v10006_v18, %v9998_v26  ;;  %v15152_v55 = vpack.c.bf16 %v10008_v28, %v10000_v20  ;;  %v10055_v26 = vld [vmem:[#allocation22 + $0x13d0] sm:$0xff]  ;;  %v10062_v18 = vld [vmem:[#allocation22 + $0x1408] sm:$0xff] }
0x1105   :  { %v10070_v20 = vld [vmem:[#allocation22 + $0x1448] sm:$0xff]  ;;  %v10064_v28 = vld [vmem:[#allocation22 + $0x1418] sm:$0xff] }
0x1106   :  { %10623 = vmatmul.mubr.f32.vlgmr.msra.gmra.mrb[86].mxu1 %v21333_v19  ;;  %10907 = vmatmul.mubr.f32.vlgmr.msra.gmra.mrb[126].mxu0 %v21333_v19 }
0x1107   :  { %14883 = vmatpush1.bf16.msra.mxu1 %v14882_v31  ;;  %15139 = vmatpush1.bf16.msra.mxu0 %v15138_v11  ;;  %v10024_v31 = vld [vmem:[#allocation22 + $0x12d8] sm:$0xff]  ;;  %v14898_v11 = vpack.c.bf16 %v10005_v36, %v9997_v45  ;;  %v15166_v45 = vpack.c.bf16 %v10055_v26, %v10047_v50  ;;  %v10061_v36 = vld [vmem:[#allocation22 + $0x1400] sm:$0xff]  ;;  %v10111_v26 = vld [vmem:[#allocation22 + $0x1590] sm:$0xff] }
0x1108   :  { %14885 = vmatprep.subr.bf16.mxu1 %v14884_v17  ;;  %15141 = vmatprep.subr.bf16.mxu0 %v15140_v21  ;;  %v10021_v17 = vld [vmem:[#allocation22 + $0x12c0] sm:$0xff]  ;;  %v14900_v21 = vpack.c.bf16 %v10022_v54, %v10014_v8  ;;  %v15156_v4 = vpack.c.bf16 %v10024_v31, %v10016_v2  ;;  %v10071_v8 = vld [vmem:[#allocation22 + $0x1450] sm:$0xff]  ;;  %v10078_v54 = vld [vmem:[#allocation22 + $0x1488] sm:$0xff] }
0x1109   :  { %10693 = vmatprep.mubr.f32.mxu1 %v21341_v27  ;;  %10977 = vmatprep.mubr.f32.mxu0 %v21341_v27  ;;  %v10086_v2 = vld [vmem:[#allocation22 + $0x14c8] sm:$0xff]  ;;  %v10080_v31 = vld [vmem:[#allocation22 + $0x1498] sm:$0xff] }
0x110b   :  { %14887 = vmatpush1.bf16.msra.mxu1 %v14886_v35  ;;  %15143 = vmatpush1.bf16.msra.mxu0 %v15142_v62  ;;  %v10040_v35 = vld [vmem:[#allocation22 + $0x1358] sm:$0xff]  ;;  %v14902_v62 = vpack.c.bf16 %v10021_v17, %v10013_v63  ;;  %v15170_v63 = vpack.c.bf16 %v10071_v8, %v10063_v22  ;;  %v10077_v17 = vld [vmem:[#allocation22 + $0x1480] sm:$0xff]  ;;  %v10127_v8 = vld [vmem:[#allocation22 + $0x1610] sm:$0xff] }
0x110c   :  { %14889 = vmatprep.subr.bf16.mxu1 %v14888_v56  ;;  %15145 = vmatprep.subr.bf16.mxu0 %v15144_v38  ;;  %v10037_v56 = vld [vmem:[#allocation22 + $0x1340] sm:$0xff]  ;;  %v14904_v38 = vpack.c.bf16 %v10038_v37, %v10030_v5  ;;  %v15160_v47 = vpack.c.bf16 %v10040_v35, %v10032_v58  ;;  %v10087_v5 = vld [vmem:[#allocation22 + $0x14d0] sm:$0xff]  ;;  %v10094_v37 = vld [vmem:[#allocation22 + $0x1508] sm:$0xff] }
0x110d   :  { %v10102_v58 = vld [vmem:[#allocation22 + $0x1548] sm:$0xff]  ;;  %v10096_v35 = vld [vmem:[#allocation22 + $0x1518] sm:$0xff] }
0x110f   :  { %14891 = vmatpush1.bf16.msra.mxu1 %v14890_v53  ;;  %15147 = vmatpush1.bf16.msra.mxu0 %v15146_v25  ;;  %v10056_v53 = vld [vmem:[#allocation22 + $0x13d8] sm:$0xff]  ;;  %v14906_v25 = vpack.c.bf16 %v10037_v56, %v10029_v49  ;;  %v15174_v49 = vpack.c.bf16 %v10087_v5, %v10079_v7  ;;  %v10093_v56 = vld [vmem:[#allocation22 + $0x1500] sm:$0xff]  ;;  %v10143_v5 = vld [vmem:[#allocation22 + $0x1690] sm:$0xff] }
0x1110   :  { %14893 = vmatprep.subr.bf16.mxu1 %v14892_v42  ;;  %15149 = vmatprep.subr.bf16.mxu0 %v15148_v23  ;;  %v10053_v42 = vld [vmem:[#allocation22 + $0x13c0] sm:$0xff]  ;;  %v14908_v23 = vpack.c.bf16 %v10054_v39, %v10046_v14  ;;  %v15164_v24 = vpack.c.bf16 %v10056_v53, %v10048_v1  ;;  %v10103_v14 = vld [vmem:[#allocation22 + $0x1550] sm:$0xff]  ;;  %v10110_v39 = vld [vmem:[#allocation22 + $0x1588] sm:$0xff] }
0x1111   :  { %v10118_v1 = vld [vmem:[#allocation22 + $0x15c8] sm:$0xff]  ;;  %v10112_v53 = vld [vmem:[#allocation22 + $0x1598] sm:$0xff] }
0x1113   :  { %14895 = vmatpush1.bf16.msra.mxu1 %v14894_v9  ;;  %15151 = vmatpush1.bf16.msra.mxu0 %v15150_v61  ;;  %v10072_v9 = vld [vmem:[#allocation22 + $0x1458] sm:$0xff]  ;;  %v14910_v61 = vpack.c.bf16 %v10053_v42, %v10045_v15  ;;  %v15178_v15 = vpack.c.bf16 %v10103_v14, %v10095_v10  ;;  %v10109_v42 = vld [vmem:[#allocation22 + $0x1580] sm:$0xff]  ;;  %v10159_v14 = vld [vmem:[#allocation22 + $0x1710] sm:$0xff] }
0x1114   :  { %14897 = vmatprep.subr.bf16.mxu1 %v14896_v6  ;;  %15153 = vmatprep.subr.bf16.mxu0 %v15152_v55  ;;  %v10069_v6 = vld [vmem:[#allocation22 + $0x1440] sm:$0xff]  ;;  %v14912_v55 = vpack.c.bf16 %v10070_v20, %v10062_v18  ;;  %v15168_v30 = vpack.c.bf16 %v10072_v9, %v10064_v28  ;;  %v10119_v18 = vld [vmem:[#allocation22 + $0x15d0] sm:$0xff]  ;;  %v10126_v20 = vld [vmem:[#allocation22 + $0x1608] sm:$0xff] }
0x1115   :  { %v10134_v28 = vld [vmem:[#allocation22 + $0x1648] sm:$0xff]  ;;  %v10128_v9 = vld [vmem:[#allocation22 + $0x1618] sm:$0xff] }
0x1117   :  { %14899 = vmatpush1.bf16.msra.mxu1 %v14898_v11  ;;  %15155 = vmatpush1.bf16.msra.mxu0 %v15154_v41  ;;  %v10088_v11 = vld [vmem:[#allocation22 + $0x14d8] sm:$0xff]  ;;  %v14914_v41 = vpack.c.bf16 %v10069_v6, %v10061_v36  ;;  %v15182_v36 = vpack.c.bf16 %v10119_v18, %v10111_v26  ;;  %v10125_v6 = vld [vmem:[#allocation22 + $0x1600] sm:$0xff]  ;;  %v10175_v18 = vld [vmem:[#allocation22 + $0x1790] sm:$0xff] }
0x1118   :  { %14901 = vmatprep.subr.bf16.mxu1 %v14900_v21  ;;  %15157 = vmatprep.subr.bf16.mxu0 %v15156_v4  ;;  %v10085_v21 = vld [vmem:[#allocation22 + $0x14c0] sm:$0xff]  ;;  %v14916_v4 = vpack.c.bf16 %v10086_v2, %v10078_v54  ;;  %v15172_v51 = vpack.c.bf16 %v10088_v11, %v10080_v31  ;;  %v10135_v54 = vld [vmem:[#allocation22 + $0x1650] sm:$0xff]  ;;  %v10142_v2 = vld [vmem:[#allocation22 + $0x1688] sm:$0xff] }
0x1119   :  { %v10150_v31 = vld [vmem:[#allocation22 + $0x16c8] sm:$0xff]  ;;  %v10144_v11 = vld [vmem:[#allocation22 + $0x1698] sm:$0xff] }
0x111b   :  { %14903 = vmatpush1.bf16.msra.mxu1 %v14902_v62  ;;  %15159 = vmatpush1.bf16.msra.mxu0 %v15158_v52  ;;  %v10104_v62 = vld [vmem:[#allocation22 + $0x1558] sm:$0xff]  ;;  %v14918_v52 = vpack.c.bf16 %v10085_v21, %v10077_v17  ;;  %v15186_v17 = vpack.c.bf16 %v10135_v54, %v10127_v8  ;;  %v10141_v21 = vld [vmem:[#allocation22 + $0x1680] sm:$0xff]  ;;  %v10191_v54 = vld [vmem:[#allocation22 + $0x1810] sm:$0xff] }
0x111c   :  { %14905 = vmatprep.subr.bf16.mxu1 %v14904_v38  ;;  %15161 = vmatprep.subr.bf16.mxu0 %v15160_v47  ;;  %v10101_v38 = vld [vmem:[#allocation22 + $0x1540] sm:$0xff]  ;;  %v14920_v47 = vpack.c.bf16 %v10102_v58, %v10094_v37  ;;  %v15176_v46 = vpack.c.bf16 %v10104_v62, %v10096_v35  ;;  %v10151_v37 = vld [vmem:[#allocation22 + $0x16d0] sm:$0xff]  ;;  %v10158_v58 = vld [vmem:[#allocation22 + $0x1708] sm:$0xff] }
0x111d   :  { %v10166_v35 = vld [vmem:[#allocation22 + $0x1748] sm:$0xff]  ;;  %v10160_v62 = vld [vmem:[#allocation22 + $0x1718] sm:$0xff] }
0x111f   :  { %14907 = vmatpush1.bf16.msra.mxu1 %v14906_v25  ;;  %15163 = vmatpush1.bf16.msra.mxu0 %v15162_v29  ;;  %v10120_v25 = vld [vmem:[#allocation22 + $0x15d8] sm:$0xff]  ;;  %v14922_v29 = vpack.c.bf16 %v10101_v38, %v10093_v56  ;;  %v15190_v56 = vpack.c.bf16 %v10151_v37, %v10143_v5  ;;  %v10157_v38 = vld [vmem:[#allocation22 + $0x1700] sm:$0xff]  ;;  %v10207_v37 = vld [vmem:[#allocation22 + $0x1890] sm:$0xff] }
0x1120   :  { %14909 = vmatprep.subr.bf16.mxu1 %v14908_v23  ;;  %15165 = vmatprep.subr.bf16.mxu0 %v15164_v24  ;;  %v10117_v23 = vld [vmem:[#allocation22 + $0x15c0] sm:$0xff]  ;;  %v14924_v24 = vpack.c.bf16 %v10118_v1, %v10110_v39  ;;  %v15180_v50 = vpack.c.bf16 %v10120_v25, %v10112_v53  ;;  %v10167_v39 = vld [vmem:[#allocation22 + $0x1750] sm:$0xff]  ;;  %v10174_v1 = vld [vmem:[#allocation22 + $0x1788] sm:$0xff] }
0x1121   :  { %v10182_v53 = vld [vmem:[#allocation22 + $0x17c8] sm:$0xff]  ;;  %v10176_v25 = vld [vmem:[#allocation22 + $0x1798] sm:$0xff] }
0x1123   :  { %14911 = vmatpush1.bf16.msra.mxu1 %v14910_v61  ;;  %15167 = vmatpush1.bf16.msra.mxu0 %v15166_v45  ;;  %v10136_v61 = vld [vmem:[#allocation22 + $0x1658] sm:$0xff]  ;;  %v14926_v45 = vpack.c.bf16 %v10117_v23, %v10109_v42  ;;  %v15194_v42 = vpack.c.bf16 %v10167_v39, %v10159_v14  ;;  %v10173_v23 = vld [vmem:[#allocation22 + $0x1780] sm:$0xff]  ;;  %v10223_v39 = vld [vmem:[#allocation22 + $0x1910] sm:$0xff] }
0x1124   :  { %14913 = vmatprep.subr.bf16.mxu1 %v14912_v55  ;;  %15169 = vmatprep.subr.bf16.mxu0 %v15168_v30  ;;  %v10133_v55 = vld [vmem:[#allocation22 + $0x1640] sm:$0xff]  ;;  %v14928_v30 = vpack.c.bf16 %v10134_v28, %v10126_v20  ;;  %v15184_v22 = vpack.c.bf16 %v10136_v61, %v10128_v9  ;;  %v10183_v20 = vld [vmem:[#allocation22 + $0x17d0] sm:$0xff]  ;;  %v10190_v28 = vld [vmem:[#allocation22 + $0x1808] sm:$0xff] }
0x1125   :  { %v10198_v9 = vld [vmem:[#allocation22 + $0x1848] sm:$0xff]  ;;  %v10192_v61 = vld [vmem:[#allocation22 + $0x1818] sm:$0xff] }
0x1127   :  { %14915 = vmatpush1.bf16.msra.mxu1 %v14914_v41  ;;  %15171 = vmatpush1.bf16.msra.mxu0 %v15170_v63  ;;  %v10152_v41 = vld [vmem:[#allocation22 + $0x16d8] sm:$0xff]  ;;  %v14930_v63 = vpack.c.bf16 %v10133_v55, %v10125_v6  ;;  %v15198_v6 = vpack.c.bf16 %v10183_v20, %v10175_v18  ;;  %v10189_v55 = vld [vmem:[#allocation22 + $0x1800] sm:$0xff]  ;;  %v10239_v20 = vld [vmem:[#allocation22 + $0x1990] sm:$0xff] }
0x1128   :  { %14917 = vmatprep.subr.bf16.mxu1 %v14916_v4  ;;  %15173 = vmatprep.subr.bf16.mxu0 %v15172_v51  ;;  %v10149_v4 = vld [vmem:[#allocation22 + $0x16c0] sm:$0xff]  ;;  %v14932_v51 = vpack.c.bf16 %v10150_v31, %v10142_v2  ;;  %v15188_v7 = vpack.c.bf16 %v10152_v41, %v10144_v11  ;;  %v10199_v2 = vld [vmem:[#allocation22 + $0x1850] sm:$0xff]  ;;  %v10206_v31 = vld [vmem:[#allocation22 + $0x1888] sm:$0xff] }
0x1129   :  { %v10214_v11 = vld [vmem:[#allocation22 + $0x18c8] sm:$0xff]  ;;  %v10208_v41 = vld [vmem:[#allocation22 + $0x1898] sm:$0xff] }
0x112b   :  { %14919 = vmatpush1.bf16.msra.mxu1 %v14918_v52  ;;  %15175 = vmatpush1.bf16.msra.mxu0 %v15174_v49  ;;  %v10168_v52 = vld [vmem:[#allocation22 + $0x1758] sm:$0xff]  ;;  %v14934_v49 = vpack.c.bf16 %v10149_v4, %v10141_v21  ;;  %v15202_v21 = vpack.c.bf16 %v10199_v2, %v10191_v54  ;;  %v10205_v4 = vld [vmem:[#allocation22 + $0x1880] sm:$0xff]  ;;  %v10255_v2 = vld [vmem:[#allocation22 + $0x1a10] sm:$0xff] }
0x112c   :  { %14921 = vmatprep.subr.bf16.mxu1 %v14920_v47  ;;  %15177 = vmatprep.subr.bf16.mxu0 %v15176_v46  ;;  %v10165_v47 = vld [vmem:[#allocation22 + $0x1740] sm:$0xff]  ;;  %v14936_v46 = vpack.c.bf16 %v10166_v35, %v10158_v58  ;;  %v15192_v10 = vpack.c.bf16 %v10168_v52, %v10160_v62  ;;  %v10215_v58 = vld [vmem:[#allocation22 + $0x18d0] sm:$0xff]  ;;  %v10222_v35 = vld [vmem:[#allocation22 + $0x1908] sm:$0xff] }
0x112d   :  { %v10230_v62 = vld [vmem:[#allocation22 + $0x1948] sm:$0xff]  ;;  %v10224_v52 = vld [vmem:[#allocation22 + $0x1918] sm:$0xff] }
0x112f   :  { %14923 = vmatpush1.bf16.msra.mxu1 %v14922_v29  ;;  %15179 = vmatpush1.bf16.msra.mxu0 %v15178_v15  ;;  %v10184_v29 = vld [vmem:[#allocation22 + $0x17d8] sm:$0xff]  ;;  %v14938_v15 = vpack.c.bf16 %v10165_v47, %v10157_v38  ;;  %v15206_v38 = vpack.c.bf16 %v10215_v58, %v10207_v37  ;;  %v10221_v47 = vld [vmem:[#allocation22 + $0x1900] sm:$0xff]  ;;  %v10271_v58 = vld [vmem:[#allocation22 + $0x1a90] sm:$0xff] }
0x1130   :  { %14925 = vmatprep.subr.bf16.mxu1 %v14924_v24  ;;  %15181 = vmatprep.subr.bf16.mxu0 %v15180_v50  ;;  %v10181_v24 = vld [vmem:[#allocation22 + $0x17c0] sm:$0xff]  ;;  %v14940_v50 = vpack.c.bf16 %v10182_v53, %v10174_v1  ;;  %v15196_v26 = vpack.c.bf16 %v10184_v29, %v10176_v25  ;;  %v10231_v1 = vld [vmem:[#allocation22 + $0x1950] sm:$0xff]  ;;  %v10238_v53 = vld [vmem:[#allocation22 + $0x1988] sm:$0xff] }
0x1131   :  { %v10246_v25 = vld [vmem:[#allocation22 + $0x19c8] sm:$0xff]  ;;  %v10240_v29 = vld [vmem:[#allocation22 + $0x1998] sm:$0xff] }
0x1133   :  { %14927 = vmatpush1.bf16.msra.mxu1 %v14926_v45  ;;  %15183 = vmatpush1.bf16.msra.mxu0 %v15182_v36  ;;  %v10200_v45 = vld [vmem:[#allocation22 + $0x1858] sm:$0xff]  ;;  %v14942_v36 = vpack.c.bf16 %v10181_v24, %v10173_v23  ;;  %v15210_v23 = vpack.c.bf16 %v10231_v1, %v10223_v39  ;;  %v10237_v24 = vld [vmem:[#allocation22 + $0x1980] sm:$0xff]  ;;  %v10287_v1 = vld [vmem:[#allocation22 + $0x1b10] sm:$0xff] }
0x1134   :  { %14929 = vmatprep.subr.bf16.mxu1 %v14928_v30  ;;  %15185 = vmatprep.subr.bf16.mxu0 %v15184_v22  ;;  %v10197_v30 = vld [vmem:[#allocation22 + $0x1840] sm:$0xff]  ;;  %v14944_v22 = vpack.c.bf16 %v10198_v9, %v10190_v28  ;;  %v15200_v8 = vpack.c.bf16 %v10200_v45, %v10192_v61  ;;  %v10247_v28 = vld [vmem:[#allocation22 + $0x19d0] sm:$0xff]  ;;  %v10254_v9 = vld [vmem:[#allocation22 + $0x1a08] sm:$0xff] }
0x1135   :  { %v10262_v61 = vld [vmem:[#allocation22 + $0x1a48] sm:$0xff]  ;;  %v10256_v45 = vld [vmem:[#allocation22 + $0x1a18] sm:$0xff] }
0x1137   :  { %14931 = vmatpush1.bf16.msra.mxu1 %v14930_v63  ;;  %15187 = vmatpush1.bf16.msra.mxu0 %v15186_v17  ;;  %v10216_v63 = vld [vmem:[#allocation22 + $0x18d8] sm:$0xff]  ;;  %v14946_v17 = vpack.c.bf16 %v10197_v30, %v10189_v55  ;;  %v15214_v55 = vpack.c.bf16 %v10247_v28, %v10239_v20  ;;  %v10253_v30 = vld [vmem:[#allocation22 + $0x1a00] sm:$0xff]  ;;  %v10303_v28 = vld [vmem:[#allocation22 + $0x1b90] sm:$0xff] }
0x1138   :  { %14933 = vmatprep.subr.bf16.mxu1 %v14932_v51  ;;  %15189 = vmatprep.subr.bf16.mxu0 %v15188_v7  ;;  %v10213_v51 = vld [vmem:[#allocation22 + $0x18c0] sm:$0xff]  ;;  %v14948_v7 = vpack.c.bf16 %v10214_v11, %v10206_v31  ;;  %v15204_v5 = vpack.c.bf16 %v10216_v63, %v10208_v41  ;;  %v10263_v31 = vld [vmem:[#allocation22 + $0x1a50] sm:$0xff]  ;;  %v10270_v11 = vld [vmem:[#allocation22 + $0x1a88] sm:$0xff] }
0x1139   :  { %v10278_v41 = vld [vmem:[#allocation22 + $0x1ac8] sm:$0xff]  ;;  %v10272_v63 = vld [vmem:[#allocation22 + $0x1a98] sm:$0xff] }
0x113b   :  { %14935 = vmatpush1.bf16.msra.mxu1 %v14934_v49  ;;  %15191 = vmatpush1.bf16.msra.mxu0 %v15190_v56  ;;  %v10232_v49 = vld [vmem:[#allocation22 + $0x1958] sm:$0xff]  ;;  %v14950_v56 = vpack.c.bf16 %v10213_v51, %v10205_v4  ;;  %v15218_v4 = vpack.c.bf16 %v10263_v31, %v10255_v2  ;;  %v10269_v51 = vld [vmem:[#allocation22 + $0x1a80] sm:$0xff]  ;;  %v10319_v31 = vld [vmem:[#allocation22 + $0x1c10] sm:$0xff] }
0x113c   :  { %14937 = vmatprep.subr.bf16.mxu1 %v14936_v46  ;;  %15193 = vmatprep.subr.bf16.mxu0 %v15192_v10  ;;  %v10229_v46 = vld [vmem:[#allocation22 + $0x1940] sm:$0xff]  ;;  %v14952_v10 = vpack.c.bf16 %v10230_v62, %v10222_v35  ;;  %v15208_v14 = vpack.c.bf16 %v10232_v49, %v10224_v52  ;;  %v10279_v35 = vld [vmem:[#allocation22 + $0x1ad0] sm:$0xff]  ;;  %v10286_v62 = vld [vmem:[#allocation22 + $0x1b08] sm:$0xff] }
0x113d   :  { %v10294_v52 = vld [vmem:[#allocation22 + $0x1b48] sm:$0xff]  ;;  %v10288_v49 = vld [vmem:[#allocation22 + $0x1b18] sm:$0xff] }
0x113f   :  { %14939 = vmatpush1.bf16.msra.mxu1 %v14938_v15  ;;  %15195 = vmatpush1.bf16.msra.mxu0 %v15194_v42  ;;  %v10248_v15 = vld [vmem:[#allocation22 + $0x19d8] sm:$0xff]  ;;  %v14954_v42 = vpack.c.bf16 %v10229_v46, %v10221_v47  ;;  %v15222_v47 = vpack.c.bf16 %v10279_v35, %v10271_v58  ;;  %v10285_v46 = vld [vmem:[#allocation22 + $0x1b00] sm:$0xff]  ;;  %v10335_v35 = vld [vmem:[#allocation22 + $0x1c90] sm:$0xff] }
0x1140   :  { %14941 = vmatprep.subr.bf16.mxu1 %v14940_v50  ;;  %15197 = vmatprep.subr.bf16.mxu0 %v15196_v26  ;;  %v10245_v50 = vld [vmem:[#allocation22 + $0x19c0] sm:$0xff]  ;;  %v14956_v26 = vpack.c.bf16 %v10246_v25, %v10238_v53  ;;  %v15212_v18 = vpack.c.bf16 %v10248_v15, %v10240_v29  ;;  %v10295_v53 = vld [vmem:[#allocation22 + $0x1b50] sm:$0xff]  ;;  %v10302_v25 = vld [vmem:[#allocation22 + $0x1b88] sm:$0xff] }
0x1141   :  { %v10310_v29 = vld [vmem:[#allocation22 + $0x1bc8] sm:$0xff]  ;;  %v10304_v15 = vld [vmem:[#allocation22 + $0x1b98] sm:$0xff] }
0x1143   :  { %14943 = vmatpush1.bf16.msra.mxu1 %v14942_v36  ;;  %15199 = vmatpush1.bf16.msra.mxu0 %v15198_v6  ;;  %v10264_v36 = vld [vmem:[#allocation22 + $0x1a58] sm:$0xff]  ;;  %v14958_v6 = vpack.c.bf16 %v10245_v50, %v10237_v24  ;;  %v15226_v24 = vpack.c.bf16 %v10295_v53, %v10287_v1  ;;  %v10301_v50 = vld [vmem:[#allocation22 + $0x1b80] sm:$0xff]  ;;  %v10351_v53 = vld [vmem:[#allocation22 + $0x1d10] sm:$0xff] }
0x1144   :  { %14945 = vmatprep.subr.bf16.mxu1 %v14944_v22  ;;  %15201 = vmatprep.subr.bf16.mxu0 %v15200_v8  ;;  %v10261_v22 = vld [vmem:[#allocation22 + $0x1a40] sm:$0xff]  ;;  %v14960_v8 = vpack.c.bf16 %v10262_v61, %v10254_v9  ;;  %v15216_v54 = vpack.c.bf16 %v10264_v36, %v10256_v45  ;;  %v10311_v9 = vld [vmem:[#allocation22 + $0x1bd0] sm:$0xff]  ;;  %v10318_v61 = vld [vmem:[#allocation22 + $0x1c08] sm:$0xff] }
0x1145   :  { %v10326_v45 = vld [vmem:[#allocation22 + $0x1c48] sm:$0xff]  ;;  %v10320_v36 = vld [vmem:[#allocation22 + $0x1c18] sm:$0xff] }
0x1146   :  { %10694 = vmatmul.mubr.f32.vlgmr.msra.gmra.mrb[86].mxu1 %v21339_v44  ;;  %10978 = vmatmul.mubr.f32.vlgmr.msra.gmra.mrb[126].mxu0 %v21339_v44 }
0x1147   :  { %14947 = vmatpush1.bf16.msra.mxu1 %v14946_v17  ;;  %15203 = vmatpush1.bf16.msra.mxu0 %v15202_v21  ;;  %v10280_v17 = vld [vmem:[#allocation22 + $0x1ad8] sm:$0xff]  ;;  %v14962_v21 = vpack.c.bf16 %v10261_v22, %v10253_v30  ;;  %v15230_v30 = vpack.c.bf16 %v10311_v9, %v10303_v28  ;;  %v10317_v22 = vld [vmem:[#allocation22 + $0x1c00] sm:$0xff]  ;;  %v10367_v9 = vld [vmem:[#allocation22 + $0x1d90] sm:$0xff] }
0x1148   :  { %14949 = vmatprep.subr.bf16.mxu1 %v14948_v7  ;;  %15205 = vmatprep.subr.bf16.mxu0 %v15204_v5  ;;  %v10277_v7 = vld [vmem:[#allocation22 + $0x1ac0] sm:$0xff]  ;;  %v14964_v5 = vpack.c.bf16 %v10278_v41, %v10270_v11  ;;  %v15220_v37 = vpack.c.bf16 %v10280_v17, %v10272_v63  ;;  %v10327_v11 = vld [vmem:[#allocation22 + $0x1c50] sm:$0xff]  ;;  %v10334_v41 = vld [vmem:[#allocation22 + $0x1c88] sm:$0xff] }
0x1149   :  { %10764 = vmatprep.mubr.f32.mxu1 %v21345_v57  ;;  %11048 = vmatprep.mubr.f32.mxu0 %v21345_v57  ;;  %v10342_v63 = vld [vmem:[#allocation22 + $0x1cc8] sm:$0xff]  ;;  %v10336_v17 = vld [vmem:[#allocation22 + $0x1c98] sm:$0xff] }
0x114b   :  { %14951 = vmatpush1.bf16.msra.mxu1 %v14950_v56  ;;  %15207 = vmatpush1.bf16.msra.mxu0 %v15206_v38  ;;  %v10296_v56 = vld [vmem:[#allocation22 + $0x1b58] sm:$0xff]  ;;  %v14966_v38 = vpack.c.bf16 %v10277_v7, %v10269_v51  ;;  %v15234_v51 = vpack.c.bf16 %v10327_v11, %v10319_v31  ;;  %v10333_v7 = vld [vmem:[#allocation22 + $0x1c80] sm:$0xff]  ;;  %v10383_v11 = vld [vmem:[#allocation22 + $0x1e10] sm:$0xff] }
0x114c   :  { %14953 = vmatprep.subr.bf16.mxu1 %v14952_v10  ;;  %15209 = vmatprep.subr.bf16.mxu0 %v15208_v14  ;;  %v10293_v10 = vld [vmem:[#allocation22 + $0x1b40] sm:$0xff]  ;;  %v14968_v14 = vpack.c.bf16 %v10294_v52, %v10286_v62  ;;  %v15224_v39 = vpack.c.bf16 %v10296_v56, %v10288_v49  ;;  %v10343_v62 = vld [vmem:[#allocation22 + $0x1cd0] sm:$0xff]  ;;  %v10350_v52 = vld [vmem:[#allocation22 + $0x1d08] sm:$0xff] }
0x114d   :  { %v10358_v49 = vld [vmem:[#allocation22 + $0x1d48] sm:$0xff]  ;;  %v10352_v56 = vld [vmem:[#allocation22 + $0x1d18] sm:$0xff] }
0x114f   :  { %14955 = vmatpush1.bf16.msra.mxu1 %v14954_v42  ;;  %15211 = vmatpush1.bf16.msra.mxu0 %v15210_v23  ;;  %v10312_v42 = vld [vmem:[#allocation22 + $0x1bd8] sm:$0xff]  ;;  %v14970_v23 = vpack.c.bf16 %v10293_v10, %v10285_v46  ;;  %v15238_v46 = vpack.c.bf16 %v10343_v62, %v10335_v35  ;;  %v10349_v10 = vld [vmem:[#allocation22 + $0x1d00] sm:$0xff]  ;;  %v10399_v62 = vld [vmem:[#allocation22 + $0x1e90] sm:$0xff] }
0x1150   :  { %14957 = vmatprep.subr.bf16.mxu1 %v14956_v26  ;;  %15213 = vmatprep.subr.bf16.mxu0 %v15212_v18  ;;  %v10309_v26 = vld [vmem:[#allocation22 + $0x1bc0] sm:$0xff]  ;;  %v14972_v18 = vpack.c.bf16 %v10310_v29, %v10302_v25  ;;  %v15228_v20 = vpack.c.bf16 %v10312_v42, %v10304_v15  ;;  %v10359_v25 = vld [vmem:[#allocation22 + $0x1d50] sm:$0xff]  ;;  %v10366_v29 = vld [vmem:[#allocation22 + $0x1d88] sm:$0xff] }
0x1151   :  { %v10374_v15 = vld [vmem:[#allocation22 + $0x1dc8] sm:$0xff]  ;;  %v10368_v42 = vld [vmem:[#allocation22 + $0x1d98] sm:$0xff] }
0x1153   :  { %14959 = vmatpush1.bf16.msra.mxu1 %v14958_v6  ;;  %15215 = vmatpush1.bf16.msra.mxu0 %v15214_v55  ;;  %v10328_v6 = vld [vmem:[#allocation22 + $0x1c58] sm:$0xff]  ;;  %v14974_v55 = vpack.c.bf16 %v10309_v26, %v10301_v50  ;;  %v15242_v50 = vpack.c.bf16 %v10359_v25, %v10351_v53  ;;  %v10365_v26 = vld [vmem:[#allocation22 + $0x1d80] sm:$0xff]  ;;  %v10415_v25 = vld [vmem:[#allocation22 + $0x1f10] sm:$0xff] }
0x1154   :  { %14961 = vmatprep.subr.bf16.mxu1 %v14960_v8  ;;  %15217 = vmatprep.subr.bf16.mxu0 %v15216_v54  ;;  %v10325_v8 = vld [vmem:[#allocation22 + $0x1c40] sm:$0xff]  ;;  %v14976_v54 = vpack.c.bf16 %v10326_v45, %v10318_v61  ;;  %v15232_v2 = vpack.c.bf16 %v10328_v6, %v10320_v36  ;;  %v10375_v61 = vld [vmem:[#allocation22 + $0x1dd0] sm:$0xff]  ;;  %v10382_v45 = vld [vmem:[#allocation22 + $0x1e08] sm:$0xff] }
0x1155   :  { %v10390_v36 = vld [vmem:[#allocation22 + $0x1e48] sm:$0xff]  ;;  %v10384_v6 = vld [vmem:[#allocation22 + $0x1e18] sm:$0xff] }
0x1157   :  { %14963 = vmatpush1.bf16.msra.mxu1 %v14962_v21  ;;  %15219 = vmatpush1.bf16.msra.mxu0 %v15218_v4  ;;  %v10344_v21 = vld [vmem:[#allocation22 + $0x1cd8] sm:$0xff]  ;;  %v14978_v4 = vpack.c.bf16 %v10325_v8, %v10317_v22  ;;  %v15246_v22 = vpack.c.bf16 %v10375_v61, %v10367_v9  ;;  %v10381_v8 = vld [vmem:[#allocation22 + $0x1e00] sm:$0xff]  ;;  %v10431_v61 = vld [vmem:[#allocation22 + $0x1f90] sm:$0xff] }
0x1158   :  { %14965 = vmatprep.subr.bf16.mxu1 %v14964_v5  ;;  %15221 = vmatprep.subr.bf16.mxu0 %v15220_v37  ;;  %v10341_v5 = vld [vmem:[#allocation22 + $0x1cc0] sm:$0xff]  ;;  %v14980_v37 = vpack.c.bf16 %v10342_v63, %v10334_v41  ;;  %v15236_v58 = vpack.c.bf16 %v10344_v21, %v10336_v17  ;;  %v10391_v41 = vld [vmem:[#allocation22 + $0x1e50] sm:$0xff]  ;;  %v10398_v63 = vld [vmem:[#allocation22 + $0x1e88] sm:$0xff] }
0x1159   :  { %v10406_v17 = vld [vmem:[#allocation22 + $0x1ec8] sm:$0xff]  ;;  %v10400_v21 = vld [vmem:[#allocation22 + $0x1e98] sm:$0xff] }
0x115b   :  { %14967 = vmatpush1.bf16.msra.mxu1 %v14966_v38  ;;  %15223 = vmatpush1.bf16.msra.mxu0 %v15222_v47  ;;  %v10360_v38 = vld [vmem:[#allocation22 + $0x1d58] sm:$0xff]  ;;  %v14982_v47 = vpack.c.bf16 %v10341_v5, %v10333_v7  ;;  %v15250_v7 = vpack.c.bf16 %v10391_v41, %v10383_v11  ;;  %v10397_v5 = vld [vmem:[#allocation22 + $0x1e80] sm:$0xff]  ;;  %v9427_v41 = vld [vmem:[#allocation22 + $0x30] sm:$0xff] }
0x115c   :  { %14969 = vmatprep.subr.bf16.mxu1 %v14968_v14  ;;  %15225 = vmatprep.subr.bf16.mxu0 %v15224_v39  ;;  %v10357_v14 = vld [vmem:[#allocation22 + $0x1d40] sm:$0xff]  ;;  %v14984_v39 = vpack.c.bf16 %v10358_v49, %v10350_v52  ;;  %v15240_v1 = vpack.c.bf16 %v10360_v38, %v10352_v56  ;;  %v10407_v52 = vld [vmem:[#allocation22 + $0x1ed0] sm:$0xff]  ;;  %v10414_v49 = vld [vmem:[#allocation22 + $0x1f08] sm:$0xff] }
0x115d   :  { %v10422_v56 = vld [vmem:[#allocation22 + $0x1f48] sm:$0xff]  ;;  %v10416_v38 = vld [vmem:[#allocation22 + $0x1f18] sm:$0xff]  ;;  %v9433_v11 = vld [vmem:[#allocation22 + $0x60] sm:$0xff] }
0x115f   :  { %14971 = vmatpush1.bf16.msra.mxu1 %v14970_v23  ;;  %15227 = vmatpush1.bf16.msra.mxu0 %v15226_v24  ;;  %v10376_v23 = vld [vmem:[#allocation22 + $0x1dd8] sm:$0xff]  ;;  %v14986_v24 = vpack.c.bf16 %v10357_v14, %v10349_v10  ;;  %v15254_v10 = vpack.c.bf16 %v10407_v52, %v10399_v62  ;;  %v10413_v14 = vld [vmem:[#allocation22 + $0x1f00] sm:$0xff] }
0x1160   :  { %14973 = vmatprep.subr.bf16.mxu1 %v14972_v18  ;;  %15229 = vmatprep.subr.bf16.mxu0 %v15228_v20  ;;  %v10373_v18 = vld [vmem:[#allocation22 + $0x1dc0] sm:$0xff]  ;;  %v14988_v20 = vpack.c.bf16 %v10374_v15, %v10366_v29  ;;  %v15244_v28 = vpack.c.bf16 %v10376_v23, %v10368_v42  ;;  %v10423_v29 = vld [vmem:[#allocation22 + $0x1f50] sm:$0xff]  ;;  %v10430_v15 = vld [vmem:[#allocation22 + $0x1f88] sm:$0xff] }
0x1161   :  { %v10438_v42 = vld [vmem:[#allocation22 + $0x1fc8] sm:$0xff]  ;;  %v10432_v23 = vld [vmem:[#allocation22 + $0x1f98] sm:$0xff] }
0x1163   :  { %14975 = vmatpush1.bf16.msra.mxu1 %v14974_v55  ;;  %15231 = vmatpush1.bf16.msra.mxu0 %v15230_v30  ;;  %v10392_v55 = vld [vmem:[#allocation22 + $0x1e58] sm:$0xff]  ;;  %v14990_v30 = vpack.c.bf16 %v10373_v18, %v10365_v26  ;;  %v15258_v26 = vpack.c.bf16 %v10423_v29, %v10415_v25  ;;  %v10429_v18 = vld [vmem:[#allocation22 + $0x1f80] sm:$0xff]  ;;  %v9459_v25 = vld [vmem:[#allocation22 + $0x130] sm:$0xff] }
0x1164   :  { %14977 = vmatprep.subr.bf16.mxu1 %v14976_v54  ;;  %15233 = vmatprep.subr.bf16.mxu0 %v15232_v2  ;;  %v10389_v54 = vld [vmem:[#allocation22 + $0x1e40] sm:$0xff]  ;;  %v14992_v2 = vpack.c.bf16 %v10390_v36, %v10382_v45  ;;  %v15248_v31 = vpack.c.bf16 %v10392_v55, %v10384_v6  ;;  %v10439_v45 = vld [vmem:[#allocation22 + $0x1fd0] sm:$0xff]  ;;  %v9426_v36 = vld [vmem:[#allocation22 + $0x28] sm:$0xff] }
0x1165   :  { %v9434_v6 = vld [vmem:[#allocation22 + $0x68] sm:$0xff]  ;;  %v9428_v55 = vld [vmem:[#allocation22 + $0x38] sm:$0xff] }
0x1167   :  { %14979 = vmatpush1.bf16.msra.mxu1 %v14978_v4  ;;  %15235 = vmatpush1.bf16.msra.mxu0 %v15234_v51  ;;  %v10408_v4 = vld [vmem:[#allocation22 + $0x1ed8] sm:$0xff]  ;;  %v14994_v51 = vpack.c.bf16 %v10389_v54, %v10381_v8  ;;  %v15262_v8 = vpack.c.bf16 %v10439_v45, %v10431_v61  ;;  %v15264_v54 = vpack.c.bf16 %v9434_v6, %v9426_v36  ;;  %v9483_v45 = vld [vmem:[#allocation22 + $0x1f0] sm:$0xff]  ;;  %v9490_v36 = vld [vmem:[#allocation22 + $0x228] sm:$0xff] }
0x1168   :  { %14981 = vmatprep.subr.bf16.mxu1 %v14980_v37  ;;  %15237 = vmatprep.subr.bf16.mxu0 %v15236_v58  ;;  %v10405_v37 = vld [vmem:[#allocation22 + $0x1ec0] sm:$0xff]  ;;  %v14996_v58 = vpack.c.bf16 %v10406_v17, %v10398_v63  ;;  %v15252_v35 = vpack.c.bf16 %v10408_v4, %v10400_v21  ;;  %v9435_v63 = vld [vmem:[#allocation22 + $0x70] sm:$0xff]  ;;  %v9442_v17 = vld [vmem:[#allocation22 + $0xa8] sm:$0xff] }
0x1169   :  { %v9450_v21 = vld [vmem:[#allocation22 + $0xe8] sm:$0xff]  ;;  %v9444_v4 = vld [vmem:[#allocation22 + $0xb8] sm:$0xff] }
0x116a   :  { %v15268_v62 = vpack.c.bf16 %v9450_v21, %v9442_v17  ;;  %v9498_v6 = vld [vmem:[#allocation22 + $0x268] sm:$0xff] }
0x116b   :  { %14983 = vmatpush1.bf16.msra.mxu1 %v14982_v47  ;;  %15239 = vmatpush1.bf16.msra.mxu0 %v15238_v46  ;;  %v10424_v47 = vld [vmem:[#allocation22 + $0x1f58] sm:$0xff]  ;;  %v14998_v46 = vpack.c.bf16 %v10405_v37, %v10397_v5  ;;  %v15522_v5 = vpack.c.bf16 %v9435_v63, %v9427_v41  ;;  %v9441_v37 = vld [vmem:[#allocation22 + $0xa0] sm:$0xff]  ;;  %v9499_v63 = vld [vmem:[#allocation22 + $0x270] sm:$0xff] }
0x116c   :  { %14985 = vmatprep.subr.bf16.mxu1 %v14984_v39  ;;  %15241 = vmatprep.subr.bf16.mxu0 %v15240_v1  ;;  %v10421_v39 = vld [vmem:[#allocation22 + $0x1f40] sm:$0xff]  ;;  %v15000_v1 = vpack.c.bf16 %v10422_v56, %v10414_v49  ;;  %v15256_v53 = vpack.c.bf16 %v10424_v47, %v10416_v38  ;;  %v9451_v49 = vld [vmem:[#allocation22 + $0xf0] sm:$0xff]  ;;  %v9458_v56 = vld [vmem:[#allocation22 + $0x128] sm:$0xff] }
0x116d   :  { %v9466_v38 = vld [vmem:[#allocation22 + $0x168] sm:$0xff]  ;;  %v9460_v47 = vld [vmem:[#allocation22 + $0x138] sm:$0xff] }
0x116e   :  { %v9506_v17 = vld [vmem:[#allocation22 + $0x2a8] sm:$0xff] }
0x116f   :  { %14987 = vmatpush1.bf16.msra.mxu1 %v14986_v24  ;;  %15243 = vmatpush1.bf16.msra.mxu0 %v15242_v50  ;;  %v10440_v24 = vld [vmem:[#allocation22 + $0x1fd8] sm:$0xff]  ;;  %v15002_v50 = vpack.c.bf16 %v10421_v39, %v10413_v14  ;;  %v15272_v39 = vpack.c.bf16 %v9466_v38, %v9458_v56  ;;  %v9514_v21 = vld [vmem:[#allocation22 + $0x2e8] sm:$0xff] }
0x1170   :  { %14989 = vmatprep.subr.bf16.mxu1 %v14988_v20  ;;  %15245 = vmatprep.subr.bf16.mxu0 %v15244_v28  ;;  %v10437_v20 = vld [vmem:[#allocation22 + $0x1fc0] sm:$0xff]  ;;  %v15004_v28 = vpack.c.bf16 %v10438_v42, %v10430_v15  ;;  %v15260_v9 = vpack.c.bf16 %v10440_v24, %v10432_v23  ;;  %v9467_v15 = vld [vmem:[#allocation22 + $0x170] sm:$0xff]  ;;  %v9474_v42 = vld [vmem:[#allocation22 + $0x1a8] sm:$0xff] }
0x1171   :  { %v9482_v23 = vld [vmem:[#allocation22 + $0x1e8] sm:$0xff]  ;;  %v9476_v24 = vld [vmem:[#allocation22 + $0x1b8] sm:$0xff] }
0x1172   :  { %v9522_v56 = vld [vmem:[#allocation22 + $0x328] sm:$0xff] }
0x1173   :  { %14991 = vmatpush1.bf16.msra.mxu1 %v14990_v30  ;;  %15247 = vmatpush1.bf16.msra.mxu0 %v15246_v22  ;;  %v9436_v30 = vld [vmem:[#allocation22 + $0x78] sm:$0xff]  ;;  %v15006_v22 = vpack.c.bf16 %v10437_v20, %v10429_v18  ;;  %v15530_v18 = vpack.c.bf16 %v9467_v15, %v9459_v25  ;;  %v15276_v20 = vpack.c.bf16 %v9482_v23, %v9474_v42  ;;  %v9530_v38 = vld [vmem:[#allocation22 + $0x368] sm:$0xff]  ;;  %v9523_v25 = vld [vmem:[#allocation22 + $0x330] sm:$0xff] }
0x1174   :  { %14993 = vmatprep.subr.bf16.mxu1 %v14992_v2  ;;  %15249 = vmatprep.subr.bf16.mxu0 %v15248_v31  ;;  %v15520_v2 = vpack.c.bf16 %v9436_v30, %v9428_v55  ;;  %v9425_v31 = vld [vmem:[#allocation22 + $0x20] sm:$0xff]  ;;  %v9492_v55 = vld [vmem:[#allocation22 + $0x238] sm:$0xff]  ;;  %v9531_v15 = vld [vmem:[#allocation22 + $0x370] sm:$0xff] }
0x1175   :  { %v9500_v30 = vld [vmem:[#allocation22 + $0x278] sm:$0xff]  ;;  %v9538_v42 = vld [vmem:[#allocation22 + $0x3a8] sm:$0xff] }
0x1176   :  { %v15536_v41 = vpack.c.bf16 %v9500_v30, %v9492_v55  ;;  %v9546_v23 = vld [vmem:[#allocation22 + $0x3e8] sm:$0xff]  ;;  %v9556_v55 = vld [vmem:[#allocation22 + $0x438] sm:$0xff] }
0x1177   :  { %14995 = vmatpush1.bf16.msra.mxu1 %v14994_v51  ;;  %15251 = vmatpush1.bf16.msra.mxu0 %v15250_v7  ;;  %v9452_v51 = vld [vmem:[#allocation22 + $0xf8] sm:$0xff]  ;;  %v15266_v7 = vpack.c.bf16 %v9433_v11, %v9425_v31  ;;  %v9497_v31 = vld [vmem:[#allocation22 + $0x260] sm:$0xff]  ;;  %v9491_v11 = vld [vmem:[#allocation22 + $0x230] sm:$0xff] }
0x1178   :  { %14997 = vmatprep.subr.bf16.mxu1 %v14996_v58  ;;  %15253 = vmatprep.subr.bf16.mxu0 %v15252_v35  ;;  %v9449_v58 = vld [vmem:[#allocation22 + $0xe0] sm:$0xff]  ;;  %v9443_v35 = vld [vmem:[#allocation22 + $0xb0] sm:$0xff]  ;;  %v15524_v52 = vpack.c.bf16 %v9452_v51, %v9444_v4  ;;  %v9508_v4 = vld [vmem:[#allocation22 + $0x2b8] sm:$0xff] }
0x1179   :  { %v15526_v14 = vpack.c.bf16 %v9451_v49, %v9443_v35  ;;  %v9516_v51 = vld [vmem:[#allocation22 + $0x2f8] sm:$0xff]  ;;  %v9513_v35 = vld [vmem:[#allocation22 + $0x2e0] sm:$0xff]  ;;  %v9515_v49 = vld [vmem:[#allocation22 + $0x2f0] sm:$0xff] }
0x117a   :  { %v9564_v30 = vld [vmem:[#allocation22 + $0x478] sm:$0xff] }
0x117b   :  { %14999 = vmatpush1.bf16.msra.mxu1 %v14998_v46  ;;  %15255 = vmatpush1.bf16.msra.mxu0 %v15254_v10  ;;  %v9468_v46 = vld [vmem:[#allocation22 + $0x178] sm:$0xff]  ;;  %v15270_v10 = vpack.c.bf16 %v9449_v58, %v9441_v37  ;;  %v15284_v37 = vpack.c.bf16 %v9514_v21, %v9506_v17  ;;  %v9505_v58 = vld [vmem:[#allocation22 + $0x2a0] sm:$0xff]  ;;  %v9570_v17 = vld [vmem:[#allocation22 + $0x4a8] sm:$0xff] }
0x117c   :  { %15001 = vmatprep.subr.bf16.mxu1 %v15000_v1  ;;  %15257 = vmatprep.subr.bf16.mxu0 %v15256_v53  ;;  %v9457_v1 = vld [vmem:[#allocation22 + $0x120] sm:$0xff]  ;;  %v15528_v29 = vpack.c.bf16 %v9468_v46, %v9460_v47  ;;  %v9524_v47 = vld [vmem:[#allocation22 + $0x338] sm:$0xff]  ;;  %v9578_v21 = vld [vmem:[#allocation22 + $0x4e8] sm:$0xff] }
0x117d   :  { %v9465_v53 = vld [vmem:[#allocation22 + $0x160] sm:$0xff]  ;;  %v9532_v46 = vld [vmem:[#allocation22 + $0x378] sm:$0xff] }
0x117f   :  { %15003 = vmatpush1.bf16.msra.mxu1 %v15002_v50  ;;  %15259 = vmatpush1.bf16.msra.mxu0 %v15258_v26  ;;  %v9484_v50 = vld [vmem:[#allocation22 + $0x1f8] sm:$0xff]  ;;  %v15274_v26 = vpack.c.bf16 %v9465_v53, %v9457_v1  ;;  %v9521_v1 = vld [vmem:[#allocation22 + $0x320] sm:$0xff] }
0x1180   :  { %15005 = vmatprep.subr.bf16.mxu1 %v15004_v28  ;;  %15261 = vmatprep.subr.bf16.mxu0 %v15260_v9  ;;  %v9481_v28 = vld [vmem:[#allocation22 + $0x1e0] sm:$0xff]  ;;  %v9475_v9 = vld [vmem:[#allocation22 + $0x1b0] sm:$0xff]  ;;  %v15532_v61 = vpack.c.bf16 %v9484_v50, %v9476_v24  ;;  %v9540_v24 = vld [vmem:[#allocation22 + $0x3b8] sm:$0xff] }
0x1181   :  { %v9529_v53 = vld [vmem:[#allocation22 + $0x360] sm:$0xff]  ;;  %v9548_v50 = vld [vmem:[#allocation22 + $0x3f8] sm:$0xff] }
0x1183   :  { %15007 = vmatpush1.bf16.msra.mxu1 %v15006_v22  ;;  %15263 = vmatpush1.bf16.msra.mxu0 %v15262_v8  ;;  %v15534_v8 = vpack.c.bf16 %v9483_v45, %v9475_v9  ;;  %v9539_v9 = vld [vmem:[#allocation22 + $0x3b0] sm:$0xff] }
0x1184   :  { %15265 = vmatprep.subr.bf16.mxu1 %v15264_v54  ;;  %15521 = vmatprep.subr.bf16.mxu0 %v15520_v2  ;;  %v15280_v54 = vpack.c.bf16 %v9498_v6, %v9490_v36  ;;  %v9489_v2 = vld [vmem:[#allocation22 + $0x220] sm:$0xff]  ;;  %v9547_v45 = vld [vmem:[#allocation22 + $0x3f0] sm:$0xff]  ;;  %v9554_v36 = vld [vmem:[#allocation22 + $0x428] sm:$0xff] }
0x1185   :  { %v9562_v6 = vld [vmem:[#allocation22 + $0x468] sm:$0xff] }
0x1186   :  { %10765 = vmatmul.mubr.f32.vlgmr.msra.gmra.mrb[86].mxu1 %v21343_v59  ;;  %11049 = vmatmul.mubr.f32.vlgmr.msra.gmra.mrb[126].mxu0 %v21343_v59 }
0x1187   :  { %15267 = vmatpush1.bf16.msra.mxu1 %v15266_v7  ;;  %11119 = vmatprep.mubr.f32.mxu1 %v21327_v34  ;;  %v15282_v7 = vpack.c.bf16 %v9497_v31, %v9489_v2  ;;  %v9553_v2 = vld [vmem:[#allocation22 + $0x420] sm:$0xff] }
0x1188   :  { %15523 = vmatpush1.bf16.msra.mxu0 %v15522_v5  ;;  %11403 = vmatprep.mubr.f32.mxu0 %v21327_v34  ;;  %v9473_v34 = vld [vmem:[#allocation22 + $0x1a0] sm:$0xff]  ;;  %v15538_v5 = vpack.c.bf16 %v9499_v63, %v9491_v11  ;;  %v9555_v11 = vld [vmem:[#allocation22 + $0x430] sm:$0xff] }
0x1189   :  { %15269 = vmatprep.subr.bf16.mxu1 %v15268_v62  ;;  %15525 = vmatprep.subr.bf16.mxu0 %v15524_v52  ;;  %v15278_v22 = vpack.c.bf16 %v9481_v28, %v9473_v34  ;;  %v9507_v62 = vld [vmem:[#allocation22 + $0x2b0] sm:$0xff]  ;;  %v15540_v52 = vpack.c.bf16 %v9516_v51, %v9508_v4  ;;  %v9537_v34 = vld [vmem:[#allocation22 + $0x3a0] sm:$0xff]  ;;  %v9572_v4 = vld [vmem:[#allocation22 + $0x4b8] sm:$0xff] }
0x118a   :  { %v9545_v28 = vld [vmem:[#allocation22 + $0x3e0] sm:$0xff]  ;;  %v9563_v63 = vld [vmem:[#allocation22 + $0x470] sm:$0xff]  ;;  %v9580_v51 = vld [vmem:[#allocation22 + $0x4f8] sm:$0xff] }
0x118b   :  { %15271 = vmatpush1.bf16.msra.mxu1 %v15270_v10  ;;  %v15286_v10 = vpack.c.bf16 %v9513_v35, %v9505_v58  ;;  %v9561_v31 = vld [vmem:[#allocation22 + $0x460] sm:$0xff] }
0x118c   :  { %15527 = vmatpush1.bf16.msra.mxu0 %v15526_v14  ;;  %15273 = vmatprep.subr.bf16.mxu1 %v15272_v39  ;;  %v15542_v14 = vpack.c.bf16 %v9515_v49, %v9507_v62  ;;  %v15288_v39 = vpack.c.bf16 %v9530_v38, %v9522_v56  ;;  %v9569_v58 = vld [vmem:[#allocation22 + $0x4a0] sm:$0xff]  ;;  %v9571_v62 = vld [vmem:[#allocation22 + $0x4b0] sm:$0xff]  ;;  %v9586_v56 = vld [vmem:[#allocation22 + $0x528] sm:$0xff] }
0x118d   :  { %15529 = vmatprep.subr.bf16.mxu0 %v15528_v29  ;;  %v15544_v29 = vpack.c.bf16 %v9532_v46, %v9524_v47  ;;  %v9577_v35 = vld [vmem:[#allocation22 + $0x4e0] sm:$0xff]  ;;  %v9579_v49 = vld [vmem:[#allocation22 + $0x4f0] sm:$0xff]  ;;  %v9594_v38 = vld [vmem:[#allocation22 + $0x568] sm:$0xff] }
0x118e   :  { %v9588_v47 = vld [vmem:[#allocation22 + $0x538] sm:$0xff] }
0x118f   :  { %15275 = vmatpush1.bf16.msra.mxu1 %v15274_v26  ;;  %v15290_v26 = vpack.c.bf16 %v9529_v53, %v9521_v1  ;;  %v9596_v46 = vld [vmem:[#allocation22 + $0x578] sm:$0xff]  ;;  %v9585_v1 = vld [vmem:[#allocation22 + $0x520] sm:$0xff] }
0x1190   :  { %15531 = vmatpush1.bf16.msra.mxu0 %v15530_v18  ;;  %15277 = vmatprep.subr.bf16.mxu1 %v15276_v20  ;;  %v15546_v18 = vpack.c.bf16 %v9531_v15, %v9523_v25  ;;  %v15292_v20 = vpack.c.bf16 %v9546_v23, %v9538_v42  ;;  %v9593_v53 = vld [vmem:[#allocation22 + $0x560] sm:$0xff]  ;;  %v9587_v25 = vld [vmem:[#allocation22 + $0x530] sm:$0xff]  ;;  %v9602_v42 = vld [vmem:[#allocation22 + $0x5a8] sm:$0xff] }
0x1191   :  { %15533 = vmatprep.subr.bf16.mxu0 %v15532_v61  ;;  %v15548_v61 = vpack.c.bf16 %v9548_v50, %v9540_v24  ;;  %v9595_v15 = vld [vmem:[#allocation22 + $0x570] sm:$0xff]  ;;  %v9610_v23 = vld [vmem:[#allocation22 + $0x5e8] sm:$0xff]  ;;  %v9604_v24 = vld [vmem:[#allocation22 + $0x5b8] sm:$0xff] }
0x1192   :  { %v9612_v50 = vld [vmem:[#allocation22 + $0x5f8] sm:$0xff] }
0x1193   :  { %15279 = vmatpush1.bf16.msra.mxu1 %v15278_v22  ;;  %v15294_v22 = vpack.c.bf16 %v9545_v28, %v9537_v34  ;;  %v9601_v34 = vld [vmem:[#allocation22 + $0x5a0] sm:$0xff] }
0x1194   :  { %15535 = vmatpush1.bf16.msra.mxu0 %v15534_v8  ;;  %15281 = vmatprep.subr.bf16.mxu1 %v15280_v54  ;;  %v15550_v8 = vpack.c.bf16 %v9547_v45, %v9539_v9  ;;  %v15296_v54 = vpack.c.bf16 %v9562_v6, %v9554_v36  ;;  %v9609_v28 = vld [vmem:[#allocation22 + $0x5e0] sm:$0xff]  ;;  %v9603_v9 = vld [vmem:[#allocation22 + $0x5b0] sm:$0xff]  ;;  %v9618_v36 = vld [vmem:[#allocation22 + $0x628] sm:$0xff] }
0x1195   :  { %15537 = vmatprep.subr.bf16.mxu0 %v15536_v41  ;;  %v15552_v41 = vpack.c.bf16 %v9564_v30, %v9556_v55  ;;  %v9611_v45 = vld [vmem:[#allocation22 + $0x5f0] sm:$0xff]  ;;  %v9626_v6 = vld [vmem:[#allocation22 + $0x668] sm:$0xff]  ;;  %v9620_v55 = vld [vmem:[#allocation22 + $0x638] sm:$0xff] }
0x1196   :  { %v9628_v30 = vld [vmem:[#allocation22 + $0x678] sm:$0xff] }
0x1197   :  { %15283 = vmatpush1.bf16.msra.mxu1 %v15282_v7  ;;  %v15298_v7 = vpack.c.bf16 %v9561_v31, %v9553_v2  ;;  %v9617_v2 = vld [vmem:[#allocation22 + $0x620] sm:$0xff] }
0x1198   :  { %15539 = vmatpush1.bf16.msra.mxu0 %v15538_v5  ;;  %15285 = vmatprep.subr.bf16.mxu1 %v15284_v37  ;;  %v15554_v5 = vpack.c.bf16 %v9563_v63, %v9555_v11  ;;  %v15300_v37 = vpack.c.bf16 %v9578_v21, %v9570_v17  ;;  %v9625_v31 = vld [vmem:[#allocation22 + $0x660] sm:$0xff]  ;;  %v9619_v11 = vld [vmem:[#allocation22 + $0x630] sm:$0xff]  ;;  %v9634_v17 = vld [vmem:[#allocation22 + $0x6a8] sm:$0xff] }
0x1199   :  { %15541 = vmatprep.subr.bf16.mxu0 %v15540_v52  ;;  %v15556_v52 = vpack.c.bf16 %v9580_v51, %v9572_v4  ;;  %v9627_v63 = vld [vmem:[#allocation22 + $0x670] sm:$0xff]  ;;  %v9642_v21 = vld [vmem:[#allocation22 + $0x6e8] sm:$0xff]  ;;  %v9636_v4 = vld [vmem:[#allocation22 + $0x6b8] sm:$0xff] }
0x119a   :  { %v9644_v51 = vld [vmem:[#allocation22 + $0x6f8] sm:$0xff] }
0x119b   :  { %15287 = vmatpush1.bf16.msra.mxu1 %v15286_v10  ;;  %v15302_v10 = vpack.c.bf16 %v9577_v35, %v9569_v58  ;;  %v9633_v58 = vld [vmem:[#allocation22 + $0x6a0] sm:$0xff] }
0x119c   :  { %15543 = vmatpush1.bf16.msra.mxu0 %v15542_v14  ;;  %15289 = vmatprep.subr.bf16.mxu1 %v15288_v39  ;;  %v15558_v14 = vpack.c.bf16 %v9579_v49, %v9571_v62  ;;  %v15304_v39 = vpack.c.bf16 %v9594_v38, %v9586_v56  ;;  %v9641_v35 = vld [vmem:[#allocation22 + $0x6e0] sm:$0xff]  ;;  %v9635_v62 = vld [vmem:[#allocation22 + $0x6b0] sm:$0xff]  ;;  %v9650_v56 = vld [vmem:[#allocation22 + $0x728] sm:$0xff] }
0x119d   :  { %15545 = vmatprep.subr.bf16.mxu0 %v15544_v29  ;;  %v15560_v29 = vpack.c.bf16 %v9596_v46, %v9588_v47  ;;  %v9643_v49 = vld [vmem:[#allocation22 + $0x6f0] sm:$0xff]  ;;  %v9658_v38 = vld [vmem:[#allocation22 + $0x768] sm:$0xff]  ;;  %v9652_v47 = vld [vmem:[#allocation22 + $0x738] sm:$0xff] }
0x119e   :  { %v9660_v46 = vld [vmem:[#allocation22 + $0x778] sm:$0xff] }
0x119f   :  { %15291 = vmatpush1.bf16.msra.mxu1 %v15290_v26  ;;  %v15306_v26 = vpack.c.bf16 %v9593_v53, %v9585_v1  ;;  %v9649_v1 = vld [vmem:[#allocation22 + $0x720] sm:$0xff] }
0x11a0   :  { %15547 = vmatpush1.bf16.msra.mxu0 %v15546_v18  ;;  %15293 = vmatprep.subr.bf16.mxu1 %v15292_v20  ;;  %v15562_v18 = vpack.c.bf16 %v9595_v15, %v9587_v25  ;;  %v15308_v20 = vpack.c.bf16 %v9610_v23, %v9602_v42  ;;  %v9657_v53 = vld [vmem:[#allocation22 + $0x760] sm:$0xff]  ;;  %v9651_v25 = vld [vmem:[#allocation22 + $0x730] sm:$0xff]  ;;  %v9666_v42 = vld [vmem:[#allocation22 + $0x7a8] sm:$0xff] }
0x11a1   :  { %15549 = vmatprep.subr.bf16.mxu0 %v15548_v61  ;;  %v15564_v61 = vpack.c.bf16 %v9612_v50, %v9604_v24  ;;  %v9659_v15 = vld [vmem:[#allocation22 + $0x770] sm:$0xff]  ;;  %v9674_v23 = vld [vmem:[#allocation22 + $0x7e8] sm:$0xff]  ;;  %v9668_v24 = vld [vmem:[#allocation22 + $0x7b8] sm:$0xff] }
0x11a2   :  { %v9676_v50 = vld [vmem:[#allocation22 + $0x7f8] sm:$0xff] }
0x11a3   :  { %15295 = vmatpush1.bf16.msra.mxu1 %v15294_v22  ;;  %v15310_v22 = vpack.c.bf16 %v9609_v28, %v9601_v34  ;;  %v9665_v34 = vld [vmem:[#allocation22 + $0x7a0] sm:$0xff] }
0x11a4   :  { %15551 = vmatpush1.bf16.msra.mxu0 %v15550_v8  ;;  %15297 = vmatprep.subr.bf16.mxu1 %v15296_v54  ;;  %v15566_v8 = vpack.c.bf16 %v9611_v45, %v9603_v9  ;;  %v15312_v54 = vpack.c.bf16 %v9626_v6, %v9618_v36  ;;  %v9673_v28 = vld [vmem:[#allocation22 + $0x7e0] sm:$0xff]  ;;  %v9667_v9 = vld [vmem:[#allocation22 + $0x7b0] sm:$0xff]  ;;  %v9682_v36 = vld [vmem:[#allocation22 + $0x828] sm:$0xff] }
0x11a5   :  { %15553 = vmatprep.subr.bf16.mxu0 %v15552_v41  ;;  %v15568_v41 = vpack.c.bf16 %v9628_v30, %v9620_v55  ;;  %v9675_v45 = vld [vmem:[#allocation22 + $0x7f0] sm:$0xff]  ;;  %v9690_v6 = vld [vmem:[#allocation22 + $0x868] sm:$0xff]  ;;  %v9684_v55 = vld [vmem:[#allocation22 + $0x838] sm:$0xff] }
0x11a6   :  { %v9692_v30 = vld [vmem:[#allocation22 + $0x878] sm:$0xff] }
0x11a7   :  { %15299 = vmatpush1.bf16.msra.mxu1 %v15298_v7  ;;  %v15314_v7 = vpack.c.bf16 %v9625_v31, %v9617_v2  ;;  %v9681_v2 = vld [vmem:[#allocation22 + $0x820] sm:$0xff] }
0x11a8   :  { %15555 = vmatpush1.bf16.msra.mxu0 %v15554_v5  ;;  %15301 = vmatprep.subr.bf16.mxu1 %v15300_v37  ;;  %v15570_v5 = vpack.c.bf16 %v9627_v63, %v9619_v11  ;;  %v15316_v37 = vpack.c.bf16 %v9642_v21, %v9634_v17  ;;  %v9689_v31 = vld [vmem:[#allocation22 + $0x860] sm:$0xff]  ;;  %v15584_v11 = vpack.c.bf16 %v9692_v30, %v9684_v55  ;;  %v9691_v63 = vld [vmem:[#allocation22 + $0x870] sm:$0xff]  ;;  %v9698_v17 = vld [vmem:[#allocation22 + $0x8a8] sm:$0xff] }
0x11a9   :  { %15557 = vmatprep.subr.bf16.mxu0 %v15556_v52  ;;  %v15572_v52 = vpack.c.bf16 %v9644_v51, %v9636_v4  ;;  %v9706_v21 = vld [vmem:[#allocation22 + $0x8e8] sm:$0xff]  ;;  %v15330_v4 = vpack.c.bf16 %v9689_v31, %v9681_v2  ;;  %v9700_v51 = vld [vmem:[#allocation22 + $0x8b8] sm:$0xff]  ;;  %v9747_v2 = vld [vmem:[#allocation22 + $0xa30] sm:$0xff] }
0x11ab   :  { %15303 = vmatpush1.bf16.msra.mxu1 %v15302_v10  ;;  %v15318_v10 = vpack.c.bf16 %v9641_v35, %v9633_v58  ;;  %v9705_v58 = vld [vmem:[#allocation22 + $0x8e0] sm:$0xff]  ;;  %v9699_v35 = vld [vmem:[#allocation22 + $0x8b0] sm:$0xff] }
0x11ac   :  { %15559 = vmatpush1.bf16.msra.mxu0 %v15558_v14  ;;  %15305 = vmatprep.subr.bf16.mxu1 %v15304_v39  ;;  %v15574_v14 = vpack.c.bf16 %v9643_v49, %v9635_v62  ;;  %v15320_v39 = vpack.c.bf16 %v9658_v38, %v9650_v56  ;;  %v15332_v62 = vpack.c.bf16 %v9706_v21, %v9698_v17  ;;  %v9714_v49 = vld [vmem:[#allocation22 + $0x928] sm:$0xff]  ;;  %v9764_v17 = vld [vmem:[#allocation22 + $0xab8] sm:$0xff] }
0x11ad   :  { %15561 = vmatprep.subr.bf16.mxu0 %v15560_v29  ;;  %v15576_v29 = vpack.c.bf16 %v9660_v46, %v9652_v47  ;;  %v9722_v56 = vld [vmem:[#allocation22 + $0x968] sm:$0xff]  ;;  %v9716_v47 = vld [vmem:[#allocation22 + $0x938] sm:$0xff] }
0x11ae   :  { %v9724_v46 = vld [vmem:[#allocation22 + $0x978] sm:$0xff] }
0x11af   :  { %15307 = vmatpush1.bf16.msra.mxu1 %v15306_v26  ;;  %v15322_v26 = vpack.c.bf16 %v9657_v53, %v9649_v1  ;;  %v9713_v1 = vld [vmem:[#allocation22 + $0x920] sm:$0xff]  ;;  %v9772_v21 = vld [vmem:[#allocation22 + $0xaf8] sm:$0xff] }
0x11b0   :  { %15563 = vmatpush1.bf16.msra.mxu0 %v15562_v18  ;;  %15309 = vmatprep.subr.bf16.mxu1 %v15308_v20  ;;  %v15578_v18 = vpack.c.bf16 %v9659_v15, %v9651_v25  ;;  %v15324_v20 = vpack.c.bf16 %v9674_v23, %v9666_v42  ;;  %v9721_v53 = vld [vmem:[#allocation22 + $0x960] sm:$0xff]  ;;  %v9715_v25 = vld [vmem:[#allocation22 + $0x930] sm:$0xff]  ;;  %v9730_v42 = vld [vmem:[#allocation22 + $0x9a8] sm:$0xff] }
0x11b1   :  { %15565 = vmatprep.subr.bf16.mxu0 %v15564_v61  ;;  %v15580_v61 = vpack.c.bf16 %v9676_v50, %v9668_v24  ;;  %v9723_v15 = vld [vmem:[#allocation22 + $0x970] sm:$0xff]  ;;  %v9738_v23 = vld [vmem:[#allocation22 + $0x9e8] sm:$0xff]  ;;  %v9732_v24 = vld [vmem:[#allocation22 + $0x9b8] sm:$0xff]  ;;  %v15338_v50 = vpack.c.bf16 %v9721_v53, %v9713_v1 }
0x11b2   :  { %v9779_v1 = vld [vmem:[#allocation22 + $0xb30] sm:$0xff] }
0x11b3   :  { %15311 = vmatpush1.bf16.msra.mxu1 %v15310_v22  ;;  %v15326_v22 = vpack.c.bf16 %v9673_v28, %v9665_v34  ;;  %v9737_v34 = vld [vmem:[#allocation22 + $0x9e0] sm:$0xff]  ;;  %v9731_v28 = vld [vmem:[#allocation22 + $0x9b0] sm:$0xff] }
0x11b4   :  { %15567 = vmatpush1.bf16.msra.mxu0 %v15566_v8  ;;  %15313 = vmatprep.subr.bf16.mxu1 %v15312_v54  ;;  %v15582_v8 = vpack.c.bf16 %v9675_v45, %v9667_v9  ;;  %v15328_v54 = vpack.c.bf16 %v9690_v6, %v9682_v36  ;;  %v9754_v45 = vld [vmem:[#allocation22 + $0xa68] sm:$0xff]  ;;  %v9748_v36 = vld [vmem:[#allocation22 + $0xa38] sm:$0xff] }
0x11b5   :  { %15569 = vmatprep.subr.bf16.mxu0 %v15568_v41  ;;  %v9683_v41 = vld [vmem:[#allocation22 + $0x830] sm:$0xff]  ;;  %v9756_v6 = vld [vmem:[#allocation22 + $0xa78] sm:$0xff] }
0x11b6   :  { %v15600_v31 = vpack.c.bf16 %v9756_v6, %v9748_v36 }
0x11b7   :  { %15315 = vmatpush1.bf16.msra.mxu1 %v15314_v7  ;;  %v9708_v7 = vld [vmem:[#allocation22 + $0x8f8] sm:$0xff] }
0x11b8   :  { %15571 = vmatpush1.bf16.msra.mxu0 %v15570_v5  ;;  %15317 = vmatprep.subr.bf16.mxu1 %v15316_v37  ;;  %v15586_v5 = vpack.c.bf16 %v9691_v63, %v9683_v41  ;;  %v9697_v37 = vld [vmem:[#allocation22 + $0x8a0] sm:$0xff]  ;;  %v15588_v38 = vpack.c.bf16 %v9708_v7, %v9700_v51  ;;  %v9762_v41 = vld [vmem:[#allocation22 + $0xaa8] sm:$0xff] }
0x11b9   :  { %15573 = vmatprep.subr.bf16.mxu0 %v15572_v52  ;;  %v9707_v52 = vld [vmem:[#allocation22 + $0x8f0] sm:$0xff]  ;;  %v9770_v63 = vld [vmem:[#allocation22 + $0xae8] sm:$0xff] }
0x11ba   :  { %v15348_v7 = vpack.c.bf16 %v9770_v63, %v9762_v41  ;;  %v9828_v41 = vld [vmem:[#allocation22 + $0xcb8] sm:$0xff] }
0x11bb   :  { %15319 = vmatpush1.bf16.msra.mxu1 %v15318_v10  ;;  %v15334_v10 = vpack.c.bf16 %v9705_v58, %v9697_v37  ;;  %v9769_v37 = vld [vmem:[#allocation22 + $0xae0] sm:$0xff]  ;;  %v9763_v58 = vld [vmem:[#allocation22 + $0xab0] sm:$0xff]  ;;  %v9836_v63 = vld [vmem:[#allocation22 + $0xcf8] sm:$0xff] }
0x11bc   :  { %15575 = vmatpush1.bf16.msra.mxu0 %v15574_v14  ;;  %15321 = vmatprep.subr.bf16.mxu1 %v15320_v39  ;;  %v15590_v14 = vpack.c.bf16 %v9707_v52, %v9699_v35  ;;  %v15336_v39 = vpack.c.bf16 %v9722_v56, %v9714_v49  ;;  %v15604_v35 = vpack.c.bf16 %v9772_v21, %v9764_v17  ;;  %v9778_v52 = vld [vmem:[#allocation22 + $0xb28] sm:$0xff]  ;;  %v9780_v56 = vld [vmem:[#allocation22 + $0xb38] sm:$0xff] }
0x11bd   :  { %15577 = vmatprep.subr.bf16.mxu0 %v15576_v29  ;;  %v15592_v29 = vpack.c.bf16 %v9724_v46, %v9716_v47  ;;  %v9786_v49 = vld [vmem:[#allocation22 + $0xb68] sm:$0xff] }
0x11bf   :  { %15323 = vmatpush1.bf16.msra.mxu1 %v15322_v26  ;;  %v15594_v26 = vpack.c.bf16 %v9723_v15, %v9715_v25  ;;  %v9787_v25 = vld [vmem:[#allocation22 + $0xb70] sm:$0xff]  ;;  %v9802_v15 = vld [vmem:[#allocation22 + $0xbe8] sm:$0xff] }
0x11c0   :  { %15579 = vmatpush1.bf16.msra.mxu0 %v15578_v18  ;;  %15325 = vmatprep.subr.bf16.mxu1 %v15324_v20  ;;  %v15340_v18 = vpack.c.bf16 %v9738_v23, %v9730_v42  ;;  %v9729_v20 = vld [vmem:[#allocation22 + $0x9a0] sm:$0xff]  ;;  %v9796_v42 = vld [vmem:[#allocation22 + $0xbb8] sm:$0xff] }
0x11c1   :  { %15581 = vmatprep.subr.bf16.mxu0 %v15580_v61  ;;  %v9746_v61 = vld [vmem:[#allocation22 + $0xa28] sm:$0xff]  ;;  %v15342_v55 = vpack.c.bf16 %v9737_v34, %v9729_v20  ;;  %v9804_v23 = vld [vmem:[#allocation22 + $0xbf8] sm:$0xff]  ;;  %v9795_v20 = vld [vmem:[#allocation22 + $0xbb0] sm:$0xff] }
0x11c2   :  { %v15612_v34 = vpack.c.bf16 %v9804_v23, %v9796_v42 }
0x11c3   :  { %15327 = vmatpush1.bf16.msra.mxu1 %v15326_v22  ;;  %v15344_v22 = vpack.c.bf16 %v9754_v45, %v9746_v61  ;;  %v9812_v61 = vld [vmem:[#allocation22 + $0xc38] sm:$0xff] }
0x11c4   :  { %15583 = vmatpush1.bf16.msra.mxu0 %v15582_v8  ;;  %15329 = vmatprep.subr.bf16.mxu1 %v15328_v54  ;;  %v9745_v8 = vld [vmem:[#allocation22 + $0xa20] sm:$0xff]  ;;  %v9820_v45 = vld [vmem:[#allocation22 + $0xc78] sm:$0xff] }
0x11c5   :  { %15585 = vmatprep.subr.bf16.mxu0 %v15584_v11  ;;  %v9753_v54 = vld [vmem:[#allocation22 + $0xa60] sm:$0xff]  ;;  %v9755_v11 = vld [vmem:[#allocation22 + $0xa70] sm:$0xff] }
0x11c6   :  { %11120 = vmatmul.mubr.f32.vlgmr.msra.gmra.mrb[88].mxu1 %v21325_v60  ;;  %v15602_v51 = vpack.c.bf16 %v9755_v11, %v9747_v2  ;;  %v9819_v2 = vld [vmem:[#allocation22 + $0xc70] sm:$0xff]  ;;  %v9834_v11 = vld [vmem:[#allocation22 + $0xce8] sm:$0xff] }
0x11c7   :  { %11404 = vmatmul.mubr.f32.vlgmr.msra.gmra.mrb[128].mxu0 %v21325_v60  ;;  %15331 = vmatpush1.bf16.msra.mxu1 %v15330_v4  ;;  %v9740_v60 = vld [vmem:[#allocation22 + $0x9f8] sm:$0xff]  ;;  %v15346_v4 = vpack.c.bf16 %v9753_v54, %v9745_v8  ;;  %v9811_v8 = vld [vmem:[#allocation22 + $0xc30] sm:$0xff]  ;;  %v15616_v54 = vpack.c.bf16 %v9820_v45, %v9812_v61 }
0x11c8   :  { %11190 = vmatprep.mubr.f32.mxu1 %v21335_v33  ;;  %15587 = vmatpush1.bf16.msra.mxu0 %v15586_v5  ;;  %v15596_v9 = vpack.c.bf16 %v9740_v60, %v9732_v24  ;;  %v9761_v5 = vld [vmem:[#allocation22 + $0xaa0] sm:$0xff]  ;;  %v15610_v60 = vpack.c.bf16 %v9787_v25, %v9779_v1  ;;  %v15618_v21 = vpack.c.bf16 %v9819_v2, %v9811_v8  ;;  %v9851_v1 = vld [vmem:[#allocation22 + $0xd70] sm:$0xff]  ;;  %v9866_v25 = vld [vmem:[#allocation22 + $0xde8] sm:$0xff] }
0x11c9   :  { %11474 = vmatprep.mubr.f32.mxu0 %v21335_v33  ;;  %15333 = vmatprep.subr.bf16.mxu1 %v15332_v62  ;;  %v9739_v33 = vld [vmem:[#allocation22 + $0x9f0] sm:$0xff]  ;;  %v15350_v47 = vpack.c.bf16 %v9769_v37, %v9761_v5  ;;  %v15620_v37 = vpack.c.bf16 %v9836_v63, %v9828_v41  ;;  %v9898_v2 = vld [vmem:[#allocation22 + $0xee8] sm:$0xff] }
0x11ca   :  { %15589 = vmatprep.subr.bf16.mxu0 %v15588_v38  ;;  %v15598_v30 = vpack.c.bf16 %v9739_v33, %v9731_v28  ;;  %v9771_v62 = vld [vmem:[#allocation22 + $0xaf0] sm:$0xff]  ;;  %v9788_v38 = vld [vmem:[#allocation22 + $0xb78] sm:$0xff]  ;;  %v9818_v33 = vld [vmem:[#allocation22 + $0xc68] sm:$0xff] }
0x11cb   :  { %15335 = vmatpush1.bf16.msra.mxu1 %v15334_v10  ;;  %v15606_v46 = vpack.c.bf16 %v9771_v62, %v9763_v58  ;;  %v15352_v10 = vpack.c.bf16 %v9786_v49, %v9778_v52  ;;  %v15608_v53 = vpack.c.bf16 %v9788_v38, %v9780_v56  ;;  %v9803_v28 = vld [vmem:[#allocation22 + $0xbf0] sm:$0xff]  ;;  %v9850_v62 = vld [vmem:[#allocation22 + $0xd68] sm:$0xff]  ;;  %v9844_v52 = vld [vmem:[#allocation22 + $0xd38] sm:$0xff] }
0x11cc   :  { %15591 = vmatpush1.bf16.msra.mxu0 %v15590_v14  ;;  %15337 = vmatprep.subr.bf16.mxu1 %v15336_v39  ;;  %v9777_v14 = vld [vmem:[#allocation22 + $0xb20] sm:$0xff]  ;;  %v15614_v6 = vpack.c.bf16 %v9803_v28, %v9795_v20  ;;  %v9827_v5 = vld [vmem:[#allocation22 + $0xcb0] sm:$0xff]  ;;  %v9852_v49 = vld [vmem:[#allocation22 + $0xd78] sm:$0xff] }
0x11cd   :  { %15593 = vmatprep.subr.bf16.mxu0 %v15592_v29  ;;  %v9785_v39 = vld [vmem:[#allocation22 + $0xb60] sm:$0xff]  ;;  %v9794_v29 = vld [vmem:[#allocation22 + $0xba8] sm:$0xff]  ;;  %v9835_v58 = vld [vmem:[#allocation22 + $0xcf0] sm:$0xff] }
0x11ce   :  { %v15354_v24 = vpack.c.bf16 %v9785_v39, %v9777_v14  ;;  %v15622_v38 = vpack.c.bf16 %v9835_v58, %v9827_v5  ;;  %v9843_v14 = vld [vmem:[#allocation22 + $0xd30] sm:$0xff]  ;;  %v15624_v39 = vpack.c.bf16 %v9852_v49, %v9844_v52  ;;  %v9882_v28 = vld [vmem:[#allocation22 + $0xe68] sm:$0xff] }
0x11cf   :  { %15339 = vmatpush1.bf16.msra.mxu1 %v15338_v50  ;;  %v15356_v50 = vpack.c.bf16 %v9802_v15, %v9794_v29  ;;  %v9860_v29 = vld [vmem:[#allocation22 + $0xdb8] sm:$0xff]  ;;  %v15626_v23 = vpack.c.bf16 %v9851_v1, %v9843_v14  ;;  %v9867_v20 = vld [vmem:[#allocation22 + $0xdf0] sm:$0xff]  ;;  %v9914_v58 = vld [vmem:[#allocation22 + $0xf68] sm:$0xff] }
0x11d0   :  { %15595 = vmatpush1.bf16.msra.mxu0 %v15594_v26  ;;  %15341 = vmatprep.subr.bf16.mxu1 %v15340_v18  ;;  %v9793_v26 = vld [vmem:[#allocation22 + $0xba0] sm:$0xff]  ;;  %v9868_v15 = vld [vmem:[#allocation22 + $0xdf8] sm:$0xff]  ;;  %v9883_v8 = vld [vmem:[#allocation22 + $0xe70] sm:$0xff] }
0x11d1   :  { %15597 = vmatprep.subr.bf16.mxu0 %v15596_v9  ;;  %v9801_v18 = vld [vmem:[#allocation22 + $0xbe0] sm:$0xff]  ;;  %v9810_v9 = vld [vmem:[#allocation22 + $0xc28] sm:$0xff]  ;;  %v9899_v5 = vld [vmem:[#allocation22 + $0xef0] sm:$0xff] }
0x11d2   :  { %v15358_v36 = vpack.c.bf16 %v9801_v18, %v9793_v26  ;;  %v9859_v26 = vld [vmem:[#allocation22 + $0xdb0] sm:$0xff]  ;;  %v15628_v18 = vpack.c.bf16 %v9868_v15, %v9860_v29  ;;  %v9930_v1 = vld [vmem:[#allocation22 + $0xfe8] sm:$0xff] }
0x11d3   :  { %15343 = vmatpush1.bf16.msra.mxu1 %v15342_v55  ;;  %v15360_v55 = vpack.c.bf16 %v9818_v33, %v9810_v9  ;;  %v9876_v9 = vld [vmem:[#allocation22 + $0xe38] sm:$0xff]  ;;  %v15630_v45 = vpack.c.bf16 %v9867_v20, %v9859_v26  ;;  %v9915_v14 = vld [vmem:[#allocation22 + $0xf70] sm:$0xff]  ;;  %v9946_v20 = vld [vmem:[#allocation22 + $0x1068] sm:$0xff] }
0x11d4   :  { %15599 = vmatpush1.bf16.msra.mxu0 %v15598_v30  ;;  %15345 = vmatprep.subr.bf16.mxu1 %v15344_v22  ;;  %v9809_v30 = vld [vmem:[#allocation22 + $0xc20] sm:$0xff]  ;;  %v9884_v33 = vld [vmem:[#allocation22 + $0xe78] sm:$0xff]  ;;  %v9931_v26 = vld [vmem:[#allocation22 + $0xff0] sm:$0xff] }
0x11d5   :  { %15601 = vmatprep.subr.bf16.mxu0 %v15600_v31  ;;  %v9817_v22 = vld [vmem:[#allocation22 + $0xc60] sm:$0xff]  ;;  %v9826_v31 = vld [vmem:[#allocation22 + $0xca8] sm:$0xff] }
0x11d6   :  { %v15362_v17 = vpack.c.bf16 %v9817_v22, %v9809_v30  ;;  %v9875_v30 = vld [vmem:[#allocation22 + $0xe30] sm:$0xff]  ;;  %v15632_v22 = vpack.c.bf16 %v9884_v33, %v9876_v9 }
0x11d7   :  { %15347 = vmatpush1.bf16.msra.mxu1 %v15346_v4  ;;  %v15364_v4 = vpack.c.bf16 %v9834_v11, %v9826_v31  ;;  %v9892_v31 = vld [vmem:[#allocation22 + $0xeb8] sm:$0xff]  ;;  %v15634_v63 = vpack.c.bf16 %v9883_v8, %v9875_v30  ;;  %v9947_v30 = vld [vmem:[#allocation22 + $0x1070] sm:$0xff]  ;;  %v9962_v8 = vld [vmem:[#allocation22 + $0x10e8] sm:$0xff] }
0x11d8   :  { %15603 = vmatpush1.bf16.msra.mxu0 %v15602_v51  ;;  %15349 = vmatprep.subr.bf16.mxu1 %v15348_v7  ;;  %v9825_v51 = vld [vmem:[#allocation22 + $0xca0] sm:$0xff]  ;;  %v9900_v11 = vld [vmem:[#allocation22 + $0xef8] sm:$0xff] }
0x11d9   :  { %15605 = vmatprep.subr.bf16.mxu0 %v15604_v35  ;;  %v9833_v7 = vld [vmem:[#allocation22 + $0xce0] sm:$0xff]  ;;  %v9842_v35 = vld [vmem:[#allocation22 + $0xd28] sm:$0xff] }
0x11da   :  { %v15366_v56 = vpack.c.bf16 %v9833_v7, %v9825_v51  ;;  %v9891_v51 = vld [vmem:[#allocation22 + $0xeb0] sm:$0xff]  ;;  %v15636_v7 = vpack.c.bf16 %v9900_v11, %v9892_v31  ;;  %v9964_v31 = vld [vmem:[#allocation22 + $0x10f8] sm:$0xff] }
0x11db   :  { %15351 = vmatpush1.bf16.msra.mxu1 %v15350_v47  ;;  %v15368_v47 = vpack.c.bf16 %v9850_v62, %v9842_v35  ;;  %v9908_v35 = vld [vmem:[#allocation22 + $0xf38] sm:$0xff]  ;;  %v15638_v49 = vpack.c.bf16 %v9899_v5, %v9891_v51  ;;  %v9970_v51 = vld [vmem:[#allocation22 + $0x1128] sm:$0xff] }
0x11dc   :  { %15607 = vmatpush1.bf16.msra.mxu0 %v15606_v46  ;;  %15353 = vmatprep.subr.bf16.mxu1 %v15352_v10  ;;  %v9841_v46 = vld [vmem:[#allocation22 + $0xd20] sm:$0xff]  ;;  %v9916_v62 = vld [vmem:[#allocation22 + $0xf78] sm:$0xff] }
0x11dd   :  { %15609 = vmatprep.subr.bf16.mxu0 %v15608_v53  ;;  %v9849_v10 = vld [vmem:[#allocation22 + $0xd60] sm:$0xff]  ;;  %v9858_v53 = vld [vmem:[#allocation22 + $0xda8] sm:$0xff] }
0x11de   :  { %v15370_v42 = vpack.c.bf16 %v9849_v10, %v9841_v46  ;;  %v9907_v46 = vld [vmem:[#allocation22 + $0xf30] sm:$0xff]  ;;  %v15640_v10 = vpack.c.bf16 %v9916_v62, %v9908_v35 }
0x11df   :  { %15355 = vmatpush1.bf16.msra.mxu1 %v15354_v24  ;;  %v15372_v24 = vpack.c.bf16 %v9866_v25, %v9858_v53  ;;  %v9924_v53 = vld [vmem:[#allocation22 + $0xfb8] sm:$0xff]  ;;  %v15642_v15 = vpack.c.bf16 %v9915_v14, %v9907_v46  ;;  %v9979_v46 = vld [vmem:[#allocation22 + $0x1170] sm:$0xff]  ;;  %v9994_v14 = vld [vmem:[#allocation22 + $0x11e8] sm:$0xff] }
0x11e0   :  { %15611 = vmatpush1.bf16.msra.mxu0 %v15610_v60  ;;  %15357 = vmatprep.subr.bf16.mxu1 %v15356_v50  ;;  %v9857_v60 = vld [vmem:[#allocation22 + $0xda0] sm:$0xff]  ;;  %v9932_v25 = vld [vmem:[#allocation22 + $0xff8] sm:$0xff] }
0x11e1   :  { %15613 = vmatprep.subr.bf16.mxu0 %v15612_v34  ;;  %v9865_v50 = vld [vmem:[#allocation22 + $0xde0] sm:$0xff]  ;;  %v9874_v34 = vld [vmem:[#allocation22 + $0xe28] sm:$0xff] }
0x11e2   :  { %v15374_v61 = vpack.c.bf16 %v9865_v50, %v9857_v60  ;;  %v9923_v60 = vld [vmem:[#allocation22 + $0xfb0] sm:$0xff]  ;;  %v15644_v50 = vpack.c.bf16 %v9932_v25, %v9924_v53 }
0x11e3   :  { %15359 = vmatpush1.bf16.msra.mxu1 %v15358_v36  ;;  %v15376_v36 = vpack.c.bf16 %v9882_v28, %v9874_v34  ;;  %v9940_v34 = vld [vmem:[#allocation22 + $0x1038] sm:$0xff]  ;;  %v15646_v33 = vpack.c.bf16 %v9931_v26, %v9923_v60  ;;  %v10010_v60 = vld [vmem:[#allocation22 + $0x1268] sm:$0xff] }
0x11e4   :  { %15615 = vmatpush1.bf16.msra.mxu0 %v15614_v6  ;;  %15361 = vmatprep.subr.bf16.mxu1 %v15360_v55  ;;  %v9873_v6 = vld [vmem:[#allocation22 + $0xe20] sm:$0xff]  ;;  %v9948_v28 = vld [vmem:[#allocation22 + $0x1078] sm:$0xff] }
0x11e5   :  { %15617 = vmatprep.subr.bf16.mxu0 %v15616_v54  ;;  %v9881_v55 = vld [vmem:[#allocation22 + $0xe60] sm:$0xff]  ;;  %v9890_v54 = vld [vmem:[#allocation22 + $0xea8] sm:$0xff]  ;;  %v10012_v26 = vld [vmem:[#allocation22 + $0x1278] sm:$0xff] }
0x11e6   :  { %v15378_v41 = vpack.c.bf16 %v9881_v55, %v9873_v6  ;;  %v15648_v6 = vpack.c.bf16 %v9948_v28, %v9940_v34  ;;  %v9939_v55 = vld [vmem:[#allocation22 + $0x1030] sm:$0xff]  ;;  %v10001_v28 = vld [vmem:[#allocation22 + $0x1220] sm:$0xff] }
0x11e7   :  { %15363 = vmatpush1.bf16.msra.mxu1 %v15362_v17  ;;  %v15380_v17 = vpack.c.bf16 %v9898_v2, %v9890_v54  ;;  %v9956_v2 = vld [vmem:[#allocation22 + $0x10b8] sm:$0xff]  ;;  %v15650_v11 = vpack.c.bf16 %v9947_v30, %v9939_v55 }
0x11e8   :  { %15619 = vmatpush1.bf16.msra.mxu0 %v15618_v21  ;;  %15365 = vmatprep.subr.bf16.mxu1 %v15364_v4  ;;  %v9889_v21 = vld [vmem:[#allocation22 + $0xea0] sm:$0xff]  ;;  %v15652_v5 = vpack.c.bf16 %v9964_v31, %v9956_v2  ;;  %v10020_v55 = vld [vmem:[#allocation22 + $0x12b8] sm:$0xff] }
0x11e9   :  { %15621 = vmatprep.subr.bf16.mxu0 %v15620_v37  ;;  %v9897_v4 = vld [vmem:[#allocation22 + $0xee0] sm:$0xff]  ;;  %v9906_v37 = vld [vmem:[#allocation22 + $0xf28] sm:$0xff]  ;;  %v10028_v30 = vld [vmem:[#allocation22 + $0x12f8] sm:$0xff] }
0x11ea   :  { %v15382_v52 = vpack.c.bf16 %v9897_v4, %v9889_v21  ;;  %v9963_v4 = vld [vmem:[#allocation22 + $0x10f0] sm:$0xff]  ;;  %v10017_v2 = vld [vmem:[#allocation22 + $0x12a0] sm:$0xff] }
0x11eb   :  { %15367 = vmatpush1.bf16.msra.mxu1 %v15366_v56  ;;  %v15384_v56 = vpack.c.bf16 %v9914_v58, %v9906_v37  ;;  %v9972_v37 = vld [vmem:[#allocation22 + $0x1138] sm:$0xff]  ;;  %v10025_v31 = vld [vmem:[#allocation22 + $0x12e0] sm:$0xff] }
0x11ec   :  { %15623 = vmatpush1.bf16.msra.mxu0 %v15622_v38  ;;  %15369 = vmatprep.subr.bf16.mxu1 %v15368_v47  ;;  %v9905_v38 = vld [vmem:[#allocation22 + $0xf20] sm:$0xff]  ;;  %v9980_v58 = vld [vmem:[#allocation22 + $0x1178] sm:$0xff] }
0x11ed   :  { %15625 = vmatprep.subr.bf16.mxu0 %v15624_v39  ;;  %v9913_v47 = vld [vmem:[#allocation22 + $0xf60] sm:$0xff]  ;;  %v9922_v39 = vld [vmem:[#allocation22 + $0xfa8] sm:$0xff] }
0x11ee   :  { %v15386_v29 = vpack.c.bf16 %v9913_v47, %v9905_v38  ;;  %v9971_v38 = vld [vmem:[#allocation22 + $0x1130] sm:$0xff]  ;;  %v15656_v47 = vpack.c.bf16 %v9980_v58, %v9972_v37  ;;  %v10033_v58 = vld [vmem:[#allocation22 + $0x1320] sm:$0xff] }
0x11ef   :  { %15371 = vmatpush1.bf16.msra.mxu1 %v15370_v42  ;;  %v15388_v42 = vpack.c.bf16 %v9930_v1, %v9922_v39  ;;  %v9988_v39 = vld [vmem:[#allocation22 + $0x11b8] sm:$0xff]  ;;  %v15658_v53 = vpack.c.bf16 %v9979_v46, %v9971_v38  ;;  %v10058_v38 = vld [vmem:[#allocation22 + $0x13e8] sm:$0xff] }
0x11f0   :  { %15627 = vmatpush1.bf16.msra.mxu0 %v15626_v23  ;;  %15373 = vmatprep.subr.bf16.mxu1 %v15372_v24  ;;  %v9921_v23 = vld [vmem:[#allocation22 + $0xfa0] sm:$0xff]  ;;  %v10060_v46 = vld [vmem:[#allocation22 + $0x13f8] sm:$0xff] }
0x11f1   :  { %15629 = vmatprep.subr.bf16.mxu0 %v15628_v18  ;;  %v9929_v24 = vld [vmem:[#allocation22 + $0xfe0] sm:$0xff]  ;;  %v9938_v18 = vld [vmem:[#allocation22 + $0x1028] sm:$0xff] }
0x11f2   :  { %v15390_v9 = vpack.c.bf16 %v9929_v24, %v9921_v23  ;;  %v10002_v24 = vld [vmem:[#allocation22 + $0x1228] sm:$0xff] }
0x11f3   :  { %15375 = vmatpush1.bf16.msra.mxu1 %v15374_v61  ;;  %v15392_v61 = vpack.c.bf16 %v9946_v20, %v9938_v18  ;;  %v15408_v34 = vpack.c.bf16 %v10010_v60, %v10002_v24 }
0x11f4   :  { %15631 = vmatpush1.bf16.msra.mxu0 %v15630_v45  ;;  %15377 = vmatprep.subr.bf16.mxu1 %v15376_v36  ;;  %v9937_v45 = vld [vmem:[#allocation22 + $0x1020] sm:$0xff] }
0x11f5   :  { %15633 = vmatprep.subr.bf16.mxu0 %v15632_v22  ;;  %v9945_v36 = vld [vmem:[#allocation22 + $0x1060] sm:$0xff]  ;;  %v9954_v22 = vld [vmem:[#allocation22 + $0x10a8] sm:$0xff] }
0x11f6   :  { %v15394_v54 = vpack.c.bf16 %v9945_v36, %v9937_v45  ;;  %v15396_v21 = vpack.c.bf16 %v9962_v8, %v9954_v22  ;;  %v10011_v45 = vld [vmem:[#allocation22 + $0x1270] sm:$0xff]  ;;  %v10018_v36 = vld [vmem:[#allocation22 + $0x12a8] sm:$0xff] }
0x11f7   :  { %15379 = vmatpush1.bf16.msra.mxu1 %v15378_v41  ;;  %v9953_v41 = vld [vmem:[#allocation22 + $0x10a0] sm:$0xff] }
0x11f8   :  { %15635 = vmatpush1.bf16.msra.mxu0 %v15634_v63  ;;  %15381 = vmatprep.subr.bf16.mxu1 %v15380_v17  ;;  %v9961_v63 = vld [vmem:[#allocation22 + $0x10e0] sm:$0xff]  ;;  %v9955_v17 = vld [vmem:[#allocation22 + $0x10b0] sm:$0xff] }
0x11f9   :  { %15637 = vmatprep.subr.bf16.mxu0 %v15636_v7  ;;  %v9978_v7 = vld [vmem:[#allocation22 + $0x1168] sm:$0xff]  ;;  %v15398_v35 = vpack.c.bf16 %v9961_v63, %v9953_v41  ;;  %v15654_v62 = vpack.c.bf16 %v9963_v4, %v9955_v17  ;;  %v15668_v41 = vpack.c.bf16 %v10028_v30, %v10020_v55  ;;  %v10027_v63 = vld [vmem:[#allocation22 + $0x12f0] sm:$0xff]  ;;  %v10036_v4 = vld [vmem:[#allocation22 + $0x1338] sm:$0xff] }
0x11fa   :  { %v10034_v17 = vld [vmem:[#allocation22 + $0x1328] sm:$0xff]  ;;  %v10081_v30 = vld [vmem:[#allocation22 + $0x14a0] sm:$0xff] }
0x11fb   :  { %15383 = vmatpush1.bf16.msra.mxu1 %v15382_v52  ;;  %v15400_v52 = vpack.c.bf16 %v9978_v7, %v9970_v51  ;;  %v10044_v51 = vld [vmem:[#allocation22 + $0x1378] sm:$0xff]  ;;  %v15414_v7 = vpack.c.bf16 %v10025_v31, %v10017_v2  ;;  %v10091_v2 = vld [vmem:[#allocation22 + $0x14f0] sm:$0xff]  ;;  %v10098_v31 = vld [vmem:[#allocation22 + $0x1528] sm:$0xff] }
0x11fc   :  { %15639 = vmatpush1.bf16.msra.mxu0 %v15638_v49  ;;  %15385 = vmatprep.subr.bf16.mxu1 %v15384_v56  ;;  %v9969_v49 = vld [vmem:[#allocation22 + $0x1120] sm:$0xff] }
0x11fd   :  { %15641 = vmatprep.subr.bf16.mxu0 %v15640_v10  ;;  %v9977_v56 = vld [vmem:[#allocation22 + $0x1160] sm:$0xff]  ;;  %v9986_v10 = vld [vmem:[#allocation22 + $0x11a8] sm:$0xff] }
0x11fe   :  { %v15402_v1 = vpack.c.bf16 %v9977_v56, %v9969_v49  ;;  %v15404_v25 = vpack.c.bf16 %v9994_v14, %v9986_v10  ;;  %v10043_v49 = vld [vmem:[#allocation22 + $0x1370] sm:$0xff]  ;;  %v10050_v56 = vld [vmem:[#allocation22 + $0x13a8] sm:$0xff] }
0x11ff   :  { %15387 = vmatpush1.bf16.msra.mxu1 %v15386_v29  ;;  %v9985_v29 = vld [vmem:[#allocation22 + $0x11a0] sm:$0xff] }
0x1200   :  { %15643 = vmatpush1.bf16.msra.mxu0 %v15642_v15  ;;  %15389 = vmatprep.subr.bf16.mxu1 %v15388_v42  ;;  %v9993_v15 = vld [vmem:[#allocation22 + $0x11e0] sm:$0xff]  ;;  %v9987_v42 = vld [vmem:[#allocation22 + $0x11b0] sm:$0xff] }
0x1201   :  { %15645 = vmatprep.subr.bf16.mxu0 %v15644_v50  ;;  %v10004_v50 = vld [vmem:[#allocation22 + $0x1238] sm:$0xff]  ;;  %v15406_v18 = vpack.c.bf16 %v9993_v15, %v9985_v29  ;;  %v10059_v29 = vld [vmem:[#allocation22 + $0x13f0] sm:$0xff]  ;;  %v10066_v15 = vld [vmem:[#allocation22 + $0x1428] sm:$0xff] }
0x1203   :  { %15391 = vmatpush1.bf16.msra.mxu1 %v15390_v9  ;;  %v10009_v9 = vld [vmem:[#allocation22 + $0x1260] sm:$0xff] }
0x1204   :  { %15647 = vmatpush1.bf16.msra.mxu0 %v15646_v33  ;;  %15393 = vmatprep.subr.bf16.mxu1 %v15392_v61  ;;  %v10003_v33 = vld [vmem:[#allocation22 + $0x1230] sm:$0xff]  ;;  %v15664_v61 = vpack.c.bf16 %v10012_v26, %v10004_v50  ;;  %v15410_v22 = vpack.c.bf16 %v10009_v9, %v10001_v28  ;;  %v10065_v26 = vld [vmem:[#allocation22 + $0x1420] sm:$0xff]  ;;  %v10082_v9 = vld [vmem:[#allocation22 + $0x14a8] sm:$0xff] }
0x1205   :  { %15649 = vmatprep.subr.bf16.mxu0 %v15648_v6  ;;  %v10026_v6 = vld [vmem:[#allocation22 + $0x12e8] sm:$0xff]  ;;  %v15666_v8 = vpack.c.bf16 %v10011_v45, %v10003_v33  ;;  %v10075_v28 = vld [vmem:[#allocation22 + $0x1470] sm:$0xff]  ;;  %v10092_v45 = vld [vmem:[#allocation22 + $0x14f8] sm:$0xff] }
0x1206   :  { %11191 = vmatmul.mubr.f32.vlgmr.msra.gmra.mrb[88].mxu1 %v21333_v19  ;;  %v10090_v33 = vld [vmem:[#allocation22 + $0x14e8] sm:$0xff] }
0x1207   :  { %11475 = vmatmul.mubr.f32.vlgmr.msra.gmra.mrb[128].mxu0 %v21333_v19  ;;  %15395 = vmatpush1.bf16.msra.mxu1 %v15394_v54  ;;  %v9996_v19 = vld [vmem:[#allocation22 + $0x11f8] sm:$0xff]  ;;  %v15412_v54 = vpack.c.bf16 %v10026_v6, %v10018_v36  ;;  %v15428_v55 = vpack.c.bf16 %v10090_v33, %v10082_v9 }
0x1208   :  { %11261 = vmatprep.mubr.f32.mxu1 %v21341_v27  ;;  %15651 = vmatpush1.bf16.msra.mxu0 %v15650_v11  ;;  %v15660_v23 = vpack.c.bf16 %v9996_v19, %v9988_v39  ;;  %v10019_v11 = vld [vmem:[#allocation22 + $0x12b0] sm:$0xff]  ;;  %v15420_v39 = vpack.c.bf16 %v10058_v38, %v10050_v56  ;;  %v10049_v19 = vld [vmem:[#allocation22 + $0x13a0] sm:$0xff] }
0x1209   :  { %11545 = vmatprep.mubr.f32.mxu0 %v21341_v27  ;;  %15397 = vmatprep.subr.bf16.mxu1 %v15396_v21  ;;  %v9995_v27 = vld [vmem:[#allocation22 + $0x11f0] sm:$0xff]  ;;  %v10042_v21 = vld [vmem:[#allocation22 + $0x1368] sm:$0xff] }
0x120a   :  { %15653 = vmatprep.subr.bf16.mxu0 %v15652_v5  ;;  %v15662_v20 = vpack.c.bf16 %v9995_v27, %v9987_v42  ;;  %v15670_v5 = vpack.c.bf16 %v10027_v63, %v10019_v11  ;;  %v15416_v37 = vpack.c.bf16 %v10042_v21, %v10034_v17  ;;  %v10074_v42 = vld [vmem:[#allocation22 + $0x1468] sm:$0xff]  ;;  %v10076_v27 = vld [vmem:[#allocation22 + $0x1478] sm:$0xff] }
0x120b   :  { %15399 = vmatpush1.bf16.msra.mxu1 %v15398_v35  ;;  %v10041_v35 = vld [vmem:[#allocation22 + $0x1360] sm:$0xff]  ;;  %v15424_v50 = vpack.c.bf16 %v10074_v42, %v10066_v15  ;;  %v10106_v11 = vld [vmem:[#allocation22 + $0x1568] sm:$0xff]  ;;  %v10108_v63 = vld [vmem:[#allocation22 + $0x1578] sm:$0xff] }
0x120c   :  { %15655 = vmatpush1.bf16.msra.mxu0 %v15654_v62  ;;  %15401 = vmatprep.subr.bf16.mxu1 %v15400_v52  ;;  %v10035_v62 = vld [vmem:[#allocation22 + $0x1330] sm:$0xff]  ;;  %v15672_v52 = vpack.c.bf16 %v10044_v51, %v10036_v4  ;;  %v15418_v10 = vpack.c.bf16 %v10041_v35, %v10033_v58  ;;  %v15432_v4 = vpack.c.bf16 %v10106_v11, %v10098_v31  ;;  %v10097_v51 = vld [vmem:[#allocation22 + $0x1520] sm:$0xff]  ;;  %v10114_v35 = vld [vmem:[#allocation22 + $0x15a8] sm:$0xff] }
0x120d   :  { %15657 = vmatprep.subr.bf16.mxu0 %v15656_v47  ;;  %v10052_v47 = vld [vmem:[#allocation22 + $0x13b8] sm:$0xff]  ;;  %v15674_v14 = vpack.c.bf16 %v10043_v49, %v10035_v62  ;;  %v10107_v58 = vld [vmem:[#allocation22 + $0x1570] sm:$0xff]  ;;  %v10122_v62 = vld [vmem:[#allocation22 + $0x15e8] sm:$0xff] }
0x120e   :  { %v10124_v49 = vld [vmem:[#allocation22 + $0x15f8] sm:$0xff] }
0x120f   :  { %15403 = vmatpush1.bf16.msra.mxu1 %v15402_v1  ;;  %v10057_v1 = vld [vmem:[#allocation22 + $0x13e0] sm:$0xff] }
0x1210   :  { %15659 = vmatpush1.bf16.msra.mxu0 %v15658_v53  ;;  %15405 = vmatprep.subr.bf16.mxu1 %v15404_v25  ;;  %v10051_v53 = vld [vmem:[#allocation22 + $0x13b0] sm:$0xff]  ;;  %v15676_v25 = vpack.c.bf16 %v10060_v46, %v10052_v47  ;;  %v15422_v24 = vpack.c.bf16 %v10057_v1, %v10049_v19  ;;  %v15436_v47 = vpack.c.bf16 %v10122_v62, %v10114_v35  ;;  %v10113_v46 = vld [vmem:[#allocation22 + $0x15a0] sm:$0xff]  ;;  %v10130_v1 = vld [vmem:[#allocation22 + $0x1628] sm:$0xff] }
0x1211   :  { %15661 = vmatprep.subr.bf16.mxu0 %v15660_v23  ;;  %v10068_v23 = vld [vmem:[#allocation22 + $0x1438] sm:$0xff]  ;;  %v15678_v60 = vpack.c.bf16 %v10059_v29, %v10051_v53  ;;  %v10123_v19 = vld [vmem:[#allocation22 + $0x15f0] sm:$0xff]  ;;  %v10138_v53 = vld [vmem:[#allocation22 + $0x1668] sm:$0xff] }
0x1212   :  { %v10140_v29 = vld [vmem:[#allocation22 + $0x1678] sm:$0xff] }
0x1213   :  { %15407 = vmatpush1.bf16.msra.mxu1 %v15406_v18  ;;  %v10073_v18 = vld [vmem:[#allocation22 + $0x1460] sm:$0xff] }
0x1214   :  { %15663 = vmatpush1.bf16.msra.mxu0 %v15662_v20  ;;  %15409 = vmatprep.subr.bf16.mxu1 %v15408_v34  ;;  %v10067_v20 = vld [vmem:[#allocation22 + $0x1430] sm:$0xff]  ;;  %v15680_v34 = vpack.c.bf16 %v10076_v27, %v10068_v23  ;;  %v15426_v36 = vpack.c.bf16 %v10073_v18, %v10065_v26  ;;  %v15440_v23 = vpack.c.bf16 %v10138_v53, %v10130_v1  ;;  %v10129_v27 = vld [vmem:[#allocation22 + $0x1620] sm:$0xff]  ;;  %v10146_v18 = vld [vmem:[#allocation22 + $0x16a8] sm:$0xff] }
0x1215   :  { %15665 = vmatprep.subr.bf16.mxu0 %v15664_v61  ;;  %v10084_v61 = vld [vmem:[#allocation22 + $0x14b8] sm:$0xff]  ;;  %v15682_v6 = vpack.c.bf16 %v10075_v28, %v10067_v20  ;;  %v10139_v26 = vld [vmem:[#allocation22 + $0x1670] sm:$0xff]  ;;  %v10154_v20 = vld [vmem:[#allocation22 + $0x16e8] sm:$0xff] }
0x1216   :  { %v10156_v28 = vld [vmem:[#allocation22 + $0x16f8] sm:$0xff] }
0x1217   :  { %15411 = vmatpush1.bf16.msra.mxu1 %v15410_v22  ;;  %v10089_v22 = vld [vmem:[#allocation22 + $0x14e0] sm:$0xff] }
0x1218   :  { %15667 = vmatpush1.bf16.msra.mxu0 %v15666_v8  ;;  %15413 = vmatprep.subr.bf16.mxu1 %v15412_v54  ;;  %v10083_v8 = vld [vmem:[#allocation22 + $0x14b0] sm:$0xff]  ;;  %v15684_v54 = vpack.c.bf16 %v10092_v45, %v10084_v61  ;;  %v15430_v17 = vpack.c.bf16 %v10089_v22, %v10081_v30  ;;  %v15444_v61 = vpack.c.bf16 %v10154_v20, %v10146_v18  ;;  %v10145_v45 = vld [vmem:[#allocation22 + $0x16a0] sm:$0xff]  ;;  %v10162_v22 = vld [vmem:[#allocation22 + $0x1728] sm:$0xff] }
0x1219   :  { %15669 = vmatprep.subr.bf16.mxu0 %v15668_v41  ;;  %v10100_v41 = vld [vmem:[#allocation22 + $0x1538] sm:$0xff]  ;;  %v15686_v21 = vpack.c.bf16 %v10091_v2, %v10083_v8  ;;  %v10155_v30 = vld [vmem:[#allocation22 + $0x16f0] sm:$0xff]  ;;  %v10170_v8 = vld [vmem:[#allocation22 + $0x1768] sm:$0xff] }
0x121a   :  { %v10172_v2 = vld [vmem:[#allocation22 + $0x1778] sm:$0xff] }
0x121b   :  { %15415 = vmatpush1.bf16.msra.mxu1 %v15414_v7  ;;  %v10105_v7 = vld [vmem:[#allocation22 + $0x1560] sm:$0xff]  ;;  %v10220_v18 = vld [vmem:[#allocation22 + $0x18f8] sm:$0xff] }
0x121c   :  { %15671 = vmatpush1.bf16.msra.mxu0 %v15670_v5  ;;  %15417 = vmatprep.subr.bf16.mxu1 %v15416_v37  ;;  %v10099_v5 = vld [vmem:[#allocation22 + $0x1530] sm:$0xff]  ;;  %v15688_v37 = vpack.c.bf16 %v10108_v63, %v10100_v41  ;;  %v15434_v56 = vpack.c.bf16 %v10105_v7, %v10097_v51  ;;  %v15448_v41 = vpack.c.bf16 %v10170_v8, %v10162_v22  ;;  %v10161_v63 = vld [vmem:[#allocation22 + $0x1720] sm:$0xff]  ;;  %v10178_v7 = vld [vmem:[#allocation22 + $0x17a8] sm:$0xff] }
0x121d   :  { %15673 = vmatprep.subr.bf16.mxu0 %v15672_v52  ;;  %v10116_v52 = vld [vmem:[#allocation22 + $0x15b8] sm:$0xff]  ;;  %v15690_v38 = vpack.c.bf16 %v10107_v58, %v10099_v5  ;;  %v10171_v51 = vld [vmem:[#allocation22 + $0x1770] sm:$0xff]  ;;  %v10186_v5 = vld [vmem:[#allocation22 + $0x17e8] sm:$0xff] }
0x121e   :  { %v10188_v58 = vld [vmem:[#allocation22 + $0x17f8] sm:$0xff] }
0x121f   :  { %15419 = vmatpush1.bf16.msra.mxu1 %v15418_v10  ;;  %v10121_v10 = vld [vmem:[#allocation22 + $0x15e0] sm:$0xff] }
0x1220   :  { %15675 = vmatpush1.bf16.msra.mxu0 %v15674_v14  ;;  %15421 = vmatprep.subr.bf16.mxu1 %v15420_v39  ;;  %v10115_v14 = vld [vmem:[#allocation22 + $0x15b0] sm:$0xff]  ;;  %v15692_v39 = vpack.c.bf16 %v10124_v49, %v10116_v52  ;;  %v15438_v15 = vpack.c.bf16 %v10121_v10, %v10113_v46  ;;  %v15452_v52 = vpack.c.bf16 %v10186_v5, %v10178_v7  ;;  %v10177_v49 = vld [vmem:[#allocation22 + $0x17a0] sm:$0xff]  ;;  %v10194_v10 = vld [vmem:[#allocation22 + $0x1828] sm:$0xff] }
0x1221   :  { %15677 = vmatprep.subr.bf16.mxu0 %v15676_v25  ;;  %v10132_v25 = vld [vmem:[#allocation22 + $0x1638] sm:$0xff]  ;;  %v15694_v42 = vpack.c.bf16 %v10123_v19, %v10115_v14  ;;  %v10187_v46 = vld [vmem:[#allocation22 + $0x17f0] sm:$0xff]  ;;  %v10202_v14 = vld [vmem:[#allocation22 + $0x1868] sm:$0xff] }
0x1222   :  { %v10204_v19 = vld [vmem:[#allocation22 + $0x1878] sm:$0xff] }
0x1223   :  { %15423 = vmatpush1.bf16.msra.mxu1 %v15422_v24  ;;  %v10137_v24 = vld [vmem:[#allocation22 + $0x1660] sm:$0xff] }
0x1224   :  { %15679 = vmatpush1.bf16.msra.mxu0 %v15678_v60  ;;  %15425 = vmatprep.subr.bf16.mxu1 %v15424_v50  ;;  %v10131_v60 = vld [vmem:[#allocation22 + $0x1630] sm:$0xff]  ;;  %v15696_v50 = vpack.c.bf16 %v10140_v29, %v10132_v25  ;;  %v15442_v9 = vpack.c.bf16 %v10137_v24, %v10129_v27  ;;  %v15456_v25 = vpack.c.bf16 %v10202_v14, %v10194_v10  ;;  %v10193_v29 = vld [vmem:[#allocation22 + $0x1820] sm:$0xff]  ;;  %v10210_v24 = vld [vmem:[#allocation22 + $0x18a8] sm:$0xff] }
0x1225   :  { %15681 = vmatprep.subr.bf16.mxu0 %v15680_v34  ;;  %v10148_v34 = vld [vmem:[#allocation22 + $0x16b8] sm:$0xff]  ;;  %v15698_v33 = vpack.c.bf16 %v10139_v26, %v10131_v60  ;;  %v10203_v27 = vld [vmem:[#allocation22 + $0x1870] sm:$0xff]  ;;  %v10218_v60 = vld [vmem:[#allocation22 + $0x18e8] sm:$0xff] }
0x1226   :  { %v10212_v26 = vld [vmem:[#allocation22 + $0x18b8] sm:$0xff]  ;;  %v10257_v14 = vld [vmem:[#allocation22 + $0x1a20] sm:$0xff] }
0x1227   :  { %15427 = vmatpush1.bf16.msra.mxu1 %v15426_v36  ;;  %v10153_v36 = vld [vmem:[#allocation22 + $0x16e0] sm:$0xff] }
0x1228   :  { %15683 = vmatpush1.bf16.msra.mxu0 %v15682_v6  ;;  %15429 = vmatprep.subr.bf16.mxu1 %v15428_v55  ;;  %v10147_v6 = vld [vmem:[#allocation22 + $0x16b0] sm:$0xff]  ;;  %v15700_v55 = vpack.c.bf16 %v10156_v28, %v10148_v34  ;;  %v15446_v31 = vpack.c.bf16 %v10153_v36, %v10145_v45  ;;  %v10209_v34 = vld [vmem:[#allocation22 + $0x18a0] sm:$0xff]  ;;  %v10226_v45 = vld [vmem:[#allocation22 + $0x1928] sm:$0xff] }
0x1229   :  { %15685 = vmatprep.subr.bf16.mxu0 %v15684_v54  ;;  %v10164_v54 = vld [vmem:[#allocation22 + $0x1738] sm:$0xff]  ;;  %v15702_v11 = vpack.c.bf16 %v10155_v30, %v10147_v6  ;;  %v10217_v28 = vld [vmem:[#allocation22 + $0x18e0] sm:$0xff]  ;;  %v10234_v36 = vld [vmem:[#allocation22 + $0x1968] sm:$0xff]  ;;  %v15716_v6 = vpack.c.bf16 %v10220_v18, %v10212_v26 }
0x122a   :  { %v10236_v30 = vld [vmem:[#allocation22 + $0x1978] sm:$0xff]  ;;  %v15462_v22 = vpack.c.bf16 %v10217_v28, %v10209_v34  ;;  %v10273_v18 = vld [vmem:[#allocation22 + $0x1aa0] sm:$0xff]  ;;  %v10275_v34 = vld [vmem:[#allocation22 + $0x1ab0] sm:$0xff] }
0x122b   :  { %15431 = vmatpush1.bf16.msra.mxu1 %v15430_v17  ;;  %v10169_v17 = vld [vmem:[#allocation22 + $0x1760] sm:$0xff] }
0x122c   :  { %15687 = vmatpush1.bf16.msra.mxu0 %v15686_v21  ;;  %15433 = vmatprep.subr.bf16.mxu1 %v15432_v4  ;;  %v10163_v21 = vld [vmem:[#allocation22 + $0x1730] sm:$0xff]  ;;  %v15704_v4 = vpack.c.bf16 %v10172_v2, %v10164_v54  ;;  %v15450_v35 = vpack.c.bf16 %v10169_v17, %v10161_v63  ;;  %v15464_v54 = vpack.c.bf16 %v10234_v36, %v10226_v45  ;;  %v10225_v2 = vld [vmem:[#allocation22 + $0x1920] sm:$0xff]  ;;  %v10242_v17 = vld [vmem:[#allocation22 + $0x19a8] sm:$0xff] }
0x122d   :  { %15689 = vmatprep.subr.bf16.mxu0 %v15688_v37  ;;  %v10180_v37 = vld [vmem:[#allocation22 + $0x17b8] sm:$0xff]  ;;  %v15706_v62 = vpack.c.bf16 %v10171_v51, %v10163_v21  ;;  %v10235_v63 = vld [vmem:[#allocation22 + $0x1970] sm:$0xff]  ;;  %v10250_v21 = vld [vmem:[#allocation22 + $0x19e8] sm:$0xff] }
0x122e   :  { %v15468_v5 = vpack.c.bf16 %v10250_v21, %v10242_v17  ;;  %v10299_v21 = vld [vmem:[#allocation22 + $0x1b70] sm:$0xff] }
0x122f   :  { %15435 = vmatpush1.bf16.msra.mxu1 %v15434_v56  ;;  %v10185_v56 = vld [vmem:[#allocation22 + $0x17e0] sm:$0xff] }
0x1230   :  { %15691 = vmatpush1.bf16.msra.mxu0 %v15690_v38  ;;  %15437 = vmatprep.subr.bf16.mxu1 %v15436_v47  ;;  %v10179_v38 = vld [vmem:[#allocation22 + $0x17b0] sm:$0xff]  ;;  %v15708_v47 = vpack.c.bf16 %v10188_v58, %v10180_v37  ;;  %v15454_v1 = vpack.c.bf16 %v10185_v56, %v10177_v49  ;;  %v10241_v37 = vld [vmem:[#allocation22 + $0x19a0] sm:$0xff]  ;;  %v10266_v49 = vld [vmem:[#allocation22 + $0x1a68] sm:$0xff] }
0x1231   :  { %15693 = vmatprep.subr.bf16.mxu0 %v15692_v39  ;;  %v10196_v39 = vld [vmem:[#allocation22 + $0x1838] sm:$0xff]  ;;  %v15710_v53 = vpack.c.bf16 %v10187_v46, %v10179_v38  ;;  %v10249_v58 = vld [vmem:[#allocation22 + $0x19e0] sm:$0xff] }
0x1232   :  { %v10260_v56 = vld [vmem:[#allocation22 + $0x1a38] sm:$0xff] }
0x1233   :  { %15439 = vmatpush1.bf16.msra.mxu1 %v15438_v15  ;;  %v10201_v15 = vld [vmem:[#allocation22 + $0x1860] sm:$0xff]  ;;  %v10268_v38 = vld [vmem:[#allocation22 + $0x1a78] sm:$0xff] }
0x1234   :  { %15695 = vmatpush1.bf16.msra.mxu0 %v15694_v42  ;;  %15441 = vmatprep.subr.bf16.mxu1 %v15440_v23  ;;  %v15712_v42 = vpack.c.bf16 %v10204_v19, %v10196_v39  ;;  %v10195_v23 = vld [vmem:[#allocation22 + $0x1830] sm:$0xff]  ;;  %v10265_v39 = vld [vmem:[#allocation22 + $0x1a60] sm:$0xff] }
0x1235   :  { %15697 = vmatprep.subr.bf16.mxu0 %v15696_v50  ;;  %v15458_v50 = vpack.c.bf16 %v10201_v15, %v10193_v29  ;;  %v15714_v20 = vpack.c.bf16 %v10203_v27, %v10195_v23  ;;  %v10259_v19 = vld [vmem:[#allocation22 + $0x1a30] sm:$0xff]  ;;  %v10282_v29 = vld [vmem:[#allocation22 + $0x1ae8] sm:$0xff]  ;;  %v10276_v15 = vld [vmem:[#allocation22 + $0x1ab8] sm:$0xff]  ;;  %v15474_v23 = vpack.c.bf16 %v10265_v39, %v10257_v14 }
0x1236   :  { %v21371_v27 = vld [vmem:[#allocation24] sm:$0xff]  ;;  %v10315_v39 = vld [vmem:[#allocation22 + $0x1bf0] sm:$0xff] }
0x1237   :  { %15443 = vmatpush1.bf16.msra.mxu1 %v15442_v9  ;;  %v10211_v9 = vld [vmem:[#allocation22 + $0x18b0] sm:$0xff]  ;;  %v10450_v45 = vrot.slane %v21371_v27, %v21253_v48  ;;  %v10458_v36 = vrot.slane %v21371_v27, %v21271_v0  ;;  %v10297_v48 = vld [vmem:[#allocation22 + $0x1b60] sm:$0xff] }
0x1238   :  { %15699 = vmatpush1.bf16.msra.mxu0 %v15698_v33  ;;  %15445 = vmatprep.subr.bf16.mxu1 %v15444_v61  ;;  %v15460_v33 = vpack.c.bf16 %v10218_v60, %v10210_v24  ;;  %v10219_v61 = vld [vmem:[#allocation22 + $0x18f0] sm:$0xff]  ;;  %v16899_v24 = vmov 1983009808  }
0x1239   :  { %15701 = vmatprep.subr.bf16.mxu0 %v15700_v55  ;;  %v10228_v55 = vld [vmem:[#allocation22 + $0x1938] sm:$0xff]  ;;  %v15718_v8 = vpack.c.bf16 %v10219_v61, %v10211_v9  ;;  %v11634_v60 = vunpack.c.l.s4 %v16899_v24  ;;  %v10283_v9 = vld [vmem:[#allocation22 + $0x1af0] sm:$0xff]  ;;  %v10298_v61 = vld [vmem:[#allocation22 + $0x1b68] sm:$0xff] }
0x123a   :  { %v10321_v24 = vld [vmem:[#allocation22 + $0x1c20] sm:$0xff] }
0x123b   :  { %15447 = vmatpush1.bf16.msra.mxu1 %v15446_v31  ;;  %v10233_v31 = vld [vmem:[#allocation22 + $0x1960] sm:$0xff] }
0x123c   :  { %15703 = vmatpush1.bf16.msra.mxu0 %v15702_v11  ;;  %15449 = vmatprep.subr.bf16.mxu1 %v15448_v41  ;;  %v10227_v11 = vld [vmem:[#allocation22 + $0x1930] sm:$0xff]  ;;  %v15720_v41 = vpack.c.bf16 %v10236_v30, %v10228_v55  ;;  %v15466_v51 = vpack.c.bf16 %v10233_v31, %v10225_v2  ;;  %v10300_v55 = vld [vmem:[#allocation22 + $0x1b78] sm:$0xff]  ;;  %v10454_v30 = vrot.slane %v21371_v27, %v21258_v3 }
0x123d   :  { %15705 = vmatprep.subr.bf16.mxu0 %v15704_v4  ;;  %v10244_v4 = vld [vmem:[#allocation22 + $0x19b8] sm:$0xff]  ;;  %v15722_v7 = vpack.c.bf16 %v10235_v63, %v10227_v11  ;;  %v15734_v2 = vpack.c.bf16 %v10283_v9, %v10275_v34  ;;  %v10289_v11 = vld [vmem:[#allocation22 + $0x1b20] sm:$0xff]  ;;  %v10346_v34 = vld [vmem:[#allocation22 + $0x1ce8] sm:$0xff] }
0x123e   :  { %v10340_v9 = vld [vmem:[#allocation22 + $0x1cb8] sm:$0xff] }
0x123f   :  { %15451 = vmatpush1.bf16.msra.mxu1 %v15450_v35  ;;  %v10243_v35 = vld [vmem:[#allocation22 + $0x19b0] sm:$0xff] }
0x1240   :  { %15707 = vmatpush1.bf16.msra.mxu0 %v15706_v62  ;;  %15453 = vmatprep.subr.bf16.mxu1 %v15452_v52  ;;  %v10258_v52 = vld [vmem:[#allocation22 + $0x1a28] sm:$0xff] }
0x1241   :  { %15709 = vmatprep.subr.bf16.mxu0 %v15708_v47  ;;  %v15470_v47 = vpack.c.bf16 %v10249_v58, %v10241_v37  ;;  %v15472_v10 = vpack.c.bf16 %v10266_v49, %v10258_v52  ;;  %v10316_v37 = vld [vmem:[#allocation22 + $0x1bf8] sm:$0xff] }
0x1243   :  { %15455 = vmatpush1.bf16.msra.mxu1 %v15454_v1  ;;  %v15728_v1 = vpack.c.bf16 %v10268_v38, %v10260_v56  ;;  %v10305_v56 = vld [vmem:[#allocation22 + $0x1ba0] sm:$0xff] }
0x1244   :  { %15711 = vmatpush1.bf16.msra.mxu0 %v15710_v53  ;;  %15457 = vmatprep.subr.bf16.mxu1 %v15456_v25  ;;  %v10267_v53 = vld [vmem:[#allocation22 + $0x1a70] sm:$0xff]  ;;  %v10274_v25 = vld [vmem:[#allocation22 + $0x1aa8] sm:$0xff]  ;;  %v10313_v38 = vld [vmem:[#allocation22 + $0x1be0] sm:$0xff] }
0x1245   :  { %15713 = vmatprep.subr.bf16.mxu0 %v15712_v42  ;;  %v10284_v42 = vld [vmem:[#allocation22 + $0x1af8] sm:$0xff]  ;;  %v15476_v26 = vpack.c.bf16 %v10282_v29, %v10274_v25 }
0x1246   :  { %11262 = vmatmul.mubr.f32.vlgmr.msra.gmra.mrb[88].mxu1 %v21339_v44  ;;  %v15732_v28 = vpack.c.bf16 %v10284_v42, %v10276_v15  ;;  %v15486_v15 = vpack.c.bf16 %v10313_v38, %v10305_v56  ;;  %v10379_v56 = vld [vmem:[#allocation22 + $0x1df0] sm:$0xff]  ;;  %v10386_v38 = vld [vmem:[#allocation22 + $0x1e28] sm:$0xff] }
0x1247   :  { %11546 = vmatmul.mubr.f32.vlgmr.msra.gmra.mrb[128].mxu0 %v21339_v44  ;;  %15459 = vmatpush1.bf16.msra.mxu1 %v15458_v50  ;;  %v10252_v44 = vld [vmem:[#allocation22 + $0x19f8] sm:$0xff]  ;;  %v15730_v50 = vpack.c.bf16 %v10267_v53, %v10259_v19  ;;  %v10322_v19 = vld [vmem:[#allocation22 + $0x1c28] sm:$0xff] }
0x1248   :  { %11332 = vmatprep.mubr.f32.mxu1 %v21345_v57  ;;  %15715 = vmatpush1.bf16.msra.mxu0 %v15714_v20  ;;  %v15724_v62 = vpack.c.bf16 %v10252_v44, %v10244_v4  ;;  %v10281_v20 = vld [vmem:[#allocation22 + $0x1ae0] sm:$0xff]  ;;  %v10306_v4 = vld [vmem:[#allocation22 + $0x1ba8] sm:$0xff]  ;;  %v10324_v53 = vld [vmem:[#allocation22 + $0x1c38] sm:$0xff] }
0x1249   :  { %11616 = vmatprep.mubr.f32.mxu0 %v21345_v57  ;;  %15461 = vmatprep.subr.bf16.mxu1 %v15460_v33  ;;  %v10251_v57 = vld [vmem:[#allocation22 + $0x19f0] sm:$0xff]  ;;  %v10290_v33 = vld [vmem:[#allocation22 + $0x1b28] sm:$0xff] }
0x124a   :  { %15717 = vmatprep.subr.bf16.mxu0 %v15716_v6  ;;  %v15726_v46 = vpack.c.bf16 %v10251_v57, %v10243_v35  ;;  %v10292_v6 = vld [vmem:[#allocation22 + $0x1b38] sm:$0xff]  ;;  %v15480_v31 = vpack.c.bf16 %v10298_v61, %v10290_v33  ;;  %v10314_v44 = vld [vmem:[#allocation22 + $0x1be8] sm:$0xff]  ;;  %v15482_v57 = vpack.c.bf16 %v10297_v48, %v10289_v11 }
0x124b   :  { %15463 = vmatpush1.bf16.msra.mxu1 %v15462_v22  ;;  %v11635_v22 = vunpack.c.0.s8 %v11634_v60  ;;  %v15736_v17 = vpack.c.bf16 %v10300_v55, %v10292_v6  ;;  %v15484_v49 = vpack.c.bf16 %v10314_v44, %v10306_v4  ;;  %v10329_v60 = vld [vmem:[#allocation22 + $0x1c60] sm:$0xff]  ;;  %v10348_v33 = vld [vmem:[#allocation22 + $0x1cf8] sm:$0xff]  ;;  %v10363_v44 = vld [vmem:[#allocation22 + $0x1d70] sm:$0xff] }
0x124c   :  { %15719 = vmatpush1.bf16.msra.mxu0 %v15718_v8  ;;  %15465 = vmatprep.subr.bf16.mxu1 %v15464_v54  ;;  %v10462_v8 = vrot.slane %v21371_v27, %v21274_v16  ;;  %v15478_v54 = vpack.c.bf16 %v10281_v20, %v10273_v18  ;;  %v10308_v16 = vld [vmem:[#allocation22 + $0x1bb8] sm:$0xff]  ;;  %v10331_v18 = vld [vmem:[#allocation22 + $0x1c70] sm:$0xff]  ;;  %v10338_v20 = vld [vmem:[#allocation22 + $0x1ca8] sm:$0xff]  ;;  %v15490_v61 = vpack.c.bf16 %v10329_v60, %v10321_v24 }
0x124d   :  { %15721 = vmatprep.subr.bf16.mxu0 %v15720_v41  ;;  %v10291_v41 = vld [vmem:[#allocation22 + $0x1b30] sm:$0xff]  ;;  %v21382_v35 = vsub.s32 %v11635_v22, %v21250_v12  ;;  %v15740_v14 = vpack.c.bf16 %v10316_v37, %v10308_v16  ;;  %v10332_v12 = vld [vmem:[#allocation22 + $0x1c78] sm:$0xff]  ;;  %v10337_v6 = vld [vmem:[#allocation22 + $0x1ca0] sm:$0xff]  ;;  %v15748_v22 = vpack.c.bf16 %v10348_v33, %v10340_v9 }
0x124e   :  { %v15738_v52 = vpack.c.bf16 %v10299_v21, %v10291_v41  ;;  %v10345_v55 = vld [vmem:[#allocation22 + $0x1ce0] sm:$0xff]  ;;  %v10364_v11 = vld [vmem:[#allocation22 + $0x1d78] sm:$0xff]  ;;  %v10355_v21 = vld [vmem:[#allocation22 + $0x1d30] sm:$0xff] }
0x124f   :  { %15467 = vmatpush1.bf16.msra.mxu1 %v15466_v51  ;;  %v15494_v48 = vpack.c.bf16 %v10345_v55, %v10337_v6  ;;  %v15754_v37 = vpack.c.bf16 %v10363_v44, %v10355_v21  ;;  %v10412_v24 = vld [vmem:[#allocation22 + $0x1ef8] sm:$0xff]  ;;  %v10411_v9 = vld [vmem:[#allocation22 + $0x1ef0] sm:$0xff]  ;;  %v10418_v33 = vld [vmem:[#allocation22 + $0x1f28] sm:$0xff] }
0x1250   :  { %15723 = vmatpush1.bf16.msra.mxu0 %v15722_v7  ;;  %15469 = vmatprep.subr.bf16.mxu1 %v15468_v5  ;;  %v10441_v44 = vld [vmem:[#allocation22 + $0x1fe0] sm:$0xff] }
0x1251   :  { %15725 = vmatprep.subr.bf16.mxu0 %v15724_v62 }
0x1253   :  { %15471 = vmatpush1.bf16.msra.mxu1 %v15470_v47  ;;  %v10307_v47 = vld [vmem:[#allocation22 + $0x1bb0] sm:$0xff] }
0x1254   :  { %15727 = vmatpush1.bf16.msra.mxu0 %v15726_v46  ;;  %15473 = vmatprep.subr.bf16.mxu1 %v15472_v10  ;;  %v15742_v42 = vpack.c.bf16 %v10315_v39, %v10307_v47  ;;  %v10394_v47 = vld [vmem:[#allocation22 + $0x1e68] sm:$0xff] }
0x1255   :  { %15729 = vmatprep.subr.bf16.mxu0 %v15728_v1  ;;  %v10330_v1 = vld [vmem:[#allocation22 + $0x1c68] sm:$0xff] }
0x1257   :  { %15475 = vmatpush1.bf16.msra.mxu1 %v15474_v23  ;;  %v15488_v23 = vpack.c.bf16 %v10330_v1, %v10322_v19  ;;  %v15504_v19 = vpack.c.bf16 %v10394_v47, %v10386_v38  ;;  %v10385_v1 = vld [vmem:[#allocation22 + $0x1e20] sm:$0xff] }
0x1258   :  { %15731 = vmatpush1.bf16.msra.mxu0 %v15730_v50  ;;  %15477 = vmatprep.subr.bf16.mxu1 %v15476_v26  ;;  %v10323_v50 = vld [vmem:[#allocation22 + $0x1c30] sm:$0xff]  ;;  %v15744_v26 = vpack.c.bf16 %v10332_v12, %v10324_v53  ;;  %v10393_v53 = vld [vmem:[#allocation22 + $0x1e60] sm:$0xff] }
0x1259   :  { %v10766_v63 = vpop.f32.mrb[86].mxu1  ;;  %v11050_v0 = vpop.f32.mrb[126].mxu0  ;;  %15733 = vmatprep.subr.bf16.mxu0 %v15732_v28  ;;  %v10387_v12 = vld [vmem:[#allocation22 + $0x1e30] sm:$0xff]  ;;  %v15506_v60 = vpack.c.bf16 %v10393_v53, %v10385_v1 }
0x125a   :  { %v15780_v3 = vadd.f32 %v10766_v63, %v10450_v45  ;;  %v15782_v51 = vadd.f32 %v11050_v0, %v10458_v36  ;;  %v10768_v7 = vpop.f32.mrb[87].mxu1  ;;  %v11052_v5 = vpop.f32.mrb[127].mxu0  ;;  %v15746_v45 = vpack.c.bf16 %v10331_v18, %v10323_v50  ;;  %v15492_v36 = vpack.c.bf16 %v10346_v34, %v10338_v20  ;;  %v10353_v0 = vld [vmem:[#allocation22 + $0x1d20] sm:$0xff]  ;;  %v10403_v34 = vld [vmem:[#allocation22 + $0x1eb0] sm:$0xff] }
0x125b   :  { %v15781_v58 = vadd.f32 %v10768_v7, %v10454_v30  ;;  %v15783_v62 = vadd.f32 %v11052_v5, %v10462_v8  ;;  %15479 = vmatpush1.bf16.msra.mxu1 %v15478_v54  ;;  %v10339_v30 = vld [vmem:[#allocation22 + $0x1cb0] sm:$0xff]  ;;  %v10354_v54 = vld [vmem:[#allocation22 + $0x1d28] sm:$0xff]  ;;  %v10372_v7 = vld [vmem:[#allocation22 + $0x1db8] sm:$0xff]  ;;  %v15766_v55 = vpack.c.bf16 %v10411_v9, %v10403_v34 }
0x125c   :  { %15735 = vmatpush1.bf16.msra.mxu0 %v15734_v2  ;;  %15481 = vmatprep.subr.bf16.mxu1 %v15480_v31  ;;  %v10347_v8 = vld [vmem:[#allocation22 + $0x1cf0] sm:$0xff]  ;;  %v10362_v2 = vld [vmem:[#allocation22 + $0x1d68] sm:$0xff]  ;;  %v10356_v31 = vld [vmem:[#allocation22 + $0x1d38] sm:$0xff] }
0x125d   :  { %v11631_v46 = vcombine.low %v15780_v3, %v15781_v58  ;;  %v11632_v10 = vcombine.low %v15782_v51, %v15783_v62  ;;  %15737 = vmatprep.subr.bf16.mxu0 %v15736_v17  ;;  %v15750_v41 = vpack.c.bf16 %v10347_v8, %v10339_v30  ;;  %v15496_v63 = vpack.c.bf16 %v10362_v2, %v10354_v54  ;;  %v10361_v17 = vld [vmem:[#allocation22 + $0x1d60] sm:$0xff]  ;;  %v10370_v3 = vld [vmem:[#allocation22 + $0x1da8] sm:$0xff]  ;;  %v10380_v5 = vld [vmem:[#allocation22 + $0x1df8] sm:$0xff] }
0x125e   :  { %v15752_v4 = vpack.c.bf16 %v10364_v11, %v10356_v31  ;;  %v10378_v51 = vld [vmem:[#allocation22 + $0x1de8] sm:$0xff]  ;;  %v15498_v16 = vpack.c.bf16 %v10361_v17, %v10353_v0  ;;  %v10369_v62 = vld [vmem:[#allocation22 + $0x1da0] sm:$0xff]  ;;  %v10419_v54 = vld [vmem:[#allocation22 + $0x1f30] sm:$0xff] }
0x125f   :  { %v11639_v25 = vrot.slane %v11631_v46, %v21382_v35  ;;  %v11646_v29 = vrot.slane %v11632_v10, %v21382_v35  ;;  %15483 = vmatpush1.bf16.msra.mxu1 %v15482_v57  ;;  %v15500_v58 = vpack.c.bf16 %v10378_v51, %v10370_v3  ;;  %v10377_v57 = vld [vmem:[#allocation22 + $0x1de0] sm:$0xff]  ;;  %v10388_v46 = vld [vmem:[#allocation22 + $0x1e38] sm:$0xff]  ;;  %v10427_v31 = vld [vmem:[#allocation22 + $0x1f70] sm:$0xff] }
0x1260   :  { %15739 = vmatpush1.bf16.msra.mxu0 %v15738_v52  ;;  %15485 = vmatprep.subr.bf16.mxu1 %v15484_v49  ;;  %v10371_v52 = vld [vmem:[#allocation22 + $0x1db0] sm:$0xff]  ;;  %v15756_v49 = vpack.c.bf16 %v10380_v5, %v10372_v7  ;;  %v10396_v10 = vld [vmem:[#allocation22 + $0x1e78] sm:$0xff]  ;;  %v10401_v18 = vld [vmem:[#allocation22 + $0x1ea0] sm:$0xff]  ;;  %v15770_v17 = vpack.c.bf16 %v10427_v31, %v10419_v54 }
0x1261   :  { %15741 = vmatprep.subr.bf16.mxu0 %v15740_v14  ;;  %v11647_v28 = vcombine.low %v11639_v25, %v11646_v29  ;;  %v15502_v14 = vpack.c.bf16 %v10377_v57, %v10369_v62  ;;  %v15758_v39 = vpack.c.bf16 %v10379_v56, %v10371_v52  ;;  %v15760_v25 = vpack.c.bf16 %v10396_v10, %v10388_v46  ;;  %v10395_v29 = vld [vmem:[#allocation22 + $0x1e70] sm:$0xff]  ;;  %v10409_v20 = vld [vmem:[#allocation22 + $0x1ee0] sm:$0xff]  ;;  %v10434_v11 = vld [vmem:[#allocation22 + $0x1fa8] sm:$0xff] }
0x1262   :  { %v15762_v50 = vpack.c.bf16 %v10395_v29, %v10387_v12  ;;  %v15510_v6 = vpack.c.bf16 %v10409_v20, %v10401_v18  ;;  %v10425_v8 = vld [vmem:[#allocation22 + $0x1f60] sm:$0xff]  ;;  %v10435_v51 = vld [vmem:[#allocation22 + $0x1fb0] sm:$0xff]  ;;  %v10470_v62 = vrot.slane %v21371_v27, %v21292_v32  ;;  %v10478_v57 = vrot.slane %v21371_v27, %v21309_v13 }
0x1263   :  { %15487 = vmatpush1.bf16.msra.mxu1 %v15486_v15  ;;  %11667 = vst [vmem:[#allocation25] sm:$0xff] %v11647_v28  ;;  %v10402_v15 = vld [vmem:[#allocation22 + $0x1ea8] sm:$0xff]  ;;  %v10443_v7 = vld [vmem:[#allocation22 + $0x1ff0] sm:$0xff] }
0x1264   :  { %15743 = vmatpush1.bf16.msra.mxu0 %v15742_v42  ;;  %15489 = vmatprep.subr.bf16.mxu1 %v15488_v23  ;;  %v10410_v42 = vld [vmem:[#allocation22 + $0x1ee8] sm:$0xff]  ;;  %v10404_v23 = vld [vmem:[#allocation22 + $0x1eb8] sm:$0xff] }
0x1265   :  { %15745 = vmatprep.subr.bf16.mxu0 %v15744_v26  ;;  %v15508_v26 = vpack.c.bf16 %v10410_v42, %v10402_v15  ;;  %v15764_v28 = vpack.c.bf16 %v10412_v24, %v10404_v23 }
0x1267   :  { %15491 = vmatpush1.bf16.msra.mxu1 %v15490_v61  ;;  %v10426_v61 = vld [vmem:[#allocation22 + $0x1f68] sm:$0xff] }
0x1268   :  { %15747 = vmatpush1.bf16.msra.mxu0 %v15746_v45  ;;  %15493 = vmatprep.subr.bf16.mxu1 %v15492_v36  ;;  %v10420_v45 = vld [vmem:[#allocation22 + $0x1f38] sm:$0xff]  ;;  %v15512_v30 = vpack.c.bf16 %v10426_v61, %v10418_v33 }
0x1269   :  { %15749 = vmatprep.subr.bf16.mxu0 %v15748_v22  ;;  %v10428_v36 = vld [vmem:[#allocation22 + $0x1f78] sm:$0xff]  ;;  %v10417_v22 = vld [vmem:[#allocation22 + $0x1f20] sm:$0xff] }
0x126a   :  { %v15768_v2 = vpack.c.bf16 %v10428_v36, %v10420_v45  ;;  %v15514_v0 = vpack.c.bf16 %v10425_v8, %v10417_v22 }
0x126b   :  { %15495 = vmatpush1.bf16.msra.mxu1 %v15494_v48  ;;  %v10442_v48 = vld [vmem:[#allocation22 + $0x1fe8] sm:$0xff] }
0x126c   :  { %15751 = vmatpush1.bf16.msra.mxu0 %v15750_v41  ;;  %15497 = vmatprep.subr.bf16.mxu1 %v15496_v63  ;;  %v10436_v41 = vld [vmem:[#allocation22 + $0x1fb8] sm:$0xff]  ;;  %v15516_v21 = vpack.c.bf16 %v10442_v48, %v10434_v11 }
0x126d   :  { %15753 = vmatprep.subr.bf16.mxu0 %v15752_v4  ;;  %v10444_v63 = vld [vmem:[#allocation22 + $0x1ff8] sm:$0xff]  ;;  %v10433_v4 = vld [vmem:[#allocation22 + $0x1fa0] sm:$0xff] }
0x126e   :  { %v15772_v3 = vpack.c.bf16 %v10444_v63, %v10436_v41  ;;  %v15518_v5 = vpack.c.bf16 %v10441_v44, %v10433_v4 }
0x126f   :  { %15499 = vmatpush1.bf16.msra.mxu1 %v15498_v16  ;;  %v15774_v16 = vpack.c.bf16 %v10443_v7, %v10435_v51 }
0x1270   :  { %15755 = vmatpush1.bf16.msra.mxu0 %v15754_v37  ;;  %15501 = vmatprep.subr.bf16.mxu1 %v15500_v58  ;;  %v10466_v37 = vrot.slane %v21371_v27, %v21287_v43  ;;  %v10474_v58 = vrot.slane %v21371_v27, %v21304_v40 }
0x1271   :  { %15757 = vmatprep.subr.bf16.mxu0 %v15756_v49 }
0x1273   :  { %15503 = vmatpush1.bf16.msra.mxu1 %v15502_v14 }
0x1274   :  { %15759 = vmatpush1.bf16.msra.mxu0 %v15758_v39  ;;  %15505 = vmatprep.subr.bf16.mxu1 %v15504_v19 }
0x1275   :  { %15761 = vmatprep.subr.bf16.mxu0 %v15760_v25 }
0x1277   :  { %15507 = vmatpush1.bf16.msra.mxu1 %v15506_v60 }
0x1278   :  { %15763 = vmatpush1.bf16.msra.mxu0 %v15762_v50  ;;  %15509 = vmatprep.subr.bf16.mxu1 %v15508_v26 }
0x1279   :  { %15765 = vmatprep.subr.bf16.mxu0 %v15764_v28 }
0x127b   :  { %15511 = vmatpush1.bf16.msra.mxu1 %v15510_v6 }
0x127c   :  { %15767 = vmatpush1.bf16.msra.mxu0 %v15766_v55  ;;  %15513 = vmatprep.subr.bf16.mxu1 %v15512_v30 }
0x127d   :  { %15769 = vmatprep.subr.bf16.mxu0 %v15768_v2 }
0x127f   :  { %15515 = vmatpush1.bf16.msra.mxu1 %v15514_v0 }
0x1280   :  { %15771 = vmatpush1.bf16.msra.mxu0 %v15770_v17  ;;  %15517 = vmatprep.subr.bf16.mxu1 %v15516_v21 }
0x1281   :  { %15773 = vmatprep.subr.bf16.mxu0 %v15772_v3 }
0x1283   :  { %15519 = vmatpush1.bf16.msra.mxu1 %v15518_v5 }
0x1284   :  { %15775 = vmatpush1.bf16.msra.mxu0 %v15774_v16 }
0x1286   :  { %11333 = vmatmul.mubr.f32.vlgmr.msra.gmra.mrb[88].mxu1 %v21343_v59 }
0x1287   :  { %11617 = vmatmul.mubr.f32.vlgmr.msra.gmra.mrb[128].mxu0 %v21343_v59 }
0x1359   :  { %v11334_v52 = vpop.f32.mrb[88].mxu1 }
0x135a   :  { %v15784_v49 = vadd.f32 %v11334_v52, %v10466_v37  ;;  %v11618_v56 = vpop.f32.mrb[128].mxu0  ;;  %v11336_v38 = vpop.f32.mrb[89].mxu1 }
0x135b   :  { %v15786_v47 = vadd.f32 %v11618_v56, %v10474_v58  ;;  %v15785_v46 = vadd.f32 %v11336_v38, %v10470_v62  ;;  %v11620_v10 = vpop.f32.mrb[129].mxu0 }
0x135c   :  { %v15787_v59 = vadd.f32 %v11620_v10, %v10478_v57 }
0x135d   :  { %v11648_v14 = vcombine.low %v15784_v49, %v15785_v46 }
0x135e   :  { %v11649_v39 = vcombine.low %v15786_v47, %v15787_v59 }
0x135f   :  { %v11656_v43 = vrot.slane %v11648_v14, %v21382_v35 }
0x1360   :  { %v11663_v40 = vrot.slane %v11649_v39, %v21382_v35 }
0x1362   :  { %v11664_v32 = vcombine.low %v11656_v43, %v11663_v40 }
0x1364   :  { %11668 = vst [vmem:[#allocation25 + $0x8] sm:$0xff] %v11664_v32 }
0x1365   :  { %16849 = shalt.err (!%p16846_p10)
}
0x1366   :  { %s16850_s30 = scalar_lea.hbm %s21425_s15, 256 }
0x1367   :  { %p16851_p11 = scmp.ne.s32.totalorder %s21425_s15, %s16850_s30  ;;  %p16854_p12 = scmp.lt.u32.totalorder %s16850_s30, %s21425_s15 }
0x1369   :  { %p16856_p13 = pnand %p16854_p12, %p16851_p11 }
0x136b   :  { %16859 = shalt.err (!%p16856_p13)
}
0x136c   :  { %11678 = dma.vmem_to_hbm [thread:$0]  %s11676_s10, 256, %s21425_s15, [#allocation6]  }
0x136d   :  { %16874 = dma.done.wait [#allocation6], 256  }
0x136e   :  { %16875 = vsyncadd [#allocation6], 4294967040 }
0x136f   :  { %11682 = vsyncpa [#allocation5], 1 }
0x1370   :  { %11683 = vsyncpa [#allocation8], 1 }
0x1371   :  { %11684 = vsyncpa [#allocation11], 1 }
0x1372   :  { %11685 = vsyncpa [#allocation14], 1 }
0x1373   :  { %11686 = vsyncpa [#allocation17], 1 }
0x1374   :  { %11687 = vsyncpa [#allocation20], 1 }
0x1375   :  { %11688 = vsyncpa [#allocation23], 1 }
0x1376   :  { %11689 = vsyncpa [#allocation6], 1 }

</bundles_post_ra>
